<compile_context>
chip_gen: v6e
topology: v6e:2x2x1
jax: 0.10.0
libtpu: 0.0.40
codegen_flags: <defaults>
</compile_context>

<pallas_src>
import numpy as np
import jax
import jax.numpy as jnp
from jax.experimental import pallas as pl
from jax.experimental.pallas import tpu as pltpu


def make_scm_kernel(H, W, C_IN, C1, C2, C4):
    HW = H * W

    def zero_border(pad_ref, cin):
        # Only the 1-pixel halo; the interior is fully rewritten every step.
        pad_ref[0:1, :, :] = jnp.zeros((1, W + 2, cin), jnp.float32)
        pad_ref[H + 1:H + 2, :, :] = jnp.zeros((1, W + 2, cin), jnp.float32)
        pad_ref[1:H + 1, 0:1, :] = jnp.zeros((H, 1, cin), jnp.float32)
        pad_ref[1:H + 1, W + 1:W + 2, :] = jnp.zeros((H, 1, cin), jnp.float32)

    def conv3x3_im2col(pad_ref, col_ref, cin, w_ref, b_ref):
        # Gather the 9 taps into one (HW, 9*cin) im2col buffer, then do a
        # single MXU matmul with K = 9*cin (instead of 9 tiny K=cin matmuls).
        for dy in range(3):
            for dx in range(3):
                t = dy * 3 + dx
                col_ref[:, t * cin:(t + 1) * cin] = (
                    pad_ref[dy:dy + H, dx:dx + W, :].reshape(HW, cin))
        col = col_ref[...].astype(jnp.bfloat16)           # bf16 MXU operand
        return jnp.dot(col, w_ref[...],
                       preferred_element_type=jnp.float32) + b_ref[...]

    def kernel(x_ref, w1_ref, b1_ref, w2_ref, b2_ref, w3_ref, b3_ref,
               w4_ref, b4_ref, g_ref, be_ref, out_ref,
               padA, padB, colA, colB):
        # ---- conv1: 3x3, C_IN -> C1, ReLU --------------------------------
        zero_border(padA, C_IN)
        padA[1:H + 1, 1:W + 1, :] = x_ref[0]
        f1 = jnp.maximum(conv3x3_im2col(padA, colA, C_IN, w1_ref, b1_ref), 0.0)

        # ---- conv2: 1x1, C1 -> C2, ReLU (bf16 operands, f32 accumulate) ---
        f2 = jnp.maximum(
            jnp.dot(f1.astype(jnp.bfloat16), w2_ref[...],
                    preferred_element_type=jnp.float32) + b2_ref[...], 0.0)

        # ---- conv3: 3x3, C2 -> C2, ReLU ------------------------------------
        zero_border(padB, C2)
        padB[1:H + 1, 1:W + 1, :] = f2.reshape(H, W, C2)
        f3 = jnp.maximum(conv3x3_im2col(padB, colB, C2, w3_ref, b3_ref), 0.0)

        # ---- conv4: 1x1, C2 -> C4 (no ReLU) --------------------------------
        f4 = (jnp.dot(f3.astype(jnp.bfloat16), w4_ref[...],
                      preferred_element_type=jnp.float32) + b4_ref[...])

        # ---- InstanceNorm2d(affine=True): per-channel stats over HW, f32 ---
        mean = jnp.mean(f4, axis=0, keepdims=True)
        var = jnp.mean((f4 - mean) ** 2, axis=0, keepdims=True)
        y = (f4 - mean) * jax.lax.rsqrt(var + 1e-5)
        y = y * g_ref[...] + be_ref[...]

        # ---- lane-dense output store: (HW, C4) -> (H, W*C4) ----------------
        # W*C4 is a multiple of 128, so this block's stores / DMA are dense.
        # The sublane->lane interleave is spelled out as W simple lane-window
        # stores (avoids relying on a minor-dim-changing reshape).
        y3 = y.reshape(H, W, C4)
        for x in range(W):
            out_ref[0, :, x * C4:(x + 1) * C4] = y3[:, x, :]

    return kernel


def scm_forward(x_nhwc, params):
    """x_nhwc: (N, H, W, 3) float32.  Returns (N, H, W, out_plane) float32."""
    w1, b1, w2, b2, w3, b3, w4, b4, gamma, beta = params
    N, H, W, C_IN = x_nhwc.shape
    C1 = w1.shape[-1]
    C2 = w3.shape[-1]
    C4 = w4.shape[-1]

    # im2col-flattened 3x3 weights ((ky, kx, cin) row-major matches the
    # kernel's tap ordering); all matmul weights passed as bf16 MXU operands.
    w1f = w1.reshape(9 * C_IN, C1).astype(jnp.bfloat16)
    w3f = w3.reshape(9 * C2, C2).astype(jnp.bfloat16)
    w2b = w2.astype(jnp.bfloat16)
    w4b = w4.astype(jnp.bfloat16)

    kernel = make_scm_kernel(H, W, C_IN, C1, C2, C4)

    def full_spec(a):
        nd = a.ndim
        return pl.BlockSpec(a.shape, lambda b, _nd=nd: (0,) * _nd)

    grid_spec = pltpu.PrefetchScalarGridSpec(
        num_scalar_prefetch=0,
        grid=(N,),
        in_specs=[
            pl.BlockSpec((1, H, W, C_IN), lambda b: (b, 0, 0, 0)),
            full_spec(w1f), full_spec(b1),
            full_spec(w2b), full_spec(b2),
            full_spec(w3f), full_spec(b3),
            full_spec(w4b), full_spec(b4),
            full_spec(gamma), full_spec(beta),
        ],
        # lane-dense output layout: (N, H, W*C4), last dim = 512 lanes
        out_specs=pl.BlockSpec((1, H, W * C4), lambda b: (b, 0, 0)),
        scratch_shapes=[
            pltpu.VMEM((H + 2, W + 2, C_IN), jnp.float32),   # padded input
            pltpu.VMEM((H + 2, W + 2, C2), jnp.float32),     # padded mid feats
            pltpu.VMEM((H * W, 9 * C_IN), jnp.float32),      # im2col (conv1)
            pltpu.VMEM((H * W, 9 * C2), jnp.float32),        # im2col (conv3)
        ],
    )

    out = pl.pallas_call(
        kernel,
        out_shape=jax.ShapeDtypeStruct((N, H, W * C4), jnp.float32),
        grid_spec=grid_spec,
        compiler_params=pltpu.CompilerParams(
            dimension_semantics=("parallel",),     # both v7x cores when N >= 2
            vmem_limit_bytes=32 * 1024 * 1024,     # v5e default scoped = 16 MiB
        ),
    )(x_nhwc, w1f, b1, w2b, b2, w3f, b3, w4b, b4, gamma, beta)

    # free wrapper-side relabel back to NHWC (same memory order)
    return out.reshape(N, H, W, C4)


def scm_reference(x, params):
    """Pure-JAX f32 NHWC reference matching the PyTorch module semantics."""
    w1, b1, w2, b2, w3, b3, w4, b4, gamma, beta = params
    dn = ('NHWC', 'HWIO', 'NHWC')

    def conv(x, w, b, relu, pad):
        y = jax.lax.conv_general_dilated(x, w, (1, 1), pad,
                                         dimension_numbers=dn)
        y = y + b.reshape(1, 1, 1, -1)
        return jnp.maximum(y, 0.0) if relu else y

    y = conv(x, w1, b1, True, 'SAME')
    y = conv(y, w2.reshape(1, 1, *w2.shape), b2, True, 'VALID')
    y = conv(y, w3, b3, True, 'SAME')
    y = conv(y, w4.reshape(1, 1, *w4.shape), b4, False, 'VALID')
    mean = jnp.mean(y, axis=(1, 2), keepdims=True)
    var = jnp.mean((y - mean) ** 2, axis=(1, 2), keepdims=True)
    y = (y - mean) / jnp.sqrt(var + 1e-5)
    return y * gamma.reshape(1, 1, 1, -1) + beta.reshape(1, 1, 1, -1)


if __name__ == "__main__":
    key = jax.random.PRNGKey(0)
    N, H, W = 2, 16, 16
    out_plane = 32
    C1, C2, C4 = out_plane // 4, out_plane // 2, out_plane

    ks = jax.random.split(key, 11)
    # deterministic synthetic parameters (shapes follow SCM's __init__)
    w1 = 0.2 * jax.random.normal(ks[1], (3, 3, 3, C1), jnp.float32)   # HWIO
    b1 = 0.1 * jax.random.normal(ks[2], (1, C1), jnp.float32)
    w2 = 0.2 * jax.random.normal(ks[3], (C1, C2), jnp.float32)        # 1x1 conv
    b2 = 0.1 * jax.random.normal(ks[4], (1, C2), jnp.float32)
    w3 = 0.2 * jax.random.normal(ks[5], (3, 3, C2, C2), jnp.float32)  # HWIO
    b3 = 0.1 * jax.random.normal(ks[6], (1, C2), jnp.float32)
    w4 = 0.2 * jax.random.normal(ks[7], (C2, C4), jnp.float32)        # 1x1 conv
    b4 = 0.1 * jax.random.normal(ks[8], (1, C4), jnp.float32)
    gamma = 1.0 + 0.1 * jax.random.normal(ks[9], (1, C4), jnp.float32)
    beta = 0.1 * jax.random.normal(ks[10], (1, C4), jnp.float32)
    params = (w1, b1, w2, b2, w3, b3, w4, b4, gamma, beta)

    # PyTorch-style NCHW input -> NHWC for the kernel
    x_nchw = jax.random.normal(ks[0], (N, 3, H, W), jnp.float32)
    x_nhwc = jnp.transpose(x_nchw, (0, 2, 3, 1))

    out = scm_forward(x_nhwc, params)
    out = jax.block_until_ready(out)

    ref = scm_reference(x_nhwc, params)
    # bf16 MXU operands (f32 accumulation) => looser tolerance than pure f32.
    np.testing.assert_allclose(np.asarray(out), np.asarray(ref),
                               rtol=5e-2, atol=5e-2)
    print("KERNEL_OK")
</pallas_src>

<mosaic_0001>
module attributes {stable_mosaic.version = 11 : i64} {
  func.func @kernel(%arg0: i32, %arg1: memref<1x16x16x3xf32, #tpu.memory_space<vmem>>, %arg2: memref<27x8xbf16, #tpu.memory_space<vmem>>, %arg3: memref<1x8xf32, #tpu.memory_space<vmem>>, %arg4: memref<8x16xbf16, #tpu.memory_space<vmem>>, %arg5: memref<1x16xf32, #tpu.memory_space<vmem>>, %arg6: memref<144x16xbf16, #tpu.memory_space<vmem>>, %arg7: memref<1x16xf32, #tpu.memory_space<vmem>>, %arg8: memref<16x32xbf16, #tpu.memory_space<vmem>>, %arg9: memref<1x32xf32, #tpu.memory_space<vmem>>, %arg10: memref<1x32xf32, #tpu.memory_space<vmem>>, %arg11: memref<1x32xf32, #tpu.memory_space<vmem>>, %arg12: memref<1x16x512xf32, #tpu.memory_space<vmem>>, %arg13: memref<18x18x3xf32, #tpu.memory_space<vmem>>, %arg14: memref<18x18x16xf32, #tpu.memory_space<vmem>>, %arg15: memref<256x27xf32, #tpu.memory_space<vmem>>, %arg16: memref<256x144xf32, #tpu.memory_space<vmem>>) attributes {dimension_semantics = [#tpu.dimension_semantics<parallel>], iteration_bounds = array<i64: 2>, scalar_prefetch = 0 : i64, scratch_operands = 4 : i64, tpu.core_type = #tpu.core_type<tc>, window_params = [{transform_indices = @transform_0, window_bounds = array<i64: 1, 16, 16, 3>}, {pipeline_mode = #tpu.pipeline_mode<synchronous>, transform_indices = @transform_1, window_bounds = array<i64: 27, 8>}, {pipeline_mode = #tpu.pipeline_mode<synchronous>, transform_indices = @transform_2, window_bounds = array<i64: 1, 8>}, {pipeline_mode = #tpu.pipeline_mode<synchronous>, transform_indices = @transform_3, window_bounds = array<i64: 8, 16>}, {pipeline_mode = #tpu.pipeline_mode<synchronous>, transform_indices = @transform_4, window_bounds = array<i64: 1, 16>}, {pipeline_mode = #tpu.pipeline_mode<synchronous>, transform_indices = @transform_5, window_bounds = array<i64: 144, 16>}, {pipeline_mode = #tpu.pipeline_mode<synchronous>, transform_indices = @transform_6, window_bounds = array<i64: 1, 16>}, {pipeline_mode = #tpu.pipeline_mode<synchronous>, transform_indices = @transform_7, window_bounds = array<i64: 16, 32>}, {pipeline_mode = #tpu.pipeline_mode<synchronous>, transform_indices = @transform_8, window_bounds = array<i64: 1, 32>}, {pipeline_mode = #tpu.pipeline_mode<synchronous>, transform_indices = @transform_9, window_bounds = array<i64: 1, 32>}, {pipeline_mode = #tpu.pipeline_mode<synchronous>, transform_indices = @transform_10, window_bounds = array<i64: 1, 32>}, {transform_indices = @transform_11, window_bounds = array<i64: 1, 16, 512>}]} {
    %cst = arith.constant 0.000000e+00 : f32
    %0 = vector.broadcast %cst : f32 to vector<1x18x3xf32>
    %c0 = arith.constant 0 : index
    %c0_0 = arith.constant 0 : index
    %c0_1 = arith.constant 0 : index
    %1 = vector.load %arg13[%c0, %c0_0, %c0_1] : memref<18x18x3xf32, #tpu.memory_space<vmem>>, vector<1x18x3xf32>
    tpu.vector_store %arg13[%c0, %c0_0, %c0_1], %0 {strides = array<i32>} : memref<18x18x3xf32, #tpu.memory_space<vmem>>, vector<1x18x3xf32>,
    %cst_2 = arith.constant 0.000000e+00 : f32
    %2 = vector.broadcast %cst_2 : f32 to vector<1x18x3xf32>
    %c17 = arith.constant 17 : index
    %c0_3 = arith.constant 0 : index
    %c0_4 = arith.constant 0 : index
    %3 = vector.load %arg13[%c17, %c0_3, %c0_4] : memref<18x18x3xf32, #tpu.memory_space<vmem>>, vector<1x18x3xf32>
    tpu.vector_store %arg13[%c17, %c0_3, %c0_4], %2 {strides = array<i32>} : memref<18x18x3xf32, #tpu.memory_space<vmem>>, vector<1x18x3xf32>,
    %cst_5 = arith.constant 0.000000e+00 : f32
    %4 = vector.broadcast %cst_5 : f32 to vector<16x1x3xf32>
    %c1 = arith.constant 1 : index
    %c0_6 = arith.constant 0 : index
    %c0_7 = arith.constant 0 : index
    %5 = vector.load %arg13[%c1, %c0_6, %c0_7] : memref<18x18x3xf32, #tpu.memory_space<vmem>>, vector<16x1x3xf32>
    tpu.vector_store %arg13[%c1, %c0_6, %c0_7], %4 {strides = array<i32>} : memref<18x18x3xf32, #tpu.memory_space<vmem>>, vector<16x1x3xf32>,
    %cst_8 = arith.constant 0.000000e+00 : f32
    %6 = vector.broadcast %cst_8 : f32 to vector<16x1x3xf32>
    %c1_9 = arith.constant 1 : index
    %c17_10 = arith.constant 17 : index
    %c0_11 = arith.constant 0 : index
    %7 = vector.load %arg13[%c1_9, %c17_10, %c0_11] : memref<18x18x3xf32, #tpu.memory_space<vmem>>, vector<16x1x3xf32>
    tpu.vector_store %arg13[%c1_9, %c17_10, %c0_11], %6 {strides = array<i32>} : memref<18x18x3xf32, #tpu.memory_space<vmem>>, vector<16x1x3xf32>,
    %c0_12 = arith.constant 0 : index
    %c0_13 = arith.constant 0 : index
    %c0_14 = arith.constant 0 : index
    %c0_15 = arith.constant 0 : index
    %8 = vector.load %arg1[%c0_12, %c0_13, %c0_14, %c0_15] : memref<1x16x16x3xf32, #tpu.memory_space<vmem>>, vector<1x16x16x3xf32>
    %9 = vector.shape_cast %8 : vector<1x16x16x3xf32> to vector<16x16x3xf32>
    %c1_16 = arith.constant 1 : index
    %c1_17 = arith.constant 1 : index
    %c0_18 = arith.constant 0 : index
    %10 = vector.load %arg13[%c1_16, %c1_17, %c0_18] : memref<18x18x3xf32, #tpu.memory_space<vmem>>, vector<16x16x3xf32>
    tpu.vector_store %arg13[%c1_16, %c1_17, %c0_18], %9 {strides = array<i32>} : memref<18x18x3xf32, #tpu.memory_space<vmem>>, vector<16x16x3xf32>,
    %c0_19 = arith.constant 0 : index
    %c0_20 = arith.constant 0 : index
    %c0_21 = arith.constant 0 : index
    %11 = vector.load %arg13[%c0_19, %c0_20, %c0_21] : memref<18x18x3xf32, #tpu.memory_space<vmem>>, vector<16x16x3xf32>
    %12 = vector.shape_cast %11 : vector<16x16x3xf32> to vector<256x3xf32>
    %c0_22 = arith.constant 0 : index
    %c0_23 = arith.constant 0 : index
    %13 = vector.load %arg15[%c0_22, %c0_23] : memref<256x27xf32, #tpu.memory_space<vmem>>, vector<256x3xf32>
    tpu.vector_store %arg15[%c0_22, %c0_23], %12 {strides = array<i32>} : memref<256x27xf32, #tpu.memory_space<vmem>>, vector<256x3xf32>,
    %c0_24 = arith.constant 0 : index
    %c1_25 = arith.constant 1 : index
    %c0_26 = arith.constant 0 : index
    %14 = vector.load %arg13[%c0_24, %c1_25, %c0_26] : memref<18x18x3xf32, #tpu.memory_space<vmem>>, vector<16x16x3xf32>
    %15 = vector.shape_cast %14 : vector<16x16x3xf32> to vector<256x3xf32>
    %c0_27 = arith.constant 0 : index
    %c3 = arith.constant 3 : index
    %16 = vector.load %arg15[%c0_27, %c3] : memref<256x27xf32, #tpu.memory_space<vmem>>, vector<256x3xf32>
    tpu.vector_store %arg15[%c0_27, %c3], %15 {strides = array<i32>} : memref<256x27xf32, #tpu.memory_space<vmem>>, vector<256x3xf32>,
    %c0_28 = arith.constant 0 : index
    %c2 = arith.constant 2 : index
    %c0_29 = arith.constant 0 : index
    %17 = vector.load %arg13[%c0_28, %c2, %c0_29] : memref<18x18x3xf32, #tpu.memory_space<vmem>>, vector<16x16x3xf32>
    %18 = vector.shape_cast %17 : vector<16x16x3xf32> to vector<256x3xf32>
    %c0_30 = arith.constant 0 : index
    %c6 = arith.constant 6 : index
    %19 = vector.load %arg15[%c0_30, %c6] : memref<256x27xf32, #tpu.memory_space<vmem>>, vector<256x3xf32>
    tpu.vector_store %arg15[%c0_30, %c6], %18 {strides = array<i32>} : memref<256x27xf32, #tpu.memory_space<vmem>>, vector<256x3xf32>,
    %c1_31 = arith.constant 1 : index
    %c0_32 = arith.constant 0 : index
    %c0_33 = arith.constant 0 : index
    %20 = vector.load %arg13[%c1_31, %c0_32, %c0_33] : memref<18x18x3xf32, #tpu.memory_space<vmem>>, vector<16x16x3xf32>
    %21 = vector.shape_cast %20 : vector<16x16x3xf32> to vector<256x3xf32>
    %c0_34 = arith.constant 0 : index
    %c9 = arith.constant 9 : index
    %22 = vector.load %arg15[%c0_34, %c9] : memref<256x27xf32, #tpu.memory_space<vmem>>, vector<256x3xf32>
    tpu.vector_store %arg15[%c0_34, %c9], %21 {strides = array<i32>} : memref<256x27xf32, #tpu.memory_space<vmem>>, vector<256x3xf32>,
    %c1_35 = arith.constant 1 : index
    %c1_36 = arith.constant 1 : index
    %c0_37 = arith.constant 0 : index
    %23 = vector.load %arg13[%c1_35, %c1_36, %c0_37] : memref<18x18x3xf32, #tpu.memory_space<vmem>>, vector<16x16x3xf32>
    %24 = vector.shape_cast %23 : vector<16x16x3xf32> to vector<256x3xf32>
    %c0_38 = arith.constant 0 : index
    %c12 = arith.constant 12 : index
    %25 = vector.load %arg15[%c0_38, %c12] : memref<256x27xf32, #tpu.memory_space<vmem>>, vector<256x3xf32>
    tpu.vector_store %arg15[%c0_38, %c12], %24 {strides = array<i32>} : memref<256x27xf32, #tpu.memory_space<vmem>>, vector<256x3xf32>,
    %c1_39 = arith.constant 1 : index
    %c2_40 = arith.constant 2 : index
    %c0_41 = arith.constant 0 : index
    %26 = vector.load %arg13[%c1_39, %c2_40, %c0_41] : memref<18x18x3xf32, #tpu.memory_space<vmem>>, vector<16x16x3xf32>
    %27 = vector.shape_cast %26 : vector<16x16x3xf32> to vector<256x3xf32>
    %c0_42 = arith.constant 0 : index
    %c15 = arith.constant 15 : index
    %28 = vector.load %arg15[%c0_42, %c15] : memref<256x27xf32, #tpu.memory_space<vmem>>, vector<256x3xf32>
    tpu.vector_store %arg15[%c0_42, %c15], %27 {strides = array<i32>} : memref<256x27xf32, #tpu.memory_space<vmem>>, vector<256x3xf32>,
    %c2_43 = arith.constant 2 : index
    %c0_44 = arith.constant 0 : index
    %c0_45 = arith.constant 0 : index
    %29 = vector.load %arg13[%c2_43, %c0_44, %c0_45] : memref<18x18x3xf32, #tpu.memory_space<vmem>>, vector<16x16x3xf32>
    %30 = vector.shape_cast %29 : vector<16x16x3xf32> to vector<256x3xf32>
    %c0_46 = arith.constant 0 : index
    %c18 = arith.constant 18 : index
    %31 = vector.load %arg15[%c0_46, %c18] : memref<256x27xf32, #tpu.memory_space<vmem>>, vector<256x3xf32>
    tpu.vector_store %arg15[%c0_46, %c18], %30 {strides = array<i32>} : memref<256x27xf32, #tpu.memory_space<vmem>>, vector<256x3xf32>,
    %c2_47 = arith.constant 2 : index
    %c1_48 = arith.constant 1 : index
    %c0_49 = arith.constant 0 : index
    %32 = vector.load %arg13[%c2_47, %c1_48, %c0_49] : memref<18x18x3xf32, #tpu.memory_space<vmem>>, vector<16x16x3xf32>
    %33 = vector.shape_cast %32 : vector<16x16x3xf32> to vector<256x3xf32>
    %c0_50 = arith.constant 0 : index
    %c21 = arith.constant 21 : index
    %34 = vector.load %arg15[%c0_50, %c21] : memref<256x27xf32, #tpu.memory_space<vmem>>, vector<256x3xf32>
    tpu.vector_store %arg15[%c0_50, %c21], %33 {strides = array<i32>} : memref<256x27xf32, #tpu.memory_space<vmem>>, vector<256x3xf32>,
    %c2_51 = arith.constant 2 : index
    %c2_52 = arith.constant 2 : index
    %c0_53 = arith.constant 0 : index
    %35 = vector.load %arg13[%c2_51, %c2_52, %c0_53] : memref<18x18x3xf32, #tpu.memory_space<vmem>>, vector<16x16x3xf32>
    %36 = vector.shape_cast %35 : vector<16x16x3xf32> to vector<256x3xf32>
    %c0_54 = arith.constant 0 : index
    %c24 = arith.constant 24 : index
    %37 = vector.load %arg15[%c0_54, %c24] : memref<256x27xf32, #tpu.memory_space<vmem>>, vector<256x3xf32>
    tpu.vector_store %arg15[%c0_54, %c24], %36 {strides = array<i32>} : memref<256x27xf32, #tpu.memory_space<vmem>>, vector<256x3xf32>,
    %c0_55 = arith.constant 0 : index
    %c0_56 = arith.constant 0 : index
    %38 = vector.load %arg15[%c0_55, %c0_56] : memref<256x27xf32, #tpu.memory_space<vmem>>, vector<256x27xf32>
    %39 = arith.truncf %38 : vector<256x27xf32> to vector<256x27xbf16>
    %c0_57 = arith.constant 0 : index
    %c0_58 = arith.constant 0 : index
    %40 = vector.load %arg2[%c0_57, %c0_58] : memref<27x8xbf16, #tpu.memory_space<vmem>>, vector<27x8xbf16>
    %cst_59 = arith.constant dense<0.000000e+00> : vector<256x8xf32>
    %41 = tpu.matmul %39, %40, %cst_59 {dimension_numbers = #tpu.dot_dimension_numbers<[1], [0], [0], [1], [0, 0, 1, 1], [], []>} : vector<256x27xbf16>, vector<27x8xbf16>, vector<256x8xf32> -> vector<256x8xf32>
    %c0_60 = arith.constant 0 : index
    %c0_61 = arith.constant 0 : index
    %42 = vector.load %arg3[%c0_60, %c0_61] : memref<1x8xf32, #tpu.memory_space<vmem>>, vector<1x8xf32>
    %43 = vector.broadcast %42 : vector<1x8xf32> to vector<256x8xf32>
    %44 = arith.addf %41, %43 : vector<256x8xf32>
    %cst_62 = arith.constant 0.000000e+00 : f32
    %45 = vector.broadcast %cst_62 : f32 to vector<256x8xf32>
    %46 = arith.maximumf %44, %45 : vector<256x8xf32>
    %47 = arith.truncf %46 : vector<256x8xf32> to vector<256x8xbf16>
    %c0_63 = arith.constant 0 : index
    %c0_64 = arith.constant 0 : index
    %48 = vector.load %arg4[%c0_63, %c0_64] : memref<8x16xbf16, #tpu.memory_space<vmem>>, vector<8x16xbf16>
    %cst_65 = arith.constant dense<0.000000e+00> : vector<256x16xf32>
    %49 = tpu.matmul %47, %48, %cst_65 {dimension_numbers = #tpu.dot_dimension_numbers<[1], [0], [0], [1], [0, 0, 1, 1], [], []>} : vector<256x8xbf16>, vector<8x16xbf16>, vector<256x16xf32> -> vector<256x16xf32>
    %c0_66 = arith.constant 0 : index
    %c0_67 = arith.constant 0 : index
    %50 = vector.load %arg5[%c0_66, %c0_67] : memref<1x16xf32, #tpu.memory_space<vmem>>, vector<1x16xf32>
    %51 = vector.broadcast %50 : vector<1x16xf32> to vector<256x16xf32>
    %52 = arith.addf %49, %51 : vector<256x16xf32>
    %cst_68 = arith.constant 0.000000e+00 : f32
    %53 = vector.broadcast %cst_68 : f32 to vector<256x16xf32>
    %54 = arith.maximumf %52, %53 : vector<256x16xf32>
    %cst_69 = arith.constant 0.000000e+00 : f32
    %55 = vector.broadcast %cst_69 : f32 to vector<1x18x16xf32>
    %c0_70 = arith.constant 0 : index
    %c0_71 = arith.constant 0 : index
    %c0_72 = arith.constant 0 : index
    %56 = vector.load %arg14[%c0_70, %c0_71, %c0_72] : memref<18x18x16xf32, #tpu.memory_space<vmem>>, vector<1x18x16xf32>
    tpu.vector_store %arg14[%c0_70, %c0_71, %c0_72], %55 {strides = array<i32>} : memref<18x18x16xf32, #tpu.memory_space<vmem>>, vector<1x18x16xf32>,
    %cst_73 = arith.constant 0.000000e+00 : f32
    %57 = vector.broadcast %cst_73 : f32 to vector<1x18x16xf32>
    %c17_74 = arith.constant 17 : index
    %c0_75 = arith.constant 0 : index
    %c0_76 = arith.constant 0 : index
    %58 = vector.load %arg14[%c17_74, %c0_75, %c0_76] : memref<18x18x16xf32, #tpu.memory_space<vmem>>, vector<1x18x16xf32>
    tpu.vector_store %arg14[%c17_74, %c0_75, %c0_76], %57 {strides = array<i32>} : memref<18x18x16xf32, #tpu.memory_space<vmem>>, vector<1x18x16xf32>,
    %cst_77 = arith.constant 0.000000e+00 : f32
    %59 = vector.broadcast %cst_77 : f32 to vector<16x1x16xf32>
    %c1_78 = arith.constant 1 : index
    %c0_79 = arith.constant 0 : index
    %c0_80 = arith.constant 0 : index
    %60 = vector.load %arg14[%c1_78, %c0_79, %c0_80] : memref<18x18x16xf32, #tpu.memory_space<vmem>>, vector<16x1x16xf32>
    tpu.vector_store %arg14[%c1_78, %c0_79, %c0_80], %59 {strides = array<i32>} : memref<18x18x16xf32, #tpu.memory_space<vmem>>, vector<16x1x16xf32>,
    %cst_81 = arith.constant 0.000000e+00 : f32
    %61 = vector.broadcast %cst_81 : f32 to vector<16x1x16xf32>
    %c1_82 = arith.constant 1 : index
    %c17_83 = arith.constant 17 : index
    %c0_84 = arith.constant 0 : index
    %62 = vector.load %arg14[%c1_82, %c17_83, %c0_84] : memref<18x18x16xf32, #tpu.memory_space<vmem>>, vector<16x1x16xf32>
    tpu.vector_store %arg14[%c1_82, %c17_83, %c0_84], %61 {strides = array<i32>} : memref<18x18x16xf32, #tpu.memory_space<vmem>>, vector<16x1x16xf32>,
    %63 = vector.shape_cast %54 : vector<256x16xf32> to vector<16x16x16xf32>
    %c1_85 = arith.constant 1 : index
    %c1_86 = arith.constant 1 : index
    %c0_87 = arith.constant 0 : index
    %64 = vector.load %arg14[%c1_85, %c1_86, %c0_87] : memref<18x18x16xf32, #tpu.memory_space<vmem>>, vector<16x16x16xf32>
    tpu.vector_store %arg14[%c1_85, %c1_86, %c0_87], %63 {strides = array<i32>} : memref<18x18x16xf32, #tpu.memory_space<vmem>>, vector<16x16x16xf32>,
    %c0_88 = arith.constant 0 : index
    %c0_89 = arith.constant 0 : index
    %c0_90 = arith.constant 0 : index
    %65 = vector.load %arg14[%c0_88, %c0_89, %c0_90] : memref<18x18x16xf32, #tpu.memory_space<vmem>>, vector<16x16x16xf32>
    %66 = vector.shape_cast %65 : vector<16x16x16xf32> to vector<256x16xf32>
    %c0_91 = arith.constant 0 : index
    %c0_92 = arith.constant 0 : index
    %67 = vector.load %arg16[%c0_91, %c0_92] : memref<256x144xf32, #tpu.memory_space<vmem>>, vector<256x16xf32>
    tpu.vector_store %arg16[%c0_91, %c0_92], %66 {strides = array<i32>} : memref<256x144xf32, #tpu.memory_space<vmem>>, vector<256x16xf32>,
    %c0_93 = arith.constant 0 : index
    %c1_94 = arith.constant 1 : index
    %c0_95 = arith.constant 0 : index
    %68 = vector.load %arg14[%c0_93, %c1_94, %c0_95] : memref<18x18x16xf32, #tpu.memory_space<vmem>>, vector<16x16x16xf32>
    %69 = vector.shape_cast %68 : vector<16x16x16xf32> to vector<256x16xf32>
    %c0_96 = arith.constant 0 : index
    %c16 = arith.constant 16 : index
    %70 = vector.load %arg16[%c0_96, %c16] : memref<256x144xf32, #tpu.memory_space<vmem>>, vector<256x16xf32>
    tpu.vector_store %arg16[%c0_96, %c16], %69 {strides = array<i32>} : memref<256x144xf32, #tpu.memory_space<vmem>>, vector<256x16xf32>,
    %c0_97 = arith.constant 0 : index
    %c2_98 = arith.constant 2 : index
    %c0_99 = arith.constant 0 : index
    %71 = vector.load %arg14[%c0_97, %c2_98, %c0_99] : memref<18x18x16xf32, #tpu.memory_space<vmem>>, vector<16x16x16xf32>
    %72 = vector.shape_cast %71 : vector<16x16x16xf32> to vector<256x16xf32>
    %c0_100 = arith.constant 0 : index
    %c32 = arith.constant 32 : index
    %73 = vector.load %arg16[%c0_100, %c32] : memref<256x144xf32, #tpu.memory_space<vmem>>, vector<256x16xf32>
    tpu.vector_store %arg16[%c0_100, %c32], %72 {strides = array<i32>} : memref<256x144xf32, #tpu.memory_space<vmem>>, vector<256x16xf32>,
    %c1_101 = arith.constant 1 : index
    %c0_102 = arith.constant 0 : index
    %c0_103 = arith.constant 0 : index
    %74 = vector.load %arg14[%c1_101, %c0_102, %c0_103] : memref<18x18x16xf32, #tpu.memory_space<vmem>>, vector<16x16x16xf32>
    %75 = vector.shape_cast %74 : vector<16x16x16xf32> to vector<256x16xf32>
    %c0_104 = arith.constant 0 : index
    %c48 = arith.constant 48 : index
    %76 = vector.load %arg16[%c0_104, %c48] : memref<256x144xf32, #tpu.memory_space<vmem>>, vector<256x16xf32>
    tpu.vector_store %arg16[%c0_104, %c48], %75 {strides = array<i32>} : memref<256x144xf32, #tpu.memory_space<vmem>>, vector<256x16xf32>,
    %c1_105 = arith.constant 1 : index
    %c1_106 = arith.constant 1 : index
    %c0_107 = arith.constant 0 : index
    %77 = vector.load %arg14[%c1_105, %c1_106, %c0_107] : memref<18x18x16xf32, #tpu.memory_space<vmem>>, vector<16x16x16xf32>
    %78 = vector.shape_cast %77 : vector<16x16x16xf32> to vector<256x16xf32>
    %c0_108 = arith.constant 0 : index
    %c64 = arith.constant 64 : index
    %79 = vector.load %arg16[%c0_108, %c64] : memref<256x144xf32, #tpu.memory_space<vmem>>, vector<256x16xf32>
    tpu.vector_store %arg16[%c0_108, %c64], %78 {strides = array<i32>} : memref<256x144xf32, #tpu.memory_space<vmem>>, vector<256x16xf32>,
    %c1_109 = arith.constant 1 : index
    %c2_110 = arith.constant 2 : index
    %c0_111 = arith.constant 0 : index
    %80 = vector.load %arg14[%c1_109, %c2_110, %c0_111] : memref<18x18x16xf32, #tpu.memory_space<vmem>>, vector<16x16x16xf32>
    %81 = vector.shape_cast %80 : vector<16x16x16xf32> to vector<256x16xf32>
    %c0_112 = arith.constant 0 : index
    %c80 = arith.constant 80 : index
    %82 = vector.load %arg16[%c0_112, %c80] : memref<256x144xf32, #tpu.memory_space<vmem>>, vector<256x16xf32>
    tpu.vector_store %arg16[%c0_112, %c80], %81 {strides = array<i32>} : memref<256x144xf32, #tpu.memory_space<vmem>>, vector<256x16xf32>,
    %c2_113 = arith.constant 2 : index
    %c0_114 = arith.constant 0 : index
    %c0_115 = arith.constant 0 : index
    %83 = vector.load %arg14[%c2_113, %c0_114, %c0_115] : memref<18x18x16xf32, #tpu.memory_space<vmem>>, vector<16x16x16xf32>
    %84 = vector.shape_cast %83 : vector<16x16x16xf32> to vector<256x16xf32>
    %c0_116 = arith.constant 0 : index
    %c96 = arith.constant 96 : index
    %85 = vector.load %arg16[%c0_116, %c96] : memref<256x144xf32, #tpu.memory_space<vmem>>, vector<256x16xf32>
    tpu.vector_store %arg16[%c0_116, %c96], %84 {strides = array<i32>} : memref<256x144xf32, #tpu.memory_space<vmem>>, vector<256x16xf32>,
    %c2_117 = arith.constant 2 : index
    %c1_118 = arith.constant 1 : index
    %c0_119 = arith.constant 0 : index
    %86 = vector.load %arg14[%c2_117, %c1_118, %c0_119] : memref<18x18x16xf32, #tpu.memory_space<vmem>>, vector<16x16x16xf32>
    %87 = vector.shape_cast %86 : vector<16x16x16xf32> to vector<256x16xf32>
    %c0_120 = arith.constant 0 : index
    %c112 = arith.constant 112 : index
    %88 = vector.load %arg16[%c0_120, %c112] : memref<256x144xf32, #tpu.memory_space<vmem>>, vector<256x16xf32>
    tpu.vector_store %arg16[%c0_120, %c112], %87 {strides = array<i32>} : memref<256x144xf32, #tpu.memory_space<vmem>>, vector<256x16xf32>,
    %c2_121 = arith.constant 2 : index
    %c2_122 = arith.constant 2 : index
    %c0_123 = arith.constant 0 : index
    %89 = vector.load %arg14[%c2_121, %c2_122, %c0_123] : memref<18x18x16xf32, #tpu.memory_space<vmem>>, vector<16x16x16xf32>
    %90 = vector.shape_cast %89 : vector<16x16x16xf32> to vector<256x16xf32>
    %c0_124 = arith.constant 0 : index
    %c128 = arith.constant 128 : index
    %91 = vector.load %arg16[%c0_124, %c128] : memref<256x144xf32, #tpu.memory_space<vmem>>, vector<256x16xf32>
    tpu.vector_store %arg16[%c0_124, %c128], %90 {strides = array<i32>} : memref<256x144xf32, #tpu.memory_space<vmem>>, vector<256x16xf32>,
    %c0_125 = arith.constant 0 : index
    %c0_126 = arith.constant 0 : index
    %92 = vector.load %arg16[%c0_125, %c0_126] : memref<256x144xf32, #tpu.memory_space<vmem>>, vector<256x144xf32>
    %93 = arith.truncf %92 : vector<256x144xf32> to vector<256x144xbf16>
    %c0_127 = arith.constant 0 : index
    %c0_128 = arith.constant 0 : index
    %94 = vector.load %arg6[%c0_127, %c0_128] : memref<144x16xbf16, #tpu.memory_space<vmem>>, vector<144x16xbf16>
    %cst_129 = arith.constant dense<0.000000e+00> : vector<256x16xf32>
    %95 = tpu.matmul %93, %94, %cst_129 {dimension_numbers = #tpu.dot_dimension_numbers<[1], [0], [0], [1], [0, 0, 1, 1], [], []>} : vector<256x144xbf16>, vector<144x16xbf16>, vector<256x16xf32> -> vector<256x16xf32>
    %c0_130 = arith.constant 0 : index
    %c0_131 = arith.constant 0 : index
    %96 = vector.load %arg7[%c0_130, %c0_131] : memref<1x16xf32, #tpu.memory_space<vmem>>, vector<1x16xf32>
    %97 = vector.broadcast %96 : vector<1x16xf32> to vector<256x16xf32>
    %98 = arith.addf %95, %97 : vector<256x16xf32>
    %cst_132 = arith.constant 0.000000e+00 : f32
    %99 = vector.broadcast %cst_132 : f32 to vector<256x16xf32>
    %100 = arith.maximumf %98, %99 : vector<256x16xf32>
    %101 = arith.truncf %100 : vector<256x16xf32> to vector<256x16xbf16>
    %c0_133 = arith.constant 0 : index
    %c0_134 = arith.constant 0 : index
    %102 = vector.load %arg8[%c0_133, %c0_134] : memref<16x32xbf16, #tpu.memory_space<vmem>>, vector<16x32xbf16>
    %cst_135 = arith.constant dense<0.000000e+00> : vector<256x32xf32>
    %103 = tpu.matmul %101, %102, %cst_135 {dimension_numbers = #tpu.dot_dimension_numbers<[1], [0], [0], [1], [0, 0, 1, 1], [], []>} : vector<256x16xbf16>, vector<16x32xbf16>, vector<256x32xf32> -> vector<256x32xf32>
    %c0_136 = arith.constant 0 : index
    %c0_137 = arith.constant 0 : index
    %104 = vector.load %arg9[%c0_136, %c0_137] : memref<1x32xf32, #tpu.memory_space<vmem>>, vector<1x32xf32>
    %105 = vector.broadcast %104 : vector<1x32xf32> to vector<256x32xf32>
    %106 = arith.addf %103, %105 : vector<256x32xf32>
    %cst_138 = arith.constant dense<0.000000e+00> : vector<32xf32>
    %107 = vector.multi_reduction <add>, %106, %cst_138 [0] : vector<256x32xf32> to vector<32xf32>
    %108 = vector.shape_cast %107 : vector<32xf32> to vector<1x32xf32>
    %cst_139 = arith.constant 2.560000e+02 : f32
    %109 = vector.broadcast %cst_139 : f32 to vector<1x32xf32>
    %110 = arith.divf %108, %109 : vector<1x32xf32>
    %111 = vector.broadcast %110 : vector<1x32xf32> to vector<256x32xf32>
    %112 = arith.subf %106, %111 : vector<256x32xf32>
    %113 = arith.mulf %112, %112 : vector<256x32xf32>
    %cst_140 = arith.constant dense<0.000000e+00> : vector<32xf32>
    %114 = vector.multi_reduction <add>, %113, %cst_140 [0] : vector<256x32xf32> to vector<32xf32>
    %115 = vector.shape_cast %114 : vector<32xf32> to vector<1x32xf32>
    %cst_141 = arith.constant 2.560000e+02 : f32
    %116 = vector.broadcast %cst_141 : f32 to vector<1x32xf32>
    %117 = arith.divf %115, %116 : vector<1x32xf32>
    %118 = vector.broadcast %110 : vector<1x32xf32> to vector<256x32xf32>
    %119 = arith.subf %106, %118 : vector<256x32xf32>
    %cst_142 = arith.constant 9.99999974E-6 : f32
    %120 = vector.broadcast %cst_142 : f32 to vector<1x32xf32>
    %121 = arith.addf %117, %120 : vector<1x32xf32>
    %122 = math.rsqrt %121 : vector<1x32xf32>
    %123 = vector.broadcast %122 : vector<1x32xf32> to vector<256x32xf32>
    %124 = arith.mulf %119, %123 : vector<256x32xf32>
    %c0_143 = arith.constant 0 : index
    %c0_144 = arith.constant 0 : index
    %125 = vector.load %arg10[%c0_143, %c0_144] : memref<1x32xf32, #tpu.memory_space<vmem>>, vector<1x32xf32>
    %126 = vector.broadcast %125 : vector<1x32xf32> to vector<256x32xf32>
    %127 = arith.mulf %124, %126 : vector<256x32xf32>
    %c0_145 = arith.constant 0 : index
    %c0_146 = arith.constant 0 : index
    %128 = vector.load %arg11[%c0_145, %c0_146] : memref<1x32xf32, #tpu.memory_space<vmem>>, vector<1x32xf32>
    %129 = vector.broadcast %128 : vector<1x32xf32> to vector<256x32xf32>
    %130 = arith.addf %127, %129 : vector<256x32xf32>
    %131 = vector.shape_cast %130 : vector<256x32xf32> to vector<16x16x32xf32>
    %132 = vector.extract_strided_slice %131 {offsets = [0, 0, 0], sizes = [16, 1, 32], strides = [1, 1, 1]} : vector<16x16x32xf32> to vector<16x1x32xf32>
    %133 = vector.shape_cast %132 : vector<16x1x32xf32> to vector<16x32xf32>
    %c0_147 = arith.constant 0 : index
    %c0_148 = arith.constant 0 : index
    %c0_149 = arith.constant 0 : index
    %134 = vector.load %arg12[%c0_147, %c0_148, %c0_149] : memref<1x16x512xf32, #tpu.memory_space<vmem>>, vector<1x16x32xf32>
    %135 = vector.shape_cast %134 : vector<1x16x32xf32> to vector<16x32xf32>
    %136 = vector.shape_cast %133 : vector<16x32xf32> to vector<1x16x32xf32>
    tpu.vector_store %arg12[%c0_147, %c0_148, %c0_149], %136 {strides = array<i32>} : memref<1x16x512xf32, #tpu.memory_space<vmem>>, vector<1x16x32xf32>,
    %137 = vector.extract_strided_slice %131 {offsets = [0, 1, 0], sizes = [16, 1, 32], strides = [1, 1, 1]} : vector<16x16x32xf32> to vector<16x1x32xf32>
    %138 = vector.shape_cast %137 : vector<16x1x32xf32> to vector<16x32xf32>
    %c0_150 = arith.constant 0 : index
    %c0_151 = arith.constant 0 : index
    %c32_152 = arith.constant 32 : index
    %139 = vector.load %arg12[%c0_150, %c0_151, %c32_152] : memref<1x16x512xf32, #tpu.memory_space<vmem>>, vector<1x16x32xf32>
    %140 = vector.shape_cast %139 : vector<1x16x32xf32> to vector<16x32xf32>
    %141 = vector.shape_cast %138 : vector<16x32xf32> to vector<1x16x32xf32>
    tpu.vector_store %arg12[%c0_150, %c0_151, %c32_152], %141 {strides = array<i32>} : memref<1x16x512xf32, #tpu.memory_space<vmem>>, vector<1x16x32xf32>,
    %142 = vector.extract_strided_slice %131 {offsets = [0, 2, 0], sizes = [16, 1, 32], strides = [1, 1, 1]} : vector<16x16x32xf32> to vector<16x1x32xf32>
    %143 = vector.shape_cast %142 : vector<16x1x32xf32> to vector<16x32xf32>
    %c0_153 = arith.constant 0 : index
    %c0_154 = arith.constant 0 : index
    %c64_155 = arith.constant 64 : index
    %144 = vector.load %arg12[%c0_153, %c0_154, %c64_155] : memref<1x16x512xf32, #tpu.memory_space<vmem>>, vector<1x16x32xf32>
    %145 = vector.shape_cast %144 : vector<1x16x32xf32> to vector<16x32xf32>
    %146 = vector.shape_cast %143 : vector<16x32xf32> to vector<1x16x32xf32>
    tpu.vector_store %arg12[%c0_153, %c0_154, %c64_155], %146 {strides = array<i32>} : memref<1x16x512xf32, #tpu.memory_space<vmem>>, vector<1x16x32xf32>,
    %147 = vector.extract_strided_slice %131 {offsets = [0, 3, 0], sizes = [16, 1, 32], strides = [1, 1, 1]} : vector<16x16x32xf32> to vector<16x1x32xf32>
    %148 = vector.shape_cast %147 : vector<16x1x32xf32> to vector<16x32xf32>
    %c0_156 = arith.constant 0 : index
    %c0_157 = arith.constant 0 : index
    %c96_158 = arith.constant 96 : index
    %149 = vector.load %arg12[%c0_156, %c0_157, %c96_158] : memref<1x16x512xf32, #tpu.memory_space<vmem>>, vector<1x16x32xf32>
    %150 = vector.shape_cast %149 : vector<1x16x32xf32> to vector<16x32xf32>
    %151 = vector.shape_cast %148 : vector<16x32xf32> to vector<1x16x32xf32>
    tpu.vector_store %arg12[%c0_156, %c0_157, %c96_158], %151 {strides = array<i32>} : memref<1x16x512xf32, #tpu.memory_space<vmem>>, vector<1x16x32xf32>,
    %152 = vector.extract_strided_slice %131 {offsets = [0, 4, 0], sizes = [16, 1, 32], strides = [1, 1, 1]} : vector<16x16x32xf32> to vector<16x1x32xf32>
    %153 = vector.shape_cast %152 : vector<16x1x32xf32> to vector<16x32xf32>
    %c0_159 = arith.constant 0 : index
    %c0_160 = arith.constant 0 : index
    %c128_161 = arith.constant 128 : index
    %154 = vector.load %arg12[%c0_159, %c0_160, %c128_161] : memref<1x16x512xf32, #tpu.memory_space<vmem>>, vector<1x16x32xf32>
    %155 = vector.shape_cast %154 : vector<1x16x32xf32> to vector<16x32xf32>
    %156 = vector.shape_cast %153 : vector<16x32xf32> to vector<1x16x32xf32>
    tpu.vector_store %arg12[%c0_159, %c0_160, %c128_161], %156 {strides = array<i32>} : memref<1x16x512xf32, #tpu.memory_space<vmem>>, vector<1x16x32xf32>,
    %157 = vector.extract_strided_slice %131 {offsets = [0, 5, 0], sizes = [16, 1, 32], strides = [1, 1, 1]} : vector<16x16x32xf32> to vector<16x1x32xf32>
    %158 = vector.shape_cast %157 : vector<16x1x32xf32> to vector<16x32xf32>
    %c0_162 = arith.constant 0 : index
    %c0_163 = arith.constant 0 : index
    %c160 = arith.constant 160 : index
    %159 = vector.load %arg12[%c0_162, %c0_163, %c160] : memref<1x16x512xf32, #tpu.memory_space<vmem>>, vector<1x16x32xf32>
    %160 = vector.shape_cast %159 : vector<1x16x32xf32> to vector<16x32xf32>
    %161 = vector.shape_cast %158 : vector<16x32xf32> to vector<1x16x32xf32>
    tpu.vector_store %arg12[%c0_162, %c0_163, %c160], %161 {strides = array<i32>} : memref<1x16x512xf32, #tpu.memory_space<vmem>>, vector<1x16x32xf32>,
    %162 = vector.extract_strided_slice %131 {offsets = [0, 6, 0], sizes = [16, 1, 32], strides = [1, 1, 1]} : vector<16x16x32xf32> to vector<16x1x32xf32>
    %163 = vector.shape_cast %162 : vector<16x1x32xf32> to vector<16x32xf32>
    %c0_164 = arith.constant 0 : index
    %c0_165 = arith.constant 0 : index
    %c192 = arith.constant 192 : index
    %164 = vector.load %arg12[%c0_164, %c0_165, %c192] : memref<1x16x512xf32, #tpu.memory_space<vmem>>, vector<1x16x32xf32>
    %165 = vector.shape_cast %164 : vector<1x16x32xf32> to vector<16x32xf32>
    %166 = vector.shape_cast %163 : vector<16x32xf32> to vector<1x16x32xf32>
    tpu.vector_store %arg12[%c0_164, %c0_165, %c192], %166 {strides = array<i32>} : memref<1x16x512xf32, #tpu.memory_space<vmem>>, vector<1x16x32xf32>,
    %167 = vector.extract_strided_slice %131 {offsets = [0, 7, 0], sizes = [16, 1, 32], strides = [1, 1, 1]} : vector<16x16x32xf32> to vector<16x1x32xf32>
    %168 = vector.shape_cast %167 : vector<16x1x32xf32> to vector<16x32xf32>
    %c0_166 = arith.constant 0 : index
    %c0_167 = arith.constant 0 : index
    %c224 = arith.constant 224 : index
    %169 = vector.load %arg12[%c0_166, %c0_167, %c224] : memref<1x16x512xf32, #tpu.memory_space<vmem>>, vector<1x16x32xf32>
    %170 = vector.shape_cast %169 : vector<1x16x32xf32> to vector<16x32xf32>
    %171 = vector.shape_cast %168 : vector<16x32xf32> to vector<1x16x32xf32>
    tpu.vector_store %arg12[%c0_166, %c0_167, %c224], %171 {strides = array<i32>} : memref<1x16x512xf32, #tpu.memory_space<vmem>>, vector<1x16x32xf32>,
    %172 = vector.extract_strided_slice %131 {offsets = [0, 8, 0], sizes = [16, 1, 32], strides = [1, 1, 1]} : vector<16x16x32xf32> to vector<16x1x32xf32>
    %173 = vector.shape_cast %172 : vector<16x1x32xf32> to vector<16x32xf32>
    %c0_168 = arith.constant 0 : index
    %c0_169 = arith.constant 0 : index
    %c256 = arith.constant 256 : index
    %174 = vector.load %arg12[%c0_168, %c0_169, %c256] : memref<1x16x512xf32, #tpu.memory_space<vmem>>, vector<1x16x32xf32>
    %175 = vector.shape_cast %174 : vector<1x16x32xf32> to vector<16x32xf32>
    %176 = vector.shape_cast %173 : vector<16x32xf32> to vector<1x16x32xf32>
    tpu.vector_store %arg12[%c0_168, %c0_169, %c256], %176 {strides = array<i32>} : memref<1x16x512xf32, #tpu.memory_space<vmem>>, vector<1x16x32xf32>,
    %177 = vector.extract_strided_slice %131 {offsets = [0, 9, 0], sizes = [16, 1, 32], strides = [1, 1, 1]} : vector<16x16x32xf32> to vector<16x1x32xf32>
    %178 = vector.shape_cast %177 : vector<16x1x32xf32> to vector<16x32xf32>
    %c0_170 = arith.constant 0 : index
    %c0_171 = arith.constant 0 : index
    %c288 = arith.constant 288 : index
    %179 = vector.load %arg12[%c0_170, %c0_171, %c288] : memref<1x16x512xf32, #tpu.memory_space<vmem>>, vector<1x16x32xf32>
    %180 = vector.shape_cast %179 : vector<1x16x32xf32> to vector<16x32xf32>
    %181 = vector.shape_cast %178 : vector<16x32xf32> to vector<1x16x32xf32>
    tpu.vector_store %arg12[%c0_170, %c0_171, %c288], %181 {strides = array<i32>} : memref<1x16x512xf32, #tpu.memory_space<vmem>>, vector<1x16x32xf32>,
    %182 = vector.extract_strided_slice %131 {offsets = [0, 10, 0], sizes = [16, 1, 32], strides = [1, 1, 1]} : vector<16x16x32xf32> to vector<16x1x32xf32>
    %183 = vector.shape_cast %182 : vector<16x1x32xf32> to vector<16x32xf32>
    %c0_172 = arith.constant 0 : index
    %c0_173 = arith.constant 0 : index
    %c320 = arith.constant 320 : index
    %184 = vector.load %arg12[%c0_172, %c0_173, %c320] : memref<1x16x512xf32, #tpu.memory_space<vmem>>, vector<1x16x32xf32>
    %185 = vector.shape_cast %184 : vector<1x16x32xf32> to vector<16x32xf32>
    %186 = vector.shape_cast %183 : vector<16x32xf32> to vector<1x16x32xf32>
    tpu.vector_store %arg12[%c0_172, %c0_173, %c320], %186 {strides = array<i32>} : memref<1x16x512xf32, #tpu.memory_space<vmem>>, vector<1x16x32xf32>,
    %187 = vector.extract_strided_slice %131 {offsets = [0, 11, 0], sizes = [16, 1, 32], strides = [1, 1, 1]} : vector<16x16x32xf32> to vector<16x1x32xf32>
    %188 = vector.shape_cast %187 : vector<16x1x32xf32> to vector<16x32xf32>
    %c0_174 = arith.constant 0 : index
    %c0_175 = arith.constant 0 : index
    %c352 = arith.constant 352 : index
    %189 = vector.load %arg12[%c0_174, %c0_175, %c352] : memref<1x16x512xf32, #tpu.memory_space<vmem>>, vector<1x16x32xf32>
    %190 = vector.shape_cast %189 : vector<1x16x32xf32> to vector<16x32xf32>
    %191 = vector.shape_cast %188 : vector<16x32xf32> to vector<1x16x32xf32>
    tpu.vector_store %arg12[%c0_174, %c0_175, %c352], %191 {strides = array<i32>} : memref<1x16x512xf32, #tpu.memory_space<vmem>>, vector<1x16x32xf32>,
    %192 = vector.extract_strided_slice %131 {offsets = [0, 12, 0], sizes = [16, 1, 32], strides = [1, 1, 1]} : vector<16x16x32xf32> to vector<16x1x32xf32>
    %193 = vector.shape_cast %192 : vector<16x1x32xf32> to vector<16x32xf32>
    %c0_176 = arith.constant 0 : index
    %c0_177 = arith.constant 0 : index
    %c384 = arith.constant 384 : index
    %194 = vector.load %arg12[%c0_176, %c0_177, %c384] : memref<1x16x512xf32, #tpu.memory_space<vmem>>, vector<1x16x32xf32>
    %195 = vector.shape_cast %194 : vector<1x16x32xf32> to vector<16x32xf32>
    %196 = vector.shape_cast %193 : vector<16x32xf32> to vector<1x16x32xf32>
    tpu.vector_store %arg12[%c0_176, %c0_177, %c384], %196 {strides = array<i32>} : memref<1x16x512xf32, #tpu.memory_space<vmem>>, vector<1x16x32xf32>,
    %197 = vector.extract_strided_slice %131 {offsets = [0, 13, 0], sizes = [16, 1, 32], strides = [1, 1, 1]} : vector<16x16x32xf32> to vector<16x1x32xf32>
    %198 = vector.shape_cast %197 : vector<16x1x32xf32> to vector<16x32xf32>
    %c0_178 = arith.constant 0 : index
    %c0_179 = arith.constant 0 : index
    %c416 = arith.constant 416 : index
    %199 = vector.load %arg12[%c0_178, %c0_179, %c416] : memref<1x16x512xf32, #tpu.memory_space<vmem>>, vector<1x16x32xf32>
    %200 = vector.shape_cast %199 : vector<1x16x32xf32> to vector<16x32xf32>
    %201 = vector.shape_cast %198 : vector<16x32xf32> to vector<1x16x32xf32>
    tpu.vector_store %arg12[%c0_178, %c0_179, %c416], %201 {strides = array<i32>} : memref<1x16x512xf32, #tpu.memory_space<vmem>>, vector<1x16x32xf32>,
    %202 = vector.extract_strided_slice %131 {offsets = [0, 14, 0], sizes = [16, 1, 32], strides = [1, 1, 1]} : vector<16x16x32xf32> to vector<16x1x32xf32>
    %203 = vector.shape_cast %202 : vector<16x1x32xf32> to vector<16x32xf32>
    %c0_180 = arith.constant 0 : index
    %c0_181 = arith.constant 0 : index
    %c448 = arith.constant 448 : index
    %204 = vector.load %arg12[%c0_180, %c0_181, %c448] : memref<1x16x512xf32, #tpu.memory_space<vmem>>, vector<1x16x32xf32>
    %205 = vector.shape_cast %204 : vector<1x16x32xf32> to vector<16x32xf32>
    %206 = vector.shape_cast %203 : vector<16x32xf32> to vector<1x16x32xf32>
    tpu.vector_store %arg12[%c0_180, %c0_181, %c448], %206 {strides = array<i32>} : memref<1x16x512xf32, #tpu.memory_space<vmem>>, vector<1x16x32xf32>,
    %207 = vector.extract_strided_slice %131 {offsets = [0, 15, 0], sizes = [16, 1, 32], strides = [1, 1, 1]} : vector<16x16x32xf32> to vector<16x1x32xf32>
    %208 = vector.shape_cast %207 : vector<16x1x32xf32> to vector<16x32xf32>
    %c0_182 = arith.constant 0 : index
    %c0_183 = arith.constant 0 : index
    %c480 = arith.constant 480 : index
    %209 = vector.load %arg12[%c0_182, %c0_183, %c480] : memref<1x16x512xf32, #tpu.memory_space<vmem>>, vector<1x16x32xf32>
    %210 = vector.shape_cast %209 : vector<1x16x32xf32> to vector<16x32xf32>
    %211 = vector.shape_cast %208 : vector<16x32xf32> to vector<1x16x32xf32>
    tpu.vector_store %arg12[%c0_182, %c0_183, %c480], %211 {strides = array<i32>} : memref<1x16x512xf32, #tpu.memory_space<vmem>>, vector<1x16x32xf32>,
    return
  }
  func.func @transform_0(%arg0: i32) -> (i32, i32, i32, i32) {
    %c0_i32 = arith.constant 0 : i32
    %c0_i32_0 = arith.constant 0 : i32
    %c0_i32_1 = arith.constant 0 : i32
    %c0_i32_2 = arith.constant 0 : i32
    return %arg0, %c0_i32, %c0_i32_0, %c0_i32_1 : i32, i32, i32, i32
  }
  func.func @transform_1(%arg0: i32) -> (i32, i32) {
    %c0_i32 = arith.constant 0 : i32
    %c0_i32_0 = arith.constant 0 : i32
    %c0_i32_1 = arith.constant 0 : i32
    return %c0_i32, %c0_i32_0 : i32, i32
  }
  func.func @transform_2(%arg0: i32) -> (i32, i32) {
    %c0_i32 = arith.constant 0 : i32
    %c0_i32_0 = arith.constant 0 : i32
    %c0_i32_1 = arith.constant 0 : i32
    return %c0_i32, %c0_i32_0 : i32, i32
  }
  func.func @transform_3(%arg0: i32) -> (i32, i32) {
    %c0_i32 = arith.constant 0 : i32
    %c0_i32_0 = arith.constant 0 : i32
    %c0_i32_1 = arith.constant 0 : i32
    return %c0_i32, %c0_i32_0 : i32, i32
  }
  func.func @transform_4(%arg0: i32) -> (i32, i32) {
    %c0_i32 = arith.constant 0 : i32
    %c0_i32_0 = arith.constant 0 : i32
    %c0_i32_1 = arith.constant 0 : i32
    return %c0_i32, %c0_i32_0 : i32, i32
  }
  func.func @transform_5(%arg0: i32) -> (i32, i32) {
    %c0_i32 = arith.constant 0 : i32
    %c0_i32_0 = arith.constant 0 : i32
    %c0_i32_1 = arith.constant 0 : i32
    return %c0_i32, %c0_i32_0 : i32, i32
  }
  func.func @transform_6(%arg0: i32) -> (i32, i32) {
    %c0_i32 = arith.constant 0 : i32
    %c0_i32_0 = arith.constant 0 : i32
    %c0_i32_1 = arith.constant 0 : i32
    return %c0_i32, %c0_i32_0 : i32, i32
  }
  func.func @transform_7(%arg0: i32) -> (i32, i32) {
    %c0_i32 = arith.constant 0 : i32
    %c0_i32_0 = arith.constant 0 : i32
    %c0_i32_1 = arith.constant 0 : i32
    return %c0_i32, %c0_i32_0 : i32, i32
  }
  func.func @transform_8(%arg0: i32) -> (i32, i32) {
    %c0_i32 = arith.constant 0 : i32
    %c0_i32_0 = arith.constant 0 : i32
    %c0_i32_1 = arith.constant 0 : i32
    return %c0_i32, %c0_i32_0 : i32, i32
  }
  func.func @transform_9(%arg0: i32) -> (i32, i32) {
    %c0_i32 = arith.constant 0 : i32
    %c0_i32_0 = arith.constant 0 : i32
    %c0_i32_1 = arith.constant 0 : i32
    return %c0_i32, %c0_i32_0 : i32, i32
  }
  func.func @transform_10(%arg0: i32) -> (i32, i32) {
    %c0_i32 = arith.constant 0 : i32
    %c0_i32_0 = arith.constant 0 : i32
    %c0_i32_1 = arith.constant 0 : i32
    return %c0_i32, %c0_i32_0 : i32, i32
  }
  func.func @transform_11(%arg0: i32) -> (i32, i32, i32) {
    %c0_i32 = arith.constant 0 : i32
    %c0_i32_0 = arith.constant 0 : i32
    %c0_i32_1 = arith.constant 0 : i32
    return %arg0, %c0_i32, %c0_i32_0 : i32, i32, i32
  }
}

</mosaic_0001>

<bundles_post_ra>
// kernel: tpu_custom_call.1
= control target key start
LH: loop header
LB: loop body
LE: loop exit
PB: predicated region body
PF: predicated region fallthrough
CT: control target
= control target key end

     0   :  { %s9860_s0 = inlined_call_operand.vmem [shape: f32[2,16,16,3], index: 0, kind: input, shape index: {}]   ;;  %s9861_s1 = inlined_call_operand.vmem [shape: bf16[27,8], index: 1, kind: input, shape index: {}]   ;;  %s9862_s2 = inlined_call_operand.vmem [shape: f32[1,8], index: 2, kind: input, shape index: {}]   ;;  %s9863_s3 = inlined_call_operand.vmem [shape: bf16[8,16], index: 3, kind: input, shape index: {}]   ;;  %s9864_s4 = inlined_call_operand.vmem [shape: f32[1,16], index: 4, kind: input, shape index: {}]   ;;  %s9865_s5 = inlined_call_operand.vmem [shape: bf16[144,16], index: 5, kind: input, shape index: {}]   ;;  %s9866_s6 = inlined_call_operand.vmem [shape: f32[1,16], index: 6, kind: input, shape index: {}]   ;;  %s9867_s7 = inlined_call_operand.vmem [shape: bf16[16,32], index: 7, kind: input, shape index: {}]   ;;  %s9868_s8 = inlined_call_operand.vmem [shape: f32[1,32], index: 8, kind: input, shape index: {}]   ;;  %s9869_s9 = inlined_call_operand.vmem [shape: f32[1,32], index: 9, kind: input, shape index: {}]   ;;  %s9870_s10 = inlined_call_operand.vmem [shape: f32[1,32], index: 10, kind: input, shape index: {}]   ;;  %s9871_s11 = inlined_call_operand.hbm [shape: f32[2,16,512], index: 11, kind: output, shape index: {}]  }
   0x1   :  { %9879 = sst [smem:[#allocation9_spill]] %s9860_s0 }
   0x2   :  { %16 = vsyncpa [#allocation7], 0 }
   0x3   :  { %18 = vsyncpa [#allocation7 + $0x1], 0  ;;  %s6370_s17 = smov 0   ;;  %s6372_s18 = smov 0  }
   0x4   :  { %s6374_s19 = smov 0   ;;  %s6376_s20 = smov 0  }
   0x5 LB: > { %s6391_s21 = sadd.s32 4294967295, %s6288_s20   ;;  %s5898_s22 = sadd.s32 4294967294, %s6288_s20   ;;  %s6288_s20 = sphi %s6376_s20, %s9890_s20   ;;  %s6284_s19 = sphi %s6374_s19, %s9889_s19   ;;  %s6280_s18 = sphi %s6372_s18, %s9888_s18   ;;  %s6276_s17 = sphi %s6370_s17, %s9887_s17  }
   0x6   : > { %s6395_s23 = sadd.s32 1, %s6288_s20   ;;  %s267_s24 = sadd.s32 1, %s6284_s19 }
   0x7   : > { %s264_s25 = ssub.s32 %s6288_s20, %s6395_s23  ;;  %p277_p0 = scmp.ne.s32.totalorder %s6284_s19, %s6280_s18 }
   0x8   : > { %p265_p1 = scmp.eq.s32.totalorder %s264_s25, 0  ;;  %p278_p2 = scmp.eq.s32.totalorder %s6391_s21, 1 }
   0x9   : > { %p283_p3 = scmp.ne.s32.totalorder %s6280_s18, %s6276_s17  ;;  %p284_p4 = scmp.eq.s32.totalorder %s5898_s22, 1 }
   0xa   : > { %s6406_s26 = scalar_select %p265_p1, %s6284_s19, %s267_s24  }
   0xb   : > { %p6408_p5 = por %p278_p2, %p277_p0  ;;  %p6412_p6 = por %p284_p4, %p283_p3 }
   0xc   : > { %p5901_p7 = scmp.ge.s32.totalorder %s6288_s20, 1  ;;  %p340_p8 = scmp.lt.s32.totalorder %s6288_s20, 3 }
   0xe   : > { %p341_p9 = pnand %p5901_p7, %p340_p8 }
   0xf   : > { %p380_p10 = scmp.lt.s32.totalorder (!%p341_p9), %s6391_s21, 1  ;;  %s9882_s0 = sld [smem:[#allocation9_spill]] (!%p341_p9) }
  0x10   : > { %344 = sbr.rel (%p341_p9) target bundleno = 2219 (0x8ab), region = 64  ;;  %s6291_s15 = smov (!%p341_p9), 3  }
  0x11   : > { %s6292_s16 = smov (!%p341_p9), 6   ;;  %s6293_s22 = smov (!%p341_p9), 9  }
  0x12   : > { %s6294_s24 = smov (!%p341_p9), 12   ;;  %s9874_s25 = smov (!%p341_p9), 15  }
  0x13   : > { %s6299_s12 = smov (!%p341_p9), 24   ;;  %s9876_s13 = smov (!%p341_p9), 112  }
  0x15   : > { %vm386_vm0 = vcmask 23552   ;;  %vm389_vm1 = vcmask 17408   ;;  %vm396_vm2 = vcmask 16384   ;;  %v6290_v0 = vmov 0.0   ;;  %s381_s29 = scalar_select %p380_p10, %s6391_s21, 1  ;;  %v6213_v50 = vld [vmem:[%s9861_s1] sm:$0xff]  }
  0x16   : > { %387 = vst.msk [vmem:[#allocation2] sm:$0xff] %vm386_vm0, %v6290_v0  ;;  %388 = vst.msk [vmem:[#allocation2 + $0x8] sm:$0xff] %vm386_vm0, %v6290_v0  ;;  %vm2221_vm3 = vcmask 1044480   ;;  %v6212_v43 = vld [vmem:[%s9861_s1 + $0x8] sm:$0x3f]   ;;  %vm2222_vm4 = vcmask 1045504  }
  0x17   : > { %392 = vst.msk [vmem:[#allocation2 + $0x198] sm:$0xff] %vm386_vm0, %v6290_v0  ;;  %393 = vst.msk [vmem:[#allocation2 + $0x1a0] sm:$0xff] %vm386_vm0, %v6290_v0  ;;  %s5992_s30 = sshll.u32 %s381_s29, 8  ;;  %s9872_s29 = smov 18   ;;  %v6298_v44 = vmov 65535   ;;  %vm717_vm5 = vcmask 48152  }
  0x18   : > { %390 = vst.msk [vmem:[#allocation2 + $0x10] sm:$0x3] %vm389_vm1, %v6290_v0  ;;  %394 = vst.msk [vmem:[#allocation2 + $0x1a8] sm:$0x3] %vm389_vm1, %v6290_v0  ;;  %s6499_s14 = scalar_lea.vmem %s9882_s0, %s5992_s30  ;;  %s6297_s30 = smov 21   ;;  %v2223_v45 = vsel %vm2221_vm3, 4294967295, %v6298_v44 }
  0x19   : > { %413 = vst.msk [vmem:[#allocation2 + $0x29] sm:$0x1] %vm396_vm2, %v6290_v0  ;;  %397 = vst.msk [vmem:[#allocation2 + $0x18] sm:$0x1] %vm396_vm2, %v6290_v0  ;;  %v429_v1 = vld [vmem:[%s6499_s14] sm:$0xff]  ;;  %v430_v2 = vld [vmem:[%s6499_s14 + $0x8] sm:$0xff] }
  0x1a   : > { %398 = vst.msk [vmem:[#allocation2 + $0x30] sm:$0x1] %vm396_vm2, %v6290_v0  ;;  %399 = vst.msk [vmem:[#allocation2 + $0x48] sm:$0x1] %vm396_vm2, %v6290_v0  ;;  %v431_v3 = vld [vmem:[%s6499_s14 + $0x10] sm:$0xff]  ;;  %v432_v7 = vld [vmem:[%s6499_s14 + $0x18] sm:$0xff] }
  0x1b   : > { %400 = vst.msk [vmem:[#allocation2 + $0x60] sm:$0x1] %vm396_vm2, %v6290_v0  ;;  %401 = vst.msk [vmem:[#allocation2 + $0x78] sm:$0x1] %vm396_vm2, %v6290_v0  ;;  %v433_v8 = vld [vmem:[%s6499_s14 + $0x20] sm:$0xff]  ;;  %v434_v9 = vld [vmem:[%s6499_s14 + $0x28] sm:$0xff] }
  0x1c   : > { %402 = vst.msk [vmem:[#allocation2 + $0x90] sm:$0x1] %vm396_vm2, %v6290_v0  ;;  %403 = vst.msk [vmem:[#allocation2 + $0xa8] sm:$0x1] %vm396_vm2, %v6290_v0  ;;  %v435_v10 = vld [vmem:[%s6499_s14 + $0x30] sm:$0xff]  ;;  %v436_v11 = vld [vmem:[%s6499_s14 + $0x38] sm:$0xff] }
  0x1d   : > { %404 = vst.msk [vmem:[#allocation2 + $0xc0] sm:$0x1] %vm396_vm2, %v6290_v0  ;;  %405 = vst.msk [vmem:[#allocation2 + $0xd8] sm:$0x1] %vm396_vm2, %v6290_v0  ;;  %v557_v4 = vld [vmem:[#allocation2 + $0x1] sm:$0xff]  ;;  %v439_v31 = vld [vmem:[%s6499_s14 + $0x50] sm:$0xff] }
  0x1e   : > { %406 = vst.msk [vmem:[#allocation2 + $0xf0] sm:$0x1] %vm396_vm2, %v6290_v0  ;;  %407 = vst.msk [vmem:[#allocation2 + $0x108] sm:$0x1] %vm396_vm2, %v6290_v0  ;;  %621 = vrot.lane.b32.xlu0 %v557_v4, %s6291_s15  ;;  %v437_v12 = vld [vmem:[%s6499_s14 + $0x40] sm:$0xff]  ;;  %v438_v13 = vld [vmem:[%s6499_s14 + $0x48] sm:$0xff] }
  0x1f   : > { %408 = vst.msk [vmem:[#allocation2 + $0x120] sm:$0x1] %vm396_vm2, %v6290_v0  ;;  %409 = vst.msk [vmem:[#allocation2 + $0x138] sm:$0x1] %vm396_vm2, %v6290_v0  ;;  %v751_v5 = vld [vmem:[#allocation2 + $0xa] sm:$0xff]  ;;  %v493_v14 = vld [vmem:[#allocation2] sm:$0xff] }
  0x20   : > { %410 = vst.msk [vmem:[#allocation2 + $0x150] sm:$0x1] %vm396_vm2, %v6290_v0  ;;  %411 = vst.msk [vmem:[#allocation2 + $0x168] sm:$0x1] %vm396_vm2, %v6290_v0  ;;  %816 = vrot.lane.b32.xlu1 %v751_v5, %s6292_s16  ;;  %v558_v6 = vld [vmem:[#allocation2 + $0x9] sm:$0xff]  ;;  %v440_v32 = vld [vmem:[%s6499_s14 + $0x58] sm:$0xff] }
  0x21   : > { %412 = vst.msk [vmem:[#allocation2 + $0x180] sm:$0x1] %vm396_vm2, %v6290_v0  ;;  %414 = vst.msk [vmem:[#allocation2 + $0x41] sm:$0x1] %vm396_vm2, %v6290_v0  ;;  %v750_v15 = vld [vmem:[#allocation2 + $0x2] sm:$0xff]  ;;  %v2224_v47 = vsel %vm2222_vm4, %v2223_v45, 0 }
  0x22   : > { %415 = vst.msk [vmem:[#allocation2 + $0x59] sm:$0x1] %vm396_vm2, %v6290_v0  ;;  %416 = vst.msk [vmem:[#allocation2 + $0x71] sm:$0x1] %vm396_vm2, %v6290_v0  ;;  %v494_v16 = vld [vmem:[#allocation2 + $0x8] sm:$0xff]  ;;  %623 = vrot.lane.b32.xlu0 %v558_v6, %s6291_s15  ;;  %v441_v39 = vld [vmem:[%s6499_s14 + $0x60] sm:$0xff]  ;;  %v2226_v48 = vand.u32 %v6212_v43, %v2224_v47 }
  0x23   : > { %417 = vst.msk [vmem:[#allocation2 + $0x89] sm:$0x1] %vm396_vm2, %v6290_v0  ;;  %418 = vst.msk [vmem:[#allocation2 + $0xa1] sm:$0x1] %vm396_vm2, %v6290_v0  ;;  %v442_v40 = vld [vmem:[%s6499_s14 + $0x68] sm:$0xff]  ;;  %v443_v53 = vld [vmem:[%s6499_s14 + $0x70] sm:$0xff] }
  0x24   : > { %419 = vst.msk [vmem:[#allocation2 + $0xb9] sm:$0x1] %vm396_vm2, %v6290_v0  ;;  %420 = vst.msk [vmem:[#allocation2 + $0xd1] sm:$0x1] %vm396_vm2, %v6290_v0  ;;  %6046 = vmatprep.subr.bf16.mxu0 %v2226_v48  ;;  %v444_v54 = vld [vmem:[%s6499_s14 + $0x78] sm:$0xff]  ;;  %v445_v61 = vld [vmem:[%s6499_s14 + $0x80] sm:$0xff] }
  0x25   : > { %421 = vst.msk [vmem:[#allocation2 + $0xe9] sm:$0x1] %vm396_vm2, %v6290_v0  ;;  %422 = vst.msk [vmem:[#allocation2 + $0x101] sm:$0x1] %vm396_vm2, %v6290_v0  ;;  %6047 = vmatpush3.bf16.msra.mxu0 %v2226_v48  ;;  %v446_v62 = vld [vmem:[%s6499_s14 + $0x88] sm:$0xff]  ;;  %vm910_vm6 = vcmask 72752  }
  0x26   : > { %423 = vst.msk [vmem:[#allocation2 + $0x119] sm:$0x1] %vm396_vm2, %v6290_v0  ;;  %424 = vst.msk [vmem:[#allocation2 + $0x131] sm:$0x1] %vm396_vm2, %v6290_v0  ;;  %814 = vrot.lane.b32.xlu0 %v750_v15, %s6292_s16  ;;  %6048 = vmatprep.subr.bf16.mxu0 %v6213_v50  ;;  %vm1103_vm7 = vcmask 97352   ;;  %vm1296_vm8 = vcmask 121952  }
  0x27   : > { %425 = vst.msk [vmem:[#allocation2 + $0x149] sm:$0x1] %vm396_vm2, %v6290_v0  ;;  %426 = vst.msk [vmem:[#allocation2 + $0x161] sm:$0x1] %vm396_vm2, %v6290_v0  ;;  %vm1489_vm9 = vcmask 146552   ;;  %vm1683_vm10 = vcmask 171152  }
  0x28   : > { %427 = vst.msk [vmem:[#allocation2 + $0x179] sm:$0x1] %vm396_vm2, %v6290_v0  ;;  %428 = vst.msk [vmem:[#allocation2 + $0x191] sm:$0x1] %vm396_vm2, %v6290_v0  ;;  %vm1876_vm11 = vcmask 195752   ;;  %v449_v45 = vld [vmem:[%s6499_s14 + $0xa0] sm:$0xff] }
  0x29   : > { %461 = vst.msk [vmem:[#allocation2 + $0x19] sm:$0xff] %vm386_vm0, %v429_v1  ;;  %462 = vst.msk [vmem:[#allocation2 + $0x21] sm:$0xff] %vm386_vm0, %v430_v2  ;;  %6049 = vmatpush3.bf16.msra.mxu0 %v6213_v50  ;;  %vm2069_vm12 = vcmask 220352   ;;  %vm2172_vm13 = vcmask 220160   ;;  %vm2494_vm14 = vcmask 1043456   ;;  %vm2445_vm15 = vcmask 64512  }
  0x2a   : > { %463 = vst.msk [vmem:[#allocation2 + $0x31] sm:$0xff] %vm386_vm0, %v431_v3  ;;  %464 = vst.msk [vmem:[#allocation2 + $0x39] sm:$0xff] %vm386_vm0, %v432_v7  ;;  %vm2701_vm1 = vcmask 122880   ;;  %vm2694_vm2 = vcmask 123904   ;;  %vm2990_vm3 = vcmask 261248   ;;  %vm3183_vm4 = vcmask 392448  }
  0x2b   : > { %465 = vst.msk [vmem:[#allocation2 + $0x49] sm:$0xff] %vm386_vm0, %v433_v8  ;;  %466 = vst.msk [vmem:[#allocation2 + $0x51] sm:$0xff] %vm386_vm0, %v434_v9 }
  0x2c   : > { %467 = vst.msk [vmem:[#allocation2 + $0x61] sm:$0xff] %vm386_vm0, %v435_v10  ;;  %468 = vst.msk [vmem:[#allocation2 + $0x69] sm:$0xff] %vm386_vm0, %v436_v11 }
  0x2d   : > { %469 = vst.msk [vmem:[#allocation2 + $0x79] sm:$0xff] %vm386_vm0, %v437_v12  ;;  %470 = vst.msk [vmem:[#allocation2 + $0x81] sm:$0xff] %vm386_vm0, %v438_v13 }
  0x2e   : > { %525 = vst.msk [vmem:[#allocation4] sm:$0xff] %vm386_vm0, %v493_v14  ;;  %526 = vst.msk [vmem:[#allocation4 + $0x8] sm:$0xff] %vm386_vm0, %v494_v16 }
  0x2f   : > { %471 = vst.msk [vmem:[#allocation2 + $0x91] sm:$0xff] %vm386_vm0, %v439_v31  ;;  %472 = vst.msk [vmem:[#allocation2 + $0x99] sm:$0xff] %vm386_vm0, %v440_v32 }
  0x30   : > { %v559_v17 = vld [vmem:[#allocation2 + $0x19] sm:$0xff]  ;;  %v560_v20 = vld [vmem:[#allocation2 + $0x21] sm:$0xff]  ;;  %473 = vst.msk [vmem:[#allocation2 + $0xa9] sm:$0xff] %vm386_vm0, %v441_v39  ;;  %474 = vst.msk [vmem:[#allocation2 + $0xb1] sm:$0xff] %vm386_vm0, %v442_v40 }
  0x31   : > { %625 = vrot.lane.b32.xlu1 %v559_v17, %s6291_s15  ;;  %v943_v18 = vld [vmem:[#allocation2 + $0x18] sm:$0xff]  ;;  %v944_v19 = vld [vmem:[#allocation2 + $0x20] sm:$0xff]  ;;  %v945_v21 = vld [vmem:[#allocation2 + $0x30] sm:$0xff]  ;;  %475 = vst.msk [vmem:[#allocation2 + $0xc1] sm:$0xff] %vm386_vm0, %v443_v53 }
  0x32   : > { %v946_v22 = vld [vmem:[#allocation2 + $0x38] sm:$0xff]  ;;  %527 = vst.msk [vmem:[#allocation4 + $0x10] sm:$0xff] %vm386_vm0, %v943_v18  ;;  %528 = vst.msk [vmem:[#allocation4 + $0x18] sm:$0xff] %vm386_vm0, %v944_v19  ;;  %v6532_v24 = vld [vmem:[#allocation2 + $0x48] sm:$0xff] }
  0x33   : > { %v752_v23 = vld [vmem:[#allocation2 + $0x1a] sm:$0xff]  ;;  %529 = vst.msk [vmem:[#allocation4 + $0x20] sm:$0xff] %vm386_vm0, %v945_v21  ;;  %530 = vst.msk [vmem:[#allocation4 + $0x28] sm:$0xff] %vm386_vm0, %v946_v22  ;;  %v6534_v25 = vld [vmem:[#allocation2 + $0x50] sm:$0xff] }
  0x34   : > { %531 = vst.msk [vmem:[#allocation4 + $0x30] sm:$0xff] %vm386_vm0, %v6532_v24  ;;  %532 = vst.msk [vmem:[#allocation4 + $0x38] sm:$0xff] %vm386_vm0, %v6534_v25  ;;  %818 = vrot.lane.b32.xlu0 %v752_v23, %s6292_s16  ;;  %v753_v26 = vld [vmem:[#allocation2 + $0x22] sm:$0xff]  ;;  %v6550_v29 = vld [vmem:[#allocation2 + $0x78] sm:$0xff] }
  0x35   : > { %627 = vrot.lane.b32.xlu1 %v560_v20, %s6291_s15  ;;  %v6542_v27 = vld [vmem:[#allocation2 + $0x60] sm:$0xff]  ;;  %v6544_v28 = vld [vmem:[#allocation2 + $0x68] sm:$0xff]  ;;  %535 = vst.msk [vmem:[#allocation4 + $0x50] sm:$0xff] %vm386_vm0, %v6550_v29  ;;  %v1138_v35 = vld [vmem:[#allocation2 + $0x31] sm:$0xff] }
  0x36   : > { %533 = vst.msk [vmem:[#allocation4 + $0x40] sm:$0xff] %vm386_vm0, %v6542_v27  ;;  %534 = vst.msk [vmem:[#allocation4 + $0x48] sm:$0xff] %vm386_vm0, %v6544_v28  ;;  %v6552_v30 = vld [vmem:[#allocation2 + $0x80] sm:$0xff]  ;;  %v6568_v33 = vld [vmem:[#allocation2 + $0x90] sm:$0xff] }
  0x37   : > { %536 = vst.msk [vmem:[#allocation4 + $0x58] sm:$0xff] %vm386_vm0, %v6552_v30  ;;  %v6570_v34 = vld [vmem:[#allocation2 + $0x98] sm:$0xff]  ;;  %537 = vst.msk [vmem:[#allocation4 + $0x60] sm:$0xff] %vm386_vm0, %v6568_v33  ;;  %v6591_v41 = vld [vmem:[#allocation2 + $0xa8] sm:$0xff] }
  0x38   : > { %1007 = vrot.lane.b32.xlu0 %v943_v18, %s6293_s22  ;;  %538 = vst.msk [vmem:[#allocation4 + $0x68] sm:$0xff] %vm386_vm0, %v6570_v34  ;;  %v1139_v36 = vld [vmem:[#allocation2 + $0x39] sm:$0xff]  ;;  %v6595_v42 = vld [vmem:[#allocation2 + $0xb0] sm:$0xff]  ;;  %539 = vst.msk [vmem:[#allocation4 + $0x70] sm:$0xff] %vm386_vm0, %v6591_v41 }
  0x39   : > { %820 = vrot.lane.b32.xlu1 %v753_v26, %s6292_s16  ;;  %v1331_v37 = vld [vmem:[#allocation2 + $0x32] sm:$0xff]  ;;  %v1332_v38 = vld [vmem:[#allocation2 + $0x3a] sm:$0xff]  ;;  %540 = vst.msk [vmem:[#allocation4 + $0x78] sm:$0xff] %vm386_vm0, %v6595_v42  ;;  %v1718_v46 = vld [vmem:[#allocation2 + $0x49] sm:$0xff] }
  0x3a   : > { %v1719_v49 = vld [vmem:[#allocation2 + $0x51] sm:$0xff]  ;;  %476 = vst.msk [vmem:[#allocation2 + $0xc9] sm:$0xff] %vm386_vm0, %v444_v54  ;;  %v6633_v55 = vld [vmem:[#allocation2 + $0xc0] sm:$0xff]  ;;  %v1143_v58 = vld [vmem:[#allocation2 + $0x69] sm:$0xff] }
  0x3b   : > { %v1911_v51 = vld [vmem:[#allocation2 + $0x4a] sm:$0xff]  ;;  %v1912_v52 = vld [vmem:[#allocation2 + $0x52] sm:$0xff]  ;;  %541 = vst.msk [vmem:[#allocation4 + $0x80] sm:$0xff] %vm386_vm0, %v6633_v55  ;;  %v1142_v57 = vld [vmem:[#allocation2 + $0x61] sm:$0xff] }
  0x3c   : > { %1011 = vrot.lane.b32.xlu0 %v945_v21, %s6293_s22  ;;  %v1335_v59 = vld [vmem:[#allocation2 + $0x62] sm:$0xff]  ;;  %v1336_v60 = vld [vmem:[#allocation2 + $0x6a] sm:$0xff]  ;;  %477 = vst.msk [vmem:[#allocation2 + $0xd9] sm:$0xff] %vm386_vm0, %v445_v61  ;;  %478 = vst.msk [vmem:[#allocation2 + $0xe1] sm:$0xff] %vm386_vm0, %v446_v62 }
  0x3d   : > { %1009 = vrot.lane.b32.xlu1 %v944_v19, %s6293_s22  ;;  %v6672_v2 = vld [vmem:[#allocation2 + $0x79] sm:$0xff]  ;;  %v6678_v5 = vld [vmem:[#allocation2 + $0x81] sm:$0xff]  ;;  %481 = vst.msk [vmem:[#allocation2 + $0x109] sm:$0xff] %vm386_vm0, %v449_v45 }
  0x3e   : > { %v6685_v8 = vld [vmem:[#allocation2 + $0x7a] sm:$0xff]  ;;  %v6692_v10 = vld [vmem:[#allocation2 + $0x82] sm:$0xff]  ;;  %2725 = vst.msk [vmem:[#allocation3 + $0xd1] sm:$0x1] %vm2701_vm1, %v6290_v0  ;;  %2702 = vst.msk [vmem:[#allocation3 + $0x18] sm:$0x1] %vm2701_vm1, %v6290_v0 }
  0x3f   : > { %v6752_v32 = vld [vmem:[#allocation2 + $0x99] sm:$0xff]  ;;  %2703 = vst.msk [vmem:[#allocation3 + $0x30] sm:$0x1] %vm2701_vm1, %v6290_v0  ;;  %2704 = vst.msk [vmem:[#allocation3 + $0x48] sm:$0x1] %vm2701_vm1, %v6290_v0 }
  0x40   : > { %1200 = vrot.lane.b32.xlu0 %v559_v17, %s6294_s24  ;;  %v6768_v40 = vld [vmem:[#allocation2 + $0x9a] sm:$0xff]  ;;  %2705 = vst.msk [vmem:[#allocation3 + $0x60] sm:$0x1] %vm2701_vm1, %v6290_v0  ;;  %2706 = vst.msk [vmem:[#allocation3 + $0x78] sm:$0x1] %vm2701_vm1, %v6290_v0 }
  0x41   : > { %1013 = vrot.lane.b32.xlu1 %v946_v22, %s6293_s22  ;;  %v6635_v56 = vld [vmem:[#allocation2 + $0xc8] sm:$0xff]  ;;  %2707 = vst.msk [vmem:[#allocation3 + $0x90] sm:$0x1] %vm2701_vm1, %v6290_v0  ;;  %2708 = vst.msk [vmem:[#allocation3 + $0xa8] sm:$0x1] %vm2701_vm1, %v6290_v0 }
  0x42   : > { %542 = vst.msk [vmem:[#allocation4 + $0x88] sm:$0xff] %vm386_vm0, %v6635_v56 }
  0x43   : > { %v6661_v63 = vld [vmem:[#allocation2 + $0xd8] sm:$0xff]  ;;  %v6665_v1 = vld [vmem:[#allocation2 + $0xe0] sm:$0xff]  ;;  %2709 = vst.msk [vmem:[#allocation3 + $0xc0] sm:$0x1] %vm2701_vm1, %v6290_v0  ;;  %2710 = vst.msk [vmem:[#allocation3 + $0xd8] sm:$0x1] %vm2701_vm1, %v6290_v0 }
  0x44   : > { %1204 = vrot.lane.b32.xlu0 %v1138_v35, %s6294_s24  ;;  %543 = vst.msk [vmem:[#allocation4 + $0x90] sm:$0xff] %vm386_vm0, %v6661_v63  ;;  %544 = vst.msk [vmem:[#allocation4 + $0x98] sm:$0xff] %vm386_vm0, %v6665_v1 }
  0x45   : > { %1202 = vrot.lane.b32.xlu1 %v560_v20, %s6294_s24  ;;  %2711 = vst.msk [vmem:[#allocation3 + $0xf0] sm:$0x1] %vm2701_vm1, %v6290_v0  ;;  %2712 = vst.msk [vmem:[#allocation3 + $0x108] sm:$0x1] %vm2701_vm1, %v6290_v0 }
  0x46   : > { %2713 = vst.msk [vmem:[#allocation3 + $0x120] sm:$0x1] %vm2701_vm1, %v6290_v0  ;;  %2714 = vst.msk [vmem:[#allocation3 + $0x138] sm:$0x1] %vm2701_vm1, %v6290_v0 }
  0x47   : > { %2715 = vst.msk [vmem:[#allocation3 + $0x150] sm:$0x1] %vm2701_vm1, %v6290_v0  ;;  %2716 = vst.msk [vmem:[#allocation3 + $0x168] sm:$0x1] %vm2701_vm1, %v6290_v0 }
  0x48   : > { %1393 = vrot.lane.b32.xlu0 %v752_v23, %s9874_s25  ;;  %2717 = vst.msk [vmem:[#allocation3 + $0x180] sm:$0x1] %vm2701_vm1, %v6290_v0  ;;  %2718 = vst.msk [vmem:[#allocation3 + $0x29] sm:$0x1] %vm2701_vm1, %v6290_v0 }
  0x49   : > { %1206 = vrot.lane.b32.xlu1 %v1139_v36, %s6294_s24  ;;  %2719 = vst.msk [vmem:[#allocation3 + $0x41] sm:$0x1] %vm2701_vm1, %v6290_v0  ;;  %2720 = vst.msk [vmem:[#allocation3 + $0x59] sm:$0x1] %vm2701_vm1, %v6290_v0 }
  0x4a   : > { %2721 = vst.msk [vmem:[#allocation3 + $0x71] sm:$0x1] %vm2701_vm1, %v6290_v0  ;;  %2722 = vst.msk [vmem:[#allocation3 + $0x89] sm:$0x1] %vm2701_vm1, %v6290_v0 }
  0x4b   : > { %2723 = vst.msk [vmem:[#allocation3 + $0xa1] sm:$0x1] %vm2701_vm1, %v6290_v0  ;;  %2724 = vst.msk [vmem:[#allocation3 + $0xb9] sm:$0x1] %vm2701_vm1, %v6290_v0 }
  0x4c   : > { %1397 = vrot.lane.b32.xlu0 %v1331_v37, %s9874_s25  ;;  %2726 = vst.msk [vmem:[#allocation3 + $0xe9] sm:$0x1] %vm2701_vm1, %v6290_v0  ;;  %2727 = vst.msk [vmem:[#allocation3 + $0x101] sm:$0x1] %vm2701_vm1, %v6290_v0 }
  0x4d   : > { %1395 = vrot.lane.b32.xlu1 %v753_v26, %s9874_s25  ;;  %2728 = vst.msk [vmem:[#allocation3 + $0x119] sm:$0x1] %vm2701_vm1, %v6290_v0  ;;  %2729 = vst.msk [vmem:[#allocation3 + $0x131] sm:$0x1] %vm2701_vm1, %v6290_v0 }
  0x4e   : > { %2730 = vst.msk [vmem:[#allocation3 + $0x149] sm:$0x1] %vm2701_vm1, %v6290_v0  ;;  %2731 = vst.msk [vmem:[#allocation3 + $0x161] sm:$0x1] %vm2701_vm1, %v6290_v0 }
  0x4f   : > { %2732 = vst.msk [vmem:[#allocation3 + $0x179] sm:$0x1] %vm2701_vm1, %v6290_v0  ;;  %2733 = vst.msk [vmem:[#allocation3 + $0x191] sm:$0x1] %vm2701_vm1, %v6290_v0  ;;  %vm5255_vm1 = vcmask 1047559  }
  0x50   : > { %1587 = vrot.lane.b32.xlu0 %v945_v21, %s9872_s29  ;;  %v447_v21 = vld [vmem:[%s6499_s14 + $0x90] sm:$0xff]  ;;  %2695 = vst.msk [vmem:[#allocation3 + $0x10] sm:$0x3] %vm2694_vm2, %v6290_v0  ;;  %2699 = vst.msk [vmem:[#allocation3 + $0x1a8] sm:$0x3] %vm2694_vm2, %v6290_v0  ;;  %vm5309_vm2 = vcmask 523520  }
  0x51   : > { %1399 = vrot.lane.b32.xlu1 %v1332_v38, %s9874_s25  ;;  %s9883_s25 = smov 15   ;;  %479 = vst.msk [vmem:[#allocation2 + $0xf1] sm:$0xff] %vm386_vm0, %v447_v21 }
  0x54   : > { %1591 = vrot.lane.b32.xlu0 %v6532_v24, %s9872_s29 }
  0x55   : > { %1589 = vrot.lane.b32.xlu1 %v946_v22, %s9872_s29  ;;  %v448_v22 = vld [vmem:[%s6499_s14 + $0x98] sm:$0xff] }
  0x56   : > { %480 = vst.msk [vmem:[#allocation2 + $0xf9] sm:$0xff] %vm386_vm0, %v448_v22 }
  0x58   : > { %1780 = vrot.lane.b32.xlu0 %v1138_v35, %s6297_s30 }
  0x59   : > { %1593 = vrot.lane.b32.xlu1 %v6534_v25, %s9872_s29  ;;  %s9884_s29 = smov 18  }
  0x5c   : > { %1784 = vrot.lane.b32.xlu0 %v1718_v46, %s6297_s30 }
  0x5d   : > { %1782 = vrot.lane.b32.xlu1 %v1139_v36, %s6297_s30 }
  0x60   : > { %1973 = vrot.lane.b32.xlu0 %v1331_v37, %s6299_s12 }
  0x61   : > { %1786 = vrot.lane.b32.xlu1 %v1719_v49, %s6297_s30 }
  0x64   : > { %1977 = vrot.lane.b32.xlu0 %v1911_v51, %s6299_s12 }
  0x65   : > { %1975 = vrot.lane.b32.xlu1 %v1332_v38, %s6299_s12 }
  0x68   : > { %629 = vrot.lane.b32.xlu0 %v1138_v35, %s6291_s15 }
  0x69   : > { %1979 = vrot.lane.b32.xlu1 %v1912_v52, %s6299_s12 }
  0x6c   : > { %633 = vrot.lane.b32.xlu0 %v1718_v46, %s6291_s15 }
  0x6d   : > { %631 = vrot.lane.b32.xlu1 %v1139_v36, %s6291_s15 }
  0x70   : > { %822 = vrot.lane.b32.xlu0 %v1331_v37, %s6292_s16 }
  0x71   : > { %635 = vrot.lane.b32.xlu1 %v1719_v49, %s6291_s15 }
  0x74   : > { %826 = vrot.lane.b32.xlu0 %v1911_v51, %s6292_s16 }
  0x75   : > { %824 = vrot.lane.b32.xlu1 %v1332_v38, %s6292_s16  ;;  %v6760_v38 = vld [vmem:[#allocation2 + $0x92] sm:$0xff] }
  0x78   : > { %1015 = vrot.lane.b32.xlu0 %v6532_v24, %s6293_s22 }
  0x79   : > { %828 = vrot.lane.b32.xlu1 %v1912_v52, %s6292_s16 }
  0x7c   : > { %1019 = vrot.lane.b32.xlu0 %v6542_v27, %s6293_s22 }
  0x7d   : > { %1017 = vrot.lane.b32.xlu1 %v6534_v25, %s6293_s22 }
  0x80   : > { %1208 = vrot.lane.b32.xlu0 %v1718_v46, %s6294_s24  ;;  %v450_v46 = vld [vmem:[%s6499_s14 + $0xa8] sm:$0xff] }
  0x81   : > { %1021 = vrot.lane.b32.xlu1 %v6544_v28, %s6293_s22  ;;  %482 = vst.msk [vmem:[#allocation2 + $0x111] sm:$0xff] %vm386_vm0, %v450_v46 }
  0x84   : > { %1212 = vrot.lane.b32.xlu0 %v1142_v57, %s6294_s24 }
  0x85   : > { %1210 = vrot.lane.b32.xlu1 %v1719_v49, %s6294_s24 }
  0x88   : > { %1401 = vrot.lane.b32.xlu0 %v1911_v51, %s9883_s25  ;;  %v6792_v51 = vld [vmem:[#allocation2 + $0x110] sm:$0xff] }
  0x89   : > { %1214 = vrot.lane.b32.xlu1 %v1143_v58, %s6294_s24  ;;  %548 = vst.msk [vmem:[#allocation4 + $0xb8] sm:$0xff] %vm386_vm0, %v6792_v51 }
  0x8c   : > { %1405 = vrot.lane.b32.xlu0 %v1335_v59, %s9883_s25 }
  0x8d   : > { %1403 = vrot.lane.b32.xlu1 %v1912_v52, %s9883_s25  ;;  %v6800_v52 = vld [vmem:[#allocation2 + $0xa9] sm:$0xff] }
  0x90   : > { %1595 = vrot.lane.b32.xlu0 %v6542_v27, %s9884_s29  ;;  %v622_v3 = vpop.permute.xlu0 %621  ;;  %v6731_v27 = vld [vmem:[#allocation2 + $0xf0] sm:$0xff] }
  0x91   : > { %1407 = vrot.lane.b32.xlu1 %v1336_v60, %s9883_s25  ;;  %718 = vst.msk [vmem:[#allocation4] sm:$0xff] %vm717_vm5, %v622_v3 }
  0x92   : > { %v817_v4 = vpop.permute.xlu1 %816  ;;  %545 = vst.msk [vmem:[#allocation4 + $0xa0] sm:$0xff] %vm386_vm0, %v6731_v27 }
  0x94   : > { %1599 = vrot.lane.b32.xlu0 %v6550_v29, %s9884_s29  ;;  %v624_v6 = vpop.permute.xlu0 %623 }
  0x95   : > { %1597 = vrot.lane.b32.xlu1 %v6544_v28, %s9884_s29  ;;  %719 = vst.msk [vmem:[#allocation4 + $0x8] sm:$0xff] %vm717_vm5, %v624_v6  ;;  %v6733_v28 = vld [vmem:[#allocation2 + $0xf8] sm:$0xff] }
  0x96   : > { %912 = vst.msk [vmem:[#allocation4 + $0x8] sm:$0xff] %vm910_vm6, %v817_v4  ;;  %v6817_v4 = vld [vmem:[#allocation2 + $0xaa] sm:$0xff] }
  0x97   : > { %546 = vst.msk [vmem:[#allocation4 + $0xa8] sm:$0xff] %vm386_vm0, %v6733_v28 }
  0x98   : > { %1788 = vrot.lane.b32.xlu0 %v1142_v57, %s6297_s30  ;;  %v815_v9 = vpop.permute.xlu0 %814 }
  0x99   : > { %1601 = vrot.lane.b32.xlu1 %v6552_v30, %s9884_s29  ;;  %911 = vst.msk [vmem:[#allocation4] sm:$0xff] %vm910_vm6, %v815_v9 }
  0x9c   : > { %1792 = vrot.lane.b32.xlu0 %v6672_v2, %s6297_s30 }
  0x9d   : > { %1790 = vrot.lane.b32.xlu1 %v1143_v58, %s6297_s30 }
  0xa0   : > { %1981 = vrot.lane.b32.xlu0 %v1335_v59, %s6299_s12 }
  0xa1   : > { %1794 = vrot.lane.b32.xlu1 %v6678_v5, %s6297_s30 }
  0xa3   : > { %v626_v7 = vpop.permute.xlu1 %625 }
  0xa4   : > { %720 = vst.msk [vmem:[#allocation4 + $0x10] sm:$0xff] %vm717_vm5, %v626_v7  ;;  %1985 = vrot.lane.b32.xlu0 %v6685_v8, %s6299_s12  ;;  %v6826_v7 = vld [vmem:[#allocation2 + $0xb2] sm:$0xff] }
  0xa5   : > { %1983 = vrot.lane.b32.xlu1 %v1336_v60, %s6299_s12 }
  0xa6   : > { %v819_v12 = vpop.permute.xlu0 %818 }
  0xa7   : > { %v628_v11 = vpop.permute.xlu1 %627  ;;  %913 = vst.msk [vmem:[#allocation4 + $0x10] sm:$0xff] %vm910_vm6, %v819_v12 }
  0xa8   : > { %721 = vst.msk [vmem:[#allocation4 + $0x18] sm:$0xff] %vm717_vm5, %v628_v11  ;;  %637 = vrot.lane.b32.xlu0 %v1142_v57, %s6291_s15  ;;  %v6808_v57 = vld [vmem:[#allocation2 + $0xb1] sm:$0xff] }
  0xa9   : > { %1987 = vrot.lane.b32.xlu1 %v6692_v10, %s6299_s12 }
  0xaa   : > { %v1008_v14 = vpop.permute.xlu0 %1007 }
  0xab   : > { %v821_v13 = vpop.permute.xlu1 %820  ;;  %1104 = vst.msk [vmem:[#allocation4] sm:$0xff] %vm1103_vm7, %v1008_v14 }
  0xac   : > { %914 = vst.msk [vmem:[#allocation4 + $0x18] sm:$0xff] %vm910_vm6, %v821_v13  ;;  %641 = vrot.lane.b32.xlu0 %v6672_v2, %s6291_s15 }
  0xad   : > { %639 = vrot.lane.b32.xlu1 %v1143_v58, %s6291_s15 }
  0xae   : > { %v1012_v16 = vpop.permute.xlu0 %1011 }
  0xaf   : > { %v1010_v15 = vpop.permute.xlu1 %1009  ;;  %1106 = vst.msk [vmem:[#allocation4 + $0x10] sm:$0xff] %vm1103_vm7, %v1012_v16 }
  0xb0   : > { %1105 = vst.msk [vmem:[#allocation4 + $0x8] sm:$0xff] %vm1103_vm7, %v1010_v15  ;;  %830 = vrot.lane.b32.xlu0 %v1335_v59, %s6292_s16 }
  0xb1   : > { %643 = vrot.lane.b32.xlu1 %v6678_v5, %s6291_s15 }
  0xb2   : > { %v1201_v18 = vpop.permute.xlu0 %1200 }
  0xb3   : > { %v1014_v17 = vpop.permute.xlu1 %1013  ;;  %1297 = vst.msk [vmem:[#allocation4] sm:$0xff] %vm1296_vm8, %v1201_v18  ;;  %v451_v18 = vld [vmem:[%s6499_s14 + $0xb0] sm:$0xff] }
  0xb4   : > { %1107 = vst.msk [vmem:[#allocation4 + $0x18] sm:$0xff] %vm1103_vm7, %v1014_v17  ;;  %834 = vrot.lane.b32.xlu0 %v6685_v8, %s6292_s16 }
  0xb5   : > { %832 = vrot.lane.b32.xlu1 %v1336_v60, %s6292_s16  ;;  %483 = vst.msk [vmem:[#allocation2 + $0x121] sm:$0xff] %vm386_vm0, %v451_v18 }
  0xb6   : > { %v1205_v20 = vpop.permute.xlu0 %1204 }
  0xb7   : > { %v1203_v19 = vpop.permute.xlu1 %1202  ;;  %1299 = vst.msk [vmem:[#allocation4 + $0x10] sm:$0xff] %vm1296_vm8, %v1205_v20 }
  0xb8   : > { %1298 = vst.msk [vmem:[#allocation4 + $0x8] sm:$0xff] %vm1296_vm8, %v1203_v19  ;;  %1023 = vrot.lane.b32.xlu0 %v6550_v29, %s6293_s22  ;;  %v452_v19 = vld [vmem:[%s6499_s14 + $0xb8] sm:$0xff] }
  0xb9   : > { %836 = vrot.lane.b32.xlu1 %v6692_v10, %s6292_s16  ;;  %484 = vst.msk [vmem:[#allocation2 + $0x129] sm:$0xff] %vm386_vm0, %v452_v19 }
  0xba   : > { %v1394_v24 = vpop.permute.xlu0 %1393 }
  0xbb   : > { %v1207_v23 = vpop.permute.xlu1 %1206  ;;  %1490 = vst.msk [vmem:[#allocation4] sm:$0xff] %vm1489_vm9, %v1394_v24 }
  0xbc   : > { %1300 = vst.msk [vmem:[#allocation4 + $0x18] sm:$0xff] %vm1296_vm8, %v1207_v23  ;;  %1027 = vrot.lane.b32.xlu0 %v6568_v33, %s6293_s22  ;;  %v6869_v24 = vld [vmem:[#allocation2 + $0x120] sm:$0xff] }
  0xbd   : > { %1025 = vrot.lane.b32.xlu1 %v6552_v30, %s6293_s22  ;;  %v6744_v30 = vld [vmem:[#allocation2 + $0x91] sm:$0xff]  ;;  %549 = vst.msk [vmem:[#allocation4 + $0xc0] sm:$0xff] %vm386_vm0, %v6869_v24 }
  0xbe   : > { %v1398_v26 = vpop.permute.xlu0 %1397 }
  0xbf   : > { %v1396_v25 = vpop.permute.xlu1 %1395  ;;  %1492 = vst.msk [vmem:[#allocation4 + $0x10] sm:$0xff] %vm1489_vm9, %v1398_v26 }
  0xc0   : > { %1491 = vst.msk [vmem:[#allocation4 + $0x8] sm:$0xff] %vm1489_vm9, %v1396_v25  ;;  %1216 = vrot.lane.b32.xlu0 %v6672_v2, %s6294_s24  ;;  %v6871_v25 = vld [vmem:[#allocation2 + $0x128] sm:$0xff] }
  0xc1   : > { %1029 = vrot.lane.b32.xlu1 %v6570_v34, %s6293_s22  ;;  %550 = vst.msk [vmem:[#allocation4 + $0xc8] sm:$0xff] %vm386_vm0, %v6871_v25 }
  0xc2   : > { %v1588_v31 = vpop.permute.xlu0 %1587 }
  0xc3   : > { %v1400_v29 = vpop.permute.xlu1 %1399  ;;  %1684 = vst.msk [vmem:[#allocation4] sm:$0xff] %vm1683_vm10, %v1588_v31 }
  0xc4   : > { %1493 = vst.msk [vmem:[#allocation4 + $0x18] sm:$0xff] %vm1489_vm9, %v1400_v29  ;;  %1220 = vrot.lane.b32.xlu0 %v6744_v30, %s6294_s24  ;;  %v6890_v29 = vld [vmem:[#allocation2 + $0xc9] sm:$0xff] }
  0xc5   : > { %1218 = vrot.lane.b32.xlu1 %v6678_v5, %s6294_s24 }
  0xc6   : > { %v1592_v36 = vpop.permute.xlu0 %1591 }
  0xc7   : > { %v1590_v35 = vpop.permute.xlu1 %1589  ;;  %1686 = vst.msk [vmem:[#allocation4 + $0x10] sm:$0xff] %vm1683_vm10, %v1592_v36 }
  0xc8   : > { %1685 = vst.msk [vmem:[#allocation4 + $0x8] sm:$0xff] %vm1683_vm10, %v1590_v35  ;;  %1409 = vrot.lane.b32.xlu0 %v6685_v8, %s9883_s25  ;;  %v6898_v35 = vld [vmem:[#allocation2 + $0xc2] sm:$0xff] }
  0xc9   : > { %1222 = vrot.lane.b32.xlu1 %v6752_v32, %s6294_s24 }
  0xca   : > { %v1781_v39 = vpop.permute.xlu0 %1780 }
  0xcb   : > { %v1594_v37 = vpop.permute.xlu1 %1593  ;;  %1877 = vst.msk [vmem:[#allocation4] sm:$0xff] %vm1876_vm11, %v1781_v39 }
  0xcc   : > { %1687 = vst.msk [vmem:[#allocation4 + $0x18] sm:$0xff] %vm1683_vm10, %v1594_v37  ;;  %1413 = vrot.lane.b32.xlu0 %v6760_v38, %s9883_s25  ;;  %v6906_v37 = vld [vmem:[#allocation2 + $0xca] sm:$0xff] }
  0xcd   : > { %1411 = vrot.lane.b32.xlu1 %v6692_v10, %s9883_s25 }
  0xce   : > { %v1785_v44 = vpop.permute.xlu0 %1784 }
  0xcf   : > { %v1783_v43 = vpop.permute.xlu1 %1782  ;;  %1879 = vst.msk [vmem:[#allocation4 + $0x10] sm:$0xff] %vm1876_vm11, %v1785_v44 }
  0xd0   : > { %1878 = vst.msk [vmem:[#allocation4 + $0x8] sm:$0xff] %vm1876_vm11, %v1783_v43  ;;  %1603 = vrot.lane.b32.xlu0 %v6568_v33, %s9884_s29  ;;  %v6787_v33 = vld [vmem:[#allocation2 + $0x108] sm:$0xff] }
  0xd1   : > { %1415 = vrot.lane.b32.xlu1 %v6768_v40, %s9883_s25  ;;  %547 = vst.msk [vmem:[#allocation4 + $0xb0] sm:$0xff] %vm386_vm0, %v6787_v33  ;;  %v454_v43 = vld [vmem:[%s6499_s14 + $0xc8] sm:$0xff] }
  0xd2   : > { %v1974_v48 = vpop.permute.xlu0 %1973  ;;  %486 = vst.msk [vmem:[#allocation2 + $0x141] sm:$0xff] %vm386_vm0, %v454_v43 }
  0xd3   : > { %v1787_v47 = vpop.permute.xlu1 %1786  ;;  %2070 = vst.msk [vmem:[#allocation4] sm:$0xff] %vm2069_vm12, %v1974_v48 }
  0xd4   : > { %1880 = vst.msk [vmem:[#allocation4 + $0x18] sm:$0xff] %vm1876_vm11, %v1787_v47  ;;  %1607 = vrot.lane.b32.xlu0 %v6591_v41, %s9884_s29 }
  0xd5   : > { %1605 = vrot.lane.b32.xlu1 %v6570_v34, %s9884_s29 }
  0xd6   : > { %v1978_v50 = vpop.permute.xlu0 %1977 }
  0xd7   : > { %v1976_v49 = vpop.permute.xlu1 %1975  ;;  %2072 = vst.msk [vmem:[#allocation4 + $0x10] sm:$0xff] %vm2069_vm12, %v1978_v50 }
  0xd8   : > { %2071 = vst.msk [vmem:[#allocation4 + $0x8] sm:$0xff] %vm2069_vm12, %v1976_v49  ;;  %1796 = vrot.lane.b32.xlu0 %v6744_v30, %s6297_s30  ;;  %v6938_v49 = vld [vmem:[#allocation2 + $0xd9] sm:$0xff] }
  0xd9   : > { %1609 = vrot.lane.b32.xlu1 %v6595_v42, %s9884_s29 }
  0xda   : > { %v630_v53 = vpop.permute.xlu0 %629  ;;  %v2102_v54 = vld [vmem:[#allocation4] sm:$0xff] }
  0xdb   : > { %v1980_v34 = vpop.permute.xlu1 %1979  ;;  %722 = vst.msk [vmem:[#allocation4 + $0x20] sm:$0xff] %vm717_vm5, %v630_v53 }
  0xdc   : > { %2073 = vst.msk [vmem:[#allocation4 + $0x18] sm:$0xff] %vm2069_vm12, %v1980_v34  ;;  %1800 = vrot.lane.b32.xlu0 %v6800_v52, %s6297_s30 }
  0xdd   : > { %1798 = vrot.lane.b32.xlu1 %v6752_v32, %s6297_s30 }
  0xde   : > { %v634_v61 = vpop.permute.xlu0 %633  ;;  %v2104_v62 = vld [vmem:[#allocation4 + $0x10] sm:$0xff] }
  0xdf   : > { %v632_v58 = vpop.permute.xlu1 %631  ;;  %v2103_v59 = vld [vmem:[#allocation4 + $0x8] sm:$0xff]  ;;  %724 = vst.msk [vmem:[#allocation4 + $0x30] sm:$0xff] %vm717_vm5, %v634_v61 }
  0xe0   : > { %723 = vst.msk [vmem:[#allocation4 + $0x28] sm:$0xff] %vm717_vm5, %v632_v58  ;;  %v2134_v60 = vpack.c.bf16 %v2103_v59, %v2102_v54  ;;  %1989 = vrot.lane.b32.xlu0 %v6760_v38, %s6299_s12 }
  0xe1   : > { %1802 = vrot.lane.b32.xlu1 %v6808_v57, %s6297_s30 }
  0xe2   : > { %6050 = vmatprep.mubr.msk.bf16.mxu0 %vm2172_vm13, %v2134_v60  ;;  %v823_v6 = vpop.permute.xlu0 %822 }
  0xe3   : > { %v636_v2 = vpop.permute.xlu1 %635  ;;  %v2105_v3 = vld [vmem:[#allocation4 + $0x18] sm:$0xff]  ;;  %915 = vst.msk [vmem:[#allocation4 + $0x20] sm:$0xff] %vm910_vm6, %v823_v6 }
  0xe4   : > { %725 = vst.msk [vmem:[#allocation4 + $0x38] sm:$0xff] %vm717_vm5, %v636_v2  ;;  %v2135_v5 = vpack.c.bf16 %v2105_v3, %v2104_v62  ;;  %1993 = vrot.lane.b32.xlu0 %v6817_v4, %s6299_s12  ;;  %v6955_v62 = vld [vmem:[#allocation2 + $0xda] sm:$0xff] }
  0xe5   : > { %1991 = vrot.lane.b32.xlu1 %v6768_v40, %s6299_s12 }
  0xe6   : > { %6051 = vmatmul.mubr.msk.bf16.vlgmr.msra.gmra.mxu0 %vm2172_vm13, %v2135_v5  ;;  %v827_v9 = vpop.permute.xlu0 %826 }
  0xe7   : > { %v825_v8 = vpop.permute.xlu1 %824  ;;  %917 = vst.msk [vmem:[#allocation4 + $0x30] sm:$0xff] %vm910_vm6, %v827_v9 }
  0xe8   : > { %916 = vst.msk [vmem:[#allocation4 + $0x28] sm:$0xff] %vm910_vm6, %v825_v8  ;;  %645 = vrot.lane.b32.xlu0 %v6744_v30, %s6291_s15 }
  0xe9   : > { %1995 = vrot.lane.b32.xlu1 %v6826_v7, %s6299_s12 }
  0xea   : > { %v1016_v11 = vpop.permute.xlu0 %1015 }
  0xeb   : > { %v829_v10 = vpop.permute.xlu1 %828  ;;  %1108 = vst.msk [vmem:[#allocation4 + $0x20] sm:$0xff] %vm1103_vm7, %v1016_v11 }
  0xec   : > { %918 = vst.msk [vmem:[#allocation4 + $0x38] sm:$0xff] %vm910_vm6, %v829_v10  ;;  %649 = vrot.lane.b32.xlu0 %v6800_v52, %s6291_s15 }
  0xed   : > { %647 = vrot.lane.b32.xlu1 %v6752_v32, %s6291_s15 }
  0xee   : > { %v1020_v13 = vpop.permute.xlu0 %1019 }
  0xef   : > { %v1018_v12 = vpop.permute.xlu1 %1017  ;;  %1110 = vst.msk [vmem:[#allocation4 + $0x30] sm:$0xff] %vm1103_vm7, %v1020_v13 }
  0xf0   : > { %1109 = vst.msk [vmem:[#allocation4 + $0x28] sm:$0xff] %vm1103_vm7, %v1018_v12  ;;  %838 = vrot.lane.b32.xlu0 %v6760_v38, %s6292_s16 }
  0xf1   : > { %651 = vrot.lane.b32.xlu1 %v6808_v57, %s6291_s15 }
  0xf2   : > { %v1209_v15 = vpop.permute.xlu0 %1208 }
  0xf3   : > { %v1022_v14 = vpop.permute.xlu1 %1021  ;;  %1301 = vst.msk [vmem:[#allocation4 + $0x20] sm:$0xff] %vm1296_vm8, %v1209_v15  ;;  %v455_v15 = vld [vmem:[%s6499_s14 + $0xd0] sm:$0xff] }
  0xf4   : > { %1111 = vst.msk [vmem:[#allocation4 + $0x38] sm:$0xff] %vm1103_vm7, %v1022_v14  ;;  %842 = vrot.lane.b32.xlu0 %v6817_v4, %s6292_s16 }
  0xf5   : > { %840 = vrot.lane.b32.xlu1 %v6768_v40, %s6292_s16  ;;  %v453_v40 = vld [vmem:[%s6499_s14 + $0xc0] sm:$0xff]  ;;  %487 = vst.msk [vmem:[#allocation2 + $0x151] sm:$0xff] %vm386_vm0, %v455_v15 }
  0xf6   : > { %v1213_v17 = vpop.permute.xlu0 %1212  ;;  %485 = vst.msk [vmem:[#allocation2 + $0x139] sm:$0xff] %vm386_vm0, %v453_v40 }
  0xf7   : > { %v1211_v16 = vpop.permute.xlu1 %1210  ;;  %1303 = vst.msk [vmem:[#allocation4 + $0x30] sm:$0xff] %vm1296_vm8, %v1213_v17 }
  0xf8   : > { %1302 = vst.msk [vmem:[#allocation4 + $0x28] sm:$0xff] %vm1296_vm8, %v1211_v16  ;;  %1031 = vrot.lane.b32.xlu0 %v6591_v41, %s6293_s22  ;;  %v456_v16 = vld [vmem:[%s6499_s14 + $0xd8] sm:$0xff] }
  0xf9   : > { %844 = vrot.lane.b32.xlu1 %v6826_v7, %s6292_s16  ;;  %488 = vst.msk [vmem:[#allocation2 + $0x159] sm:$0xff] %vm386_vm0, %v456_v16 }
  0xfa   : > { %v1402_v21 = vpop.permute.xlu0 %1401 }
  0xfb   : > { %v1215_v20 = vpop.permute.xlu1 %1214  ;;  %1494 = vst.msk [vmem:[#allocation4 + $0x20] sm:$0xff] %vm1489_vm9, %v1402_v21 }
  0xfc   : > { %1304 = vst.msk [vmem:[#allocation4 + $0x38] sm:$0xff] %vm1296_vm8, %v1215_v20  ;;  %1035 = vrot.lane.b32.xlu0 %v6633_v55, %s6293_s22  ;;  %v7007_v21 = vld [vmem:[#allocation2 + $0x150] sm:$0xff] }
  0xfd   : > { %1033 = vrot.lane.b32.xlu1 %v6595_v42, %s6293_s22  ;;  %v6882_v42 = vld [vmem:[#allocation2 + $0xc1] sm:$0xff]  ;;  %v6925_v48 = vld [vmem:[#allocation2 + $0x138] sm:$0xff]  ;;  %553 = vst.msk [vmem:[#allocation4 + $0xe0] sm:$0xff] %vm386_vm0, %v7007_v21 }
  0xfe   : > { %v1406_v23 = vpop.permute.xlu0 %1405  ;;  %551 = vst.msk [vmem:[#allocation4 + $0xd0] sm:$0xff] %vm386_vm0, %v6925_v48 }
  0xff   : > { %v1404_v22 = vpop.permute.xlu1 %1403  ;;  %1496 = vst.msk [vmem:[#allocation4 + $0x30] sm:$0xff] %vm1489_vm9, %v1406_v23 }
 0x100   : > { %1495 = vst.msk [vmem:[#allocation4 + $0x28] sm:$0xff] %vm1489_vm9, %v1404_v22  ;;  %1224 = vrot.lane.b32.xlu0 %v6800_v52, %s6294_s24  ;;  %v6946_v52 = vld [vmem:[#allocation2 + $0xe1] sm:$0xff]  ;;  %v7009_v22 = vld [vmem:[#allocation2 + $0x158] sm:$0xff] }
 0x101   : > { %1037 = vrot.lane.b32.xlu1 %v6635_v56, %s6293_s22  ;;  %554 = vst.msk [vmem:[#allocation4 + $0xe8] sm:$0xff] %vm386_vm0, %v7009_v22 }
 0x102   : > { %v1596_v26 = vpop.permute.xlu0 %1595 }
 0x103   : > { %v1408_v41 = vpop.permute.xlu1 %1407  ;;  %1688 = vst.msk [vmem:[#allocation4 + $0x20] sm:$0xff] %vm1683_vm10, %v1596_v26 }
 0x104   : > { %1497 = vst.msk [vmem:[#allocation4 + $0x38] sm:$0xff] %vm1489_vm9, %v1408_v41  ;;  %1228 = vrot.lane.b32.xlu0 %v6882_v42, %s6294_s24  ;;  %v7028_v41 = vld [vmem:[#allocation2 + $0xf9] sm:$0xff] }
 0x105   : > { %1226 = vrot.lane.b32.xlu1 %v6808_v57, %s6294_s24 }
 0x106   : > { %v1600_v31 = vpop.permute.xlu0 %1599 }
 0x107   : > { %v1598_v30 = vpop.permute.xlu1 %1597  ;;  %1690 = vst.msk [vmem:[#allocation4 + $0x30] sm:$0xff] %vm1683_vm10, %v1600_v31 }
 0x108   : > { %1689 = vst.msk [vmem:[#allocation4 + $0x28] sm:$0xff] %vm1683_vm10, %v1598_v30  ;;  %1417 = vrot.lane.b32.xlu0 %v6817_v4, %s9883_s25  ;;  %v6964_v4 = vld [vmem:[#allocation2 + $0xe2] sm:$0xff]  ;;  %v7036_v30 = vld [vmem:[#allocation2 + $0xf2] sm:$0xff] }
 0x109   : > { %1230 = vrot.lane.b32.xlu1 %v6890_v29, %s6294_s24 }
 0x10a   : > { %v1789_v36 = vpop.permute.xlu0 %1788 }
 0x10b   : > { %v1602_v32 = vpop.permute.xlu1 %1601  ;;  %1881 = vst.msk [vmem:[#allocation4 + $0x20] sm:$0xff] %vm1876_vm11, %v1789_v36 }
 0x10c   : > { %1691 = vst.msk [vmem:[#allocation4 + $0x38] sm:$0xff] %vm1683_vm10, %v1602_v32  ;;  %1421 = vrot.lane.b32.xlu0 %v6898_v35, %s9883_s25  ;;  %v7044_v32 = vld [vmem:[#allocation2 + $0xfa] sm:$0xff] }
 0x10d   : > { %1419 = vrot.lane.b32.xlu1 %v6826_v7, %s9883_s25 }
 0x10e   : > { %v1793_v39 = vpop.permute.xlu0 %1792 }
 0x10f   : > { %v1791_v38 = vpop.permute.xlu1 %1790  ;;  %1883 = vst.msk [vmem:[#allocation4 + $0x30] sm:$0xff] %vm1876_vm11, %v1793_v39 }
 0x110   : > { %1882 = vst.msk [vmem:[#allocation4 + $0x28] sm:$0xff] %vm1876_vm11, %v1791_v38  ;;  %1611 = vrot.lane.b32.xlu0 %v6633_v55, %s9884_s29  ;;  %v6930_v55 = vld [vmem:[#allocation2 + $0x140] sm:$0xff]  ;;  %v458_v38 = vld [vmem:[%s6499_s14 + $0xe8] sm:$0xff] }
 0x111   : > { %1423 = vrot.lane.b32.xlu1 %v6906_v37, %s9883_s25  ;;  %552 = vst.msk [vmem:[#allocation4 + $0xd8] sm:$0xff] %vm386_vm0, %v6930_v55  ;;  %490 = vst.msk [vmem:[#allocation2 + $0x171] sm:$0xff] %vm386_vm0, %v458_v38  ;;  %v7202_v38 = vld [vmem:[#allocation2 + $0x141] sm:$0xff] }
 0x112   : > { %v1982_v45 = vpop.permute.xlu0 %1981 }
 0x113   : > { %v1795_v44 = vpop.permute.xlu1 %1794  ;;  %2074 = vst.msk [vmem:[#allocation4 + $0x20] sm:$0xff] %vm2069_vm12, %v1982_v45 }
 0x114   : > { %1884 = vst.msk [vmem:[#allocation4 + $0x38] sm:$0xff] %vm1876_vm11, %v1795_v44  ;;  %1615 = vrot.lane.b32.xlu0 %v6661_v63, %s9884_s29 }
 0x115   : > { %1613 = vrot.lane.b32.xlu1 %v6635_v56, %s9884_s29 }
 0x116   : > { %v1986_v47 = vpop.permute.xlu0 %1985 }
 0x117   : > { %v1984_v46 = vpop.permute.xlu1 %1983  ;;  %2076 = vst.msk [vmem:[#allocation4 + $0x30] sm:$0xff] %vm2069_vm12, %v1986_v47 }
 0x118   : > { %2075 = vst.msk [vmem:[#allocation4 + $0x28] sm:$0xff] %vm2069_vm12, %v1984_v46  ;;  %1804 = vrot.lane.b32.xlu0 %v6882_v42, %s6297_s30  ;;  %v7076_v46 = vld [vmem:[#allocation2 + $0x109] sm:$0xff] }
 0x119   : > { %1617 = vrot.lane.b32.xlu1 %v6665_v1, %s9884_s29 }
 0x11a   : > { %v638_v50 = vpop.permute.xlu0 %637  ;;  %v2106_v34 = vld [vmem:[#allocation4 + $0x20] sm:$0xff] }
 0x11b   : > { %v1988_v56 = vpop.permute.xlu1 %1987  ;;  %726 = vst.msk [vmem:[#allocation4 + $0x40] sm:$0xff] %vm717_vm5, %v638_v50 }
 0x11c   : > { %2077 = vst.msk [vmem:[#allocation4 + $0x38] sm:$0xff] %vm2069_vm12, %v1988_v56  ;;  %1808 = vrot.lane.b32.xlu0 %v6938_v49, %s6297_s30 }
 0x11d   : > { %1806 = vrot.lane.b32.xlu1 %v6890_v29, %s6297_s30 }
 0x11e   : > { %v642_v58 = vpop.permute.xlu0 %641  ;;  %v2108_v59 = vld [vmem:[#allocation4 + $0x30] sm:$0xff] }
 0x11f   : > { %v640_v53 = vpop.permute.xlu1 %639  ;;  %v2107_v54 = vld [vmem:[#allocation4 + $0x28] sm:$0xff]  ;;  %728 = vst.msk [vmem:[#allocation4 + $0x50] sm:$0xff] %vm717_vm5, %v642_v58 }
 0x120   : > { %727 = vst.msk [vmem:[#allocation4 + $0x48] sm:$0xff] %vm717_vm5, %v640_v53  ;;  %v2136_v57 = vpack.c.bf16 %v2107_v54, %v2106_v34  ;;  %1997 = vrot.lane.b32.xlu0 %v6898_v35, %s6299_s12 }
 0x121   : > { %1810 = vrot.lane.b32.xlu1 %v6946_v52, %s6297_s30 }
 0x122   : > { %6054 = vmatprep.mubr.msk.bf16.mxu0 %vm2172_vm13, %v2136_v57  ;;  %v831_v3 = vpop.permute.xlu0 %830 }
 0x123   : > { %v644_v60 = vpop.permute.xlu1 %643  ;;  %v2109_v61 = vld [vmem:[#allocation4 + $0x38] sm:$0xff]  ;;  %919 = vst.msk [vmem:[#allocation4 + $0x40] sm:$0xff] %vm910_vm6, %v831_v3 }
 0x124   : > { %729 = vst.msk [vmem:[#allocation4 + $0x58] sm:$0xff] %vm717_vm5, %v644_v60  ;;  %v2137_v2 = vpack.c.bf16 %v2109_v61, %v2108_v59  ;;  %2001 = vrot.lane.b32.xlu0 %v6955_v62, %s6299_s12  ;;  %v7093_v59 = vld [vmem:[#allocation2 + $0x10a] sm:$0xff] }
 0x125   : > { %1999 = vrot.lane.b32.xlu1 %v6906_v37, %s6299_s12 }
 0x126   : > { %6055 = vmatmul.mubr.msk.bf16.gmra.mxu0 %vm2172_vm13, %v2137_v2  ;;  %v835_v6 = vpop.permute.xlu0 %834 }
 0x127   : > { %v833_v5 = vpop.permute.xlu1 %832  ;;  %921 = vst.msk [vmem:[#allocation4 + $0x50] sm:$0xff] %vm910_vm6, %v835_v6 }
 0x128   : > { %920 = vst.msk [vmem:[#allocation4 + $0x48] sm:$0xff] %vm910_vm6, %v833_v5  ;;  %653 = vrot.lane.b32.xlu0 %v6882_v42, %s6291_s15 }
 0x129   : > { %2003 = vrot.lane.b32.xlu1 %v6964_v4, %s6299_s12 }
 0x12a   : > { %v1024_v8 = vpop.permute.xlu0 %1023 }
 0x12b   : > { %v837_v7 = vpop.permute.xlu1 %836  ;;  %1112 = vst.msk [vmem:[#allocation4 + $0x40] sm:$0xff] %vm1103_vm7, %v1024_v8 }
 0x12c   : > { %922 = vst.msk [vmem:[#allocation4 + $0x58] sm:$0xff] %vm910_vm6, %v837_v7  ;;  %657 = vrot.lane.b32.xlu0 %v6938_v49, %s6291_s15 }
 0x12d   : > { %655 = vrot.lane.b32.xlu1 %v6890_v29, %s6291_s15 }
 0x12e   : > { %v1028_v10 = vpop.permute.xlu0 %1027 }
 0x12f   : > { %v1026_v9 = vpop.permute.xlu1 %1025  ;;  %1114 = vst.msk [vmem:[#allocation4 + $0x50] sm:$0xff] %vm1103_vm7, %v1028_v10 }
 0x130   : > { %1113 = vst.msk [vmem:[#allocation4 + $0x48] sm:$0xff] %vm1103_vm7, %v1026_v9  ;;  %846 = vrot.lane.b32.xlu0 %v6898_v35, %s6292_s16 }
 0x131   : > { %659 = vrot.lane.b32.xlu1 %v6946_v52, %s6291_s15 }
 0x132   : > { %v1217_v12 = vpop.permute.xlu0 %1216 }
 0x133   : > { %v1030_v11 = vpop.permute.xlu1 %1029  ;;  %1305 = vst.msk [vmem:[#allocation4 + $0x40] sm:$0xff] %vm1296_vm8, %v1217_v12  ;;  %v459_v12 = vld [vmem:[%s6499_s14 + $0xf0] sm:$0xff] }
 0x134   : > { %1115 = vst.msk [vmem:[#allocation4 + $0x58] sm:$0xff] %vm1103_vm7, %v1030_v11  ;;  %850 = vrot.lane.b32.xlu0 %v6955_v62, %s6292_s16 }
 0x135   : > { %848 = vrot.lane.b32.xlu1 %v6906_v37, %s6292_s16  ;;  %v457_v37 = vld [vmem:[%s6499_s14 + $0xe0] sm:$0xff]  ;;  %491 = vst.msk [vmem:[#allocation2 + $0x181] sm:$0xff] %vm386_vm0, %v459_v12 }
 0x136   : > { %v1221_v14 = vpop.permute.xlu0 %1220  ;;  %489 = vst.msk [vmem:[#allocation2 + $0x169] sm:$0xff] %vm386_vm0, %v457_v37 }
 0x137   : > { %v1219_v13 = vpop.permute.xlu1 %1218  ;;  %1307 = vst.msk [vmem:[#allocation4 + $0x50] sm:$0xff] %vm1296_vm8, %v1221_v14 }
 0x138   : > { %1306 = vst.msk [vmem:[#allocation4 + $0x48] sm:$0xff] %vm1296_vm8, %v1219_v13  ;;  %1039 = vrot.lane.b32.xlu0 %v6661_v63, %s6293_s22  ;;  %v460_v13 = vld [vmem:[%s6499_s14 + $0xf8] sm:$0xff]  ;;  %s6306_s14 = smov 64  }
 0x139   : > { %852 = vrot.lane.b32.xlu1 %v6964_v4, %s6292_s16  ;;  %492 = vst.msk [vmem:[#allocation2 + $0x189] sm:$0xff] %vm386_vm0, %v460_v13 }
 0x13a   : > { %v1410_v18 = vpop.permute.xlu0 %1409 }
 0x13b   : > { %v1223_v17 = vpop.permute.xlu1 %1222  ;;  %1498 = vst.msk [vmem:[#allocation4 + $0x40] sm:$0xff] %vm1489_vm9, %v1410_v18  ;;  %v7150_v18 = vld [vmem:[#allocation2 + $0x121] sm:$0xff] }
 0x13c   : > { %1308 = vst.msk [vmem:[#allocation4 + $0x58] sm:$0xff] %vm1296_vm8, %v1223_v17  ;;  %1043 = vrot.lane.b32.xlu0 %v6731_v27, %s6293_s22 }
 0x13d   : > { %1041 = vrot.lane.b32.xlu1 %v6665_v1, %s6293_s22  ;;  %v7020_v1 = vld [vmem:[#allocation2 + $0xf1] sm:$0xff]  ;;  %v7063_v45 = vld [vmem:[#allocation2 + $0x168] sm:$0xff] }
 0x13e   : > { %v1414_v20 = vpop.permute.xlu0 %1413  ;;  %555 = vst.msk [vmem:[#allocation4 + $0xf0] sm:$0xff] %vm386_vm0, %v7063_v45 }
 0x13f   : > { %v1412_v19 = vpop.permute.xlu1 %1411  ;;  %1500 = vst.msk [vmem:[#allocation4 + $0x50] sm:$0xff] %vm1489_vm9, %v1414_v20 }
 0x140   : > { %1499 = vst.msk [vmem:[#allocation4 + $0x48] sm:$0xff] %vm1489_vm9, %v1412_v19  ;;  %1232 = vrot.lane.b32.xlu0 %v6938_v49, %s6294_s24  ;;  %v7084_v49 = vld [vmem:[#allocation2 + $0x111] sm:$0xff]  ;;  %v7158_v19 = vld [vmem:[#allocation2 + $0x129] sm:$0xff] }
 0x141   : > { %1045 = vrot.lane.b32.xlu1 %v6733_v28, %s6293_s22 }
 0x142   : > { %v1604_v23 = vpop.permute.xlu0 %1603 }
 0x143   : > { %v1416_v63 = vpop.permute.xlu1 %1415  ;;  %1692 = vst.msk [vmem:[#allocation4 + $0x40] sm:$0xff] %vm1683_vm10, %v1604_v23  ;;  %v7166_v23 = vld [vmem:[#allocation2 + $0x122] sm:$0xff] }
 0x144   : > { %1501 = vst.msk [vmem:[#allocation4 + $0x58] sm:$0xff] %vm1489_vm9, %v1416_v63  ;;  %1236 = vrot.lane.b32.xlu0 %v7020_v1, %s6294_s24 }
 0x145   : > { %1234 = vrot.lane.b32.xlu1 %v6946_v52, %s6294_s24 }
 0x146   : > { %v1608_v26 = vpop.permute.xlu0 %1607 }
 0x147   : > { %v1606_v42 = vpop.permute.xlu1 %1605  ;;  %1694 = vst.msk [vmem:[#allocation4 + $0x50] sm:$0xff] %vm1683_vm10, %v1608_v26 }
 0x148   : > { %1693 = vst.msk [vmem:[#allocation4 + $0x48] sm:$0xff] %vm1683_vm10, %v1606_v42  ;;  %1425 = vrot.lane.b32.xlu0 %v6955_v62, %s9883_s25  ;;  %v7102_v62 = vld [vmem:[#allocation2 + $0x112] sm:$0xff]  ;;  %v7174_v42 = vld [vmem:[#allocation2 + $0x12a] sm:$0xff] }
 0x149   : > { %1238 = vrot.lane.b32.xlu1 %v7028_v41, %s6294_s24 }
 0x14a   : > { %v1797_v31 = vpop.permute.xlu0 %1796 }
 0x14b   : > { %v1610_v29 = vpop.permute.xlu1 %1609  ;;  %1885 = vst.msk [vmem:[#allocation4 + $0x40] sm:$0xff] %vm1876_vm11, %v1797_v31 }
 0x14c   : > { %1695 = vst.msk [vmem:[#allocation4 + $0x58] sm:$0xff] %vm1683_vm10, %v1610_v29  ;;  %1429 = vrot.lane.b32.xlu0 %v7036_v30, %s9883_s25 }
 0x14d   : > { %1427 = vrot.lane.b32.xlu1 %v6964_v4, %s9883_s25 }
 0x14e   : > { %v1801_v36 = vpop.permute.xlu0 %1800 }
 0x14f   : > { %v1799_v35 = vpop.permute.xlu1 %1798  ;;  %1887 = vst.msk [vmem:[#allocation4 + $0x50] sm:$0xff] %vm1876_vm11, %v1801_v36  ;;  %v7194_v36 = vld [vmem:[#allocation2 + $0x139] sm:$0xff] }
 0x150   : > { %1886 = vst.msk [vmem:[#allocation4 + $0x48] sm:$0xff] %vm1876_vm11, %v1799_v35  ;;  %1619 = vrot.lane.b32.xlu0 %v6731_v27, %s9884_s29  ;;  %v7068_v27 = vld [vmem:[#allocation2 + $0x170] sm:$0xff] }
 0x151   : > { %1431 = vrot.lane.b32.xlu1 %v7044_v32, %s9883_s25  ;;  %556 = vst.msk [vmem:[#allocation4 + $0xf8] sm:$0xff] %vm386_vm0, %v7068_v27  ;;  %vm2691_vm0 = vcmask 130048  }
 0x152   : > { %v1990_v40 = vpop.permute.xlu0 %1989  ;;  %2692 = vst.msk [vmem:[#allocation3] sm:$0xff] %vm2691_vm0, %v6290_v0  ;;  %2693 = vst.msk [vmem:[#allocation3 + $0x8] sm:$0xff] %vm2691_vm0, %v6290_v0 }
 0x153   : > { %v1803_v39 = vpop.permute.xlu1 %1802  ;;  %2078 = vst.msk [vmem:[#allocation4 + $0x40] sm:$0xff] %vm2069_vm12, %v1990_v40 }
 0x154   : > { %1888 = vst.msk [vmem:[#allocation4 + $0x58] sm:$0xff] %vm1876_vm11, %v1803_v39  ;;  %1623 = vrot.lane.b32.xlu0 %v6787_v33, %s9884_s29 }
 0x155   : > { %1621 = vrot.lane.b32.xlu1 %v6733_v28, %s9884_s29  ;;  %2697 = vst.msk [vmem:[#allocation3 + $0x198] sm:$0xff] %vm2691_vm0, %v6290_v0  ;;  %2698 = vst.msk [vmem:[#allocation3 + $0x1a0] sm:$0xff] %vm2691_vm0, %v6290_v0 }
 0x156   : > { %v1994_v44 = vpop.permute.xlu0 %1993 }
 0x157   : > { %v1992_v43 = vpop.permute.xlu1 %1991  ;;  %2080 = vst.msk [vmem:[#allocation4 + $0x50] sm:$0xff] %vm2069_vm12, %v1994_v44 }
 0x158   : > { %2079 = vst.msk [vmem:[#allocation4 + $0x48] sm:$0xff] %vm2069_vm12, %v1992_v43  ;;  %1812 = vrot.lane.b32.xlu0 %v7020_v1, %s6297_s30 }
 0x159   : > { %1625 = vrot.lane.b32.xlu1 %v6792_v51, %s9884_s29 }
 0x15a   : > { %v646_v47 = vpop.permute.xlu0 %645  ;;  %v2110_v56 = vld [vmem:[#allocation4 + $0x40] sm:$0xff] }
 0x15b   : > { %v1996_v28 = vpop.permute.xlu1 %1995  ;;  %730 = vst.msk [vmem:[#allocation4 + $0x60] sm:$0xff] %vm717_vm5, %v646_v47 }
 0x15c   : > { %2081 = vst.msk [vmem:[#allocation4 + $0x58] sm:$0xff] %vm2069_vm12, %v1996_v28  ;;  %1816 = vrot.lane.b32.xlu0 %v7076_v46, %s6297_s30 }
 0x15d   : > { %1814 = vrot.lane.b32.xlu1 %v7028_v41, %s6297_s30 }
 0x15e   : > { %v650_v53 = vpop.permute.xlu0 %649  ;;  %v2112_v54 = vld [vmem:[#allocation4 + $0x50] sm:$0xff] }
 0x15f   : > { %v648_v50 = vpop.permute.xlu1 %647  ;;  %v2111_v34 = vld [vmem:[#allocation4 + $0x48] sm:$0xff]  ;;  %732 = vst.msk [vmem:[#allocation4 + $0x70] sm:$0xff] %vm717_vm5, %v650_v53 }
 0x160   : > { %731 = vst.msk [vmem:[#allocation4 + $0x68] sm:$0xff] %vm717_vm5, %v648_v50  ;;  %v2138_v52 = vpack.c.bf16 %v2111_v34, %v2110_v56  ;;  %2005 = vrot.lane.b32.xlu0 %v7036_v30, %s6299_s12  ;;  %v7211_v56 = vld [vmem:[#allocation2 + $0x13a] sm:$0xff]  ;;  %v7225_v53 = vld [vmem:[#allocation2 + $0x142] sm:$0xff] }
 0x161   : > { %1818 = vrot.lane.b32.xlu1 %v7084_v49, %s6297_s30 }
 0x162   : > { %6058 = vmatprep.mubr.msk.bf16.mxu0 %vm2172_vm13, %v2138_v52  ;;  %v839_v61 = vpop.permute.xlu0 %838  ;;  %v7220_v52 = vld [vmem:[%s9862_s2] ss:$0 sm:$0xff] }
 0x163   : > { %v652_v57 = vpop.permute.xlu1 %651  ;;  %v2113_v58 = vld [vmem:[#allocation4 + $0x58] sm:$0xff]  ;;  %923 = vst.msk [vmem:[#allocation4 + $0x60] sm:$0xff] %vm910_vm6, %v839_v61 }
 0x164   : > { %733 = vst.msk [vmem:[#allocation4 + $0x78] sm:$0xff] %vm717_vm5, %v652_v57  ;;  %v2139_v60 = vpack.c.bf16 %v2113_v58, %v2112_v54  ;;  %2009 = vrot.lane.b32.xlu0 %v7093_v59, %s6299_s12 }
 0x165   : > { %2007 = vrot.lane.b32.xlu1 %v7044_v32, %s6299_s12 }
 0x166   : > { %6059 = vmatmul.mubr.msk.bf16.gmra.mxu0 %vm2172_vm13, %v2139_v60  ;;  %v843_v3 = vpop.permute.xlu0 %842 }
 0x167   : > { %v841_v2 = vpop.permute.xlu1 %840  ;;  %925 = vst.msk [vmem:[#allocation4 + $0x70] sm:$0xff] %vm910_vm6, %v843_v3 }
 0x168   : > { %924 = vst.msk [vmem:[#allocation4 + $0x68] sm:$0xff] %vm910_vm6, %v841_v2  ;;  %661 = vrot.lane.b32.xlu0 %v7020_v1, %s6291_s15 }
 0x169   : > { %2011 = vrot.lane.b32.xlu1 %v7102_v62, %s6299_s12 }
 0x16a   : > { %v1032_v5 = vpop.permute.xlu0 %1031 }
 0x16b   : > { %v845_v4 = vpop.permute.xlu1 %844  ;;  %1116 = vst.msk [vmem:[#allocation4 + $0x60] sm:$0xff] %vm1103_vm7, %v1032_v5 }
 0x16c   : > { %926 = vst.msk [vmem:[#allocation4 + $0x78] sm:$0xff] %vm910_vm6, %v845_v4  ;;  %665 = vrot.lane.b32.xlu0 %v7076_v46, %s6291_s15 }
 0x16d   : > { %663 = vrot.lane.b32.xlu1 %v7028_v41, %s6291_s15 }
 0x16e   : > { %v1036_v7 = vpop.permute.xlu0 %1035 }
 0x16f   : > { %v1034_v6 = vpop.permute.xlu1 %1033  ;;  %1118 = vst.msk [vmem:[#allocation4 + $0x70] sm:$0xff] %vm1103_vm7, %v1036_v7 }
 0x170   : > { %1117 = vst.msk [vmem:[#allocation4 + $0x68] sm:$0xff] %vm1103_vm7, %v1034_v6  ;;  %854 = vrot.lane.b32.xlu0 %v7036_v30, %s6292_s16 }
 0x171   : > { %667 = vrot.lane.b32.xlu1 %v7084_v49, %s6291_s15 }
 0x172   : > { %v1225_v9 = vpop.permute.xlu0 %1224 }
 0x173   : > { %v1038_v8 = vpop.permute.xlu1 %1037  ;;  %1309 = vst.msk [vmem:[#allocation4 + $0x60] sm:$0xff] %vm1296_vm8, %v1225_v9 }
 0x174   : > { %1119 = vst.msk [vmem:[#allocation4 + $0x78] sm:$0xff] %vm1103_vm7, %v1038_v8  ;;  %858 = vrot.lane.b32.xlu0 %v7093_v59, %s6292_s16 }
 0x175   : > { %856 = vrot.lane.b32.xlu1 %v7044_v32, %s6292_s16 }
 0x176   : > { %v1229_v11 = vpop.permute.xlu0 %1228 }
 0x177   : > { %v1227_v10 = vpop.permute.xlu1 %1226  ;;  %1311 = vst.msk [vmem:[#allocation4 + $0x70] sm:$0xff] %vm1296_vm8, %v1229_v11 }
 0x178   : > { %1310 = vst.msk [vmem:[#allocation4 + $0x68] sm:$0xff] %vm1296_vm8, %v1227_v10  ;;  %1047 = vrot.lane.b32.xlu0 %v6787_v33, %s6293_s22 }
 0x179   : > { %860 = vrot.lane.b32.xlu1 %v7102_v62, %s6292_s16 }
 0x17a   : > { %v1418_v15 = vpop.permute.xlu0 %1417 }
 0x17b   : > { %v1231_v14 = vpop.permute.xlu1 %1230  ;;  %1502 = vst.msk [vmem:[#allocation4 + $0x60] sm:$0xff] %vm1489_vm9, %v1418_v15 }
 0x17c   : > { %1312 = vst.msk [vmem:[#allocation4 + $0x78] sm:$0xff] %vm1296_vm8, %v1231_v14  ;;  %1051 = vrot.lane.b32.xlu0 %v6869_v24, %s6293_s22 }
 0x17d   : > { %1049 = vrot.lane.b32.xlu1 %v6792_v51, %s6293_s22 }
 0x17e   : > { %v1422_v17 = vpop.permute.xlu0 %1421 }
 0x17f   : > { %v1420_v16 = vpop.permute.xlu1 %1419  ;;  %1504 = vst.msk [vmem:[#allocation4 + $0x70] sm:$0xff] %vm1489_vm9, %v1422_v17 }
 0x180   : > { %1503 = vst.msk [vmem:[#allocation4 + $0x68] sm:$0xff] %vm1489_vm9, %v1420_v16  ;;  %1240 = vrot.lane.b32.xlu0 %v7076_v46, %s6294_s24 }
 0x181   : > { %1053 = vrot.lane.b32.xlu1 %v6871_v25, %s6293_s22 }
 0x182   : > { %v1612_v51 = vpop.permute.xlu0 %1611 }
 0x183   : > { %v1424_v33 = vpop.permute.xlu1 %1423  ;;  %1696 = vst.msk [vmem:[#allocation4 + $0x60] sm:$0xff] %vm1683_vm10, %v1612_v51 }
 0x184   : > { %1505 = vst.msk [vmem:[#allocation4 + $0x78] sm:$0xff] %vm1489_vm9, %v1424_v33  ;;  %1244 = vrot.lane.b32.xlu0 %v7150_v18, %s6294_s24 }
 0x185   : > { %1242 = vrot.lane.b32.xlu1 %v7084_v49, %s6294_s24 }
 0x186   : > { %v1616_v63 = vpop.permute.xlu0 %1615 }
 0x187   : > { %v1614_v20 = vpop.permute.xlu1 %1613  ;;  %1698 = vst.msk [vmem:[#allocation4 + $0x70] sm:$0xff] %vm1683_vm10, %v1616_v63  ;;  %v7285_v63 = vld [vmem:[#allocation2 + $0x159] sm:$0xff] }
 0x188   : > { %1697 = vst.msk [vmem:[#allocation4 + $0x68] sm:$0xff] %vm1683_vm10, %v1614_v20  ;;  %1433 = vrot.lane.b32.xlu0 %v7093_v59, %s9883_s25  ;;  %v7277_v20 = vld [vmem:[#allocation2 + $0x151] sm:$0xff] }
 0x189   : > { %1246 = vrot.lane.b32.xlu1 %v7158_v19, %s6294_s24 }
 0x18a   : > { %v1805_v41 = vpop.permute.xlu0 %1804 }
 0x18b   : > { %v1618_v1 = vpop.permute.xlu1 %1617  ;;  %1889 = vst.msk [vmem:[#allocation4 + $0x60] sm:$0xff] %vm1876_vm11, %v1805_v41 }
 0x18c   : > { %1699 = vst.msk [vmem:[#allocation4 + $0x78] sm:$0xff] %vm1683_vm10, %v1618_v1  ;;  %1437 = vrot.lane.b32.xlu0 %v7166_v23, %s9883_s25 }
 0x18d   : > { %1435 = vrot.lane.b32.xlu1 %v7102_v62, %s9883_s25 }
 0x18e   : > { %v1809_v29 = vpop.permute.xlu0 %1808 }
 0x18f   : > { %v1807_v26 = vpop.permute.xlu1 %1806  ;;  %1891 = vst.msk [vmem:[#allocation4 + $0x70] sm:$0xff] %vm1876_vm11, %v1809_v29  ;;  %v7301_v29 = vld [vmem:[#allocation2 + $0x15a] sm:$0xff] }
 0x190   : > { %1890 = vst.msk [vmem:[#allocation4 + $0x68] sm:$0xff] %vm1876_vm11, %v1807_v26  ;;  %1627 = vrot.lane.b32.xlu0 %v6869_v24, %s9884_s29 }
 0x191   : > { %1439 = vrot.lane.b32.xlu1 %v7174_v42, %s9883_s25 }
 0x192   : > { %v1998_v31 = vpop.permute.xlu0 %1997 }
 0x193   : > { %v1811_v30 = vpop.permute.xlu1 %1810  ;;  %2082 = vst.msk [vmem:[#allocation4 + $0x60] sm:$0xff] %vm2069_vm12, %v1998_v31 }
 0x194   : > { %1892 = vst.msk [vmem:[#allocation4 + $0x78] sm:$0xff] %vm1876_vm11, %v1811_v30  ;;  %1631 = vrot.lane.b32.xlu0 %v6925_v48, %s9884_s29 }
 0x195   : > { %1629 = vrot.lane.b32.xlu1 %v6871_v25, %s9884_s29 }
 0x196   : > { %v2002_v35 = vpop.permute.xlu0 %2001 }
 0x197   : > { %v2000_v32 = vpop.permute.xlu1 %1999  ;;  %2084 = vst.msk [vmem:[#allocation4 + $0x70] sm:$0xff] %vm2069_vm12, %v2002_v35 }
 0x198   : > { %2083 = vst.msk [vmem:[#allocation4 + $0x68] sm:$0xff] %vm2069_vm12, %v2000_v32  ;;  %1820 = vrot.lane.b32.xlu0 %v7150_v18, %s6297_s30 }
 0x199   : > { %1633 = vrot.lane.b32.xlu1 %v6930_v55, %s9884_s29 }
 0x19a   : > { %v654_v25 = vpop.permute.xlu0 %653  ;;  %v2114_v37 = vld [vmem:[#allocation4 + $0x60] sm:$0xff] }
 0x19b   : > { %v2004_v24 = vpop.permute.xlu1 %2003  ;;  %734 = vst.msk [vmem:[#allocation4 + $0x80] sm:$0xff] %vm717_vm5, %v654_v25  ;;  %v7321_v25 = vld [vmem:[#allocation2 + $0x169] sm:$0xff] }
 0x19c   : > { %2085 = vst.msk [vmem:[#allocation4 + $0x78] sm:$0xff] %vm2069_vm12, %v2004_v24  ;;  %1824 = vrot.lane.b32.xlu0 %v7194_v36, %s6297_s30 }
 0x19d   : > { %1822 = vrot.lane.b32.xlu1 %v7158_v19, %s6297_s30 }
 0x19e   : > { %v658_v44 = vpop.permute.xlu0 %657  ;;  %v2116_v28 = vld [vmem:[#allocation4 + $0x70] sm:$0xff] }
 0x19f   : > { %v656_v39 = vpop.permute.xlu1 %655  ;;  %v2115_v40 = vld [vmem:[#allocation4 + $0x68] sm:$0xff]  ;;  %736 = vst.msk [vmem:[#allocation4 + $0x90] sm:$0xff] %vm717_vm5, %v658_v44 }
 0x1a0   : > { %735 = vst.msk [vmem:[#allocation4 + $0x88] sm:$0xff] %vm717_vm5, %v656_v39  ;;  %v2140_v43 = vpack.c.bf16 %v2115_v40, %v2114_v37  ;;  %2013 = vrot.lane.b32.xlu0 %v7166_v23, %s6299_s12 }
 0x1a1   : > { %1826 = vrot.lane.b32.xlu1 %v7202_v38, %s6297_s30 }
 0x1a2   : > { %6062 = vmatprep.mubr.msk.bf16.mxu0 %vm2172_vm13, %v2140_v43  ;;  %v847_v50 = vpop.permute.xlu0 %846 }
 0x1a3   : > { %v660_v46 = vpop.permute.xlu1 %659  ;;  %v2117_v47 = vld [vmem:[#allocation4 + $0x78] sm:$0xff]  ;;  %927 = vst.msk [vmem:[#allocation4 + $0x80] sm:$0xff] %vm910_vm6, %v847_v50 }
 0x1a4   : > { %737 = vst.msk [vmem:[#allocation4 + $0x98] sm:$0xff] %vm717_vm5, %v660_v46  ;;  %v2141_v49 = vpack.c.bf16 %v2117_v47, %v2116_v28  ;;  %2017 = vrot.lane.b32.xlu0 %v7211_v56, %s6299_s12 }
 0x1a5   : > { %2015 = vrot.lane.b32.xlu1 %v7174_v42, %s6299_s12 }
 0x1a6   : > { %v6052_v34 = vpop.f32.mrf.mxu0  ;;  %6063 = vmatmul.mubr.msk.bf16.gmra.mxu0 %vm2172_vm13, %v2141_v49  ;;  %v851_v58 = vpop.permute.xlu0 %850 }
 0x1a7   : > { %v849_v54 = vpop.permute.xlu1 %848  ;;  %v2271_v59 = vadd.f32 %v6052_v34, %v7220_v52  ;;  %929 = vst.msk [vmem:[#allocation4 + $0x90] sm:$0xff] %vm910_vm6, %v851_v58 }
 0x1a8   : > { %928 = vst.msk [vmem:[#allocation4 + $0x88] sm:$0xff] %vm910_vm6, %v849_v54  ;;  %v2262_v57 = vpop.f32.mrf.mxu0  ;;  %669 = vrot.lane.b32.xlu0 %v7150_v18, %s6291_s15 }
 0x1a9   : > { %2019 = vrot.lane.b32.xlu1 %v7225_v53, %s6299_s12  ;;  %v2263_v61 = vadd.f32 %v7220_v52, %v2262_v57  ;;  %v2391_v5 = vmax.f32 %v2271_v59, 0.0 }
 0x1aa   : > { %v6053_v60 = vpop.f32.mrf.mxu0  ;;  %v1040_v4 = vpop.permute.xlu0 %1039 }
 0x1ab   : > { %v2274_v62 = vadd.f32 %v6053_v60, %v7220_v52  ;;  %v853_v2 = vpop.permute.xlu1 %852  ;;  %1120 = vst.msk [vmem:[#allocation4 + $0x80] sm:$0xff] %vm1103_vm7, %v1040_v4  ;;  %v2389_v8 = vmax.f32 %v2263_v61, 0.0 }
 0x1ac   : > { %930 = vst.msk [vmem:[#allocation4 + $0x98] sm:$0xff] %vm910_vm6, %v853_v2  ;;  %v2265_v3 = vpop.f32.mrf.mxu0  ;;  %673 = vrot.lane.b32.xlu0 %v7194_v36, %s6291_s15 }
 0x1ad   : > { %v2392_v6 = vmax.f32 %v2274_v62, 0.0  ;;  %v2266_v7 = vadd.f32 %v7220_v52, %v2265_v3  ;;  %671 = vrot.lane.b32.xlu1 %v7158_v19, %s6291_s15 }
 0x1ae   : > { %v1044_v12 = vpop.permute.xlu0 %1043 }
 0x1af   : > { %v7243_v9 = vpack.c.bf16 %v2392_v6, %v2391_v5  ;;  %v2390_v10 = vmax.f32 %v2266_v7, 0.0  ;;  %v1042_v11 = vpop.permute.xlu1 %1041  ;;  %1122 = vst.msk [vmem:[#allocation4 + $0x90] sm:$0xff] %vm1103_vm7, %v1044_v12 }
 0x1b0   : > { %1121 = vst.msk [vmem:[#allocation4 + $0x88] sm:$0xff] %vm1103_vm7, %v1042_v11  ;;  %862 = vrot.lane.b32.xlu0 %v7166_v23, %s6292_s16 }
 0x1b1   : > { %v7246_v13 = vpack.c.bf16 %v2390_v10, %v2389_v8  ;;  %675 = vrot.lane.b32.xlu1 %v7202_v38, %s6291_s15 }
 0x1b2   : > { %v1233_v15 = vpop.permute.xlu0 %1232 }
 0x1b3   : > { %v1046_v14 = vpop.permute.xlu1 %1045  ;;  %1313 = vst.msk [vmem:[#allocation4 + $0x80] sm:$0xff] %vm1296_vm8, %v1233_v15 }
 0x1b4   : > { %1123 = vst.msk [vmem:[#allocation4 + $0x98] sm:$0xff] %vm1103_vm7, %v1046_v14  ;;  %866 = vrot.lane.b32.xlu0 %v7211_v56, %s6292_s16  ;;  %v2437_v14 = vld [vmem:[%s9863_s3] sm:$0xf] }
 0x1b5   : > { %864 = vrot.lane.b32.xlu1 %v7174_v42, %s6292_s16  ;;  %v7293_v42 = vld [vmem:[#allocation2 + $0x152] sm:$0xff]  ;;  %6152 = vmatprep.subr.msk.bf16.mxu0 %vm2494_vm14, %v2437_v14 }
 0x1b6   : > { %v1237_v17 = vpop.permute.xlu0 %1236  ;;  %6153 = vmatprep.subr.msk.bf16.mxu1 %vm2494_vm14, %v2437_v14 }
 0x1b7   : > { %v1235_v16 = vpop.permute.xlu1 %1234  ;;  %1315 = vst.msk [vmem:[#allocation4 + $0x90] sm:$0xff] %vm1296_vm8, %v1237_v17 }
 0x1b8   : > { %1314 = vst.msk [vmem:[#allocation4 + $0x88] sm:$0xff] %vm1296_vm8, %v1235_v16  ;;  %1055 = vrot.lane.b32.xlu0 %v6925_v48, %s6293_s22  ;;  %v2496_v16 = vsel %vm2494_vm14, %v2437_v14, 0  ;;  %vm5246_vm14 = vcmask 1044484  }
 0x1b9   : > { %868 = vrot.lane.b32.xlu1 %v7225_v53, %s6292_s16  ;;  %6083 = vmatpush3.bf16.msra.mxu0 %v2496_v16 }
 0x1ba   : > { %v1426_v18 = vpop.permute.xlu0 %1425  ;;  %6151 = vmatpush3.bf16.msra.mxu1 %v2496_v16 }
 0x1bb   : > { %v1239_v33 = vpop.permute.xlu1 %1238  ;;  %1506 = vst.msk [vmem:[#allocation4 + $0x80] sm:$0xff] %vm1489_vm9, %v1426_v18 }
 0x1bc   : > { %1316 = vst.msk [vmem:[#allocation4 + $0x98] sm:$0xff] %vm1296_vm8, %v1239_v33  ;;  %1059 = vrot.lane.b32.xlu0 %v7007_v21, %s6293_s22 }
 0x1bd   : > { %1057 = vrot.lane.b32.xlu1 %v6930_v55, %s6293_s22 }
 0x1be   : > { %v1430_v19 = vpop.permute.xlu0 %1429 }
 0x1bf   : > { %v1428_v51 = vpop.permute.xlu1 %1427  ;;  %1508 = vst.msk [vmem:[#allocation4 + $0x90] sm:$0xff] %vm1489_vm9, %v1430_v19 }
 0x1c0   : > { %1507 = vst.msk [vmem:[#allocation4 + $0x88] sm:$0xff] %vm1489_vm9, %v1428_v51  ;;  %1248 = vrot.lane.b32.xlu0 %v7194_v36, %s6294_s24 }
 0x1c1   : > { %1061 = vrot.lane.b32.xlu1 %v7009_v22, %s6293_s22 }
 0x1c2   : > { %v1620_v55 = vpop.permute.xlu0 %1619 }
 0x1c3   : > { %v1432_v48 = vpop.permute.xlu1 %1431  ;;  %1700 = vst.msk [vmem:[#allocation4 + $0x80] sm:$0xff] %vm1683_vm10, %v1620_v55 }
 0x1c4   : > { %1509 = vst.msk [vmem:[#allocation4 + $0x98] sm:$0xff] %vm1489_vm9, %v1432_v48  ;;  %1252 = vrot.lane.b32.xlu0 %v7277_v20, %s6294_s24 }
 0x1c5   : > { %1250 = vrot.lane.b32.xlu1 %v7202_v38, %s6294_s24  ;;  %v7329_v38 = vld [vmem:[#allocation2 + $0x171] sm:$0xff] }
 0x1c6   : > { %v1624_v23 = vpop.permute.xlu0 %1623 }
 0x1c7   : > { %v1622_v1 = vpop.permute.xlu1 %1621  ;;  %1702 = vst.msk [vmem:[#allocation4 + $0x90] sm:$0xff] %vm1683_vm10, %v1624_v23 }
 0x1c8   : > { %1701 = vst.msk [vmem:[#allocation4 + $0x88] sm:$0xff] %vm1683_vm10, %v1622_v1  ;;  %1441 = vrot.lane.b32.xlu0 %v7211_v56, %s9883_s25  ;;  %v7338_v56 = vld [vmem:[#allocation2 + $0x16a] sm:$0xff] }
 0x1c9   : > { %1254 = vrot.lane.b32.xlu1 %v7285_v63, %s6294_s24 }
 0x1ca   : > { %v1813_v26 = vpop.permute.xlu0 %1812 }
 0x1cb   : > { %v1626_v41 = vpop.permute.xlu1 %1625  ;;  %1893 = vst.msk [vmem:[#allocation4 + $0x80] sm:$0xff] %vm1876_vm11, %v1813_v26 }
 0x1cc   : > { %1703 = vst.msk [vmem:[#allocation4 + $0x98] sm:$0xff] %vm1683_vm10, %v1626_v41  ;;  %1445 = vrot.lane.b32.xlu0 %v7293_v42, %s9883_s25  ;;  %v1166_v41 = vld [vmem:[#allocation2 + $0x181] sm:$0xff] }
 0x1cd   : > { %1443 = vrot.lane.b32.xlu1 %v7225_v53, %s9883_s25  ;;  %v7347_v53 = vld [vmem:[#allocation2 + $0x172] sm:$0xff] }
 0x1ce   : > { %v1817_v31 = vpop.permute.xlu0 %1816 }
 0x1cf   : > { %v1815_v30 = vpop.permute.xlu1 %1814  ;;  %1895 = vst.msk [vmem:[#allocation4 + $0x90] sm:$0xff] %vm1876_vm11, %v1817_v31  ;;  %v1359_v31 = vld [vmem:[#allocation2 + $0x182] sm:$0xff] }
 0x1d0   : > { %1894 = vst.msk [vmem:[#allocation4 + $0x88] sm:$0xff] %vm1876_vm11, %v1815_v30  ;;  %1635 = vrot.lane.b32.xlu0 %v7007_v21, %s9884_s29 }
 0x1d1   : > { %1447 = vrot.lane.b32.xlu1 %v7301_v29, %s9883_s25 }
 0x1d2   : > { %v2006_v35 = vpop.permute.xlu0 %2005 }
 0x1d3   : > { %v1819_v32 = vpop.permute.xlu1 %1818  ;;  %2086 = vst.msk [vmem:[#allocation4 + $0x80] sm:$0xff] %vm2069_vm12, %v2006_v35  ;;  %v1360_v35 = vld [vmem:[#allocation2 + $0x18a] sm:$0xff] }
 0x1d4   : > { %1896 = vst.msk [vmem:[#allocation4 + $0x98] sm:$0xff] %vm1876_vm11, %v1819_v32  ;;  %1639 = vrot.lane.b32.xlu0 %v7063_v45, %s9884_s29 }
 0x1d5   : > { %1637 = vrot.lane.b32.xlu1 %v7009_v22, %s9884_s29 }
 0x1d6   : > { %v2010_v36 = vpop.permute.xlu0 %2009 }
 0x1d7   : > { %v2008_v24 = vpop.permute.xlu1 %2007  ;;  %2088 = vst.msk [vmem:[#allocation4 + $0x90] sm:$0xff] %vm2069_vm12, %v2010_v36 }
 0x1d8   : > { %2087 = vst.msk [vmem:[#allocation4 + $0x88] sm:$0xff] %vm2069_vm12, %v2008_v24  ;;  %1828 = vrot.lane.b32.xlu0 %v7277_v20, %s6297_s30 }
 0x1d9   : > { %1641 = vrot.lane.b32.xlu1 %v7068_v27, %s9884_s29 }
 0x1da   : > { %v662_v22 = vpop.permute.xlu0 %661  ;;  %v2118_v37 = vld [vmem:[#allocation4 + $0x80] sm:$0xff] }
 0x1db   : > { %v2012_v21 = vpop.permute.xlu1 %2011  ;;  %738 = vst.msk [vmem:[#allocation4 + $0xa0] sm:$0xff] %vm717_vm5, %v662_v22 }
 0x1dc   : > { %2089 = vst.msk [vmem:[#allocation4 + $0x98] sm:$0xff] %vm2069_vm12, %v2012_v21  ;;  %1832 = vrot.lane.b32.xlu0 %v7321_v25, %s6297_s30 }
 0x1dd   : > { %1830 = vrot.lane.b32.xlu1 %v7285_v63, %s6297_s30 }
 0x1de   : > { %v666_v44 = vpop.permute.xlu0 %665  ;;  %v2120_v28 = vld [vmem:[#allocation4 + $0x90] sm:$0xff] }
 0x1df   : > { %v664_v39 = vpop.permute.xlu1 %663  ;;  %v2119_v40 = vld [vmem:[#allocation4 + $0x88] sm:$0xff]  ;;  %740 = vst.msk [vmem:[#allocation4 + $0xb0] sm:$0xff] %vm717_vm5, %v666_v44 }
 0x1e0   : > { %739 = vst.msk [vmem:[#allocation4 + $0xa8] sm:$0xff] %vm717_vm5, %v664_v39  ;;  %v2142_v43 = vpack.c.bf16 %v2119_v40, %v2118_v37  ;;  %2021 = vrot.lane.b32.xlu0 %v7293_v42, %s6299_s12  ;;  %v1554_v37 = vld [vmem:[#allocation2 + $0x1a0] sm:$0xff] }
 0x1e1   : > { %1834 = vrot.lane.b32.xlu1 %v7329_v38, %s6297_s30 }
 0x1e2   : > { %6066 = vmatprep.mubr.msk.bf16.mxu0 %vm2172_vm13, %v2142_v43  ;;  %v855_v50 = vpop.permute.xlu0 %854  ;;  %v1746_v43 = vld [vmem:[#allocation2 + $0x199] sm:$0xff] }
 0x1e3   : > { %v668_v46 = vpop.permute.xlu1 %667  ;;  %v2121_v47 = vld [vmem:[#allocation4 + $0x98] sm:$0xff]  ;;  %931 = vst.msk [vmem:[#allocation4 + $0xa0] sm:$0xff] %vm910_vm6, %v855_v50 }
 0x1e4   : > { %741 = vst.msk [vmem:[#allocation4 + $0xb8] sm:$0xff] %vm717_vm5, %v668_v46  ;;  %v2143_v49 = vpack.c.bf16 %v2121_v47, %v2120_v28  ;;  %2025 = vrot.lane.b32.xlu0 %v7338_v56, %s6299_s12  ;;  %v1747_v46 = vld [vmem:[#allocation2 + $0x1a1] sm:$0xff] }
 0x1e5   : > { %2023 = vrot.lane.b32.xlu1 %v7301_v29, %s6299_s12 }
 0x1e6   : > { %v6056_v34 = vpop.f32.mrf.mxu0  ;;  %6067 = vmatmul.mubr.msk.bf16.gmra.mxu0 %vm2172_vm13, %v2143_v49  ;;  %v859_v58 = vpop.permute.xlu0 %858 }
 0x1e7   : > { %v857_v54 = vpop.permute.xlu1 %856  ;;  %v2287_v59 = vadd.f32 %v6056_v34, %v7220_v52  ;;  %933 = vst.msk [vmem:[#allocation4 + $0xb0] sm:$0xff] %vm910_vm6, %v859_v58 }
 0x1e8   : > { %932 = vst.msk [vmem:[#allocation4 + $0xa8] sm:$0xff] %vm910_vm6, %v857_v54  ;;  %v2278_v57 = vpop.f32.mrf.mxu0  ;;  %677 = vrot.lane.b32.xlu0 %v7277_v20, %s6291_s15  ;;  %v973_v20 = vld [vmem:[#allocation2 + $0x180] sm:$0xff] }
 0x1e9   : > { %2027 = vrot.lane.b32.xlu1 %v7347_v53, %s6299_s12  ;;  %v2279_v61 = vadd.f32 %v7220_v52, %v2278_v57  ;;  %v2395_v5 = vmax.f32 %v2287_v59, 0.0  ;;  %v1939_v57 = vld [vmem:[#allocation2 + $0x19a] sm:$0xff] }
 0x1ea   : > { %v6057_v60 = vpop.f32.mrf.mxu0  ;;  %v1048_v4 = vpop.permute.xlu0 %1047 }
 0x1eb   : > { %v2290_v62 = vadd.f32 %v6057_v60, %v7220_v52  ;;  %v861_v2 = vpop.permute.xlu1 %860  ;;  %1124 = vst.msk [vmem:[#allocation4 + $0xa0] sm:$0xff] %vm1103_vm7, %v1048_v4  ;;  %v2393_v8 = vmax.f32 %v2279_v61, 0.0  ;;  %v1940_v61 = vld [vmem:[#allocation2 + $0x1a2] sm:$0xff] }
 0x1ec   : > { %934 = vst.msk [vmem:[#allocation4 + $0xb8] sm:$0xff] %vm910_vm6, %v861_v2  ;;  %v2281_v3 = vpop.f32.mrf.mxu0  ;;  %681 = vrot.lane.b32.xlu0 %v7321_v25, %s6291_s15 }
 0x1ed   : > { %v2396_v6 = vmax.f32 %v2290_v62, 0.0  ;;  %v2282_v7 = vadd.f32 %v7220_v52, %v2281_v3  ;;  %679 = vrot.lane.b32.xlu1 %v7285_v63, %s6291_s15  ;;  %v974_v63 = vld [vmem:[#allocation2 + $0x188] sm:$0xff] }
 0x1ee   : > { %v1052_v15 = vpop.permute.xlu0 %1051 }
 0x1ef   : > { %v7365_v10 = vpack.c.bf16 %v2396_v6, %v2395_v5  ;;  %v2394_v11 = vmax.f32 %v2282_v7, 0.0  ;;  %v1050_v12 = vpop.permute.xlu1 %1049  ;;  %1126 = vst.msk [vmem:[#allocation4 + $0xb0] sm:$0xff] %vm1103_vm7, %v1052_v15 }
 0x1f0   : > { %1125 = vst.msk [vmem:[#allocation4 + $0xa8] sm:$0xff] %vm1103_vm7, %v1050_v12  ;;  %870 = vrot.lane.b32.xlu0 %v7293_v42, %s6292_s16  ;;  %v1167_v42 = vld [vmem:[#allocation2 + $0x189] sm:$0xff] }
 0x1f1   : > { %v7371_v17 = vpack.c.bf16 %v2394_v11, %v2393_v8  ;;  %683 = vrot.lane.b32.xlu1 %v7329_v38, %s6291_s15  ;;  %s6300_s15 = smov 16  }
 0x1f2   : > { %v1241_v18 = vpop.permute.xlu0 %1240 }
 0x1f3   : > { %v1054_v33 = vpop.permute.xlu1 %1053  ;;  %1317 = vst.msk [vmem:[#allocation4 + $0xa0] sm:$0xff] %vm1296_vm8, %v1241_v18 }
 0x1f4   : > { %1127 = vst.msk [vmem:[#allocation4 + $0xb8] sm:$0xff] %vm1103_vm7, %v1054_v33  ;;  %874 = vrot.lane.b32.xlu0 %v7338_v56, %s6292_s16 }
 0x1f5   : > { %872 = vrot.lane.b32.xlu1 %v7301_v29, %s6292_s16 }
 0x1f6   : > { %v1245_v19 = vpop.permute.xlu0 %1244 }
 0x1f7   : > { %v1243_v51 = vpop.permute.xlu1 %1242  ;;  %1319 = vst.msk [vmem:[#allocation4 + $0xb0] sm:$0xff] %vm1296_vm8, %v1245_v19 }
 0x1f8   : > { %1318 = vst.msk [vmem:[#allocation4 + $0xa8] sm:$0xff] %vm1296_vm8, %v1243_v51  ;;  %1063 = vrot.lane.b32.xlu0 %v7063_v45, %s6293_s22 }
 0x1f9   : > { %876 = vrot.lane.b32.xlu1 %v7347_v53, %s6292_s16  ;;  %s9878_s16 = smov 32  }
 0x1fa   : > { %v1434_v55 = vpop.permute.xlu0 %1433 }
 0x1fb   : > { %v1247_v48 = vpop.permute.xlu1 %1246  ;;  %1510 = vst.msk [vmem:[#allocation4 + $0xa0] sm:$0xff] %vm1489_vm9, %v1434_v55 }
 0x1fc   : > { %1320 = vst.msk [vmem:[#allocation4 + $0xb8] sm:$0xff] %vm1296_vm8, %v1247_v48  ;;  %1067 = vrot.lane.b32.xlu0 %v973_v20, %s6293_s22 }
 0x1fd   : > { %1065 = vrot.lane.b32.xlu1 %v7068_v27, %s6293_s22 }
 0x1fe   : > { %v1438_v23 = vpop.permute.xlu0 %1437 }
 0x1ff   : > { %v1436_v1 = vpop.permute.xlu1 %1435  ;;  %1512 = vst.msk [vmem:[#allocation4 + $0xb0] sm:$0xff] %vm1489_vm9, %v1438_v23 }
 0x200   : > { %1511 = vst.msk [vmem:[#allocation4 + $0xa8] sm:$0xff] %vm1489_vm9, %v1436_v1  ;;  %1256 = vrot.lane.b32.xlu0 %v7321_v25, %s6294_s24  ;;  %v1553_v25 = vld [vmem:[#allocation2 + $0x198] sm:$0xff] }
 0x201   : > { %1069 = vrot.lane.b32.xlu1 %v974_v63, %s6293_s22  ;;  %s6307_s22 = smov 80  }
 0x202   : > { %v1628_v27 = vpop.permute.xlu0 %1627 }
 0x203   : > { %v1440_v45 = vpop.permute.xlu1 %1439  ;;  %1704 = vst.msk [vmem:[#allocation4 + $0xa0] sm:$0xff] %vm1683_vm10, %v1628_v27 }
 0x204   : > { %1513 = vst.msk [vmem:[#allocation4 + $0xb8] sm:$0xff] %vm1489_vm9, %v1440_v45  ;;  %1260 = vrot.lane.b32.xlu0 %v1166_v41, %s6294_s24 }
 0x205   : > { %1258 = vrot.lane.b32.xlu1 %v7329_v38, %s6294_s24 }
 0x206   : > { %v1632_v29 = vpop.permute.xlu0 %1631 }
 0x207   : > { %v1630_v26 = vpop.permute.xlu1 %1629  ;;  %1706 = vst.msk [vmem:[#allocation4 + $0xb0] sm:$0xff] %vm1683_vm10, %v1632_v29 }
 0x208   : > { %1705 = vst.msk [vmem:[#allocation4 + $0xa8] sm:$0xff] %vm1683_vm10, %v1630_v26  ;;  %1449 = vrot.lane.b32.xlu0 %v7338_v56, %s9883_s25 }
 0x209   : > { %1262 = vrot.lane.b32.xlu1 %v1167_v42, %s6294_s24 }
 0x20a   : > { %v1821_v32 = vpop.permute.xlu0 %1820 }
 0x20b   : > { %v1634_v30 = vpop.permute.xlu1 %1633  ;;  %1897 = vst.msk [vmem:[#allocation4 + $0xa0] sm:$0xff] %vm1876_vm11, %v1821_v32 }
 0x20c   : > { %1707 = vst.msk [vmem:[#allocation4 + $0xb8] sm:$0xff] %vm1683_vm10, %v1634_v30  ;;  %1453 = vrot.lane.b32.xlu0 %v1359_v31, %s9883_s25 }
 0x20d   : > { %1451 = vrot.lane.b32.xlu1 %v7347_v53, %s9883_s25 }
 0x20e   : > { %v1825_v36 = vpop.permute.xlu0 %1824 }
 0x20f   : > { %v1823_v24 = vpop.permute.xlu1 %1822  ;;  %1899 = vst.msk [vmem:[#allocation4 + $0xb0] sm:$0xff] %vm1876_vm11, %v1825_v36 }
 0x210   : > { %1898 = vst.msk [vmem:[#allocation4 + $0xa8] sm:$0xff] %vm1876_vm11, %v1823_v24  ;;  %1643 = vrot.lane.b32.xlu0 %v973_v20, %s9884_s29 }
 0x211   : > { %1455 = vrot.lane.b32.xlu1 %v1360_v35, %s9883_s25  ;;  %s6302_s25 = smov 96  }
 0x212   : > { %v2014_v22 = vpop.permute.xlu0 %2013 }
 0x213   : > { %v1827_v21 = vpop.permute.xlu1 %1826  ;;  %2090 = vst.msk [vmem:[#allocation4 + $0xa0] sm:$0xff] %vm2069_vm12, %v2014_v22 }
 0x214   : > { %1900 = vst.msk [vmem:[#allocation4 + $0xb8] sm:$0xff] %vm1876_vm11, %v1827_v21  ;;  %1647 = vrot.lane.b32.xlu0 %v1553_v25, %s9884_s29 }
 0x215   : > { %1645 = vrot.lane.b32.xlu1 %v974_v63, %s9884_s29 }
 0x216   : > { %v2018_v39 = vpop.permute.xlu0 %2017 }
 0x217   : > { %v2016_v38 = vpop.permute.xlu1 %2015  ;;  %2092 = vst.msk [vmem:[#allocation4 + $0xb0] sm:$0xff] %vm2069_vm12, %v2018_v39 }
 0x218   : > { %2091 = vst.msk [vmem:[#allocation4 + $0xa8] sm:$0xff] %vm2069_vm12, %v2016_v38  ;;  %1836 = vrot.lane.b32.xlu0 %v1166_v41, %s6297_s30 }
 0x219   : > { %1649 = vrot.lane.b32.xlu1 %v1554_v37, %s9884_s29 }
 0x21a   : > { %v670_v44 = vpop.permute.xlu0 %669  ;;  %v2122_v28 = vld [vmem:[#allocation4 + $0xa0] sm:$0xff] }
 0x21b   : > { %v2020_v40 = vpop.permute.xlu1 %2019  ;;  %742 = vst.msk [vmem:[#allocation4 + $0xc0] sm:$0xff] %vm717_vm5, %v670_v44 }
 0x21c   : > { %2093 = vst.msk [vmem:[#allocation4 + $0xb8] sm:$0xff] %vm2069_vm12, %v2020_v40  ;;  %1840 = vrot.lane.b32.xlu0 %v1746_v43, %s6297_s30 }
 0x21d   : > { %1838 = vrot.lane.b32.xlu1 %v1167_v42, %s6297_s30 }
 0x21e   : > { %v674_v50 = vpop.permute.xlu0 %673  ;;  %v2124_v34 = vld [vmem:[#allocation4 + $0xb0] sm:$0xff] }
 0x21f   : > { %v672_v47 = vpop.permute.xlu1 %671  ;;  %v2123_v56 = vld [vmem:[#allocation4 + $0xa8] sm:$0xff]  ;;  %744 = vst.msk [vmem:[#allocation4 + $0xd0] sm:$0xff] %vm717_vm5, %v674_v50 }
 0x220   : > { %743 = vst.msk [vmem:[#allocation4 + $0xc8] sm:$0xff] %vm717_vm5, %v672_v47  ;;  %v2144_v49 = vpack.c.bf16 %v2123_v56, %v2122_v28  ;;  %2029 = vrot.lane.b32.xlu0 %v1359_v31, %s6299_s12 }
 0x221   : > { %1842 = vrot.lane.b32.xlu1 %v1747_v46, %s6297_s30  ;;  %s6305_s30 = smov 48  }
 0x222   : > { %6070 = vmatprep.mubr.msk.bf16.mxu0 %vm2172_vm13, %v2144_v49  ;;  %v863_v59 = vpop.permute.xlu0 %862 }
 0x223   : > { %v676_v53 = vpop.permute.xlu1 %675  ;;  %v2125_v54 = vld [vmem:[#allocation4 + $0xb8] sm:$0xff]  ;;  %935 = vst.msk [vmem:[#allocation4 + $0xc0] sm:$0xff] %vm910_vm6, %v863_v59 }
 0x224   : > { %745 = vst.msk [vmem:[#allocation4 + $0xd8] sm:$0xff] %vm717_vm5, %v676_v53  ;;  %v2145_v58 = vpack.c.bf16 %v2125_v54, %v2124_v34  ;;  %2033 = vrot.lane.b32.xlu0 %v1939_v57, %s6299_s12 }
 0x225   : > { %2031 = vrot.lane.b32.xlu1 %v1360_v35, %s6299_s12 }
 0x226   : > { %v6060_v60 = vpop.f32.mrf.mxu0  ;;  %6071 = vmatmul.mubr.msk.bf16.gmra.mxu0 %vm2172_vm13, %v2145_v58  ;;  %v867_v3 = vpop.permute.xlu0 %866 }
 0x227   : > { %v865_v62 = vpop.permute.xlu1 %864  ;;  %v2303_v4 = vadd.f32 %v6060_v60, %v7220_v52  ;;  %937 = vst.msk [vmem:[#allocation4 + $0xd0] sm:$0xff] %vm910_vm6, %v867_v3 }
 0x228   : > { %936 = vst.msk [vmem:[#allocation4 + $0xc8] sm:$0xff] %vm910_vm6, %v865_v62  ;;  %v2294_v2 = vpop.f32.mrf.mxu0 }
 0x229   : > { %2035 = vrot.lane.b32.xlu1 %v1940_v61, %s6299_s12  ;;  %v2295_v6 = vadd.f32 %v7220_v52, %v2294_v2  ;;  %v2399_v14 = vmax.f32 %v2303_v4, 0.0 }
 0x22a   : > { %v6061_v5 = vpop.f32.mrf.mxu0  ;;  %v1056_v12 = vpop.permute.xlu0 %1055 }
 0x22b   : > { %v2306_v7 = vadd.f32 %v6061_v5, %v7220_v52  ;;  %v869_v8 = vpop.permute.xlu1 %868  ;;  %1128 = vst.msk [vmem:[#allocation4 + $0xc0] sm:$0xff] %vm1103_vm7, %v1056_v12  ;;  %v2397_v33 = vmax.f32 %v2295_v6, 0.0 }
 0x22c   : > { %938 = vst.msk [vmem:[#allocation4 + $0xd8] sm:$0xff] %vm910_vm6, %v869_v8  ;;  %v2297_v11 = vpop.f32.mrf.mxu0 }
 0x22d   : > { %v2400_v15 = vmax.f32 %v2306_v7, 0.0  ;;  %v2298_v16 = vadd.f32 %v7220_v52, %v2297_v11 }
 0x22e   : > { %v1060_v48 = vpop.permute.xlu0 %1059 }
 0x22f   : > { %v7450_v18 = vpack.c.bf16 %v2400_v15, %v2399_v14  ;;  %v2398_v51 = vmax.f32 %v2298_v16, 0.0  ;;  %v1058_v19 = vpop.permute.xlu1 %1057  ;;  %1130 = vst.msk [vmem:[#allocation4 + $0xd0] sm:$0xff] %vm1103_vm7, %v1060_v48 }
 0x230   : > { %1129 = vst.msk [vmem:[#allocation4 + $0xc8] sm:$0xff] %vm1103_vm7, %v1058_v19 }
 0x231   : > { %v7453_v20 = vpack.c.bf16 %v2398_v51, %v2397_v33 }
 0x232   : > { %v1249_v63 = vpop.permute.xlu0 %1248 }
 0x233   : > { %v1062_v55 = vpop.permute.xlu1 %1061  ;;  %1321 = vst.msk [vmem:[#allocation4 + $0xc0] sm:$0xff] %vm1296_vm8, %v1249_v63 }
 0x234   : > { %1131 = vst.msk [vmem:[#allocation4 + $0xd8] sm:$0xff] %vm1103_vm7, %v1062_v55 }
 0x236   : > { %v1253_v23 = vpop.permute.xlu0 %1252 }
 0x237   : > { %v1251_v1 = vpop.permute.xlu1 %1250  ;;  %1323 = vst.msk [vmem:[#allocation4 + $0xd0] sm:$0xff] %vm1296_vm8, %v1253_v23 }
 0x238   : > { %1322 = vst.msk [vmem:[#allocation4 + $0xc8] sm:$0xff] %vm1296_vm8, %v1251_v1 }
 0x23a   : > { %v1442_v41 = vpop.permute.xlu0 %1441 }
 0x23b   : > { %v1255_v45 = vpop.permute.xlu1 %1254  ;;  %1514 = vst.msk [vmem:[#allocation4 + $0xc0] sm:$0xff] %vm1489_vm9, %v1442_v41 }
 0x23c   : > { %1324 = vst.msk [vmem:[#allocation4 + $0xd8] sm:$0xff] %vm1296_vm8, %v1255_v45 }
 0x23e   : > { %v1446_v42 = vpop.permute.xlu0 %1445 }
 0x23f   : > { %v1444_v27 = vpop.permute.xlu1 %1443  ;;  %1516 = vst.msk [vmem:[#allocation4 + $0xd0] sm:$0xff] %vm1489_vm9, %v1446_v42 }
 0x240   : > { %1515 = vst.msk [vmem:[#allocation4 + $0xc8] sm:$0xff] %vm1489_vm9, %v1444_v27 }
 0x242   : > { %v1636_v29 = vpop.permute.xlu0 %1635 }
 0x243   : > { %v1448_v26 = vpop.permute.xlu1 %1447  ;;  %1708 = vst.msk [vmem:[#allocation4 + $0xc0] sm:$0xff] %vm1683_vm10, %v1636_v29 }
 0x244   : > { %1517 = vst.msk [vmem:[#allocation4 + $0xd8] sm:$0xff] %vm1489_vm9, %v1448_v26 }
 0x246   : > { %v1640_v31 = vpop.permute.xlu0 %1639 }
 0x247   : > { %v1638_v30 = vpop.permute.xlu1 %1637  ;;  %1710 = vst.msk [vmem:[#allocation4 + $0xd0] sm:$0xff] %vm1683_vm10, %v1640_v31 }
 0x248   : > { %1709 = vst.msk [vmem:[#allocation4 + $0xc8] sm:$0xff] %vm1683_vm10, %v1638_v30 }
 0x24a   : > { %v1829_v35 = vpop.permute.xlu0 %1828 }
 0x24b   : > { %v1642_v32 = vpop.permute.xlu1 %1641  ;;  %1901 = vst.msk [vmem:[#allocation4 + $0xc0] sm:$0xff] %vm1876_vm11, %v1829_v35 }
 0x24c   : > { %1711 = vst.msk [vmem:[#allocation4 + $0xd8] sm:$0xff] %vm1683_vm10, %v1642_v32 }
 0x24e   : > { %v1833_v36 = vpop.permute.xlu0 %1832 }
 0x24f   : > { %v1831_v24 = vpop.permute.xlu1 %1830  ;;  %1903 = vst.msk [vmem:[#allocation4 + $0xd0] sm:$0xff] %vm1876_vm11, %v1833_v36 }
 0x250   : > { %1902 = vst.msk [vmem:[#allocation4 + $0xc8] sm:$0xff] %vm1876_vm11, %v1831_v24 }
 0x252   : > { %v2022_v25 = vpop.permute.xlu0 %2021 }
 0x253   : > { %v1835_v21 = vpop.permute.xlu1 %1834  ;;  %2094 = vst.msk [vmem:[#allocation4 + $0xc0] sm:$0xff] %vm2069_vm12, %v2022_v25 }
 0x254   : > { %1904 = vst.msk [vmem:[#allocation4 + $0xd8] sm:$0xff] %vm1876_vm11, %v1835_v21 }
 0x256   : > { %v2026_v37 = vpop.permute.xlu0 %2025 }
 0x257   : > { %v2024_v22 = vpop.permute.xlu1 %2023  ;;  %2096 = vst.msk [vmem:[#allocation4 + $0xd0] sm:$0xff] %vm2069_vm12, %v2026_v37 }
 0x258   : > { %2095 = vst.msk [vmem:[#allocation4 + $0xc8] sm:$0xff] %vm2069_vm12, %v2024_v22 }
 0x25a   : > { %v678_v39 = vpop.permute.xlu0 %677  ;;  %v2126_v40 = vld [vmem:[#allocation4 + $0xc0] sm:$0xff] }
 0x25b   : > { %v2028_v38 = vpop.permute.xlu1 %2027  ;;  %746 = vst.msk [vmem:[#allocation4 + $0xe0] sm:$0xff] %vm717_vm5, %v678_v39 }
 0x25c   : > { %2097 = vst.msk [vmem:[#allocation4 + $0xd8] sm:$0xff] %vm2069_vm12, %v2028_v38 }
 0x25e   : > { %v682_v46 = vpop.permute.xlu0 %681  ;;  %v2128_v47 = vld [vmem:[#allocation4 + $0xd0] sm:$0xff] }
 0x25f   : > { %v680_v43 = vpop.permute.xlu1 %679  ;;  %v2127_v44 = vld [vmem:[#allocation4 + $0xc8] sm:$0xff]  ;;  %748 = vst.msk [vmem:[#allocation4 + $0xf0] sm:$0xff] %vm717_vm5, %v682_v46 }
 0x260   : > { %747 = vst.msk [vmem:[#allocation4 + $0xe8] sm:$0xff] %vm717_vm5, %v680_v43  ;;  %v2146_v28 = vpack.c.bf16 %v2127_v44, %v2126_v40 }
 0x262   : > { %6074 = vmatprep.mubr.msk.bf16.mxu0 %vm2172_vm13, %v2146_v28  ;;  %v871_v34 = vpop.permute.xlu0 %870 }
 0x263   : > { %v684_v56 = vpop.permute.xlu1 %683  ;;  %v2129_v49 = vld [vmem:[#allocation4 + $0xd8] sm:$0xff]  ;;  %939 = vst.msk [vmem:[#allocation4 + $0xe0] sm:$0xff] %vm910_vm6, %v871_v34 }
 0x264   : > { %749 = vst.msk [vmem:[#allocation4 + $0xf8] sm:$0xff] %vm717_vm5, %v684_v56  ;;  %v2147_v50 = vpack.c.bf16 %v2129_v49, %v2128_v47  ;;  %vm3376_vm5 = vcmask 523648  }
 0x266   : > { %v6064_v53 = vpop.f32.mrf.mxu0  ;;  %6075 = vmatmul.mubr.msk.bf16.gmra.mxu0 %vm2172_vm13, %v2147_v50  ;;  %v875_v58 = vpop.permute.xlu0 %874 }
 0x267   : > { %v873_v54 = vpop.permute.xlu1 %872  ;;  %941 = vst.msk [vmem:[#allocation4 + $0xf0] sm:$0xff] %vm910_vm6, %v875_v58  ;;  %v2319_v2 = vadd.f32 %v6064_v53, %v7220_v52 }
 0x268   : > { %940 = vst.msk [vmem:[#allocation4 + $0xe8] sm:$0xff] %vm910_vm6, %v873_v54  ;;  %v2310_v57 = vpop.f32.mrf.mxu0 }
 0x269   : > { %v2311_v60 = vadd.f32 %v7220_v52, %v2310_v57  ;;  %v2403_v12 = vmax.f32 %v2319_v2, 0.0 }
 0x26a   : > { %v6065_v59 = vpop.f32.mrf.mxu0  ;;  %v1064_v4 = vpop.permute.xlu0 %1063 }
 0x26b   : > { %v2322_v61 = vadd.f32 %v6065_v59, %v7220_v52  ;;  %v877_v62 = vpop.permute.xlu1 %876  ;;  %1132 = vst.msk [vmem:[#allocation4 + $0xe0] sm:$0xff] %vm1103_vm7, %v1064_v4  ;;  %v2401_v7 = vmax.f32 %v2311_v60, 0.0 }
 0x26c   : > { %942 = vst.msk [vmem:[#allocation4 + $0xf8] sm:$0xff] %vm910_vm6, %v877_v62  ;;  %v2313_v3 = vpop.f32.mrf.mxu0  ;;  %vm3569_vm6 = vcmask 654848  }
 0x26d   : > { %v2314_v5 = vadd.f32 %v7220_v52, %v2313_v3  ;;  %v2404_v6 = vmax.f32 %v2322_v61, 0.0 }
 0x26e   : > { %v1068_v14 = vpop.permute.xlu0 %1067 }
 0x26f   : > { %v2402_v8 = vmax.f32 %v2314_v5, 0.0  ;;  %v1066_v11 = vpop.permute.xlu1 %1065  ;;  %1134 = vst.msk [vmem:[#allocation4 + $0xf0] sm:$0xff] %vm1103_vm7, %v1068_v14  ;;  %v2428_v16 = vpack.c.bf16 %v2404_v6, %v2403_v12 }
 0x270   : > { %1133 = vst.msk [vmem:[#allocation4 + $0xe8] sm:$0xff] %vm1103_vm7, %v1066_v11  ;;  %v3024_v11 = vld [vmem:[#allocation3 + $0xa] sm:$0xff] }
 0x271   : > { %v2427_v15 = vpack.c.bf16 %v2402_v8, %v2401_v7  ;;  %v2830_v7 = vld [vmem:[#allocation3 + $0x1] sm:$0xff]  ;;  %v2831_v8 = vld [vmem:[#allocation3 + $0x9] sm:$0xff] }
 0x272   : > { %v1257_v51 = vpop.permute.xlu0 %1256  ;;  %2894 = vrot.lane.b32.xlu0 %v2830_v7, %s6300_s15  ;;  %2896 = vrot.lane.b32.xlu1 %v2831_v8, %s6300_s15 }
 0x273   : > { %v1070_v33 = vpop.permute.xlu1 %1069  ;;  %6096 = vmatprep.mubr.msk.bf16.mxu1 %vm2445_vm15, %v2427_v15  ;;  %1325 = vst.msk [vmem:[#allocation4 + $0xe0] sm:$0xff] %vm1296_vm8, %v1257_v51  ;;  %v7624_v15 = vld [vmem:[%s9862_s2] ss:$0 sm:$0xff] }
 0x274   : > { %1135 = vst.msk [vmem:[#allocation4 + $0xf8] sm:$0xff] %vm1103_vm7, %v1070_v33  ;;  %6097 = vmatmul.mubr.msk.bf16.vlgmr.msra.gmra.mxu1 %vm2445_vm15, %v2428_v16  ;;  %vm3762_vm7 = vcmask 786048  }
 0x276   : > { %v1261_v48 = vpop.permute.xlu0 %1260  ;;  %3089 = vrot.lane.b32.xlu1 %v3024_v11, %s9878_s16 }
 0x277   : > { %v1259_v19 = vpop.permute.xlu1 %1258  ;;  %1327 = vst.msk [vmem:[#allocation4 + $0xf0] sm:$0xff] %vm1296_vm8, %v1261_v48 }
 0x278   : > { %1326 = vst.msk [vmem:[#allocation4 + $0xe8] sm:$0xff] %vm1296_vm8, %v1259_v19 }
 0x27a   : > { %v1450_v63 = vpop.permute.xlu0 %1449 }
 0x27b   : > { %v1263_v55 = vpop.permute.xlu1 %1262  ;;  %1518 = vst.msk [vmem:[#allocation4 + $0xe0] sm:$0xff] %vm1489_vm9, %v1450_v63 }
 0x27c   : > { %1328 = vst.msk [vmem:[#allocation4 + $0xf8] sm:$0xff] %vm1296_vm8, %v1263_v55  ;;  %vm3956_vm8 = vcmask 917248  }
 0x27e   : > { %v1454_v23 = vpop.permute.xlu0 %1453 }
 0x27f   : > { %v1452_v1 = vpop.permute.xlu1 %1451  ;;  %1520 = vst.msk [vmem:[#allocation4 + $0xf0] sm:$0xff] %vm1489_vm9, %v1454_v23 }
 0x280   : > { %1519 = vst.msk [vmem:[#allocation4 + $0xe8] sm:$0xff] %vm1489_vm9, %v1452_v1 }
 0x282   : > { %v1644_v41 = vpop.permute.xlu0 %1643 }
 0x283   : > { %v1456_v45 = vpop.permute.xlu1 %1455  ;;  %1712 = vst.msk [vmem:[#allocation4 + $0xe0] sm:$0xff] %vm1683_vm10, %v1644_v41 }
 0x284   : > { %1521 = vst.msk [vmem:[#allocation4 + $0xf8] sm:$0xff] %vm1489_vm9, %v1456_v45  ;;  %vm4149_vm9 = vcmask 1048448  }
 0x286   : > { %v1648_v42 = vpop.permute.xlu0 %1647 }
 0x287   : > { %v1646_v27 = vpop.permute.xlu1 %1645  ;;  %1714 = vst.msk [vmem:[#allocation4 + $0xf0] sm:$0xff] %vm1683_vm10, %v1648_v42 }
 0x288   : > { %1713 = vst.msk [vmem:[#allocation4 + $0xe8] sm:$0xff] %vm1683_vm10, %v1646_v27  ;;  %v7633_v27 = vld [vmem:[%s9864_s4] ss:$0 sm:$0xff] }
 0x28a   : > { %v1837_v29 = vpop.permute.xlu0 %1836 }
 0x28b   : > { %v1650_v26 = vpop.permute.xlu1 %1649  ;;  %1905 = vst.msk [vmem:[#allocation4 + $0xe0] sm:$0xff] %vm1876_vm11, %v1837_v29 }
 0x28c   : > { %1715 = vst.msk [vmem:[#allocation4 + $0xf8] sm:$0xff] %vm1683_vm10, %v1650_v26  ;;  %vm4902_vm10 = vcmask 261120  }
 0x28e   : > { %v1841_v31 = vpop.permute.xlu0 %1840 }
 0x28f   : > { %v1839_v30 = vpop.permute.xlu1 %1838  ;;  %1907 = vst.msk [vmem:[#allocation4 + $0xf0] sm:$0xff] %vm1876_vm11, %v1841_v31 }
 0x290   : > { %1906 = vst.msk [vmem:[#allocation4 + $0xe8] sm:$0xff] %vm1876_vm11, %v1839_v30 }
 0x292   : > { %v2030_v35 = vpop.permute.xlu0 %2029 }
 0x293   : > { %v1843_v32 = vpop.permute.xlu1 %1842  ;;  %2098 = vst.msk [vmem:[#allocation4 + $0xe0] sm:$0xff] %vm2069_vm12, %v2030_v35 }
 0x294   : > { %1908 = vst.msk [vmem:[#allocation4 + $0xf8] sm:$0xff] %vm1876_vm11, %v1843_v32  ;;  %vm5237_vm11 = vcmask 1041409  }
 0x296   : > { %v2034_v36 = vpop.permute.xlu0 %2033 }
 0x297   : > { %v2032_v24 = vpop.permute.xlu1 %2031  ;;  %2100 = vst.msk [vmem:[#allocation4 + $0xf0] sm:$0xff] %vm2069_vm12, %v2034_v36 }
 0x298   : > { %2099 = vst.msk [vmem:[#allocation4 + $0xe8] sm:$0xff] %vm2069_vm12, %v2032_v24 }
 0x29a   : > { %v2130_v25 = vld [vmem:[#allocation4 + $0xe0] sm:$0xff] }
 0x29b   : > { %v2036_v21 = vpop.permute.xlu1 %2035 }
 0x29c   : > { %2101 = vst.msk [vmem:[#allocation4 + $0xf8] sm:$0xff] %vm2069_vm12, %v2036_v21  ;;  %vm5240_vm12 = vcmask 1042434  }
 0x29e   : > { %v2132_v38 = vld [vmem:[#allocation4 + $0xf0] sm:$0xff] }
 0x29f   : > { %v2131_v22 = vld [vmem:[#allocation4 + $0xe8] sm:$0xff] }
 0x2a0   : > { %v2148_v37 = vpack.c.bf16 %v2131_v22, %v2130_v25 }
 0x2a2   : > { %6078 = vmatprep.mubr.msk.bf16.mxu0 %vm2172_vm13, %v2148_v37 }
 0x2a3   : > { %v2133_v39 = vld [vmem:[#allocation4 + $0xf8] sm:$0xff] }
 0x2a4   : > { %v2149_v40 = vpack.c.bf16 %v2133_v39, %v2132_v38 }
 0x2a6   : > { %v6068_v43 = vpop.f32.mrf.mxu0  ;;  %6079 = vmatmul.mubr.msk.bf16.gmra.mxu0 %vm2172_vm13, %v2149_v40  ;;  %vm5243_vm13 = vcmask 1043459  }
 0x2a7   : > { %6084 = vmatprep.mubr.msk.bf16.mxu0 %vm2445_vm15, %v7246_v13  ;;  %v2335_v56 = vadd.f32 %v6068_v43, %v7220_v52 }
 0x2a8   : > { %v2326_v44 = vpop.f32.mrf.mxu0 }
 0x2a9   : > { %v2327_v46 = vadd.f32 %v7220_v52, %v2326_v44  ;;  %v2407_v13 = vmax.f32 %v2335_v56, 0.0 }
 0x2aa   : > { %v6069_v28 = vpop.f32.mrf.mxu0 }
 0x2ab   : > { %v2338_v47 = vadd.f32 %v6069_v28, %v7220_v52  ;;  %v2405_v53 = vmax.f32 %v2327_v46, 0.0 }
 0x2ac   : > { %v2329_v49 = vpop.f32.mrf.mxu0 }
 0x2ad   : > { %v2330_v50 = vadd.f32 %v7220_v52, %v2329_v49  ;;  %v2408_v34 = vmax.f32 %v2338_v47, 0.0  ;;  %v2766_v47 = vld [vmem:[#allocation3] sm:$0xff] }
 0x2ae   : > { %6085 = vmatmul.mubr.msk.bf16.vlgmr.msra.gmra.mxu0 %vm2445_vm15, %v7243_v9  ;;  %2798 = vst.msk [vmem:[#allocation5] sm:$0xff] %vm2691_vm0, %v2766_v47 }
 0x2af   : > { %v2406_v54 = vmax.f32 %v2330_v50, 0.0  ;;  %6088 = vmatprep.mubr.msk.bf16.mxu0 %vm2445_vm15, %v7371_v17  ;;  %v2430_v58 = vpack.c.bf16 %v2408_v34, %v2407_v13  ;;  %v2767_v50 = vld [vmem:[#allocation3 + $0x8] sm:$0xff] }
 0x2b0   : > { %2799 = vst.msk [vmem:[#allocation5 + $0x10] sm:$0xff] %vm2691_vm0, %v2767_v50 }
 0x2b1   : > { %v2429_v57 = vpack.c.bf16 %v2406_v54, %v2405_v53 }
 0x2b3   : > { %6100 = vmatprep.mubr.msk.bf16.mxu1 %vm2445_vm15, %v2429_v57 }
 0x2b4   : > { %6101 = vmatmul.mubr.msk.bf16.gmra.mxu1 %vm2445_vm15, %v2430_v58 }
 0x2b6   : > { %6089 = vmatmul.mubr.msk.bf16.gmra.mxu0 %vm2445_vm15, %v7365_v10 }
 0x2b7   : > { %6092 = vmatprep.mubr.msk.bf16.mxu0 %vm2445_vm15, %v7453_v20 }
 0x2be   : > { %6093 = vmatmul.mubr.msk.bf16.gmra.mxu0 %vm2445_vm15, %v7450_v18 }
 0x2e4   : > { %v2895_v56 = vpop.permute.xlu0 %2894  ;;  %v2897_v54 = vpop.permute.xlu1 %2896 }
 0x2e5   : > { %2991 = vst.msk [vmem:[#allocation5] sm:$0xff] %vm2990_vm3, %v2895_v56  ;;  %2992 = vst.msk [vmem:[#allocation5 + $0x10] sm:$0xff] %vm2990_vm3, %v2897_v54 }
 0x2e6   : > { %v6072_v9 = vpop.f32.mrf.mxu0 }
 0x2e7   : > { %v2351_v60 = vadd.f32 %v6072_v9, %v7220_v52 }
 0x2e8   : > { %v2342_v10 = vpop.f32.mrf.mxu0 }
 0x2e9   : > { %v2343_v20 = vadd.f32 %v7220_v52, %v2342_v10  ;;  %v2411_v18 = vmax.f32 %v2351_v60, 0.0  ;;  %v3090_v60 = vpop.permute.xlu1 %3089 }
 0x2ea   : > { %v6073_v17 = vpop.f32.mrf.mxu0  ;;  %3185 = vst.msk [vmem:[#allocation5 + $0x10] sm:$0xff] %vm3183_vm4, %v3090_v60 }
 0x2eb   : > { %v2354_v59 = vadd.f32 %v6073_v17, %v7220_v52  ;;  %v2409_v3 = vmax.f32 %v2343_v20, 0.0 }
 0x2ec   : > { %v2345_v61 = vpop.f32.mrf.mxu0 }
 0x2ed   : > { %v2346_v62 = vadd.f32 %v7220_v52, %v2345_v61  ;;  %v2412_v2 = vmax.f32 %v2354_v59, 0.0  ;;  %v3023_v52 = vld [vmem:[#allocation3 + $0x2] sm:$0xff] }
 0x2ee   : > { %3087 = vrot.lane.b32.xlu0 %v3023_v52, %s9878_s16 }
 0x2ef   : > { %v2410_v4 = vmax.f32 %v2346_v62, 0.0  ;;  %v2432_v6 = vpack.c.bf16 %v2412_v2, %v2411_v18 }
 0x2f1   : > { %v2431_v5 = vpack.c.bf16 %v2410_v4, %v2409_v3 }
 0x2f3   : > { %6104 = vmatprep.mubr.msk.bf16.mxu1 %vm2445_vm15, %v2431_v5 }
 0x2f4   : > { %6105 = vmatmul.mubr.msk.bf16.gmra.mxu1 %vm2445_vm15, %v2432_v6 }
 0x326   : > { %v6076_v0 = vpop.f32.mrf.mxu0 }
 0x327   : > { %v2367_v51 = vadd.f32 %v7624_v15, %v6076_v0 }
 0x328   : > { %v2358_v12 = vpop.f32.mrf.mxu0 }
 0x329   : > { %v2359_v16 = vadd.f32 %v7624_v15, %v2358_v12  ;;  %v2415_v23 = vmax.f32 %v2367_v51, 0.0 }
 0x32a   : > { %v6077_v14 = vpop.f32.mrf.mxu0 }
 0x32b   : > { %v2370_v33 = vadd.f32 %v7624_v15, %v6077_v14  ;;  %v2413_v63 = vmax.f32 %v2359_v16, 0.0 }
 0x32c   : > { %v2361_v19 = vpop.f32.mrf.mxu0 }
 0x32d   : > { %v2362_v48 = vadd.f32 %v7624_v15, %v2361_v19  ;;  %v2416_v55 = vmax.f32 %v2370_v33, 0.0 }
 0x32f   : > { %v2414_v1 = vmax.f32 %v2362_v48, 0.0  ;;  %v2434_v41 = vpack.c.bf16 %v2416_v55, %v2415_v23 }
 0x331   : > { %v2433_v45 = vpack.c.bf16 %v2414_v1, %v2413_v63 }
 0x333   : > { %6108 = vmatprep.mubr.msk.bf16.mxu1 %vm2445_vm15, %v2433_v45 }
 0x334   : > { %v6098_v42 = vpop.f32.mrf.mxu1  ;;  %6109 = vmatmul.mubr.msk.bf16.gmra.mxu1 %vm2445_vm15, %v2434_v41 }
 0x335   : > { %v2589_v26 = vadd.f32 %v6098_v42, %v7633_v27 }
 0x336   : > { %v2580_v29 = vpop.f32.mrf.mxu1 }
 0x337   : > { %v2673_v30 = vmax.f32 %v2589_v26, 0.0  ;;  %v2581_v31 = vadd.f32 %v7633_v27, %v2580_v29 }
 0x338   : > { %v6099_v32 = vpop.f32.mrf.mxu1 }
 0x339   : > { %2748 = vst.msk [vmem:[#allocation3 + $0xc1] sm:$0xff] %vm2691_vm0, %v2673_v30  ;;  %v2671_v35 = vmax.f32 %v2581_v31, 0.0  ;;  %v2592_v24 = vadd.f32 %v6099_v32, %v7633_v27 }
 0x33a   : > { %v2583_v36 = vpop.f32.mrf.mxu1 }
 0x33b   : > { %2746 = vst.msk [vmem:[#allocation3 + $0xa9] sm:$0xff] %vm2691_vm0, %v2671_v35  ;;  %v2674_v21 = vmax.f32 %v2592_v24, 0.0  ;;  %v2584_v25 = vadd.f32 %v7633_v27, %v2583_v36 }
 0x33d   : > { %2749 = vst.msk [vmem:[#allocation3 + $0xc9] sm:$0xff] %vm2691_vm0, %v2674_v21  ;;  %v2672_v22 = vmax.f32 %v2584_v25, 0.0 }
 0x33f   : > { %2747 = vst.msk [vmem:[#allocation3 + $0xb1] sm:$0xff] %vm2691_vm0, %v2672_v22  ;;  %v6214_v22 = vld [vmem:[%s9865_s5 + $0x38] sm:$0xff]  }
 0x340   : > { %v7645_v37 = vld [vmem:[#allocation3 + $0xc0] sm:$0xff] }
 0x341   : > { %2814 = vst.msk [vmem:[#allocation5 + $0x100] sm:$0xff] %vm2691_vm0, %v7645_v37 }
 0x342   : > { %v7649_v38 = vld [vmem:[#allocation3 + $0xa8] sm:$0xff] }
 0x343   : > { %2812 = vst.msk [vmem:[#allocation5 + $0xe0] sm:$0xff] %vm2691_vm0, %v7649_v38 }
 0x344   : > { %v4194_v39 = vld [vmem:[#allocation3 + $0xc2] sm:$0xff]  ;;  %v4195_v40 = vld [vmem:[#allocation3 + $0xca] sm:$0xff] }
 0x345   : > { %v7653_v43 = vld [vmem:[#allocation3 + $0xc8] sm:$0xff]  ;;  %4226 = vst.msk [vmem:[#allocation5 + $0xc8] sm:$0xff] %vm2691_vm0, %v4194_v39  ;;  %4227 = vst.msk [vmem:[#allocation5 + $0xd8] sm:$0xff] %vm2691_vm0, %v4195_v40 }
 0x346   : > { %2815 = vst.msk [vmem:[#allocation5 + $0x110] sm:$0xff] %vm2691_vm0, %v7653_v43  ;;  %v7659_v44 = vld [vmem:[#allocation3 + $0xaa] sm:$0xff]  ;;  %v7661_v28 = vld [vmem:[#allocation3 + $0xb2] sm:$0xff] }
 0x347   : > { %v7663_v46 = vld [vmem:[#allocation3 + $0xb0] sm:$0xff]  ;;  %4224 = vst.msk [vmem:[#allocation5 + $0xa8] sm:$0xff] %vm2691_vm0, %v7659_v44  ;;  %4225 = vst.msk [vmem:[#allocation5 + $0xb8] sm:$0xff] %vm2691_vm0, %v7661_v28 }
 0x348   : > { %2813 = vst.msk [vmem:[#allocation5 + $0xf0] sm:$0xff] %vm2691_vm0, %v7663_v46 }
 0x360   : > { %v3088_v53 = vpop.permute.xlu0 %3087 }
 0x361   : > { %3184 = vst.msk [vmem:[#allocation5] sm:$0xff] %vm3183_vm4, %v3088_v53 }
 0x366   : > { %v6080_v49 = vpop.f32.mrf.mxu0 }
 0x367   : > { %v2383_v9 = vadd.f32 %v7624_v15, %v6080_v49  ;;  %v6303_v49 = vmov 0  }
 0x368   : > { %v2374_v34 = vpop.f32.mrf.mxu0  ;;  %4469 = vmatprep.subr.bf16.mxu1 %v6303_v49 }
 0x369   : > { %v2375_v57 = vadd.f32 %v7624_v15, %v2374_v34  ;;  %v2419_v3 = vmax.f32 %v2383_v9, 0.0  ;;  %4470 = vmatpush1.bf16.msra.mxu1 %v6214_v22  ;;  %v6220_v22 = vld [vmem:[%s9865_s5 + $0x8] sm:$0xff]  }
 0x36a   : > { %v6081_v13 = vpop.f32.mrf.mxu0  ;;  %4471 = vmatprep.subr.bf16.mxu1 %v6303_v49 }
 0x36b   : > { %v2386_v58 = vadd.f32 %v7624_v15, %v6081_v13  ;;  %v2417_v61 = vmax.f32 %v2375_v57, 0.0 }
 0x36c   : > { %v2377_v10 = vpop.f32.mrf.mxu0 }
 0x36d   : > { %v2378_v17 = vadd.f32 %v7624_v15, %v2377_v10  ;;  %v2420_v20 = vmax.f32 %v2386_v58, 0.0 }
 0x36e   : > { %v6086_v59 = vpop.f32.mrf.mxu0 }
 0x36f   : > { %v2418_v62 = vmax.f32 %v2378_v17, 0.0  ;;  %v2541_v2 = vadd.f32 %v6086_v59, %v7633_v27  ;;  %v2436_v7 = vpack.c.bf16 %v2420_v20, %v2419_v3  ;;  %v6215_v20 = vld [vmem:[%s9865_s5 + $0x30] sm:$0xff]  }
 0x370   : > { %v2532_v4 = vpop.f32.mrf.mxu0  ;;  %4472 = vmatpush1.bf16.msra.mxu1 %v6215_v20 }
 0x371   : > { %v2435_v18 = vpack.c.bf16 %v2418_v62, %v2417_v61  ;;  %v2661_v5 = vmax.f32 %v2541_v2, 0.0  ;;  %v2533_v6 = vadd.f32 %v7633_v27, %v2532_v4  ;;  %4473 = vmatprep.subr.bf16.mxu1 %v6303_v49 }
 0x372   : > { %v6087_v52 = vpop.f32.mrf.mxu0 }
 0x373   : > { %2736 = vst.msk [vmem:[#allocation3 + $0x31] sm:$0xff] %vm2691_vm0, %v2661_v5  ;;  %v2659_v8 = vmax.f32 %v2533_v6, 0.0  ;;  %v2544_v11 = vadd.f32 %v6087_v52, %v7633_v27  ;;  %6112 = vmatprep.mubr.msk.bf16.mxu1 %vm2445_vm15, %v2435_v18 }
 0x374   : > { %v2535_v0 = vpop.f32.mrf.mxu0  ;;  %v6102_v12 = vpop.f32.mrf.mxu1  ;;  %6113 = vmatmul.mubr.msk.bf16.gmra.mxu1 %vm2445_vm15, %v2436_v7  ;;  %vm5249_vm15 = vcmask 1045509  }
 0x375   : > { %2734 = vst.msk [vmem:[#allocation3 + $0x19] sm:$0xff] %vm2691_vm0, %v2659_v8  ;;  %v2662_v14 = vmax.f32 %v2544_v11, 0.0  ;;  %v2536_v15 = vadd.f32 %v7633_v27, %v2535_v0  ;;  %v2605_v16 = vadd.f32 %v6102_v12, %v7633_v27  ;;  %v6216_v11 = vld [vmem:[%s9865_s5 + $0x28] sm:$0xff]  }
 0x376   : > { %v6090_v33 = vpop.f32.mrf.mxu0  ;;  %v2596_v51 = vpop.f32.mrf.mxu1  ;;  %4474 = vmatpush1.bf16.msra.mxu1 %v6216_v11 }
 0x377   : > { %2737 = vst.msk [vmem:[#allocation3 + $0x39] sm:$0xff] %vm2691_vm0, %v2662_v14  ;;  %v2660_v19 = vmax.f32 %v2536_v15, 0.0  ;;  %v2677_v48 = vmax.f32 %v2605_v16, 0.0  ;;  %v2557_v55 = vadd.f32 %v6090_v33, %v7633_v27  ;;  %v2597_v63 = vadd.f32 %v7633_v27, %v2596_v51  ;;  %4475 = vmatprep.subr.bf16.mxu1 %v6303_v49 }
 0x378   : > { %v2548_v1 = vpop.f32.mrf.mxu0  ;;  %v6103_v23 = vpop.f32.mrf.mxu1 }
 0x379   : > { %2735 = vst.msk [vmem:[#allocation3 + $0x21] sm:$0xff] %vm2691_vm0, %v2660_v19  ;;  %2752 = vst.msk [vmem:[#allocation3 + $0xf1] sm:$0xff] %vm2691_vm0, %v2677_v48  ;;  %v2665_v45 = vmax.f32 %v2557_v55, 0.0  ;;  %v2675_v41 = vmax.f32 %v2597_v63, 0.0  ;;  %v2549_v42 = vadd.f32 %v7633_v27, %v2548_v1  ;;  %v2608_v26 = vadd.f32 %v6103_v23, %v7633_v27 }
 0x37a   : > { %v6091_v29 = vpop.f32.mrf.mxu0  ;;  %v2599_v30 = vpop.f32.mrf.mxu1  ;;  %v3796_v31 = vld [vmem:[#allocation3 + $0x30] sm:$0xff] }
 0x37b   : > { %2740 = vst.msk [vmem:[#allocation3 + $0x61] sm:$0xff] %vm2691_vm0, %v2665_v45  ;;  %2750 = vst.msk [vmem:[#allocation3 + $0xd9] sm:$0xff] %vm2691_vm0, %v2675_v41  ;;  %v2663_v32 = vmax.f32 %v2549_v42, 0.0  ;;  %v2678_v35 = vmax.f32 %v2608_v26, 0.0  ;;  %v2560_v24 = vadd.f32 %v6091_v29, %v7633_v27  ;;  %v2600_v36 = vadd.f32 %v7633_v27, %v2599_v30  ;;  %3860 = vrot.lane.b32.xlu0 %v3796_v31, %s6302_s25  ;;  %v7711_v56 = vld [vmem:[#allocation3 + $0x31] sm:$0xff]  ;;  %v6218_v29 = vld [vmem:[%s9865_s5 + $0x18] sm:$0xff]  }
 0x37c   : > { %2802 = vst.msk [vmem:[#allocation5 + $0x40] sm:$0xff] %vm2691_vm0, %v3796_v31  ;;  %v2551_v21 = vpop.f32.mrf.mxu0  ;;  %v7703_v25 = vld [vmem:[#allocation3 + $0x18] sm:$0xff]  ;;  %v6217_v41 = vld [vmem:[%s9865_s5 + $0x20] sm:$0xff]  }
 0x37d   : > { %2738 = vst.msk [vmem:[#allocation3 + $0x49] sm:$0xff] %vm2691_vm0, %v2663_v32  ;;  %2753 = vst.msk [vmem:[#allocation3 + $0xf9] sm:$0xff] %vm2691_vm0, %v2678_v35  ;;  %v2666_v39 = vmax.f32 %v2560_v24, 0.0  ;;  %v2676_v40 = vmax.f32 %v2600_v36, 0.0  ;;  %v2552_v47 = vadd.f32 %v7633_v27, %v2551_v21  ;;  %4476 = vmatpush1.bf16.msra.mxu1 %v6217_v41  ;;  %v6219_v35 = vld [vmem:[%s9865_s5 + $0x10] sm:$0xff]  }
 0x37e   : > { %2800 = vst.msk [vmem:[#allocation5 + $0x20] sm:$0xff] %vm2691_vm0, %v7703_v25  ;;  %v7716_v50 = vld [vmem:[#allocation3 + $0x32] sm:$0xff]  ;;  %v7718_v34 = vld [vmem:[#allocation3 + $0x3a] sm:$0xff]  ;;  %v6094_v53 = vpop.f32.mrf.mxu0  ;;  %4477 = vmatprep.subr.bf16.mxu1 %v6303_v49 }
 0x37f   : > { %v3797_v54 = vld [vmem:[#allocation3 + $0x38] sm:$0xff]  ;;  %4214 = vst.msk [vmem:[#allocation5 + $0x8] sm:$0xff] %vm2691_vm0, %v7716_v50  ;;  %4215 = vst.msk [vmem:[#allocation5 + $0x18] sm:$0xff] %vm2691_vm0, %v7718_v34  ;;  %v2664_v13 = vmax.f32 %v2552_v47, 0.0  ;;  %v2573_v57 = vadd.f32 %v6094_v53, %v7633_v27  ;;  %4053 = vrot.lane.b32.xlu0 %v7711_v56, %s9876_s13  ;;  %v6222_v47 = vld [vmem:[%s9865_s5 + $0x40] sm:$0xff]  }
 0x380   : > { %2741 = vst.msk [vmem:[#allocation3 + $0x69] sm:$0xff] %vm2691_vm0, %v2666_v39  ;;  %2751 = vst.msk [vmem:[#allocation3 + $0xe1] sm:$0xff] %vm2691_vm0, %v2676_v40  ;;  %3862 = vrot.lane.b32.xlu1 %v3797_v54, %s6302_s25  ;;  %v2564_v58 = vpop.f32.mrf.mxu0  ;;  %v7731_v9 = vld [vmem:[#allocation3 + $0x20] sm:$0xff]  ;;  %v7741_v59 = vld [vmem:[#allocation3 + $0xf0] sm:$0xff] }
 0x381   : > { %2803 = vst.msk [vmem:[#allocation5 + $0x50] sm:$0xff] %vm2691_vm0, %v3797_v54  ;;  %2739 = vst.msk [vmem:[#allocation3 + $0x51] sm:$0xff] %vm2691_vm0, %v2664_v13  ;;  %v2669_v10 = vmax.f32 %v2573_v57, 0.0  ;;  %v2565_v17 = vadd.f32 %v7633_v27, %v2564_v58  ;;  %v7743_v61 = vld [vmem:[#allocation3 + $0x39] sm:$0xff]  ;;  %4478 = vmatpush1.bf16.msra.mxu1 %v6218_v29  ;;  %v6221_v39 = vld [vmem:[%s9865_s5] sm:$0xff]  }
 0x382   : > { %2801 = vst.msk [vmem:[#allocation5 + $0x30] sm:$0xff] %vm2691_vm0, %v7731_v9  ;;  %v6095_v60 = vpop.f32.mrf.mxu0  ;;  %v7745_v62 = vld [vmem:[#allocation3 + $0x60] sm:$0xff]  ;;  %v7747_v2 = vld [vmem:[#allocation3 + $0xd8] sm:$0xff]  ;;  %2818 = vst.msk [vmem:[#allocation5 + $0x140] sm:$0xff] %vm2691_vm0, %v7741_v59  ;;  %4479 = vmatprep.subr.bf16.mxu1 %v6303_v49 }
 0x383   : > { %2744 = vst.msk [vmem:[#allocation3 + $0x91] sm:$0xff] %vm2691_vm0, %v2669_v10  ;;  %v2667_v3 = vmax.f32 %v2565_v17, 0.0  ;;  %v2576_v4 = vadd.f32 %v6095_v60, %v7633_v27  ;;  %3284 = vrot.lane.b32.xlu0 %v3796_v31, %s6305_s30  ;;  %2806 = vst.msk [vmem:[#allocation5 + $0x80] sm:$0xff] %vm2691_vm0, %v7745_v62  ;;  %v3410_v40 = vld [vmem:[#allocation3 + $0x21] sm:$0xff] }
 0x384   : > { %4055 = vrot.lane.b32.xlu1 %v7743_v61, %s9876_s13  ;;  %2816 = vst.msk [vmem:[#allocation5 + $0x120] sm:$0xff] %vm2691_vm0, %v7747_v2  ;;  %v4198_v18 = vld [vmem:[#allocation3 + $0xf2] sm:$0xff]  ;;  %v4199_v5 = vld [vmem:[#allocation3 + $0xfa] sm:$0xff]  ;;  %v2567_v6 = vpop.f32.mrf.mxu0  ;;  %v7760_v7 = vld [vmem:[#allocation3 + $0x48] sm:$0xff]  ;;  %s9885_s13 = smov 112  }
 0x385   : > { %4230 = vst.msk [vmem:[#allocation5 + $0x108] sm:$0xff] %vm2691_vm0, %v4198_v18  ;;  %4231 = vst.msk [vmem:[#allocation5 + $0x118] sm:$0xff] %vm2691_vm0, %v4199_v5  ;;  %v2670_v52 = vmax.f32 %v2576_v4, 0.0  ;;  %v2568_v8 = vadd.f32 %v7633_v27, %v2567_v6  ;;  %v7772_v0 = vld [vmem:[#allocation3 + $0xf8] sm:$0xff]  ;;  %4480 = vmatpush1.bf16.msra.mxu1 %v6219_v35  ;;  %v3993_v18 = vld [vmem:[#allocation3 + $0x61] sm:$0xff] }
 0x386   : > { %2742 = vst.msk [vmem:[#allocation3 + $0x79] sm:$0xff] %vm2691_vm0, %v2667_v3  ;;  %2804 = vst.msk [vmem:[#allocation5 + $0x60] sm:$0xff] %vm2691_vm0, %v7760_v7  ;;  %v4247_v51 = vld [vmem:[#allocation5 + $0x8] sm:$0xff]  ;;  %v4249_v19 = vld [vmem:[#allocation5 + $0x18] sm:$0xff]  ;;  %4481 = vmatprep.subr.bf16.mxu1 %v6303_v49 }
 0x387   : > { %v7774_v12 = vld [vmem:[#allocation3 + $0x62] sm:$0xff]  ;;  %v7776_v14 = vld [vmem:[#allocation3 + $0x6a] sm:$0xff]  ;;  %v4196_v15 = vld [vmem:[#allocation3 + $0xda] sm:$0xff]  ;;  %2819 = vst.msk [vmem:[#allocation5 + $0x150] sm:$0xff] %vm2691_vm0, %v7772_v0  ;;  %v2668_v33 = vmax.f32 %v2568_v8, 0.0  ;;  %3477 = vrot.lane.b32.xlu0 %v7711_v56, %s6306_s14  ;;  %v4311_v63 = vpack.c.bf16 %v4249_v19, %v4247_v51 }
 0x388   : > { %4218 = vst.msk [vmem:[#allocation5 + $0x48] sm:$0xff] %vm2691_vm0, %v7774_v12  ;;  %4219 = vst.msk [vmem:[#allocation5 + $0x58] sm:$0xff] %vm2691_vm0, %v7776_v14  ;;  %v4197_v16 = vld [vmem:[#allocation3 + $0xe2] sm:$0xff]  ;;  %3286 = vrot.lane.b32.xlu1 %v3797_v54, %s6305_s30  ;;  %v7790_v48 = vld [vmem:[#allocation3 + $0x4a] sm:$0xff] }
 0x389   : > { %4228 = vst.msk [vmem:[#allocation5 + $0xe8] sm:$0xff] %vm2691_vm0, %v4196_v15  ;;  %2745 = vst.msk [vmem:[#allocation3 + $0x99] sm:$0xff] %vm2691_vm0, %v2670_v52  ;;  %v7792_v55 = vld [vmem:[#allocation3 + $0x52] sm:$0xff]  ;;  %v7801_v23 = vld [vmem:[#allocation3 + $0x68] sm:$0xff]  ;;  %5951 = vmatprep.mubr.msk.bf16.mxu1 %vm2691_vm0, %v4311_v63  ;;  %4482 = vmatpush1.bf16.msra.mxu1 %v6220_v22 }
 0x38a   : > { %4229 = vst.msk [vmem:[#allocation5 + $0xf8] sm:$0xff] %vm2691_vm0, %v4197_v16  ;;  %v7794_v1 = vld [vmem:[#allocation3 + $0x50] sm:$0xff]  ;;  %4216 = vst.msk [vmem:[#allocation5 + $0x28] sm:$0xff] %vm2691_vm0, %v7790_v48  ;;  %v7818_v42 = vld [vmem:[#allocation3 + $0xe0] sm:$0xff]  ;;  %4483 = vmatprep.subr.bf16.mxu1 %v6303_v49 }
 0x38b   : > { %4217 = vst.msk [vmem:[#allocation5 + $0x38] sm:$0xff] %vm2691_vm0, %v7792_v55  ;;  %2743 = vst.msk [vmem:[#allocation3 + $0x81] sm:$0xff] %vm2691_vm0, %v2668_v33  ;;  %v7807_v45 = vld [vmem:[#allocation3 + $0x90] sm:$0xff]  ;;  %2902 = vrot.lane.b32.xlu0 %v7711_v56, %s6300_s15  ;;  %v3603_v56 = vld [vmem:[#allocation3 + $0x22] sm:$0xff] }
 0x38c   : > { %2805 = vst.msk [vmem:[#allocation5 + $0x70] sm:$0xff] %vm2691_vm0, %v7794_v1  ;;  %2807 = vst.msk [vmem:[#allocation5 + $0x90] sm:$0xff] %vm2691_vm0, %v7801_v23  ;;  %3479 = vrot.lane.b32.xlu1 %v7743_v61, %s6306_s14  ;;  %v3602_v53 = vld [vmem:[#allocation3 + $0x1a] sm:$0xff]  ;;  %v3991_v54 = vld [vmem:[#allocation3 + $0x49] sm:$0xff] }
 0x38d   : > { %2810 = vst.msk [vmem:[#allocation5 + $0xc0] sm:$0xff] %vm2691_vm0, %v7807_v45  ;;  %v7822_v26 = vld [vmem:[#allocation3 + $0x78] sm:$0xff]  ;;  %2817 = vst.msk [vmem:[#allocation5 + $0x130] sm:$0xff] %vm2691_vm0, %v7818_v42  ;;  %4484 = vmatpush1.bf16.msra.mxu1 %v6221_v39  ;;  %v3994_v8 = vld [vmem:[#allocation3 + $0x69] sm:$0xff] }
 0x38e   : > { %2808 = vst.msk [vmem:[#allocation5 + $0xa0] sm:$0xff] %vm2691_vm0, %v7822_v26  ;;  %4499 = vmatprep.subr.bf16.mxu1 %v6303_v49  ;;  %v3992_v49 = vld [vmem:[#allocation3 + $0x51] sm:$0xff]  ;;  %v3995_v33 = vld [vmem:[#allocation3 + $0x79] sm:$0xff] }
 0x38f   : > { %3280 = vrot.lane.b32.xlu0 %v7703_v25, %s6305_s30  ;;  %v3409_v25 = vld [vmem:[#allocation3 + $0x19] sm:$0xff]  ;;  %v8002_v39 = vld [vmem:[#allocation3 + $0x91] sm:$0xff] }
 0x390   : > { %v7832_v30 = vld [vmem:[#allocation3 + $0x92] sm:$0xff]  ;;  %v7834_v31 = vld [vmem:[#allocation3 + $0x9a] sm:$0xff]  ;;  %3672 = vrot.lane.b32.xlu1 %v7718_v34, %s6307_s22 }
 0x391   : > { %v7836_v32 = vld [vmem:[#allocation3 + $0x98] sm:$0xff]  ;;  %4222 = vst.msk [vmem:[#allocation5 + $0x88] sm:$0xff] %vm2691_vm0, %v7832_v30  ;;  %4223 = vst.msk [vmem:[#allocation5 + $0x98] sm:$0xff] %vm2691_vm0, %v7834_v31  ;;  %4500 = vmatpush2.bf16.msra.mxu1 %v6222_v47 }
 0x392   : > { %2811 = vst.msk [vmem:[#allocation5 + $0xd0] sm:$0xff] %vm2691_vm0, %v7836_v32  ;;  %v7851_v24 = vld [vmem:[#allocation3 + $0x7a] sm:$0xff]  ;;  %v7853_v36 = vld [vmem:[#allocation3 + $0x82] sm:$0xff] }
 0x393   : > { %v7855_v21 = vld [vmem:[#allocation3 + $0x80] sm:$0xff]  ;;  %4220 = vst.msk [vmem:[#allocation5 + $0x68] sm:$0xff] %vm2691_vm0, %v7851_v24  ;;  %4221 = vst.msk [vmem:[#allocation5 + $0x78] sm:$0xff] %vm2691_vm0, %v7853_v36  ;;  %3473 = vrot.lane.b32.xlu0 %v3409_v25, %s6306_s14 }
 0x394   : > { %2809 = vst.msk [vmem:[#allocation5 + $0xb0] sm:$0xff] %vm2691_vm0, %v7855_v21  ;;  %2904 = vrot.lane.b32.xlu1 %v7743_v61, %s6300_s15 }
 0x397   : > { %2898 = vrot.lane.b32.xlu0 %v3409_v25, %s6300_s15 }
 0x398   : > { %3282 = vrot.lane.b32.xlu1 %v7731_v9, %s6305_s30 }
 0x39b   : > { %3670 = vrot.lane.b32.xlu0 %v7716_v50, %s6307_s22 }
 0x39c   : > { %3475 = vrot.lane.b32.xlu1 %v3410_v40, %s6306_s14 }
 0x39f   : > { %3666 = vrot.lane.b32.xlu0 %v3602_v53, %s6307_s22 }
 0x3a0   : > { %3668 = vrot.lane.b32.xlu1 %v3603_v56, %s6307_s22 }
 0x3a3   : > { %3091 = vrot.lane.b32.xlu0 %v3602_v53, %s9878_s16 }
 0x3a4   : > { %2900 = vrot.lane.b32.xlu1 %v3410_v40, %s6300_s15 }
 0x3a7   : > { %3864 = vrot.lane.b32.xlu0 %v7760_v7, %s6302_s25 }
 0x3a8   : > { %3093 = vrot.lane.b32.xlu1 %v3603_v56, %s9878_s16 }
 0x3ab   : > { %4057 = vrot.lane.b32.xlu0 %v3991_v54, %s9885_s13 }
 0x3ac   : > { %3097 = vrot.lane.b32.xlu1 %v7718_v34, %s9878_s16 }
 0x3af   : > { %3095 = vrot.lane.b32.xlu0 %v7716_v50, %s9878_s16 }
 0x3b0   : > { %3866 = vrot.lane.b32.xlu1 %v7794_v1, %s6302_s25 }
 0x3b3   : > { %3288 = vrot.lane.b32.xlu0 %v7760_v7, %s6305_s30 }
 0x3b4   : > { %4059 = vrot.lane.b32.xlu1 %v3992_v49, %s9885_s13  ;;  %v6106_v13 = vpop.f32.mrf.mxu1 }
 0x3b5   : > { %v2621_v57 = vadd.f32 %v6106_v13, %v7633_v27 }
 0x3b6   : > { %v2612_v58 = vpop.f32.mrf.mxu1 }
 0x3b7   : > { %v2681_v9 = vmax.f32 %v2621_v57, 0.0  ;;  %v2613_v34 = vadd.f32 %v7633_v27, %v2612_v58  ;;  %3481 = vrot.lane.b32.xlu0 %v3991_v54, %s6306_s14 }
 0x3b8   : > { %3290 = vrot.lane.b32.xlu1 %v7794_v1, %s6305_s30  ;;  %v6107_v10 = vpop.f32.mrf.mxu1 }
 0x3b9   : > { %2756 = vst.msk [vmem:[#allocation3 + $0x121] sm:$0xff] %vm2691_vm0, %v2681_v9  ;;  %v2679_v50 = vmax.f32 %v2613_v34, 0.0  ;;  %v2624_v17 = vadd.f32 %v6107_v10, %v7633_v27 }
 0x3ba   : > { %v2615_v20 = vpop.f32.mrf.mxu1 }
 0x3bb   : > { %2754 = vst.msk [vmem:[#allocation3 + $0x109] sm:$0xff] %vm2691_vm0, %v2679_v50  ;;  %v2682_v60 = vmax.f32 %v2624_v17, 0.0  ;;  %v2616_v61 = vadd.f32 %v7633_v27, %v2615_v20  ;;  %3674 = vrot.lane.b32.xlu0 %v7790_v48, %s6307_s22 }
 0x3bc   : > { %3483 = vrot.lane.b32.xlu1 %v3992_v49, %s6306_s14 }
 0x3bd   : > { %2757 = vst.msk [vmem:[#allocation3 + $0x129] sm:$0xff] %vm2691_vm0, %v2682_v60  ;;  %v2680_v3 = vmax.f32 %v2616_v61, 0.0 }
 0x3bf   : > { %2755 = vst.msk [vmem:[#allocation3 + $0x111] sm:$0xff] %vm2691_vm0, %v2680_v3  ;;  %3868 = vrot.lane.b32.xlu0 %v7745_v62, %s6302_s25 }
 0x3c0   : > { %3676 = vrot.lane.b32.xlu1 %v7792_v55, %s6307_s22  ;;  %v7920_v4 = vld [vmem:[#allocation3 + $0x120] sm:$0xff] }
 0x3c1   : > { %2822 = vst.msk [vmem:[#allocation5 + $0x180] sm:$0xff] %vm2691_vm0, %v7920_v4 }
 0x3c2   : > { %v7924_v5 = vld [vmem:[#allocation3 + $0x108] sm:$0xff] }
 0x3c3   : > { %4061 = vrot.lane.b32.xlu0 %v3993_v18, %s9885_s13  ;;  %2820 = vst.msk [vmem:[#allocation5 + $0x160] sm:$0xff] %vm2691_vm0, %v7924_v5 }
 0x3c4   : > { %3870 = vrot.lane.b32.xlu1 %v7801_v23, %s6302_s25  ;;  %v4202_v6 = vld [vmem:[#allocation3 + $0x122] sm:$0xff]  ;;  %v4203_v7 = vld [vmem:[#allocation3 + $0x12a] sm:$0xff] }
 0x3c5   : > { %v7931_v52 = vld [vmem:[#allocation3 + $0x128] sm:$0xff]  ;;  %4234 = vst.msk [vmem:[#allocation5 + $0x148] sm:$0xff] %vm2691_vm0, %v4202_v6  ;;  %4235 = vst.msk [vmem:[#allocation5 + $0x158] sm:$0xff] %vm2691_vm0, %v4203_v7 }
 0x3c6   : > { %2823 = vst.msk [vmem:[#allocation5 + $0x190] sm:$0xff] %vm2691_vm0, %v7931_v52  ;;  %v4200_v11 = vld [vmem:[#allocation3 + $0x10a] sm:$0xff]  ;;  %v4201_v15 = vld [vmem:[#allocation3 + $0x112] sm:$0xff] }
 0x3c7   : > { %v7937_v16 = vld [vmem:[#allocation3 + $0x110] sm:$0xff]  ;;  %4232 = vst.msk [vmem:[#allocation5 + $0x128] sm:$0xff] %vm2691_vm0, %v4200_v11  ;;  %4233 = vst.msk [vmem:[#allocation5 + $0x138] sm:$0xff] %vm2691_vm0, %v4201_v15  ;;  %2906 = vrot.lane.b32.xlu0 %v3991_v54, %s6300_s15 }
 0x3c8   : > { %4063 = vrot.lane.b32.xlu1 %v3994_v8, %s9885_s13  ;;  %2821 = vst.msk [vmem:[#allocation5 + $0x170] sm:$0xff] %vm2691_vm0, %v7937_v16  ;;  %v8079_v11 = vld [vmem:[#allocation3 + $0xa9] sm:$0xff] }
 0x3cb   : > { %3099 = vrot.lane.b32.xlu0 %v7790_v48, %s9878_s16 }
 0x3cc   : > { %2908 = vrot.lane.b32.xlu1 %v3992_v49, %s6300_s15  ;;  %v8014_v49 = vld [vmem:[#allocation3 + $0x99] sm:$0xff] }
 0x3cf   : > { %3292 = vrot.lane.b32.xlu0 %v7745_v62, %s6305_s30  ;;  %v3996_v62 = vld [vmem:[#allocation3 + $0x81] sm:$0xff] }
 0x3d0   : > { %3101 = vrot.lane.b32.xlu1 %v7792_v55, %s9878_s16 }
 0x3d3   : > { %3485 = vrot.lane.b32.xlu0 %v3993_v18, %s6306_s14 }
 0x3d4   : > { %3294 = vrot.lane.b32.xlu1 %v7801_v23, %s6305_s30 }
 0x3d7   : > { %3678 = vrot.lane.b32.xlu0 %v7774_v12, %s6307_s22 }
 0x3d8   : > { %3487 = vrot.lane.b32.xlu1 %v3994_v8, %s6306_s14 }
 0x3db   : > { %3872 = vrot.lane.b32.xlu0 %v7822_v26, %s6302_s25 }
 0x3dc   : > { %3680 = vrot.lane.b32.xlu1 %v7776_v14, %s6307_s22 }
 0x3df   : > { %4065 = vrot.lane.b32.xlu0 %v3995_v33, %s9885_s13 }
 0x3e0   : > { %3874 = vrot.lane.b32.xlu1 %v7855_v21, %s6302_s25 }
 0x3e3   : > { %2910 = vrot.lane.b32.xlu0 %v3993_v18, %s6300_s15 }
 0x3e4   : > { %4067 = vrot.lane.b32.xlu1 %v3996_v62, %s9885_s13 }
 0x3e7   : > { %3103 = vrot.lane.b32.xlu0 %v7774_v12, %s9878_s16 }
 0x3e8   : > { %2912 = vrot.lane.b32.xlu1 %v3994_v8, %s6300_s15 }
 0x3eb   : > { %3296 = vrot.lane.b32.xlu0 %v7822_v26, %s6305_s30 }
 0x3ec   : > { %3105 = vrot.lane.b32.xlu1 %v7776_v14, %s9878_s16 }
 0x3ed   : > { %v7974_v51 = vpop.permute.xlu0 %3860 }
 0x3ef   : > { %3489 = vrot.lane.b32.xlu0 %v3995_v33, %s6306_s14 }
 0x3f0   : > { %3298 = vrot.lane.b32.xlu1 %v7855_v21, %s6305_s30 }
 0x3f1   : > { %v7979_v19 = vpop.permute.xlu0 %4053 }
 0x3f2   : > { %v7981_v48 = vpop.permute.xlu1 %3862 }
 0x3f3   : > { %3682 = vrot.lane.b32.xlu0 %v7851_v24, %s6307_s22 }
 0x3f4   : > { %3491 = vrot.lane.b32.xlu1 %v3996_v62, %s6306_s14  ;;  %v6110_v12 = vpop.f32.mrf.mxu1 }
 0x3f5   : > { %v2637_v14 = vadd.f32 %v6110_v12, %v7633_v27  ;;  %v7987_v55 = vpop.permute.xlu0 %3284  ;;  %v4253_v12 = vld [vmem:[#allocation5 + $0x38] sm:$0xff] }
 0x3f6   : > { %v7989_v63 = vpop.permute.xlu1 %4055  ;;  %v2628_v1 = vpop.f32.mrf.mxu1 }
 0x3f7   : > { %v2685_v23 = vmax.f32 %v2637_v14, 0.0  ;;  %v2629_v41 = vadd.f32 %v7633_v27, %v2628_v1  ;;  %3876 = vrot.lane.b32.xlu0 %v7807_v45, %s6302_s25 }
 0x3f8   : > { %3684 = vrot.lane.b32.xlu1 %v7853_v36, %s6307_s22  ;;  %v6111_v26 = vpop.f32.mrf.mxu1 }
 0x3f9   : > { %2760 = vst.msk [vmem:[#allocation3 + $0x151] sm:$0xff] %vm2691_vm0, %v2685_v23  ;;  %v2683_v29 = vmax.f32 %v2629_v41, 0.0  ;;  %v2640_v35 = vadd.f32 %v6111_v26, %v7633_v27  ;;  %v7998_v21 = vpop.permute.xlu0 %3477 }
 0x3fa   : > { %v8000_v25 = vpop.permute.xlu1 %3286  ;;  %v2631_v22 = vpop.f32.mrf.mxu1 }
 0x3fb   : > { %2758 = vst.msk [vmem:[#allocation3 + $0x139] sm:$0xff] %vm2691_vm0, %v2683_v29  ;;  %v2686_v40 = vmax.f32 %v2640_v35, 0.0  ;;  %v2632_v47 = vadd.f32 %v7633_v27, %v2631_v22  ;;  %4069 = vrot.lane.b32.xlu0 %v8002_v39, %s9885_s13 }
 0x3fc   : > { %3878 = vrot.lane.b32.xlu1 %v7836_v32, %s6302_s25 }
 0x3fd   : > { %2761 = vst.msk [vmem:[#allocation3 + $0x159] sm:$0xff] %vm2691_vm0, %v2686_v40  ;;  %v2684_v56 = vmax.f32 %v2632_v47, 0.0  ;;  %v2903_v53 = vpop.permute.xlu0 %2902 }
 0x3fe   : > { %v8011_v54 = vpop.permute.xlu1 %3479  ;;  %2995 = vst.msk [vmem:[#allocation5 + $0x40] sm:$0xff] %vm2990_vm3, %v2903_v53 }
 0x3ff   : > { %2759 = vst.msk [vmem:[#allocation3 + $0x141] sm:$0xff] %vm2691_vm0, %v2684_v56  ;;  %2914 = vrot.lane.b32.xlu0 %v3995_v33, %s6300_s15  ;;  %v8138_v56 = vld [vmem:[#allocation3 + $0xc1] sm:$0xff] }
 0x400   : > { %4071 = vrot.lane.b32.xlu1 %v8014_v49, %s9885_s13  ;;  %v8020_v13 = vld [vmem:[#allocation3 + $0x150] sm:$0xff] }
 0x401   : > { %v3281_v58 = vpop.permute.xlu0 %3280  ;;  %2826 = vst.msk [vmem:[#allocation5 + $0x1c0] sm:$0xff] %vm2691_vm0, %v8020_v13 }
 0x402   : > { %v8022_v57 = vpop.permute.xlu1 %3672  ;;  %3377 = vst.msk [vmem:[#allocation5] sm:$0xff] %vm3376_vm5, %v3281_v58  ;;  %v8027_v9 = vld [vmem:[#allocation3 + $0x138] sm:$0xff]  ;;  %v8147_v58 = vld [vmem:[#allocation3 + $0xc9] sm:$0xff] }
 0x403   : > { %3107 = vrot.lane.b32.xlu0 %v7851_v24, %s9878_s16  ;;  %2824 = vst.msk [vmem:[#allocation5 + $0x1a0] sm:$0xff] %vm2691_vm0, %v8027_v9 }
 0x404   : > { %2916 = vrot.lane.b32.xlu1 %v3996_v62, %s6300_s15  ;;  %v4206_v34 = vld [vmem:[#allocation3 + $0x152] sm:$0xff]  ;;  %v4207_v10 = vld [vmem:[#allocation3 + $0x15a] sm:$0xff] }
 0x405   : > { %v8034_v50 = vld [vmem:[#allocation3 + $0x158] sm:$0xff]  ;;  %4238 = vst.msk [vmem:[#allocation5 + $0x188] sm:$0xff] %vm2691_vm0, %v4206_v34  ;;  %4239 = vst.msk [vmem:[#allocation5 + $0x198] sm:$0xff] %vm2691_vm0, %v4207_v10  ;;  %v3474_v20 = vpop.permute.xlu0 %3473 }
 0x406   : > { %v2905_v17 = vpop.permute.xlu1 %2904  ;;  %2827 = vst.msk [vmem:[#allocation5 + $0x1d0] sm:$0xff] %vm2691_vm0, %v8034_v50  ;;  %v4204_v60 = vld [vmem:[#allocation3 + $0x13a] sm:$0xff]  ;;  %v4205_v61 = vld [vmem:[#allocation3 + $0x142] sm:$0xff]  ;;  %v8092_v62 = vld [vmem:[#allocation3 + $0xb1] sm:$0xff] }
 0x407   : > { %2996 = vst.msk [vmem:[#allocation5 + $0x50] sm:$0xff] %vm2990_vm3, %v2905_v17  ;;  %v8042_v24 = vld [vmem:[#allocation3 + $0x140] sm:$0xff]  ;;  %3300 = vrot.lane.b32.xlu0 %v7807_v45, %s6305_s30 }
 0x408   : > { %3570 = vst.msk [vmem:[#allocation5] sm:$0xff] %vm3569_vm6, %v3474_v20  ;;  %3109 = vrot.lane.b32.xlu1 %v7853_v36, %s9878_s16 }
 0x409   : > { %4236 = vst.msk [vmem:[#allocation5 + $0x168] sm:$0xff] %vm2691_vm0, %v4204_v60  ;;  %4237 = vst.msk [vmem:[#allocation5 + $0x178] sm:$0xff] %vm2691_vm0, %v4205_v61  ;;  %v2899_v18 = vpop.permute.xlu0 %2898 }
 0x40a   : > { %2825 = vst.msk [vmem:[#allocation5 + $0x1b0] sm:$0xff] %vm2691_vm0, %v8042_v24  ;;  %v3283_v3 = vpop.permute.xlu1 %3282 }
 0x40b   : > { %3378 = vst.msk [vmem:[#allocation5 + $0x10] sm:$0xff] %vm3376_vm5, %v3283_v3  ;;  %3493 = vrot.lane.b32.xlu0 %v8002_v39, %s6306_s14 }
 0x40c   : > { %2993 = vst.msk [vmem:[#allocation5 + $0x20] sm:$0xff] %vm2990_vm3, %v2899_v18  ;;  %3302 = vrot.lane.b32.xlu1 %v7836_v32, %s6305_s30 }
 0x40d   : > { %v3671_v36 = vpop.permute.xlu0 %3670 }
 0x40e   : > { %v3476_v6 = vpop.permute.xlu1 %3475 }
 0x40f   : > { %3571 = vst.msk [vmem:[#allocation5 + $0x10] sm:$0xff] %vm3569_vm6, %v3476_v6  ;;  %3686 = vrot.lane.b32.xlu0 %v7832_v30, %s6307_s22  ;;  %v3037_v6 = vld [vmem:[#allocation3 + $0xaa] sm:$0xff] }
 0x410   : > { %3495 = vrot.lane.b32.xlu1 %v8014_v49, %s6306_s14 }
 0x411   : > { %v3667_v7 = vpop.permute.xlu0 %3666 }
 0x412   : > { %v3669_v45 = vpop.permute.xlu1 %3668  ;;  %3763 = vst.msk [vmem:[#allocation5] sm:$0xff] %vm3762_vm7, %v3667_v7 }
 0x413   : > { %3764 = vst.msk [vmem:[#allocation5 + $0x10] sm:$0xff] %vm3762_vm7, %v3669_v45  ;;  %3880 = vrot.lane.b32.xlu0 %v7649_v38, %s6302_s25  ;;  %v6227_v45 = vld [vmem:[%s9864_s4] ss:$0 sm:$0xff] }
 0x414   : > { %3958 = vst.msk [vmem:[#allocation5 + $0x10] sm:$0xff] %vm3956_vm8, %v7981_v48  ;;  %3957 = vst.msk [vmem:[#allocation5] sm:$0xff] %vm3956_vm8, %v7974_v51  ;;  %3688 = vrot.lane.b32.xlu1 %v7834_v31, %s6307_s22  ;;  %v4251_v51 = vld [vmem:[#allocation5 + $0x28] sm:$0xff] }
 0x415   : > { %4151 = vst.msk [vmem:[#allocation5 + $0x10] sm:$0xff] %vm4149_vm9, %v7989_v63  ;;  %4150 = vst.msk [vmem:[#allocation5] sm:$0xff] %vm4149_vm9, %v7979_v19  ;;  %v3092_v8 = vpop.permute.xlu0 %3091  ;;  %v4313_v1 = vpack.c.bf16 %v4253_v12, %v4251_v51 }
 0x416   : > { %v2901_v32 = vpop.permute.xlu1 %2900  ;;  %3186 = vst.msk [vmem:[#allocation5 + $0x20] sm:$0xff] %vm3183_vm4, %v3092_v8 }
 0x417   : > { %2994 = vst.msk [vmem:[#allocation5 + $0x30] sm:$0xff] %vm2990_vm3, %v2901_v32  ;;  %4073 = vrot.lane.b32.xlu0 %v8079_v11, %s9885_s13 }
 0x418   : > { %3379 = vst.msk [vmem:[#allocation5 + $0x20] sm:$0xff] %vm3376_vm5, %v7987_v55  ;;  %3882 = vrot.lane.b32.xlu1 %v7663_v46, %s6302_s25 }
 0x419   : > { %3572 = vst.msk [vmem:[#allocation5 + $0x20] sm:$0xff] %vm3569_vm6, %v7998_v21  ;;  %v3865_v33 = vpop.permute.xlu0 %3864 }
 0x41a   : > { %3765 = vst.msk [vmem:[#allocation5 + $0x20] sm:$0xff] %vm3762_vm7, %v3671_v36  ;;  %v3094_v15 = vpop.permute.xlu1 %3093 }
 0x41b   : > { %3187 = vst.msk [vmem:[#allocation5 + $0x30] sm:$0xff] %vm3183_vm4, %v3094_v15  ;;  %2918 = vrot.lane.b32.xlu0 %v8002_v39, %s6300_s15  ;;  %v4259_v15 = vld [vmem:[#allocation5 + $0x68] sm:$0xff] }
 0x41c   : > { %3959 = vst.msk [vmem:[#allocation5 + $0x20] sm:$0xff] %vm3956_vm8, %v3865_v33  ;;  %4075 = vrot.lane.b32.xlu1 %v8092_v62, %s9885_s13  ;;  %v4246_v19 = vld [vmem:[#allocation5] sm:$0xff]  ;;  %v4248_v48 = vld [vmem:[#allocation5 + $0x10] sm:$0xff]  ;;  %v4261_v33 = vld [vmem:[#allocation5 + $0x78] sm:$0xff] }
 0x41d   : > { %3380 = vst.msk [vmem:[#allocation5 + $0x30] sm:$0xff] %vm3376_vm5, %v8000_v25  ;;  %v4310_v14 = vpack.c.bf16 %v4248_v48, %v4246_v19  ;;  %v4058_v63 = vpop.permute.xlu0 %4057 }
 0x41e   : > { %3573 = vst.msk [vmem:[#allocation5 + $0x30] sm:$0xff] %vm3569_vm6, %v8011_v54  ;;  %v3098_v55 = vpop.permute.xlu1 %3097 }
 0x41f   : > { %3766 = vst.msk [vmem:[#allocation5 + $0x30] sm:$0xff] %vm3762_vm7, %v8022_v57  ;;  %4502 = vmatmul.mubr.bf16.vlgmr.msra.gmra.mxu1 %v4310_v14  ;;  %3111 = vrot.lane.b32.xlu0 %v7832_v30, %s9878_s16 }
 0x420   : > { %3189 = vst.msk [vmem:[#allocation5 + $0x50] sm:$0xff] %vm3183_vm4, %v3098_v55  ;;  %2920 = vrot.lane.b32.xlu1 %v8014_v49, %s6300_s15  ;;  %5952 = vmatprep.mubr.msk.bf16.mxu1 %vm2691_vm0, %v4313_v1 }
 0x421   : > { %4152 = vst.msk [vmem:[#allocation5 + $0x20] sm:$0xff] %vm4149_vm9, %v4058_v63  ;;  %v3096_v41 = vpop.permute.xlu0 %3095 }
 0x422   : > { %v3867_v23 = vpop.permute.xlu1 %3866  ;;  %3188 = vst.msk [vmem:[#allocation5 + $0x40] sm:$0xff] %vm3183_vm4, %v3096_v41  ;;  %v3616_v41 = vld [vmem:[#allocation3 + $0xc2] sm:$0xff] }
 0x423   : > { %3960 = vst.msk [vmem:[#allocation5 + $0x30] sm:$0xff] %vm3956_vm8, %v3867_v23  ;;  %3304 = vrot.lane.b32.xlu0 %v7649_v38, %s6305_s30  ;;  %v4255_v38 = vld [vmem:[#allocation5 + $0x48] sm:$0xff] }
 0x424   : > { %3113 = vrot.lane.b32.xlu1 %v7834_v31, %s9878_s16  ;;  %v4257_v31 = vld [vmem:[#allocation5 + $0x58] sm:$0xff] }
 0x425   : > { %v3289_v29 = vpop.permute.xlu0 %3288  ;;  %v4315_v40 = vpack.c.bf16 %v4257_v31, %v4255_v38  ;;  %v3617_v38 = vld [vmem:[#allocation3 + $0xca] sm:$0xff] }
 0x426   : > { %v4060_v26 = vpop.permute.xlu1 %4059  ;;  %3381 = vst.msk [vmem:[#allocation5 + $0x40] sm:$0xff] %vm3376_vm5, %v3289_v29 }
 0x427   : > { %4153 = vst.msk [vmem:[#allocation5 + $0x30] sm:$0xff] %vm4149_vm9, %v4060_v26  ;;  %3497 = vrot.lane.b32.xlu0 %v8079_v11, %s6306_s14 }
 0x428   : > { %3306 = vrot.lane.b32.xlu1 %v7663_v46, %s6305_s30  ;;  %v4250_v46 = vld [vmem:[#allocation5 + $0x20] sm:$0xff] }
 0x429   : > { %v3482_v35 = vpop.permute.xlu0 %3481 }
 0x42a   : > { %v3291_v30 = vpop.permute.xlu1 %3290  ;;  %3574 = vst.msk [vmem:[#allocation5 + $0x40] sm:$0xff] %vm3569_vm6, %v3482_v35 }
 0x42b   : > { %3382 = vst.msk [vmem:[#allocation5 + $0x50] sm:$0xff] %vm3376_vm5, %v3291_v30  ;;  %3690 = vrot.lane.b32.xlu0 %v7659_v44, %s6307_s22 }
 0x42c   : > { %3499 = vrot.lane.b32.xlu1 %v8092_v62, %s6306_s14 }
 0x42d   : > { %v3675_v25 = vpop.permute.xlu0 %3674 }
 0x42e   : > { %v3484_v21 = vpop.permute.xlu1 %3483  ;;  %v4252_v22 = vld [vmem:[#allocation5 + $0x30] sm:$0xff]  ;;  %3767 = vst.msk [vmem:[#allocation5 + $0x40] sm:$0xff] %vm3762_vm7, %v3675_v25 }
 0x42f   : > { %3575 = vst.msk [vmem:[#allocation5 + $0x50] sm:$0xff] %vm3569_vm6, %v3484_v21  ;;  %v4312_v39 = vpack.c.bf16 %v4252_v22, %v4250_v46  ;;  %3884 = vrot.lane.b32.xlu0 %v7645_v37, %s6302_s25  ;;  %v4003_v25 = vld [vmem:[#allocation3 + $0xd9] sm:$0xff] }
 0x430   : > { %3692 = vrot.lane.b32.xlu1 %v7661_v28, %s6307_s22 }
 0x431   : > { %4510 = vmatmul.mubr.bf16.gmra.mxu1 %v4312_v39  ;;  %v3869_v47 = vpop.permute.xlu0 %3868  ;;  %v4004_v39 = vld [vmem:[#allocation3 + $0xe1] sm:$0xff] }
 0x432   : > { %v3677_v44 = vpop.permute.xlu1 %3676  ;;  %5953 = vmatprep.mubr.msk.bf16.mxu1 %vm2691_vm0, %v4315_v40  ;;  %3961 = vst.msk [vmem:[#allocation5 + $0x40] sm:$0xff] %vm3956_vm8, %v3869_v47 }
 0x433   : > { %3768 = vst.msk [vmem:[#allocation5 + $0x50] sm:$0xff] %vm3762_vm7, %v3677_v44  ;;  %4077 = vrot.lane.b32.xlu0 %v8138_v56, %s9885_s13 }
 0x434   : > { %3886 = vrot.lane.b32.xlu1 %v7653_v43, %s6302_s25  ;;  %v6114_v28 = vpop.f32.mrf.mxu1 }
 0x435   : > { %v2653_v53 = vadd.f32 %v6114_v28, %v7633_v27  ;;  %v4062_v49 = vpop.permute.xlu0 %4061 }
 0x436   : > { %v3871_v54 = vpop.permute.xlu1 %3870  ;;  %4154 = vst.msk [vmem:[#allocation5 + $0x40] sm:$0xff] %vm4149_vm9, %v4062_v49  ;;  %v2644_v57 = vpop.f32.mrf.mxu1 }
 0x437   : > { %3962 = vst.msk [vmem:[#allocation5 + $0x50] sm:$0xff] %vm3956_vm8, %v3871_v54  ;;  %v2689_v34 = vmax.f32 %v2653_v53, 0.0  ;;  %v2645_v10 = vadd.f32 %v7633_v27, %v2644_v57  ;;  %2922 = vrot.lane.b32.xlu0 %v8079_v11, %s6300_s15  ;;  %v3038_v11 = vld [vmem:[#allocation3 + $0xb2] sm:$0xff]  ;;  %v4265_v53 = vld [vmem:[#allocation5 + $0x98] sm:$0xff] }
 0x438   : > { %4079 = vrot.lane.b32.xlu1 %v8147_v58, %s9885_s13  ;;  %v6115_v17 = vpop.f32.mrf.mxu1 }
 0x439   : > { %2764 = vst.msk [vmem:[#allocation3 + $0x181] sm:$0xff] %vm2691_vm0, %v2689_v34  ;;  %v2687_v20 = vmax.f32 %v2645_v10, 0.0  ;;  %v2656_v60 = vadd.f32 %v6115_v17, %v7633_v27  ;;  %v2907_v3 = vpop.permute.xlu0 %2906 }
 0x43a   : > { %v4064_v61 = vpop.permute.xlu1 %4063  ;;  %2997 = vst.msk [vmem:[#allocation5 + $0x60] sm:$0xff] %vm2990_vm3, %v2907_v3  ;;  %v2647_v18 = vpop.f32.mrf.mxu1 }
 0x43b   : > { %4155 = vst.msk [vmem:[#allocation5 + $0x50] sm:$0xff] %vm4149_vm9, %v4064_v61  ;;  %v2690_v36 = vmax.f32 %v2656_v60, 0.0  ;;  %v2648_v7 = vadd.f32 %v6227_v45, %v2647_v18  ;;  %3115 = vrot.lane.b32.xlu0 %v3037_v6, %s9878_s16  ;;  %v8238_v6 = vld [vmem:[#allocation3 + $0xf1] sm:$0xff] }
 0x43c   : > { %2762 = vst.msk [vmem:[#allocation3 + $0x169] sm:$0xff] %vm2691_vm0, %v2687_v20  ;;  %2924 = vrot.lane.b32.xlu1 %v8092_v62, %s6300_s15  ;;  %v3618_v20 = vld [vmem:[#allocation3 + $0xda] sm:$0xff] }
 0x43d   : > { %2765 = vst.msk [vmem:[#allocation3 + $0x189] sm:$0xff] %vm2691_vm0, %v2690_v36  ;;  %v2688_v27 = vmax.f32 %v2648_v7, 0.0  ;;  %v3100_v8 = vpop.permute.xlu0 %3099  ;;  %v4254_v19 = vld [vmem:[#allocation5 + $0x40] sm:$0xff]  ;;  %v8246_v7 = vld [vmem:[#allocation3 + $0xf9] sm:$0xff] }
 0x43e   : > { %v2909_v32 = vpop.permute.xlu1 %2908  ;;  %3190 = vst.msk [vmem:[#allocation5 + $0x60] sm:$0xff] %vm3183_vm4, %v3100_v8 }
 0x43f   : > { %2998 = vst.msk [vmem:[#allocation5 + $0x70] sm:$0xff] %vm2990_vm3, %v2909_v32  ;;  %3308 = vrot.lane.b32.xlu0 %v7645_v37, %s6305_s30  ;;  %v4317_v37 = vpack.c.bf16 %v4261_v33, %v4259_v15  ;;  %v4267_v15 = vld [vmem:[#allocation5 + $0xa8] sm:$0xff]  ;;  %v4269_v33 = vld [vmem:[#allocation5 + $0xb8] sm:$0xff] }
 0x440   : > { %2763 = vst.msk [vmem:[#allocation3 + $0x171] sm:$0xff] %vm2691_vm0, %v2688_v27  ;;  %3117 = vrot.lane.b32.xlu1 %v3038_v11, %s9878_s16 }
 0x441   : > { %v3293_v51 = vpop.permute.xlu0 %3292 }
 0x442   : > { %v3102_v62 = vpop.permute.xlu1 %3101  ;;  %v4256_v48 = vld [vmem:[#allocation5 + $0x50] sm:$0xff]  ;;  %3383 = vst.msk [vmem:[#allocation5 + $0x60] sm:$0xff] %vm3376_vm5, %v3293_v51 }
 0x443   : > { %3191 = vst.msk [vmem:[#allocation5 + $0x70] sm:$0xff] %vm3183_vm4, %v3102_v62  ;;  %v4314_v12 = vpack.c.bf16 %v4256_v48, %v4254_v19  ;;  %v8174_v14 = vld [vmem:[#allocation3 + $0x168] sm:$0xff]  ;;  %3501 = vrot.lane.b32.xlu0 %v8138_v56, %s6306_s14 }
 0x444   : > { %3310 = vrot.lane.b32.xlu1 %v7653_v43, %s6305_s30  ;;  %2828 = vst.msk [vmem:[#allocation5 + $0x1e0] sm:$0xff] %vm2691_vm0, %v8174_v14  ;;  %v4210_v55 = vld [vmem:[#allocation3 + $0x182] sm:$0xff]  ;;  %v4211_v63 = vld [vmem:[#allocation3 + $0x18a] sm:$0xff] }
 0x445   : > { %4518 = vmatmul.mubr.bf16.gmra.mxu1 %v4314_v12  ;;  %4242 = vst.msk [vmem:[#allocation5 + $0x1c8] sm:$0xff] %vm2691_vm0, %v4210_v55  ;;  %4243 = vst.msk [vmem:[#allocation5 + $0x1d8] sm:$0xff] %vm2691_vm0, %v4211_v63  ;;  %v3486_v23 = vpop.permute.xlu0 %3485  ;;  %v6223_v12 = vld [vmem:[%s9867_s7] sm:$0xff]  }
 0x446   : > { %v3295_v1 = vpop.permute.xlu1 %3294  ;;  %5954 = vmatprep.mubr.msk.bf16.mxu1 %vm2691_vm0, %v4317_v37  ;;  %3576 = vst.msk [vmem:[#allocation5 + $0x60] sm:$0xff] %vm3569_vm6, %v3486_v23  ;;  %6116 = vmatprep.subr.bf16.mxu0 %v6223_v12 }
 0x447   : > { %v4208_v43 = vld [vmem:[#allocation3 + $0x16a] sm:$0xff]  ;;  %v4209_v26 = vld [vmem:[#allocation3 + $0x172] sm:$0xff]  ;;  %3384 = vst.msk [vmem:[#allocation5 + $0x70] sm:$0xff] %vm3376_vm5, %v3295_v1  ;;  %3694 = vrot.lane.b32.xlu0 %v3616_v41, %s6307_s22  ;;  %6117 = vmatpush3.bf16.msra.mxu0 %v6223_v12 }
 0x448   : > { %v8187_v29 = vld [vmem:[#allocation3 + $0x170] sm:$0xff]  ;;  %4240 = vst.msk [vmem:[#allocation5 + $0x1a8] sm:$0xff] %vm2691_vm0, %v4208_v43  ;;  %4241 = vst.msk [vmem:[#allocation5 + $0x1b8] sm:$0xff] %vm2691_vm0, %v4209_v26  ;;  %3503 = vrot.lane.b32.xlu1 %v8147_v58, %s6306_s14 }
 0x449   : > { %2829 = vst.msk [vmem:[#allocation5 + $0x1f0] sm:$0xff] %vm2691_vm0, %v8187_v29  ;;  %v3679_v35 = vpop.permute.xlu0 %3678  ;;  %v3620_v1 = vld [vmem:[#allocation3 + $0xf2] sm:$0xff] }
 0x44a   : > { %v3488_v30 = vpop.permute.xlu1 %3487  ;;  %3769 = vst.msk [vmem:[#allocation5 + $0x60] sm:$0xff] %vm3762_vm7, %v3679_v35 }
 0x44b   : > { %3577 = vst.msk [vmem:[#allocation5 + $0x70] sm:$0xff] %vm3569_vm6, %v3488_v30  ;;  %3888 = vrot.lane.b32.xlu0 %v7747_v2, %s6302_s25  ;;  %v4007_v30 = vld [vmem:[#allocation3 + $0x109] sm:$0xff] }
 0x44c   : > { %3696 = vrot.lane.b32.xlu1 %v3617_v38, %s6307_s22 }
 0x44d   : > { %v3873_v21 = vpop.permute.xlu0 %3872 }
 0x44e   : > { %v3681_v31 = vpop.permute.xlu1 %3680  ;;  %3963 = vst.msk [vmem:[#allocation5 + $0x60] sm:$0xff] %vm3956_vm8, %v3873_v21 }
 0x44f   : > { %3770 = vst.msk [vmem:[#allocation5 + $0x70] sm:$0xff] %vm3762_vm7, %v3681_v31  ;;  %4081 = vrot.lane.b32.xlu0 %v4003_v25, %s9885_s13  ;;  %v4008_v31 = vld [vmem:[#allocation3 + $0x111] sm:$0xff] }
 0x450   : > { %3890 = vrot.lane.b32.xlu1 %v7818_v42, %s6302_s25 }
 0x451   : > { %v4066_v22 = vpop.permute.xlu0 %4065 }
 0x452   : > { %v3875_v46 = vpop.permute.xlu1 %3874  ;;  %4156 = vst.msk [vmem:[#allocation5 + $0x60] sm:$0xff] %vm4149_vm9, %v4066_v22 }
 0x453   : > { %3964 = vst.msk [vmem:[#allocation5 + $0x70] sm:$0xff] %vm3956_vm8, %v3875_v46  ;;  %2926 = vrot.lane.b32.xlu0 %v8138_v56, %s6300_s15  ;;  %v4263_v56 = vld [vmem:[#allocation5 + $0x88] sm:$0xff] }
 0x454   : > { %4083 = vrot.lane.b32.xlu1 %v4004_v39, %s9885_s13  ;;  %v4319_v10 = vpack.c.bf16 %v4265_v53, %v4263_v56 }
 0x455   : > { %v2911_v44 = vpop.permute.xlu0 %2910 }
 0x456   : > { %v4068_v40 = vpop.permute.xlu1 %4067  ;;  %2999 = vst.msk [vmem:[#allocation5 + $0x80] sm:$0xff] %vm2990_vm3, %v2911_v44 }
 0x457   : > { %4157 = vst.msk [vmem:[#allocation5 + $0x70] sm:$0xff] %vm4149_vm9, %v4068_v40  ;;  %3119 = vrot.lane.b32.xlu0 %v3616_v41, %s9878_s16  ;;  %v3621_v41 = vld [vmem:[#allocation3 + $0xfa] sm:$0xff]  ;;  %v4273_v40 = vld [vmem:[#allocation5 + $0xd8] sm:$0xff] }
 0x458   : > { %2928 = vrot.lane.b32.xlu1 %v8147_v58, %s6300_s15 }
 0x459   : > { %v3104_v28 = vpop.permute.xlu0 %3103  ;;  %v4258_v57 = vld [vmem:[#allocation5 + $0x60] sm:$0xff] }
 0x45a   : > { %v2913_v47 = vpop.permute.xlu1 %2912  ;;  %3192 = vst.msk [vmem:[#allocation5 + $0x80] sm:$0xff] %vm3183_vm4, %v3104_v28 }
 0x45b   : > { %3000 = vst.msk [vmem:[#allocation5 + $0x90] sm:$0xff] %vm2990_vm3, %v2913_v47  ;;  %3312 = vrot.lane.b32.xlu0 %v7747_v2, %s6305_s30 }
 0x45c   : > { %3121 = vrot.lane.b32.xlu1 %v3617_v38, %s9878_s16 }
 0x45d   : > { %v3297_v49 = vpop.permute.xlu0 %3296 }
 0x45e   : > { %v3106_v54 = vpop.permute.xlu1 %3105  ;;  %v4260_v34 = vld [vmem:[#allocation5 + $0x70] sm:$0xff]  ;;  %3385 = vst.msk [vmem:[#allocation5 + $0x80] sm:$0xff] %vm3376_vm5, %v3297_v49 }
 0x45f   : > { %3193 = vst.msk [vmem:[#allocation5 + $0x90] sm:$0xff] %vm3183_vm4, %v3106_v54  ;;  %v4316_v58 = vpack.c.bf16 %v4260_v34, %v4258_v57  ;;  %3505 = vrot.lane.b32.xlu0 %v4003_v25, %s6306_s14  ;;  %v3622_v57 = vld [vmem:[#allocation3 + $0x10a] sm:$0xff] }
 0x460   : > { %3314 = vrot.lane.b32.xlu1 %v7818_v42, %s6305_s30  ;;  %v3619_v42 = vld [vmem:[#allocation3 + $0xe2] sm:$0xff] }
 0x461   : > { %4526 = vmatmul.mubr.bf16.gmra.mxu1 %v4316_v58  ;;  %v3490_v2 = vpop.permute.xlu0 %3489 }
 0x462   : > { %v3299_v17 = vpop.permute.xlu1 %3298  ;;  %5955 = vmatprep.mubr.msk.bf16.mxu1 %vm2691_vm0, %v4319_v10  ;;  %3578 = vst.msk [vmem:[#allocation5 + $0x80] sm:$0xff] %vm3569_vm6, %v3490_v2  ;;  %v4009_v2 = vld [vmem:[#allocation3 + $0x121] sm:$0xff] }
 0x463   : > { %3386 = vst.msk [vmem:[#allocation5 + $0x90] sm:$0xff] %vm3376_vm5, %v3299_v17  ;;  %3698 = vrot.lane.b32.xlu0 %v3618_v20, %s6307_s22 }
 0x464   : > { %3507 = vrot.lane.b32.xlu1 %v4004_v39, %s6306_s14 }
 0x465   : > { %v3683_v61 = vpop.permute.xlu0 %3682 }
 0x466   : > { %v3492_v60 = vpop.permute.xlu1 %3491  ;;  %3771 = vst.msk [vmem:[#allocation5 + $0x80] sm:$0xff] %vm3762_vm7, %v3683_v61  ;;  %v4010_v61 = vld [vmem:[#allocation3 + $0x129] sm:$0xff] }
 0x467   : > { %3579 = vst.msk [vmem:[#allocation5 + $0x90] sm:$0xff] %vm3569_vm6, %v3492_v60  ;;  %3892 = vrot.lane.b32.xlu0 %v7741_v59, %s6302_s25 }
 0x468   : > { %3700 = vrot.lane.b32.xlu1 %v3619_v42, %s6307_s22 }
 0x469   : > { %v3877_v18 = vpop.permute.xlu0 %3876 }
 0x46a   : > { %v3685_v3 = vpop.permute.xlu1 %3684  ;;  %3965 = vst.msk [vmem:[#allocation5 + $0x80] sm:$0xff] %vm3956_vm8, %v3877_v18 }
 0x46b   : > { %3772 = vst.msk [vmem:[#allocation5 + $0x90] sm:$0xff] %vm3762_vm7, %v3685_v3  ;;  %4085 = vrot.lane.b32.xlu0 %v8238_v6, %s9885_s13 }
 0x46c   : > { %3894 = vrot.lane.b32.xlu1 %v7772_v0, %s6302_s25 }
 0x46d   : > { %v4070_v45 = vpop.permute.xlu0 %4069 }
 0x46e   : > { %v3879_v36 = vpop.permute.xlu1 %3878  ;;  %4158 = vst.msk [vmem:[#allocation5 + $0x80] sm:$0xff] %vm4149_vm9, %v4070_v45  ;;  %v4277_v45 = vld [vmem:[#allocation5 + $0xf8] sm:$0xff] }
 0x46f   : > { %3966 = vst.msk [vmem:[#allocation5 + $0x90] sm:$0xff] %vm3956_vm8, %v3879_v36  ;;  %2930 = vrot.lane.b32.xlu0 %v4003_v25, %s6300_s15  ;;  %v4275_v36 = vld [vmem:[#allocation5 + $0xe8] sm:$0xff] }
 0x470   : > { %4087 = vrot.lane.b32.xlu1 %v8246_v7, %s9885_s13 }
 0x471   : > { %v2915_v32 = vpop.permute.xlu0 %2914 }
 0x472   : > { %v4072_v27 = vpop.permute.xlu1 %4071  ;;  %3001 = vst.msk [vmem:[#allocation5 + $0xa0] sm:$0xff] %vm2990_vm3, %v2915_v32 }
 0x473   : > { %4159 = vst.msk [vmem:[#allocation5 + $0x90] sm:$0xff] %vm4149_vm9, %v4072_v27  ;;  %3123 = vrot.lane.b32.xlu0 %v3618_v20, %s9878_s16 }
 0x474   : > { %2932 = vrot.lane.b32.xlu1 %v4004_v39, %s6300_s15  ;;  %v4271_v39 = vld [vmem:[#allocation5 + $0xc8] sm:$0xff] }
 0x475   : > { %v3108_v11 = vpop.permute.xlu0 %3107  ;;  %v4262_v19 = vld [vmem:[#allocation5 + $0x80] sm:$0xff]  ;;  %v4323_v54 = vpack.c.bf16 %v4273_v40, %v4271_v39  ;;  %v3627_v40 = vld [vmem:[#allocation3 + $0x142] sm:$0xff] }
 0x476   : > { %v2917_v8 = vpop.permute.xlu1 %2916  ;;  %3194 = vst.msk [vmem:[#allocation5 + $0xa0] sm:$0xff] %vm3183_vm4, %v3108_v11 }
 0x477   : > { %3002 = vst.msk [vmem:[#allocation5 + $0xb0] sm:$0xff] %vm2990_vm3, %v2917_v8  ;;  %3316 = vrot.lane.b32.xlu0 %v7741_v59, %s6305_s30  ;;  %v4321_v59 = vpack.c.bf16 %v4269_v33, %v4267_v15  ;;  %v4325_v15 = vpack.c.bf16 %v4277_v45, %v4275_v36 }
 0x478   : > { %3125 = vrot.lane.b32.xlu1 %v3619_v42, %s9878_s16 }
 0x479   : > { %v3301_v51 = vpop.permute.xlu0 %3300 }
 0x47a   : > { %v3110_v62 = vpop.permute.xlu1 %3109  ;;  %v4264_v48 = vld [vmem:[#allocation5 + $0x90] sm:$0xff]  ;;  %3387 = vst.msk [vmem:[#allocation5 + $0xa0] sm:$0xff] %vm3376_vm5, %v3301_v51 }
 0x47b   : > { %3195 = vst.msk [vmem:[#allocation5 + $0xb0] sm:$0xff] %vm3183_vm4, %v3110_v62  ;;  %v4318_v37 = vpack.c.bf16 %v4264_v48, %v4262_v19  ;;  %3509 = vrot.lane.b32.xlu0 %v8238_v6, %s6306_s14  ;;  %v3624_v62 = vld [vmem:[#allocation3 + $0x122] sm:$0xff] }
 0x47c   : > { %3318 = vrot.lane.b32.xlu1 %v7772_v0, %s6305_s30 }
 0x47d   : > { %4534 = vmatmul.mubr.bf16.gmra.mxu1 %v4318_v37  ;;  %v3494_v63 = vpop.permute.xlu0 %3493  ;;  %v8350_v37 = vld [vmem:[#allocation3 + $0x139] sm:$0xff] }
 0x47e   : > { %v3303_v55 = vpop.permute.xlu1 %3302  ;;  %5956 = vmatprep.mubr.msk.bf16.mxu1 %vm2691_vm0, %v4321_v59  ;;  %3580 = vst.msk [vmem:[#allocation5 + $0xa0] sm:$0xff] %vm3569_vm6, %v3494_v63  ;;  %v8358_v63 = vld [vmem:[#allocation3 + $0x141] sm:$0xff] }
 0x47f   : > { %3388 = vst.msk [vmem:[#allocation5 + $0xb0] sm:$0xff] %vm3376_vm5, %v3303_v55  ;;  %3702 = vrot.lane.b32.xlu0 %v3620_v1, %s6307_s22 }
 0x480   : > { %3511 = vrot.lane.b32.xlu1 %v8246_v7, %s6306_s14 }
 0x481   : > { %v3687_v23 = vpop.permute.xlu0 %3686 }
 0x482   : > { %v3496_v0 = vpop.permute.xlu1 %3495  ;;  %3773 = vst.msk [vmem:[#allocation5 + $0xa0] sm:$0xff] %vm3762_vm7, %v3687_v23 }
 0x483   : > { %3581 = vst.msk [vmem:[#allocation5 + $0xb0] sm:$0xff] %vm3569_vm6, %v3496_v0  ;;  %3896 = vrot.lane.b32.xlu0 %v7924_v5, %s6302_s25 }
 0x484   : > { %3704 = vrot.lane.b32.xlu1 %v3621_v41, %s6307_s22 }
 0x485   : > { %v3881_v26 = vpop.permute.xlu0 %3880 }
 0x486   : > { %v3689_v43 = vpop.permute.xlu1 %3688  ;;  %3967 = vst.msk [vmem:[#allocation5 + $0xa0] sm:$0xff] %vm3956_vm8, %v3881_v26  ;;  %v4281_v26 = vld [vmem:[#allocation5 + $0x118] sm:$0xff] }
 0x487   : > { %3774 = vst.msk [vmem:[#allocation5 + $0xb0] sm:$0xff] %vm3762_vm7, %v3689_v43  ;;  %4089 = vrot.lane.b32.xlu0 %v4007_v30, %s9885_s13  ;;  %v4279_v43 = vld [vmem:[#allocation5 + $0x108] sm:$0xff] }
 0x488   : > { %3898 = vrot.lane.b32.xlu1 %v7937_v16, %s6302_s25 }
 0x489   : > { %v4074_v38 = vpop.permute.xlu0 %4073 }
 0x48a   : > { %v3883_v35 = vpop.permute.xlu1 %3882  ;;  %4160 = vst.msk [vmem:[#allocation5 + $0xa0] sm:$0xff] %vm4149_vm9, %v4074_v38 }
 0x48b   : > { %3968 = vst.msk [vmem:[#allocation5 + $0xb0] sm:$0xff] %vm3956_vm8, %v3883_v35  ;;  %2934 = vrot.lane.b32.xlu0 %v8238_v6, %s6300_s15 }
 0x48c   : > { %4091 = vrot.lane.b32.xlu1 %v4008_v31, %s9885_s13 }
 0x48d   : > { %v2919_v25 = vpop.permute.xlu0 %2918 }
 0x48e   : > { %v4076_v21 = vpop.permute.xlu1 %4075  ;;  %3003 = vst.msk [vmem:[#allocation5 + $0xc0] sm:$0xff] %vm2990_vm3, %v2919_v25  ;;  %v4327_v25 = vpack.c.bf16 %v4281_v26, %v4279_v43  ;;  %v8452_v43 = vld [vmem:[#allocation3 + $0x171] sm:$0xff] }
 0x48f   : > { %4161 = vst.msk [vmem:[#allocation5 + $0xb0] sm:$0xff] %vm4149_vm9, %v4076_v21  ;;  %3127 = vrot.lane.b32.xlu0 %v3620_v1, %s9878_s16 }
 0x490   : > { %2936 = vrot.lane.b32.xlu1 %v8246_v7, %s6300_s15 }
 0x491   : > { %v3112_v22 = vpop.permute.xlu0 %3111  ;;  %v4266_v28 = vld [vmem:[#allocation5 + $0xa0] sm:$0xff] }
 0x492   : > { %v2921_v46 = vpop.permute.xlu1 %2920  ;;  %3196 = vst.msk [vmem:[#allocation5 + $0xc0] sm:$0xff] %vm3183_vm4, %v3112_v22  ;;  %v3626_v22 = vld [vmem:[#allocation3 + $0x13a] sm:$0xff] }
 0x493   : > { %3004 = vst.msk [vmem:[#allocation5 + $0xd0] sm:$0xff] %vm2990_vm3, %v2921_v46  ;;  %3320 = vrot.lane.b32.xlu0 %v7924_v5, %s6305_s30 }
 0x494   : > { %3129 = vrot.lane.b32.xlu1 %v3621_v41, %s9878_s16 }
 0x495   : > { %v3305_v47 = vpop.permute.xlu0 %3304 }
 0x496   : > { %v3114_v44 = vpop.permute.xlu1 %3113  ;;  %v4268_v56 = vld [vmem:[#allocation5 + $0xb0] sm:$0xff]  ;;  %3389 = vst.msk [vmem:[#allocation5 + $0xc0] sm:$0xff] %vm3376_vm5, %v3305_v47 }
 0x497   : > { %3197 = vst.msk [vmem:[#allocation5 + $0xd0] sm:$0xff] %vm3183_vm4, %v3114_v44  ;;  %v4320_v53 = vpack.c.bf16 %v4268_v56, %v4266_v28  ;;  %3513 = vrot.lane.b32.xlu0 %v4007_v30, %s6306_s14  ;;  %v8391_v28 = vld [vmem:[#allocation3 + $0x151] sm:$0xff] }
 0x498   : > { %3322 = vrot.lane.b32.xlu1 %v7937_v16, %s6305_s30  ;;  %v3623_v16 = vld [vmem:[#allocation3 + $0x112] sm:$0xff] }
 0x499   : > { %4542 = vmatmul.mubr.bf16.gmra.mxu1 %v4320_v53  ;;  %v3498_v5 = vpop.permute.xlu0 %3497 }
 0x49a   : > { %v3307_v49 = vpop.permute.xlu1 %3306  ;;  %5957 = vmatprep.mubr.msk.bf16.mxu1 %vm2691_vm0, %v4323_v54  ;;  %3582 = vst.msk [vmem:[#allocation5 + $0xc0] sm:$0xff] %vm3569_vm6, %v3498_v5  ;;  %v8402_v54 = vld [vmem:[%s9866_s6] ss:$0 sm:$0xff]  ;;  %v8404_v5 = vld [vmem:[#allocation3 + $0x159] sm:$0xff] }
 0x49b   : > { %3390 = vst.msk [vmem:[#allocation5 + $0xd0] sm:$0xff] %vm3376_vm5, %v3307_v49  ;;  %3706 = vrot.lane.b32.xlu0 %v3622_v57, %s6307_s22 }
 0x49c   : > { %3515 = vrot.lane.b32.xlu1 %v4008_v31, %s6306_s14 }
 0x49d   : > { %v3691_v58 = vpop.permute.xlu0 %3690 }
 0x49e   : > { %v3500_v34 = vpop.permute.xlu1 %3499  ;;  %3775 = vst.msk [vmem:[#allocation5 + $0xc0] sm:$0xff] %vm3762_vm7, %v3691_v58 }
 0x49f   : > { %3583 = vst.msk [vmem:[#allocation5 + $0xd0] sm:$0xff] %vm3569_vm6, %v3500_v34  ;;  %3900 = vrot.lane.b32.xlu0 %v7920_v4, %s6302_s25 }
 0x4a0   : > { %3708 = vrot.lane.b32.xlu1 %v3623_v16, %s6307_s22 }
 0x4a1   : > { %v3885_v17 = vpop.permute.xlu0 %3884 }
 0x4a2   : > { %v3693_v10 = vpop.permute.xlu1 %3692  ;;  %3969 = vst.msk [vmem:[#allocation5 + $0xc0] sm:$0xff] %vm3956_vm8, %v3885_v17 }
 0x4a3   : > { %3776 = vst.msk [vmem:[#allocation5 + $0xd0] sm:$0xff] %vm3762_vm7, %v3693_v10  ;;  %4093 = vrot.lane.b32.xlu0 %v4009_v2, %s9885_s13 }
 0x4a4   : > { %3902 = vrot.lane.b32.xlu1 %v7931_v52, %s6302_s25 }
 0x4a5   : > { %v4078_v60 = vpop.permute.xlu0 %4077 }
 0x4a6   : > { %v3887_v20 = vpop.permute.xlu1 %3886  ;;  %4162 = vst.msk [vmem:[#allocation5 + $0xc0] sm:$0xff] %vm4149_vm9, %v4078_v60 }
 0x4a7   : > { %3970 = vst.msk [vmem:[#allocation5 + $0xd0] sm:$0xff] %vm3956_vm8, %v3887_v20  ;;  %2938 = vrot.lane.b32.xlu0 %v4007_v30, %s6300_s15 }
 0x4a8   : > { %4095 = vrot.lane.b32.xlu1 %v4010_v61, %s9885_s13 }
 0x4a9   : > { %v2923_v3 = vpop.permute.xlu0 %2922 }
 0x4aa   : > { %v4080_v42 = vpop.permute.xlu1 %4079  ;;  %3005 = vst.msk [vmem:[#allocation5 + $0xe0] sm:$0xff] %vm2990_vm3, %v2923_v3 }
 0x4ab   : > { %4163 = vst.msk [vmem:[#allocation5 + $0xd0] sm:$0xff] %vm4149_vm9, %v4080_v42  ;;  %3131 = vrot.lane.b32.xlu0 %v3622_v57, %s9878_s16 }
 0x4ac   : > { %2940 = vrot.lane.b32.xlu1 %v4008_v31, %s6300_s15 }
 0x4ad   : > { %v3116_v6 = vpop.permute.xlu0 %3115  ;;  %v4270_v32 = vld [vmem:[#allocation5 + $0xc0] sm:$0xff] }
 0x4ae   : > { %v2925_v18 = vpop.permute.xlu1 %2924  ;;  %3198 = vst.msk [vmem:[#allocation5 + $0xe0] sm:$0xff] %vm3183_vm4, %v3116_v6  ;;  %v4285_v6 = vld [vmem:[#allocation5 + $0x138] sm:$0xff] }
 0x4af   : > { %3006 = vst.msk [vmem:[#allocation5 + $0xf0] sm:$0xff] %vm2990_vm3, %v2925_v18  ;;  %3324 = vrot.lane.b32.xlu0 %v7920_v4, %s6305_s30  ;;  %v4283_v18 = vld [vmem:[#allocation5 + $0x128] sm:$0xff] }
 0x4b0   : > { %3133 = vrot.lane.b32.xlu1 %v3623_v16, %s9878_s16 }
 0x4b1   : > { %v3309_v27 = vpop.permute.xlu0 %3308 }
 0x4b2   : > { %v3118_v7 = vpop.permute.xlu1 %3117  ;;  %v4272_v8 = vld [vmem:[#allocation5 + $0xd0] sm:$0xff]  ;;  %3391 = vst.msk [vmem:[#allocation5 + $0xe0] sm:$0xff] %vm3376_vm5, %v3309_v27 }
 0x4b3   : > { %3199 = vst.msk [vmem:[#allocation5 + $0xf0] sm:$0xff] %vm3183_vm4, %v3118_v7  ;;  %v4322_v11 = vpack.c.bf16 %v4272_v8, %v4270_v32  ;;  %3517 = vrot.lane.b32.xlu0 %v4009_v2, %s6306_s14 }
 0x4b4   : > { %3326 = vrot.lane.b32.xlu1 %v7931_v52, %s6305_s30  ;;  %v3625_v52 = vld [vmem:[#allocation3 + $0x12a] sm:$0xff] }
 0x4b5   : > { %4550 = vmatmul.mubr.bf16.gmra.mxu1 %v4322_v11  ;;  %v3502_v4 = vpop.permute.xlu0 %3501 }
 0x4b6   : > { %v3311_v33 = vpop.permute.xlu1 %3310  ;;  %5958 = vmatprep.mubr.msk.bf16.mxu1 %vm2691_vm0, %v4325_v15  ;;  %3584 = vst.msk [vmem:[#allocation5 + $0xe0] sm:$0xff] %vm3569_vm6, %v3502_v4  ;;  %v3628_v15 = vld [vmem:[#allocation3 + $0x152] sm:$0xff] }
 0x4b7   : > { %3392 = vst.msk [vmem:[#allocation5 + $0xf0] sm:$0xff] %vm3376_vm5, %v3311_v33  ;;  %3710 = vrot.lane.b32.xlu0 %v3624_v62, %s6307_s22 }
 0x4b8   : > { %3519 = vrot.lane.b32.xlu1 %v4010_v61, %s6306_s14 }
 0x4b9   : > { %v3695_v19 = vpop.permute.xlu0 %3694 }
 0x4ba   : > { %v3504_v51 = vpop.permute.xlu1 %3503  ;;  %3777 = vst.msk [vmem:[#allocation5 + $0xe0] sm:$0xff] %vm3762_vm7, %v3695_v19 }
 0x4bb   : > { %3585 = vst.msk [vmem:[#allocation5 + $0xf0] sm:$0xff] %vm3569_vm6, %v3504_v51  ;;  %3904 = vrot.lane.b32.xlu0 %v8027_v9, %s6302_s25  ;;  %v3629_v51 = vld [vmem:[#allocation3 + $0x15a] sm:$0xff] }
 0x4bc   : > { %3712 = vrot.lane.b32.xlu1 %v3625_v52, %s6307_s22 }
 0x4bd   : > { %v3889_v12 = vpop.permute.xlu0 %3888 }
 0x4be   : > { %v3697_v48 = vpop.permute.xlu1 %3696  ;;  %3971 = vst.msk [vmem:[#allocation5 + $0xe0] sm:$0xff] %vm3956_vm8, %v3889_v12 }
 0x4bf   : > { %3778 = vst.msk [vmem:[#allocation5 + $0xf0] sm:$0xff] %vm3762_vm7, %v3697_v48  ;;  %4097 = vrot.lane.b32.xlu0 %v8350_v37, %s9885_s13 }
 0x4c0   : > { %3906 = vrot.lane.b32.xlu1 %v8042_v24, %s6302_s25 }
 0x4c1   : > { %v4082_v55 = vpop.permute.xlu0 %4081 }
 0x4c2   : > { %v3891_v59 = vpop.permute.xlu1 %3890  ;;  %4164 = vst.msk [vmem:[#allocation5 + $0xe0] sm:$0xff] %vm4149_vm9, %v4082_v55  ;;  %v8444_v55 = vld [vmem:[#allocation3 + $0x169] sm:$0xff] }
 0x4c3   : > { %3972 = vst.msk [vmem:[#allocation5 + $0xf0] sm:$0xff] %vm3956_vm8, %v3891_v59  ;;  %2942 = vrot.lane.b32.xlu0 %v4009_v2, %s6300_s15 }
 0x4c4   : > { %4099 = vrot.lane.b32.xlu1 %v8358_v63, %s9885_s13 }
 0x4c5   : > { %v2927_v0 = vpop.permute.xlu0 %2926 }
 0x4c6   : > { %v4084_v1 = vpop.permute.xlu1 %4083  ;;  %3007 = vst.msk [vmem:[#allocation5 + $0x100] sm:$0xff] %vm2990_vm3, %v2927_v0 }
 0x4c7   : > { %4165 = vst.msk [vmem:[#allocation5 + $0xf0] sm:$0xff] %vm4149_vm9, %v4084_v1  ;;  %3135 = vrot.lane.b32.xlu0 %v3624_v62, %s9878_s16 }
 0x4c8   : > { %2944 = vrot.lane.b32.xlu1 %v4010_v61, %s6300_s15 }
 0x4c9   : > { %v3120_v41 = vpop.permute.xlu0 %3119  ;;  %v4274_v38 = vld [vmem:[#allocation5 + $0xe0] sm:$0xff] }
 0x4ca   : > { %v2929_v23 = vpop.permute.xlu1 %2928  ;;  %3200 = vst.msk [vmem:[#allocation5 + $0x100] sm:$0xff] %vm3183_vm4, %v3120_v41 }
 0x4cb   : > { %3008 = vst.msk [vmem:[#allocation5 + $0x110] sm:$0xff] %vm2990_vm3, %v2929_v23  ;;  %3328 = vrot.lane.b32.xlu0 %v8027_v9, %s6305_s30 }
 0x4cc   : > { %3137 = vrot.lane.b32.xlu1 %v3625_v52, %s9878_s16 }
 0x4cd   : > { %v3313_v35 = vpop.permute.xlu0 %3312 }
 0x4ce   : > { %v3122_v30 = vpop.permute.xlu1 %3121  ;;  %v4276_v31 = vld [vmem:[#allocation5 + $0xf0] sm:$0xff]  ;;  %3393 = vst.msk [vmem:[#allocation5 + $0x100] sm:$0xff] %vm3376_vm5, %v3313_v35 }
 0x4cf   : > { %3201 = vst.msk [vmem:[#allocation5 + $0x110] sm:$0xff] %vm3183_vm4, %v3122_v30  ;;  %v4324_v21 = vpack.c.bf16 %v4276_v31, %v4274_v38  ;;  %3521 = vrot.lane.b32.xlu0 %v8350_v37, %s6306_s14 }
 0x4d0   : > { %3330 = vrot.lane.b32.xlu1 %v8042_v24, %s6305_s30 }
 0x4d1   : > { %4558 = vmatmul.mubr.bf16.gmra.mxu1 %v4324_v21  ;;  %v3506_v46 = vpop.permute.xlu0 %3505  ;;  %v4287_v21 = vld [vmem:[#allocation5 + $0x148] sm:$0xff] }
 0x4d2   : > { %v3315_v9 = vpop.permute.xlu1 %3314  ;;  %5959 = vmatprep.mubr.msk.bf16.mxu1 %vm2691_vm0, %v4327_v25  ;;  %3586 = vst.msk [vmem:[#allocation5 + $0x100] sm:$0xff] %vm3569_vm6, %v3506_v46  ;;  %v4289_v25 = vld [vmem:[#allocation5 + $0x158] sm:$0xff] }
 0x4d3   : > { %3394 = vst.msk [vmem:[#allocation5 + $0x110] sm:$0xff] %vm3376_vm5, %v3315_v9  ;;  %3714 = vrot.lane.b32.xlu0 %v3626_v22, %s6307_s22 }
 0x4d4   : > { %3523 = vrot.lane.b32.xlu1 %v8358_v63, %s6306_s14 }
 0x4d5   : > { %v3699_v39 = vpop.permute.xlu0 %3698 }
 0x4d6   : > { %v3508_v24 = vpop.permute.xlu1 %3507  ;;  %3779 = vst.msk [vmem:[#allocation5 + $0x100] sm:$0xff] %vm3762_vm7, %v3699_v39 }
 0x4d7   : > { %3587 = vst.msk [vmem:[#allocation5 + $0x110] sm:$0xff] %vm3569_vm6, %v3508_v24  ;;  %3908 = vrot.lane.b32.xlu0 %v8020_v13, %s6302_s25 }
 0x4d8   : > { %3716 = vrot.lane.b32.xlu1 %v3627_v40, %s6307_s22 }
 0x4d9   : > { %v3893_v47 = vpop.permute.xlu0 %3892 }
 0x4da   : > { %v3701_v44 = vpop.permute.xlu1 %3700  ;;  %3973 = vst.msk [vmem:[#allocation5 + $0x100] sm:$0xff] %vm3956_vm8, %v3893_v47 }
 0x4db   : > { %3780 = vst.msk [vmem:[#allocation5 + $0x110] sm:$0xff] %vm3762_vm7, %v3701_v44  ;;  %4101 = vrot.lane.b32.xlu0 %v8391_v28, %s9885_s13 }
 0x4dc   : > { %3910 = vrot.lane.b32.xlu1 %v8034_v50, %s6302_s25 }
 0x4dd   : > { %v4086_v53 = vpop.permute.xlu0 %4085 }
 0x4de   : > { %v3895_v56 = vpop.permute.xlu1 %3894  ;;  %4166 = vst.msk [vmem:[#allocation5 + $0x100] sm:$0xff] %vm4149_vm9, %v4086_v53 }
 0x4df   : > { %3974 = vst.msk [vmem:[#allocation5 + $0x110] sm:$0xff] %vm3956_vm8, %v3895_v56  ;;  %v4503_v49 = vpop.f32.mrf.mxu1  ;;  %2946 = vrot.lane.b32.xlu0 %v8350_v37, %s6300_s15 }
 0x4e0   : > { %4103 = vrot.lane.b32.xlu1 %v8404_v5, %s9885_s13  ;;  %v4504_v34 = vadd.f32 %v8402_v54, %v4503_v49 }
 0x4e1   : > { %v4505_v57 = vpop.f32.mrf.mxu1  ;;  %v2931_v16 = vpop.permute.xlu0 %2930 }
 0x4e2   : > { %v4088_v58 = vpop.permute.xlu1 %4087  ;;  %3009 = vst.msk [vmem:[#allocation5 + $0x120] sm:$0xff] %vm2990_vm3, %v2931_v16  ;;  %v4630_v20 = vmax.f32 %v4504_v34, 0.0 }
 0x4e3   : > { %4167 = vst.msk [vmem:[#allocation5 + $0x110] sm:$0xff] %vm4149_vm9, %v4088_v58  ;;  %v4506_v10 = vpop.f32.mrf.mxu1  ;;  %3139 = vrot.lane.b32.xlu0 %v3626_v22, %s9878_s16 }
 0x4e4   : > { %v4507_v17 = vadd.f32 %v8402_v54, %v4506_v10  ;;  %2948 = vrot.lane.b32.xlu1 %v8358_v63, %s6300_s15  ;;  %v3631_v10 = vld [vmem:[#allocation3 + $0x172] sm:$0xff] }
 0x4e5   : > { %v4508_v2 = vpop.f32.mrf.mxu1  ;;  %v3124_v42 = vpop.permute.xlu0 %3123  ;;  %v4278_v7 = vld [vmem:[#allocation5 + $0x100] sm:$0xff] }
 0x4e6   : > { %v4631_v60 = vmax.f32 %v4507_v17, 0.0  ;;  %v2933_v61 = vpop.permute.xlu1 %2932  ;;  %3202 = vst.msk [vmem:[#allocation5 + $0x120] sm:$0xff] %vm3183_vm4, %v3124_v42  ;;  %v3824_v17 = vld [vmem:[#allocation3 + $0x180] sm:$0xff] }
 0x4e7   : > { %3010 = vst.msk [vmem:[#allocation5 + $0x130] sm:$0xff] %vm2990_vm3, %v2933_v61  ;;  %3332 = vrot.lane.b32.xlu0 %v8020_v13, %s6305_s30  ;;  %v4329_v13 = vpack.c.bf16 %v4285_v6, %v4283_v18  ;;  %v4017_v61 = vld [vmem:[#allocation3 + $0x181] sm:$0xff]  ;;  %v4018_v18 = vld [vmem:[#allocation3 + $0x189] sm:$0xff] }
 0x4e8   : > { %v4662_v3 = vpack.c.bf16 %v4631_v60, %v4630_v20  ;;  %3141 = vrot.lane.b32.xlu1 %v3627_v40, %s9878_s16  ;;  %v3825_v60 = vld [vmem:[#allocation3 + $0x188] sm:$0xff] }
 0x4e9   : > { %v3317_v45 = vpop.permute.xlu0 %3316 }
 0x4ea   : > { %v3126_v36 = vpop.permute.xlu1 %3125  ;;  %6118 = vmatprep.mubr.msk.bf16.mxu0 %vm2691_vm0, %v4662_v3  ;;  %v4280_v27 = vld [vmem:[#allocation5 + $0x110] sm:$0xff]  ;;  %3395 = vst.msk [vmem:[#allocation5 + $0x120] sm:$0xff] %vm3376_vm5, %v3317_v45 }
 0x4eb   : > { %3203 = vst.msk [vmem:[#allocation5 + $0x130] sm:$0xff] %vm3183_vm4, %v3126_v36  ;;  %v4326_v32 = vpack.c.bf16 %v4280_v27, %v4278_v7  ;;  %3525 = vrot.lane.b32.xlu0 %v8391_v28, %s6306_s14 }
 0x4ec   : > { %3334 = vrot.lane.b32.xlu1 %v8034_v50, %s6305_s30 }
 0x4ed   : > { %4566 = vmatmul.mubr.bf16.gmra.mxu1 %v4326_v32  ;;  %v3510_v11 = vpop.permute.xlu0 %3509  ;;  %v4291_v32 = vld [vmem:[#allocation5 + $0x168] sm:$0xff] }
 0x4ee   : > { %v3319_v8 = vpop.permute.xlu1 %3318  ;;  %5960 = vmatprep.mubr.msk.bf16.mxu1 %vm2691_vm0, %v4329_v13  ;;  %3588 = vst.msk [vmem:[#allocation5 + $0x120] sm:$0xff] %vm3569_vm6, %v3510_v11  ;;  %v4293_v13 = vld [vmem:[#allocation5 + $0x178] sm:$0xff] }
 0x4ef   : > { %3396 = vst.msk [vmem:[#allocation5 + $0x130] sm:$0xff] %vm3376_vm5, %v3319_v8  ;;  %3718 = vrot.lane.b32.xlu0 %v3628_v15, %s6307_s22 }
 0x4f0   : > { %3527 = vrot.lane.b32.xlu1 %v8404_v5, %s6306_s14 }
 0x4f1   : > { %v4511_v50 = vpop.f32.mrf.mxu1  ;;  %v3703_v4 = vpop.permute.xlu0 %3702 }
 0x4f2   : > { %v3512_v33 = vpop.permute.xlu1 %3511  ;;  %3781 = vst.msk [vmem:[#allocation5 + $0x120] sm:$0xff] %vm3762_vm7, %v3703_v4  ;;  %v4512_v19 = vadd.f32 %v8402_v54, %v4511_v50 }
 0x4f3   : > { %3589 = vst.msk [vmem:[#allocation5 + $0x130] sm:$0xff] %vm3569_vm6, %v3512_v33  ;;  %v4513_v62 = vpop.f32.mrf.mxu1  ;;  %3912 = vrot.lane.b32.xlu0 %v8174_v14, %s6302_s25 }
 0x4f4   : > { %3720 = vrot.lane.b32.xlu1 %v3629_v51, %s6307_s22  ;;  %v4632_v63 = vmax.f32 %v4512_v19, 0.0 }
 0x4f5   : > { %v4514_v52 = vpop.f32.mrf.mxu1  ;;  %v3897_v37 = vpop.permute.xlu0 %3896 }
 0x4f6   : > { %v4515_v48 = vadd.f32 %v8402_v54, %v4514_v52  ;;  %v3705_v12 = vpop.permute.xlu1 %3704  ;;  %3975 = vst.msk [vmem:[#allocation5 + $0x120] sm:$0xff] %vm3956_vm8, %v3897_v37 }
 0x4f7   : > { %3782 = vst.msk [vmem:[#allocation5 + $0x130] sm:$0xff] %vm3762_vm7, %v3705_v12  ;;  %v4516_v59 = vpop.f32.mrf.mxu1  ;;  %4105 = vrot.lane.b32.xlu0 %v8444_v55, %s9885_s13 }
 0x4f8   : > { %v4633_v1 = vmax.f32 %v4515_v48, 0.0  ;;  %3914 = vrot.lane.b32.xlu1 %v8187_v29, %s6302_s25  ;;  %v3632_v59 = vld [vmem:[#allocation3 + $0x182] sm:$0xff] }
 0x4f9   : > { %v4090_v41 = vpop.permute.xlu0 %4089 }
 0x4fa   : > { %v4663_v0 = vpack.c.bf16 %v4633_v1, %v4632_v63  ;;  %v3899_v23 = vpop.permute.xlu1 %3898  ;;  %4168 = vst.msk [vmem:[#allocation5 + $0x120] sm:$0xff] %vm4149_vm9, %v4090_v41  ;;  %v3826_v41 = vld [vmem:[#allocation3 + $0x198] sm:$0xff] }
 0x4fb   : > { %3976 = vst.msk [vmem:[#allocation5 + $0x130] sm:$0xff] %vm3956_vm8, %v3899_v23  ;;  %2950 = vrot.lane.b32.xlu0 %v8391_v28, %s6300_s15 }
 0x4fc   : > { %4107 = vrot.lane.b32.xlu1 %v8452_v43, %s9885_s13  ;;  %6119 = vmatmul.mubr.msk.bf16.vlgmr.msra.gmra.mxu0 %vm2691_vm0, %v4663_v0 }
 0x4fd   : > { %v2935_v30 = vpop.permute.xlu0 %2934 }
 0x4fe   : > { %v4092_v26 = vpop.permute.xlu1 %4091  ;;  %3011 = vst.msk [vmem:[#allocation5 + $0x140] sm:$0xff] %vm2990_vm3, %v2935_v30 }
 0x4ff   : > { %4169 = vst.msk [vmem:[#allocation5 + $0x130] sm:$0xff] %vm4149_vm9, %v4092_v26  ;;  %3143 = vrot.lane.b32.xlu0 %v3628_v15, %s9878_s16  ;;  %v3827_v26 = vld [vmem:[#allocation3 + $0x1a0] sm:$0xff] }
 0x500   : > { %2952 = vrot.lane.b32.xlu1 %v8404_v5, %s6300_s15  ;;  %v3630_v5 = vld [vmem:[#allocation3 + $0x16a] sm:$0xff] }
 0x501   : > { %v3128_v38 = vpop.permute.xlu0 %3127  ;;  %v4282_v22 = vld [vmem:[#allocation5 + $0x120] sm:$0xff] }
 0x502   : > { %v2937_v35 = vpop.permute.xlu1 %2936  ;;  %3204 = vst.msk [vmem:[#allocation5 + $0x140] sm:$0xff] %vm3183_vm4, %v3128_v38  ;;  %v4019_v38 = vld [vmem:[#allocation3 + $0x199] sm:$0xff] }
 0x503   : > { %3012 = vst.msk [vmem:[#allocation5 + $0x150] sm:$0xff] %vm2990_vm3, %v2937_v35  ;;  %3336 = vrot.lane.b32.xlu0 %v8174_v14, %s6305_s30  ;;  %v4331_v14 = vpack.c.bf16 %v4289_v25, %v4287_v21  ;;  %v4213_v21 = vld [vmem:[#allocation3 + $0x1a2] sm:$0xff] }
 0x504   : > { %3145 = vrot.lane.b32.xlu1 %v3629_v51, %s9878_s16  ;;  %v4333_v51 = vpack.c.bf16 %v4293_v13, %v4291_v32  ;;  %v4020_v25 = vld [vmem:[#allocation3 + $0x1a1] sm:$0xff]  ;;  %4245 = vst.msk [vmem:[#allocation5 + $0x1f8] sm:$0xff] %vm2691_vm0, %v4213_v21 }
 0x505   : > { %v4519_v31 = vpop.f32.mrf.mxu1  ;;  %v3321_v46 = vpop.permute.xlu0 %3320 }
 0x506   : > { %v3130_v9 = vpop.permute.xlu1 %3129  ;;  %v4284_v24 = vld [vmem:[#allocation5 + $0x130] sm:$0xff]  ;;  %3397 = vst.msk [vmem:[#allocation5 + $0x140] sm:$0xff] %vm3376_vm5, %v3321_v46  ;;  %v4520_v44 = vadd.f32 %v8402_v54, %v4519_v31 }
 0x507   : > { %3205 = vst.msk [vmem:[#allocation5 + $0x150] sm:$0xff] %vm3183_vm4, %v3130_v9  ;;  %v4521_v39 = vpop.f32.mrf.mxu1  ;;  %v4328_v40 = vpack.c.bf16 %v4284_v24, %v4282_v22  ;;  %3529 = vrot.lane.b32.xlu0 %v8444_v55, %s6306_s14  ;;  %v4212_v31 = vld [vmem:[#allocation3 + $0x19a] sm:$0xff] }
 0x508   : > { %3338 = vrot.lane.b32.xlu1 %v8187_v29, %s6305_s30  ;;  %v4634_v57 = vmax.f32 %v4520_v44, 0.0  ;;  %4244 = vst.msk [vmem:[#allocation5 + $0x1e8] sm:$0xff] %vm2691_vm0, %v4212_v31 }
 0x509   : > { %v4522_v47 = vpop.f32.mrf.mxu1  ;;  %4574 = vmatmul.mubr.bf16.gmra.mxu1 %v4328_v40  ;;  %v3514_v53 = vpop.permute.xlu0 %3513 }
 0x50a   : > { %v4523_v28 = vadd.f32 %v8402_v54, %v4522_v47  ;;  %v3323_v56 = vpop.permute.xlu1 %3322  ;;  %5961 = vmatprep.mubr.msk.bf16.mxu1 %vm2691_vm0, %v4331_v14  ;;  %3590 = vst.msk [vmem:[#allocation5 + $0x140] sm:$0xff] %vm3569_vm6, %v3514_v53  ;;  %v4295_v14 = vld [vmem:[#allocation5 + $0x188] sm:$0xff]  ;;  %v4297_v47 = vld [vmem:[#allocation5 + $0x198] sm:$0xff] }
 0x50b   : > { %3398 = vst.msk [vmem:[#allocation5 + $0x150] sm:$0xff] %vm3376_vm5, %v3323_v56  ;;  %v4524_v49 = vpop.f32.mrf.mxu1  ;;  %3722 = vrot.lane.b32.xlu0 %v3630_v5, %s6307_s22 }
 0x50c   : > { %v4635_v29 = vmax.f32 %v4523_v28, 0.0  ;;  %3531 = vrot.lane.b32.xlu1 %v8452_v43, %s6306_s14 }
 0x50d   : > { %v3707_v16 = vpop.permute.xlu0 %3706 }
 0x50e   : > { %v4664_v34 = vpack.c.bf16 %v4635_v29, %v4634_v57  ;;  %v3516_v58 = vpop.permute.xlu1 %3515  ;;  %3783 = vst.msk [vmem:[#allocation5 + $0x140] sm:$0xff] %vm3762_vm7, %v3707_v16 }
 0x50f   : > { %3591 = vst.msk [vmem:[#allocation5 + $0x150] sm:$0xff] %vm3569_vm6, %v3516_v58  ;;  %3916 = vrot.lane.b32.xlu0 %v3824_v17, %s6302_s25 }
 0x510   : > { %3724 = vrot.lane.b32.xlu1 %v3631_v10, %s6307_s22  ;;  %6122 = vmatprep.mubr.msk.bf16.mxu0 %vm2691_vm0, %v4664_v34  ;;  %v4335_v34 = vpack.c.bf16 %v4297_v47, %v4295_v14 }
 0x511   : > { %v3901_v20 = vpop.permute.xlu0 %3900 }
 0x512   : > { %v3709_v2 = vpop.permute.xlu1 %3708  ;;  %3977 = vst.msk [vmem:[#allocation5 + $0x140] sm:$0xff] %vm3956_vm8, %v3901_v20 }
 0x513   : > { %3784 = vst.msk [vmem:[#allocation5 + $0x150] sm:$0xff] %vm3762_vm7, %v3709_v2  ;;  %4109 = vrot.lane.b32.xlu0 %v4017_v61, %s9885_s13 }
 0x514   : > { %3918 = vrot.lane.b32.xlu1 %v3825_v60, %s6302_s25 }
 0x515   : > { %v4094_v3 = vpop.permute.xlu0 %4093 }
 0x516   : > { %v3903_v42 = vpop.permute.xlu1 %3902  ;;  %4170 = vst.msk [vmem:[#allocation5 + $0x140] sm:$0xff] %vm4149_vm9, %v4094_v3 }
 0x517   : > { %3978 = vst.msk [vmem:[#allocation5 + $0x150] sm:$0xff] %vm3956_vm8, %v3903_v42  ;;  %2954 = vrot.lane.b32.xlu0 %v8444_v55, %s6300_s15 }
 0x518   : > { %4111 = vrot.lane.b32.xlu1 %v4018_v18, %s9885_s13 }
 0x519   : > { %v2939_v36 = vpop.permute.xlu0 %2938 }
 0x51a   : > { %v4096_v6 = vpop.permute.xlu1 %4095  ;;  %3013 = vst.msk [vmem:[#allocation5 + $0x160] sm:$0xff] %vm2990_vm3, %v2939_v36 }
 0x51b   : > { %4171 = vst.msk [vmem:[#allocation5 + $0x150] sm:$0xff] %vm4149_vm9, %v4096_v6  ;;  %3147 = vrot.lane.b32.xlu0 %v3630_v5, %s9878_s16 }
 0x51c   : > { %2956 = vrot.lane.b32.xlu1 %v8452_v43, %s6300_s15  ;;  %v3633_v43 = vld [vmem:[#allocation3 + $0x18a] sm:$0xff]  ;;  %s5993_s15 = sshll.u32 %s6391_s21, 10 }
 0x51d   : > { %v3132_v7 = vpop.permute.xlu0 %3131  ;;  %v4286_v15 = vld [vmem:[#allocation5 + $0x140] sm:$0xff]  ;;  %s9811_s12 = scalar_lea.hbm %s9871_s11, %s5993_s15 }
 0x51e   : > { %v2941_v45 = vpop.permute.xlu1 %2940  ;;  %3206 = vst.msk [vmem:[#allocation5 + $0x160] sm:$0xff] %vm3183_vm4, %v3132_v7 }
 0x51f   : > { %3014 = vst.msk [vmem:[#allocation5 + $0x170] sm:$0xff] %vm2990_vm3, %v2941_v45  ;;  %3340 = vrot.lane.b32.xlu0 %v3824_v17, %s6305_s30 }
 0x520   : > { %3149 = vrot.lane.b32.xlu1 %v3631_v10, %s9878_s16 }
 0x521   : > { %v4527_v27 = vpop.f32.mrf.mxu1  ;;  %v3325_v11 = vpop.permute.xlu0 %3324 }
 0x522   : > { %v3134_v8 = vpop.permute.xlu1 %3133  ;;  %v4288_v50 = vld [vmem:[#allocation5 + $0x150] sm:$0xff]  ;;  %3399 = vst.msk [vmem:[#allocation5 + $0x160] sm:$0xff] %vm3376_vm5, %v3325_v11  ;;  %v4528_v62 = vadd.f32 %v8402_v54, %v4527_v27  ;;  %v4299_v11 = vld [vmem:[#allocation5 + $0x1a8] sm:$0xff] }
 0x523   : > { %3207 = vst.msk [vmem:[#allocation5 + $0x170] sm:$0xff] %vm3183_vm4, %v3134_v8  ;;  %v4529_v33 = vpop.f32.mrf.mxu1  ;;  %v4330_v4 = vpack.c.bf16 %v4288_v50, %v4286_v15  ;;  %3533 = vrot.lane.b32.xlu0 %v4017_v61, %s6306_s14  ;;  %v4301_v15 = vld [vmem:[#allocation5 + $0x1b8] sm:$0xff] }
 0x524   : > { %3342 = vrot.lane.b32.xlu1 %v3825_v60, %s6305_s30  ;;  %v4636_v55 = vmax.f32 %v4528_v62, 0.0 }
 0x525   : > { %v4530_v19 = vpop.f32.mrf.mxu1  ;;  %4582 = vmatmul.mubr.bf16.gmra.mxu1 %v4330_v4  ;;  %v3518_v12 = vpop.permute.xlu0 %3517 }
 0x526   : > { %v4531_v52 = vadd.f32 %v8402_v54, %v4530_v19  ;;  %v3327_v48 = vpop.permute.xlu1 %3326  ;;  %5962 = vmatprep.mubr.msk.bf16.mxu1 %vm2691_vm0, %v4333_v51  ;;  %3592 = vst.msk [vmem:[#allocation5 + $0x160] sm:$0xff] %vm3569_vm6, %v3518_v12 }
 0x527   : > { %3400 = vst.msk [vmem:[#allocation5 + $0x170] sm:$0xff] %vm3376_vm5, %v3327_v48  ;;  %v4532_v37 = vpop.f32.mrf.mxu1  ;;  %3726 = vrot.lane.b32.xlu0 %v3632_v59, %s6307_s22  ;;  %v4337_v48 = vpack.c.bf16 %v4301_v15, %v4299_v11 }
 0x528   : > { %v4637_v63 = vmax.f32 %v4531_v52, 0.0  ;;  %3535 = vrot.lane.b32.xlu1 %v4018_v18, %s6306_s14 }
 0x529   : > { %v3711_v23 = vpop.permute.xlu0 %3710 }
 0x52a   : > { %v4665_v1 = vpack.c.bf16 %v4637_v63, %v4636_v55  ;;  %v3520_v0 = vpop.permute.xlu1 %3519  ;;  %3785 = vst.msk [vmem:[#allocation5 + $0x160] sm:$0xff] %vm3762_vm7, %v3711_v23 }
 0x52b   : > { %3593 = vst.msk [vmem:[#allocation5 + $0x170] sm:$0xff] %vm3569_vm6, %v3520_v0  ;;  %3920 = vrot.lane.b32.xlu0 %v3826_v41, %s6302_s25 }
 0x52c   : > { %3728 = vrot.lane.b32.xlu1 %v3633_v43, %s6307_s22  ;;  %6123 = vmatmul.mubr.msk.bf16.gmra.mxu0 %vm2691_vm0, %v4665_v1 }
 0x52d   : > { %v3905_v35 = vpop.permute.xlu0 %3904 }
 0x52e   : > { %v3713_v30 = vpop.permute.xlu1 %3712  ;;  %3979 = vst.msk [vmem:[#allocation5 + $0x160] sm:$0xff] %vm3956_vm8, %v3905_v35 }
 0x52f   : > { %3786 = vst.msk [vmem:[#allocation5 + $0x170] sm:$0xff] %vm3762_vm7, %v3713_v30  ;;  %4113 = vrot.lane.b32.xlu0 %v4019_v38, %s9885_s13 }
 0x530   : > { %3922 = vrot.lane.b32.xlu1 %v3827_v26, %s6302_s25 }
 0x531   : > { %v4098_v46 = vpop.permute.xlu0 %4097 }
 0x532   : > { %v3907_v9 = vpop.permute.xlu1 %3906  ;;  %4172 = vst.msk [vmem:[#allocation5 + $0x160] sm:$0xff] %vm4149_vm9, %v4098_v46 }
 0x533   : > { %3980 = vst.msk [vmem:[#allocation5 + $0x170] sm:$0xff] %vm3956_vm8, %v3907_v9 }
 0x534   : > { %4115 = vrot.lane.b32.xlu1 %v4020_v25, %s9885_s13 }
 0x535   : > { %v2943_v24 = vpop.permute.xlu0 %2942 }
 0x536   : > { %v4100_v22 = vpop.permute.xlu1 %4099  ;;  %3015 = vst.msk [vmem:[#allocation5 + $0x180] sm:$0xff] %vm2990_vm3, %v2943_v24  ;;  %v4305_v24 = vld [vmem:[#allocation5 + $0x1d8] sm:$0xff] }
 0x537   : > { %4173 = vst.msk [vmem:[#allocation5 + $0x170] sm:$0xff] %vm4149_vm9, %v4100_v22  ;;  %v4303_v22 = vld [vmem:[#allocation5 + $0x1c8] sm:$0xff] }
 0x539   : > { %v3136_v40 = vpop.permute.xlu0 %3135  ;;  %v4290_v53 = vld [vmem:[#allocation5 + $0x160] sm:$0xff] }
 0x53a   : > { %v2945_v39 = vpop.permute.xlu1 %2944  ;;  %3208 = vst.msk [vmem:[#allocation5 + $0x180] sm:$0xff] %vm3183_vm4, %v3136_v40 }
 0x53b   : > { %3016 = vst.msk [vmem:[#allocation5 + $0x190] sm:$0xff] %vm2990_vm3, %v2945_v39 }
 0x53d   : > { %v4535_v44 = vpop.f32.mrf.mxu1  ;;  %v3329_v56 = vpop.permute.xlu0 %3328 }
 0x53e   : > { %v3138_v28 = vpop.permute.xlu1 %3137  ;;  %v4292_v49 = vld [vmem:[#allocation5 + $0x170] sm:$0xff]  ;;  %3401 = vst.msk [vmem:[#allocation5 + $0x180] sm:$0xff] %vm3376_vm5, %v3329_v56  ;;  %v4536_v29 = vadd.f32 %v8402_v54, %v4535_v44 }
 0x53f   : > { %3209 = vst.msk [vmem:[#allocation5 + $0x190] sm:$0xff] %vm3183_vm4, %v3138_v28  ;;  %v4537_v5 = vpop.f32.mrf.mxu1  ;;  %v4332_v57 = vpack.c.bf16 %v4292_v49, %v4290_v53  ;;  %v4339_v53 = vpack.c.bf16 %v4305_v24, %v4303_v22 }
 0x540   : > { %v4638_v20 = vmax.f32 %v4536_v29, 0.0 }
 0x541   : > { %v4538_v58 = vpop.f32.mrf.mxu1  ;;  %4590 = vmatmul.mubr.bf16.gmra.mxu1 %v4332_v57  ;;  %v3522_v17 = vpop.permute.xlu0 %3521 }
 0x542   : > { %v4539_v16 = vadd.f32 %v8402_v54, %v4538_v58  ;;  %v3331_v10 = vpop.permute.xlu1 %3330  ;;  %5963 = vmatprep.mubr.msk.bf16.mxu1 %vm2691_vm0, %v4335_v34  ;;  %3594 = vst.msk [vmem:[#allocation5 + $0x180] sm:$0xff] %vm3569_vm6, %v3522_v17 }
 0x543   : > { %3402 = vst.msk [vmem:[#allocation5 + $0x190] sm:$0xff] %vm3376_vm5, %v3331_v10  ;;  %v4540_v2 = vpop.f32.mrf.mxu1 }
 0x544   : > { %v4639_v60 = vmax.f32 %v4539_v16, 0.0 }
 0x545   : > { %v3715_v3 = vpop.permute.xlu0 %3714 }
 0x546   : > { %v4666_v61 = vpack.c.bf16 %v4639_v60, %v4638_v20  ;;  %v3524_v42 = vpop.permute.xlu1 %3523  ;;  %3787 = vst.msk [vmem:[#allocation5 + $0x180] sm:$0xff] %vm3762_vm7, %v3715_v3 }
 0x547   : > { %3595 = vst.msk [vmem:[#allocation5 + $0x190] sm:$0xff] %vm3569_vm6, %v3524_v42 }
 0x548   : > { %6126 = vmatprep.mubr.msk.bf16.mxu0 %vm2691_vm0, %v4666_v61 }
 0x549   : > { %v3909_v6 = vpop.permute.xlu0 %3908 }
 0x54a   : > { %v3717_v18 = vpop.permute.xlu1 %3716  ;;  %3981 = vst.msk [vmem:[#allocation5 + $0x180] sm:$0xff] %vm3956_vm8, %v3909_v6 }
 0x54b   : > { %3788 = vst.msk [vmem:[#allocation5 + $0x190] sm:$0xff] %vm3762_vm7, %v3717_v18 }
 0x54d   : > { %v4102_v45 = vpop.permute.xlu0 %4101 }
 0x54e   : > { %v3911_v36 = vpop.permute.xlu1 %3910  ;;  %4174 = vst.msk [vmem:[#allocation5 + $0x180] sm:$0xff] %vm4149_vm9, %v4102_v45  ;;  %v4307_v45 = vld [vmem:[#allocation5 + $0x1e8] sm:$0xff] }
 0x54f   : > { %3982 = vst.msk [vmem:[#allocation5 + $0x190] sm:$0xff] %vm3956_vm8, %v3911_v36 }
 0x551   : > { %v2947_v27 = vpop.permute.xlu0 %2946 }
 0x552   : > { %v4104_v7 = vpop.permute.xlu1 %4103  ;;  %3017 = vst.msk [vmem:[#allocation5 + $0x1a0] sm:$0xff] %vm2990_vm3, %v2947_v27 }
 0x553   : > { %4175 = vst.msk [vmem:[#allocation5 + $0x190] sm:$0xff] %vm4149_vm9, %v4104_v7  ;;  %v4309_v7 = vld [vmem:[#allocation5 + $0x1f8] sm:$0xff] }
 0x554   : > { %v4341_v15 = vpack.c.bf16 %v4309_v7, %v4307_v45 }
 0x555   : > { %v3140_v13 = vpop.permute.xlu0 %3139  ;;  %v4294_v4 = vld [vmem:[#allocation5 + $0x180] sm:$0xff] }
 0x556   : > { %v2949_v32 = vpop.permute.xlu1 %2948  ;;  %3210 = vst.msk [vmem:[#allocation5 + $0x1a0] sm:$0xff] %vm3183_vm4, %v3140_v13 }
 0x557   : > { %3018 = vst.msk [vmem:[#allocation5 + $0x1b0] sm:$0xff] %vm2990_vm3, %v2949_v32 }
 0x559   : > { %v4543_v8 = vpop.f32.mrf.mxu1  ;;  %v3333_v33 = vpop.permute.xlu0 %3332 }
 0x55a   : > { %v3142_v50 = vpop.permute.xlu1 %3141  ;;  %v4296_v62 = vld [vmem:[#allocation5 + $0x190] sm:$0xff]  ;;  %3403 = vst.msk [vmem:[#allocation5 + $0x1a0] sm:$0xff] %vm3376_vm5, %v3333_v33  ;;  %v4544_v52 = vadd.f32 %v8402_v54, %v4543_v8 }
 0x55b   : > { %3211 = vst.msk [vmem:[#allocation5 + $0x1b0] sm:$0xff] %vm3183_vm4, %v3142_v50  ;;  %v4545_v51 = vpop.f32.mrf.mxu1  ;;  %v4334_v19 = vpack.c.bf16 %v4296_v62, %v4294_v4 }
 0x55c   : > { %v4640_v1 = vmax.f32 %v4544_v52, 0.0 }
 0x55d   : > { %v4546_v12 = vpop.f32.mrf.mxu1  ;;  %4598 = vmatmul.mubr.bf16.gmra.mxu1 %v4334_v19  ;;  %v3526_v55 = vpop.permute.xlu0 %3525 }
 0x55e   : > { %v4547_v37 = vadd.f32 %v8402_v54, %v4546_v12  ;;  %v3335_v59 = vpop.permute.xlu1 %3334  ;;  %5964 = vmatprep.mubr.msk.bf16.mxu1 %vm2691_vm0, %v4337_v48  ;;  %3596 = vst.msk [vmem:[#allocation5 + $0x1a0] sm:$0xff] %vm3569_vm6, %v3526_v55 }
 0x55f   : > { %3404 = vst.msk [vmem:[#allocation5 + $0x1b0] sm:$0xff] %vm3376_vm5, %v3335_v59  ;;  %v4548_v63 = vpop.f32.mrf.mxu1 }
 0x560   : > { %v4641_v0 = vmax.f32 %v4547_v37, 0.0 }
 0x561   : > { %v3719_v43 = vpop.permute.xlu0 %3718 }
 0x562   : > { %v4667_v23 = vpack.c.bf16 %v4641_v0, %v4640_v1  ;;  %v3528_v41 = vpop.permute.xlu1 %3527  ;;  %3789 = vst.msk [vmem:[#allocation5 + $0x1a0] sm:$0xff] %vm3762_vm7, %v3719_v43 }
 0x563   : > { %3597 = vst.msk [vmem:[#allocation5 + $0x1b0] sm:$0xff] %vm3569_vm6, %v3528_v41 }
 0x564   : > { %6127 = vmatmul.mubr.msk.bf16.gmra.mxu0 %vm2691_vm0, %v4667_v23 }
 0x565   : > { %v3913_v30 = vpop.permute.xlu0 %3912 }
 0x566   : > { %v3721_v26 = vpop.permute.xlu1 %3720  ;;  %3983 = vst.msk [vmem:[#allocation5 + $0x1a0] sm:$0xff] %vm3956_vm8, %v3913_v30 }
 0x567   : > { %3790 = vst.msk [vmem:[#allocation5 + $0x1b0] sm:$0xff] %vm3762_vm7, %v3721_v26 }
 0x569   : > { %v4106_v38 = vpop.permute.xlu0 %4105 }
 0x56a   : > { %v3915_v35 = vpop.permute.xlu1 %3914  ;;  %4176 = vst.msk [vmem:[#allocation5 + $0x1a0] sm:$0xff] %vm4149_vm9, %v4106_v38 }
 0x56b   : > { %3984 = vst.msk [vmem:[#allocation5 + $0x1b0] sm:$0xff] %vm3956_vm8, %v3915_v35 }
 0x56d   : > { %v2951_v21 = vpop.permute.xlu0 %2950 }
 0x56e   : > { %v4108_v31 = vpop.permute.xlu1 %4107  ;;  %3019 = vst.msk [vmem:[#allocation5 + $0x1c0] sm:$0xff] %vm2990_vm3, %v2951_v21 }
 0x56f   : > { %4177 = vst.msk [vmem:[#allocation5 + $0x1b0] sm:$0xff] %vm4149_vm9, %v4108_v31 }
 0x571   : > { %v3144_v9 = vpop.permute.xlu0 %3143  ;;  %v4298_v44 = vld [vmem:[#allocation5 + $0x1a0] sm:$0xff] }
 0x572   : > { %v2953_v25 = vpop.permute.xlu1 %2952  ;;  %3212 = vst.msk [vmem:[#allocation5 + $0x1c0] sm:$0xff] %vm3183_vm4, %v3144_v9 }
 0x573   : > { %3020 = vst.msk [vmem:[#allocation5 + $0x1d0] sm:$0xff] %vm2990_vm3, %v2953_v25 }
 0x575   : > { %v4551_v46 = vpop.f32.mrf.mxu1  ;;  %v3337_v40 = vpop.permute.xlu0 %3336 }
 0x576   : > { %v3146_v39 = vpop.permute.xlu1 %3145  ;;  %v4300_v14 = vld [vmem:[#allocation5 + $0x1b0] sm:$0xff]  ;;  %3405 = vst.msk [vmem:[#allocation5 + $0x1c0] sm:$0xff] %vm3376_vm5, %v3337_v40  ;;  %v4552_v56 = vadd.f32 %v8402_v54, %v4551_v46 }
 0x577   : > { %3213 = vst.msk [vmem:[#allocation5 + $0x1d0] sm:$0xff] %vm3183_vm4, %v3146_v39  ;;  %v4553_v47 = vpop.f32.mrf.mxu1  ;;  %v4336_v28 = vpack.c.bf16 %v4300_v14, %v4298_v44 }
 0x578   : > { %v4642_v58 = vmax.f32 %v4552_v56, 0.0 }
 0x579   : > { %v4554_v49 = vpop.f32.mrf.mxu1  ;;  %4606 = vmatmul.mubr.bf16.gmra.mxu1 %v4336_v28  ;;  %v3530_v29 = vpop.permute.xlu0 %3529 }
 0x57a   : > { %v4555_v5 = vadd.f32 %v8402_v54, %v4554_v49  ;;  %v3339_v57 = vpop.permute.xlu1 %3338  ;;  %5965 = vmatprep.mubr.msk.bf16.mxu1 %vm2691_vm0, %v4339_v53  ;;  %3598 = vst.msk [vmem:[#allocation5 + $0x1c0] sm:$0xff] %vm3569_vm6, %v3530_v29 }
 0x57b   : > { %3406 = vst.msk [vmem:[#allocation5 + $0x1d0] sm:$0xff] %vm3376_vm5, %v3339_v57  ;;  %v4556_v34 = vpop.f32.mrf.mxu1 }
 0x57c   : > { %v4643_v16 = vmax.f32 %v4555_v5, 0.0 }
 0x57d   : > { %v3723_v2 = vpop.permute.xlu0 %3722 }
 0x57e   : > { %v4668_v10 = vpack.c.bf16 %v4643_v16, %v4642_v58  ;;  %v3532_v17 = vpop.permute.xlu1 %3531  ;;  %3791 = vst.msk [vmem:[#allocation5 + $0x1c0] sm:$0xff] %vm3762_vm7, %v3723_v2 }
 0x57f   : > { %3599 = vst.msk [vmem:[#allocation5 + $0x1d0] sm:$0xff] %vm3569_vm6, %v3532_v17 }
 0x580   : > { %6130 = vmatprep.mubr.msk.bf16.mxu0 %vm2691_vm0, %v4668_v10 }
 0x581   : > { %v3917_v60 = vpop.permute.xlu0 %3916 }
 0x582   : > { %v3725_v20 = vpop.permute.xlu1 %3724  ;;  %3985 = vst.msk [vmem:[#allocation5 + $0x1c0] sm:$0xff] %vm3956_vm8, %v3917_v60 }
 0x583   : > { %3792 = vst.msk [vmem:[#allocation5 + $0x1d0] sm:$0xff] %vm3762_vm7, %v3725_v20 }
 0x585   : > { %v4110_v42 = vpop.permute.xlu0 %4109 }
 0x586   : > { %v3919_v61 = vpop.permute.xlu1 %3918  ;;  %4178 = vst.msk [vmem:[#allocation5 + $0x1c0] sm:$0xff] %vm4149_vm9, %v4110_v42 }
 0x587   : > { %3986 = vst.msk [vmem:[#allocation5 + $0x1d0] sm:$0xff] %vm3956_vm8, %v3919_v61 }
 0x589   : > { %v2955_v18 = vpop.permute.xlu0 %2954 }
 0x58a   : > { %v4112_v3 = vpop.permute.xlu1 %4111  ;;  %3021 = vst.msk [vmem:[#allocation5 + $0x1e0] sm:$0xff] %vm2990_vm3, %v2955_v18 }
 0x58b   : > { %4179 = vst.msk [vmem:[#allocation5 + $0x1d0] sm:$0xff] %vm4149_vm9, %v4112_v3 }
 0x58d   : > { %v3148_v36 = vpop.permute.xlu0 %3147  ;;  %v4302_v8 = vld [vmem:[#allocation5 + $0x1c0] sm:$0xff] }
 0x58e   : > { %v2957_v6 = vpop.permute.xlu1 %2956  ;;  %3214 = vst.msk [vmem:[#allocation5 + $0x1e0] sm:$0xff] %vm3183_vm4, %v3148_v36 }
 0x58f   : > { %3022 = vst.msk [vmem:[#allocation5 + $0x1f0] sm:$0xff] %vm2990_vm3, %v2957_v6  ;;  %vm5346_vm3 = vcmask 785920  }
 0x591   : > { %v4559_v27 = vpop.f32.mrf.mxu1  ;;  %v3341_v13 = vpop.permute.xlu0 %3340 }
 0x592   : > { %v3150_v32 = vpop.permute.xlu1 %3149  ;;  %v4304_v11 = vld [vmem:[#allocation5 + $0x1d0] sm:$0xff]  ;;  %3407 = vst.msk [vmem:[#allocation5 + $0x1e0] sm:$0xff] %vm3376_vm5, %v3341_v13  ;;  %v4560_v4 = vadd.f32 %v8402_v54, %v4559_v27 }
 0x593   : > { %3215 = vst.msk [vmem:[#allocation5 + $0x1f0] sm:$0xff] %vm3183_vm4, %v3150_v32  ;;  %v4561_v50 = vpop.f32.mrf.mxu1  ;;  %v4338_v33 = vpack.c.bf16 %v4304_v11, %v4302_v8  ;;  %vm5383_vm4 = vcmask 1048320  }
 0x594   : > { %v4644_v12 = vmax.f32 %v4560_v4, 0.0 }
 0x595   : > { %v4562_v62 = vpop.f32.mrf.mxu1  ;;  %4614 = vmatmul.mubr.bf16.gmra.mxu1 %v4338_v33  ;;  %v3534_v52 = vpop.permute.xlu0 %3533 }
 0x596   : > { %v4563_v51 = vadd.f32 %v8402_v54, %v4562_v62  ;;  %v3343_v19 = vpop.permute.xlu1 %3342  ;;  %5966 = vmatprep.mubr.msk.bf16.mxu1 %vm2691_vm0, %v4341_v15  ;;  %3600 = vst.msk [vmem:[#allocation5 + $0x1e0] sm:$0xff] %vm3569_vm6, %v3534_v52 }
 0x597   : > { %3408 = vst.msk [vmem:[#allocation5 + $0x1f0] sm:$0xff] %vm3376_vm5, %v3343_v19  ;;  %v4564_v48 = vpop.f32.mrf.mxu1 }
 0x598   : > { %v4645_v37 = vmax.f32 %v4563_v51, 0.0 }
 0x599   : > { %v3727_v63 = vpop.permute.xlu0 %3726 }
 0x59a   : > { %v4669_v59 = vpack.c.bf16 %v4645_v37, %v4644_v12  ;;  %v3536_v55 = vpop.permute.xlu1 %3535  ;;  %3793 = vst.msk [vmem:[#allocation5 + $0x1e0] sm:$0xff] %vm3762_vm7, %v3727_v63 }
 0x59b   : > { %3601 = vst.msk [vmem:[#allocation5 + $0x1f0] sm:$0xff] %vm3569_vm6, %v3536_v55 }
 0x59c   : > { %6131 = vmatmul.mubr.msk.bf16.gmra.mxu0 %vm2691_vm0, %v4669_v59 }
 0x59d   : > { %v3921_v0 = vpop.permute.xlu0 %3920 }
 0x59e   : > { %v3729_v1 = vpop.permute.xlu1 %3728  ;;  %3987 = vst.msk [vmem:[#allocation5 + $0x1e0] sm:$0xff] %vm3956_vm8, %v3921_v0 }
 0x59f   : > { %3794 = vst.msk [vmem:[#allocation5 + $0x1f0] sm:$0xff] %vm3762_vm7, %v3729_v1 }
 0x5a1   : > { %v4114_v41 = vpop.permute.xlu0 %4113 }
 0x5a2   : > { %v3923_v23 = vpop.permute.xlu1 %3922  ;;  %4180 = vst.msk [vmem:[#allocation5 + $0x1e0] sm:$0xff] %vm4149_vm9, %v4114_v41 }
 0x5a3   : > { %3988 = vst.msk [vmem:[#allocation5 + $0x1f0] sm:$0xff] %vm3956_vm8, %v3923_v23 }
 0x5a6   : > { %v4116_v43 = vpop.permute.xlu1 %4115 }
 0x5a7   : > { %4181 = vst.msk [vmem:[#allocation5 + $0x1f0] sm:$0xff] %vm4149_vm9, %v4116_v43 }
 0x5a9   : > { %v4306_v26 = vld [vmem:[#allocation5 + $0x1e0] sm:$0xff] }
 0x5ad   : > { %v4567_v30 = vpop.f32.mrf.mxu1 }
 0x5ae   : > { %v4308_v35 = vld [vmem:[#allocation5 + $0x1f0] sm:$0xff]  ;;  %v4568_v21 = vadd.f32 %v8402_v54, %v4567_v30 }
 0x5af   : > { %v4569_v38 = vpop.f32.mrf.mxu1  ;;  %v4340_v31 = vpack.c.bf16 %v4308_v35, %v4306_v26 }
 0x5b0   : > { %v4646_v22 = vmax.f32 %v4568_v21, 0.0 }
 0x5b1   : > { %v4570_v25 = vpop.f32.mrf.mxu1  ;;  %4622 = vmatmul.mubr.bf16.gmra.mxu1 %v4340_v31 }
 0x5b2   : > { %v4571_v9 = vadd.f32 %v8402_v54, %v4570_v25 }
 0x5b3   : > { %v4572_v46 = vpop.f32.mrf.mxu1 }
 0x5b4   : > { %v4647_v24 = vmax.f32 %v4571_v9, 0.0 }
 0x5b6   : > { %v4670_v39 = vpack.c.bf16 %v4647_v24, %v4646_v22 }
 0x5b8   : > { %6134 = vmatprep.mubr.msk.bf16.mxu0 %vm2691_vm0, %v4670_v39 }
 0x5c9   : > { %v4575_v40 = vpop.f32.mrf.mxu1 }
 0x5ca   : > { %v4576_v14 = vadd.f32 %v8402_v54, %v4575_v40  ;;  %v6120_v40 = vpop.f32.mrf.mxu0 }
 0x5cb   : > { %v4577_v44 = vpop.f32.mrf.mxu1 }
 0x5cc   : > { %v4648_v53 = vmax.f32 %v4576_v14, 0.0  ;;  %v4775_v44 = vpop.f32.mrf.mxu0 }
 0x5cd   : > { %v4578_v47 = vpop.f32.mrf.mxu1 }
 0x5ce   : > { %v4579_v28 = vadd.f32 %v8402_v54, %v4578_v47  ;;  %v6121_v14 = vpop.f32.mrf.mxu0 }
 0x5cf   : > { %v4580_v56 = vpop.f32.mrf.mxu1 }
 0x5d0   : > { %v4649_v49 = vmax.f32 %v4579_v28, 0.0  ;;  %v4778_v47 = vpop.f32.mrf.mxu0 }
 0x5d2   : > { %v4671_v5 = vpack.c.bf16 %v4649_v49, %v4648_v53  ;;  %v8631_v49 = vld [vmem:[%s9868_s8] ss:$0 sm:$0xff] }
 0x5d4   : > { %6135 = vmatmul.mubr.msk.bf16.gmra.mxu0 %vm2691_vm0, %v4671_v5 }
 0x5e5   : > { %v4583_v57 = vpop.f32.mrf.mxu1 }
 0x5e6   : > { %v4584_v34 = vadd.f32 %v8402_v54, %v4583_v57 }
 0x5e7   : > { %v4585_v29 = vpop.f32.mrf.mxu1 }
 0x5e8   : > { %v4650_v17 = vmax.f32 %v4584_v34, 0.0  ;;  %v8637_v29 = vadd.f32 %v8631_v49, %v4775_v44 }
 0x5e9   : > { %v4586_v58 = vpop.f32.mrf.mxu1 }
 0x5ea   : > { %v4587_v16 = vadd.f32 %v8402_v54, %v4586_v58 }
 0x5eb   : > { %v4588_v10 = vpop.f32.mrf.mxu1 }
 0x5ec   : > { %v4651_v2 = vmax.f32 %v4587_v16, 0.0  ;;  %v6124_v28 = vpop.f32.mrf.mxu0  ;;  %v8642_v16 = vadd.f32 %v6120_v40, %v8631_v49  ;;  %v4903_v10 = vsel %vm4902_vm10, %v8637_v29, 0.0 }
 0x5ee   : > { %v4672_v20 = vpack.c.bf16 %v4651_v2, %v4650_v17  ;;  %v4791_v56 = vpop.f32.mrf.mxu0 }
 0x5f0   : > { %6138 = vmatprep.mubr.msk.bf16.mxu0 %vm2691_vm0, %v4672_v20  ;;  %v6125_v53 = vpop.f32.mrf.mxu0  ;;  %v4906_v20 = vsel %vm4902_vm10, %v8642_v16, 0.0 }
 0x5f2   : > { %v4794_v5 = vpop.f32.mrf.mxu0 }
 0x601   : > { %v4591_v60 = vpop.f32.mrf.mxu1 }
 0x602   : > { %v4592_v42 = vadd.f32 %v8402_v54, %v4591_v60  ;;  %v8649_v60 = vadd.f32 %v6121_v14, %v8631_v49 }
 0x603   : > { %v4593_v61 = vpop.f32.mrf.mxu1 }
 0x604   : > { %v4652_v36 = vmax.f32 %v4592_v42, 0.0  ;;  %v8652_v61 = vadd.f32 %v8631_v49, %v4791_v56 }
 0x605   : > { %v4594_v3 = vpop.f32.mrf.mxu1 }
 0x606   : > { %v4595_v18 = vadd.f32 %v8402_v54, %v4594_v3  ;;  %v8655_v3 = vadd.f32 %v8631_v49, %v4794_v5 }
 0x607   : > { %v4596_v6 = vpop.f32.mrf.mxu1 }
 0x608   : > { %v4653_v45 = vmax.f32 %v4595_v18, 0.0  ;;  %v4908_v6 = vsel %vm4902_vm10, %v8649_v60, 0.0 }
 0x60a   : > { %v4673_v7 = vpack.c.bf16 %v4653_v45, %v4652_v36  ;;  %v4910_v36 = vsel %vm4902_vm10, %v8652_v61, 0.0 }
 0x60c   : > { %6139 = vmatmul.mubr.msk.bf16.gmra.mxu0 %vm2691_vm0, %v4673_v7 }
 0x61d   : > { %v4599_v27 = vpop.f32.mrf.mxu1 }
 0x61e   : > { %v4600_v13 = vadd.f32 %v8402_v54, %v4599_v27  ;;  %v4912_v27 = vsel %vm4902_vm10, %v8655_v3, 0.0 }
 0x61f   : > { %v4601_v32 = vpop.f32.mrf.mxu1 }
 0x620   : > { %v4654_v50 = vmax.f32 %v4600_v13, 0.0  ;;  %v8664_v13 = vadd.f32 %v6124_v28, %v8631_v49 }
 0x621   : > { %v4602_v8 = vpop.f32.mrf.mxu1 }
 0x622   : > { %v4603_v11 = vadd.f32 %v8402_v54, %v4602_v8 }
 0x623   : > { %v4604_v15 = vpop.f32.mrf.mxu1 }
 0x624   : > { %v4655_v33 = vmax.f32 %v4603_v11, 0.0  ;;  %v6128_v57 = vpop.f32.mrf.mxu0  ;;  %v4914_v15 = vsel %vm4902_vm10, %v8664_v13, 0.0 }
 0x626   : > { %v4674_v4 = vpack.c.bf16 %v4655_v33, %v4654_v50  ;;  %v4807_v58 = vpop.f32.mrf.mxu0  ;;  %v8669_v50 = vadd.f32 %v6125_v53, %v8631_v49 }
 0x627   : > { %v8672_v33 = vadd.f32 %v8631_v49, %v4807_v58 }
 0x628   : > { %6142 = vmatprep.mubr.msk.bf16.mxu0 %vm2691_vm0, %v4674_v4  ;;  %v6129_v2 = vpop.f32.mrf.mxu0 }
 0x62a   : > { %v4810_v18 = vpop.f32.mrf.mxu0 }
 0x639   : > { %v4607_v62 = vpop.f32.mrf.mxu1 }
 0x63a   : > { %v4608_v19 = vadd.f32 %v8402_v54, %v4607_v62 }
 0x63b   : > { %v4609_v51 = vpop.f32.mrf.mxu1 }
 0x63c   : > { %v4656_v37 = vmax.f32 %v4608_v19, 0.0  ;;  %v8675_v51 = vadd.f32 %v8631_v49, %v4810_v18  ;;  %v4916_v19 = vsel %vm4902_vm10, %v8669_v50, 0.0 }
 0x63d   : > { %v4610_v52 = vpop.f32.mrf.mxu1 }
 0x63e   : > { %v4611_v48 = vadd.f32 %v8402_v54, %v4610_v52  ;;  %v4918_v52 = vsel %vm4902_vm10, %v8672_v33, 0.0 }
 0x63f   : > { %v4612_v12 = vpop.f32.mrf.mxu1 }
 0x640   : > { %v4657_v59 = vmax.f32 %v4611_v48, 0.0 }
 0x642   : > { %v4675_v55 = vpack.c.bf16 %v4657_v59, %v4656_v37  ;;  %v4920_v37 = vsel %vm4902_vm10, %v8675_v51, 0.0 }
 0x644   : > { %6143 = vmatmul.mubr.msk.bf16.gmra.mxu0 %vm2691_vm0, %v4675_v55 }
 0x655   : > { %v4615_v63 = vpop.f32.mrf.mxu1 }
 0x656   : > { %v4616_v0 = vadd.f32 %v8402_v54, %v4615_v63  ;;  %v8684_v63 = vadd.f32 %v6128_v57, %v8631_v49 }
 0x657   : > { %v4617_v1 = vpop.f32.mrf.mxu1 }
 0x658   : > { %v4658_v26 = vmax.f32 %v4616_v0, 0.0 }
 0x659   : > { %v4618_v23 = vpop.f32.mrf.mxu1 }
 0x65a   : > { %v4619_v41 = vadd.f32 %v8402_v54, %v4618_v23  ;;  %v4922_v23 = vsel %vm4902_vm10, %v8684_v63, 0.0 }
 0x65b   : > { %v4620_v43 = vpop.f32.mrf.mxu1 }
 0x65c   : > { %v4659_v30 = vmax.f32 %v4619_v41, 0.0  ;;  %v6132_v7 = vpop.f32.mrf.mxu0  ;;  %v8689_v41 = vadd.f32 %v6129_v2, %v8631_v49 }
 0x65e   : > { %v4676_v35 = vpack.c.bf16 %v4659_v30, %v4658_v26  ;;  %v4823_v11 = vpop.f32.mrf.mxu0 }
 0x65f   : > { %v8692_v43 = vadd.f32 %v8631_v49, %v4823_v11 }
 0x660   : > { %6146 = vmatprep.mubr.msk.bf16.mxu0 %vm2691_vm0, %v4676_v35  ;;  %v6133_v62 = vpop.f32.mrf.mxu0 }
 0x661   : > { %v8709_v44 = vadd.f32 %v6133_v62, %v8631_v49 }
 0x662   : > { %v4826_v12 = vpop.f32.mrf.mxu0 }
 0x663   : > { %v8695_v30 = vadd.f32 %v8631_v49, %v4826_v12  ;;  %v4932_v53 = vsel %vm4902_vm10, %v8709_v44, 0.0 }
 0x671   : > { %v4623_v38 = vpop.f32.mrf.mxu1 }
 0x672   : > { %v4624_v21 = vadd.f32 %v8402_v54, %v4623_v38  ;;  %v4924_v38 = vsel %vm4902_vm10, %v8689_v41, 0.0 }
 0x673   : > { %v4625_v31 = vpop.f32.mrf.mxu1 }
 0x674   : > { %v4660_v22 = vmax.f32 %v4624_v21, 0.0  ;;  %v4926_v31 = vsel %vm4902_vm10, %v8692_v43, 0.0 }
 0x675   : > { %v4626_v25 = vpop.f32.mrf.mxu1 }
 0x676   : > { %v4627_v9 = vadd.f32 %v8402_v54, %v4626_v25  ;;  %v8634_v54 = vadd.f32 %v8631_v49, %v4778_v47  ;;  %v4928_v25 = vsel %vm4902_vm10, %v8695_v30, 0.0 }
 0x677   : > { %v4628_v46 = vpop.f32.mrf.mxu1 }
 0x678   : > { %v4661_v24 = vmax.f32 %v4627_v9, 0.0  ;;  %v4904_v34 = vsel %vm4902_vm10, %v8634_v54, 0.0 }
 0x679   : > { %v4905_v17 = vadd.f32 %v4904_v34, %v4903_v10 }
 0x67a   : > { %v4677_v39 = vpack.c.bf16 %v4661_v24, %v4660_v22  ;;  %v8704_v22 = vadd.f32 %v6132_v7, %v8631_v49 }
 0x67b   : > { %v4907_v42 = vadd.f32 %v4906_v20, %v4905_v17 }
 0x67c   : > { %6147 = vmatmul.mubr.msk.bf16.gmra.mxu0 %vm2691_vm0, %v4677_v39  ;;  %v4930_v40 = vsel %vm4902_vm10, %v8704_v22, 0.0  ;;  %vm5252_vm0 = vcmask 1046534  }
 0x67d   : > { %v4909_v45 = vadd.f32 %v4908_v6, %v4907_v42 }
 0x67f   : > { %v4911_v32 = vadd.f32 %v4910_v36, %v4909_v45 }
 0x681   : > { %v4913_v8 = vadd.f32 %v4912_v27, %v4911_v32 }
 0x683   : > { %v4915_v4 = vadd.f32 %v4914_v15, %v4913_v8 }
 0x685   : > { %v4917_v48 = vadd.f32 %v4916_v19, %v4915_v4 }
 0x687   : > { %v4919_v59 = vadd.f32 %v4918_v52, %v4917_v48 }
 0x689   : > { %v4921_v1 = vadd.f32 %v4920_v37, %v4919_v59 }
 0x68b   : > { %v4923_v26 = vadd.f32 %v4922_v23, %v4921_v1 }
 0x68d   : > { %v4925_v21 = vadd.f32 %v4924_v38, %v4923_v26 }
 0x68f   : > { %v4927_v9 = vadd.f32 %v4926_v31, %v4925_v21 }
 0x691   : > { %v4929_v24 = vadd.f32 %v4928_v25, %v4927_v9 }
 0x693   : > { %v4931_v47 = vadd.f32 %v4930_v40, %v4929_v24 }
 0x694   : > { %v6136_v55 = vpop.f32.mrf.mxu0 }
 0x695   : > { %v4933_v57 = vadd.f32 %v4932_v53, %v4931_v47  ;;  %v8724_v17 = vadd.f32 %v6136_v55, %v8631_v49 }
 0x696   : > { %v4839_v0 = vpop.f32.mrf.mxu0 }
 0x697   : > { %v8712_v14 = vadd.f32 %v8631_v49, %v4839_v0  ;;  %v4938_v18 = vsel %vm4902_vm10, %v8724_v17, 0.0 }
 0x698   : > { %v6137_v35 = vpop.f32.mrf.mxu0 }
 0x699   : > { %v4934_v5 = vsel %vm4902_vm10, %v8712_v14, 0.0  ;;  %v8729_v6 = vadd.f32 %v6137_v35, %v8631_v49 }
 0x69a   : > { %v4842_v46 = vpop.f32.mrf.mxu0  ;;  %v4935_v10 = vadd.f32 %v4934_v5, %v4933_v57 }
 0x69b   : > { %v8715_v56 = vadd.f32 %v8631_v49, %v4842_v46  ;;  %v4940_v32 = vsel %vm4902_vm10, %v8729_v6, 0.0 }
 0x69d   : > { %v4936_v58 = vsel %vm4902_vm10, %v8715_v56, 0.0 }
 0x69e   : > { %v4937_v2 = vadd.f32 %v4936_v58, %v4935_v10 }
 0x6a0   : > { %v4939_v45 = vadd.f32 %v4938_v18, %v4937_v2 }
 0x6a2   : > { %v4941_v11 = vadd.f32 %v4940_v32, %v4939_v45 }
 0x6cc   : > { %v6140_v39 = vpop.f32.mrf.mxu0 }
 0x6cd   : > { %v8744_v19 = vadd.f32 %v6140_v39, %v8631_v49 }
 0x6ce   : > { %v4855_v28 = vpop.f32.mrf.mxu0 }
 0x6cf   : > { %v8732_v36 = vadd.f32 %v8631_v49, %v4855_v28  ;;  %v4946_v12 = vsel %vm4902_vm10, %v8744_v19, 0.0 }
 0x6d0   : > { %v6141_v34 = vpop.f32.mrf.mxu0 }
 0x6d1   : > { %v4942_v8 = vsel %vm4902_vm10, %v8732_v36, 0.0  ;;  %v8749_v37 = vadd.f32 %v6141_v34, %v8631_v49 }
 0x6d2   : > { %v4858_v20 = vpop.f32.mrf.mxu0  ;;  %v4943_v4 = vadd.f32 %v4942_v8, %v4941_v11 }
 0x6d3   : > { %v8735_v7 = vadd.f32 %v8631_v49, %v4858_v20  ;;  %v4948_v0 = vsel %vm4902_vm10, %v8749_v37, 0.0 }
 0x6d5   : > { %v4944_v15 = vsel %vm4902_vm10, %v8735_v7, 0.0 }
 0x6d6   : > { %v4945_v52 = vadd.f32 %v4944_v15, %v4943_v4 }
 0x6d8   : > { %v4947_v55 = vadd.f32 %v4946_v12, %v4945_v52 }
 0x6da   : > { %v4949_v26 = vadd.f32 %v4948_v0, %v4947_v55 }
 0x704   : > { %v6144_v42 = vpop.f32.mrf.mxu0 }
 0x705   : > { %v8764_v31 = vadd.f32 %v6144_v42, %v8631_v49 }
 0x706   : > { %v4871_v27 = vpop.f32.mrf.mxu0 }
 0x707   : > { %v8752_v59 = vadd.f32 %v8631_v49, %v4871_v27  ;;  %v4954_v9 = vsel %vm4902_vm10, %v8764_v31, 0.0 }
 0x708   : > { %v6145_v62 = vpop.f32.mrf.mxu0 }
 0x709   : > { %v4950_v23 = vsel %vm4902_vm10, %v8752_v59, 0.0  ;;  %v8769_v46 = vadd.f32 %v6145_v62, %v8631_v49 }
 0x70a   : > { %v4874_v48 = vpop.f32.mrf.mxu0  ;;  %v4951_v38 = vadd.f32 %v4950_v23, %v4949_v26 }
 0x70b   : > { %v8755_v1 = vadd.f32 %v8631_v49, %v4874_v48  ;;  %v4956_v28 = vsel %vm4902_vm10, %v8769_v46, 0.0 }
 0x70d   : > { %v4952_v35 = vsel %vm4902_vm10, %v8755_v1, 0.0 }
 0x70e   : > { %v4953_v21 = vadd.f32 %v4952_v35, %v4951_v38 }
 0x710   : > { %v4955_v24 = vadd.f32 %v4954_v9, %v4953_v21 }
 0x712   : > { %v4957_v5 = vadd.f32 %v4956_v28, %v4955_v24 }
 0x73c   : > { %v6148_v25 = vpop.f32.mrf.mxu0 }
 0x73d   : > { %v8779_v34 = vadd.f32 %v6148_v25, %v8631_v49 }
 0x73e   : > { %v4887_v39 = vpop.f32.mrf.mxu0 }
 0x73f   : > { %v8772_v40 = vadd.f32 %v8631_v49, %v4887_v39  ;;  %v4962_v18 = vsel %vm4902_vm10, %v8779_v34, 0.0 }
 0x740   : > { %v6149_v47 = vpop.f32.mrf.mxu0 }
 0x741   : > { %v4958_v53 = vsel %vm4902_vm10, %v8772_v40, 0.0  ;;  %v8785_v2 = vadd.f32 %v6149_v47, %v8631_v49 }
 0x742   : > { %v4890_v57 = vpop.f32.mrf.mxu0  ;;  %v4959_v10 = vadd.f32 %v4958_v53, %v4957_v5 }
 0x743   : > { %v8782_v58 = vadd.f32 %v8631_v49, %v4890_v57  ;;  %v4964_v27 = vsel %vm4902_vm10, %v8785_v2, 0.0 }
 0x745   : > { %v4960_v20 = vsel %vm4902_vm10, %v8782_v58, 0.0 }
 0x746   : > { %v4961_v42 = vadd.f32 %v4960_v20, %v4959_v10 }
 0x748   : > { %v4963_v45 = vadd.f32 %v4962_v18, %v4961_v42 }
 0x74a   : > { %v4965_v32 = vadd.f32 %v4964_v27, %v4963_v45 }
 0x74c   : > { %v4966_v8 = vrot.slane %v4965_v32, 4 }
 0x74e   : > { %v4967_v11 = vadd.f32 %v4966_v8, %v4965_v32 }
 0x750   : > { %v4968_v15 = vrot.slane %v4967_v11, 2 }
 0x752   : > { %v4969_v4 = vadd.f32 %v4968_v15, %v4967_v11 }
 0x754   : > { %v4970_v62 = vrot.slane %v4969_v4, 1 }
 0x756   : > { %v4971_v52 = vadd.f32 %v4970_v62, %v4969_v4 }
 0x758   : > { %v8793_v49 = vmul.f32 0.00390625, %v4971_v52 }
 0x75a   : > { %v8797_v48 = vsub.f32 %v8637_v29, %v8793_v49  ;;  %v8801_v12 = vsub.f32 %v8634_v54, %v8793_v49  ;;  %v8805_v55 = vsub.f32 %v8642_v16, %v8793_v49  ;;  %v8809_v0 = vsub.f32 %v8649_v60, %v8793_v49 }
 0x75b   : > { %v8817_v29 = vsub.f32 %v8652_v61, %v8793_v49  ;;  %v8823_v16 = vsub.f32 %v8655_v3, %v8793_v49  ;;  %v8831_v25 = vsub.f32 %v8664_v13, %v8793_v49  ;;  %v8838_v3 = vsub.f32 %v8669_v50, %v8793_v49 }
 0x75c   : > { %v5006_v23 = vmul.f32 %v8797_v48, %v8797_v48  ;;  %v5007_v26 = vmul.f32 %v8801_v12, %v8801_v12  ;;  %v5008_v54 = vmul.f32 %v8805_v55, %v8805_v55  ;;  %v5009_v60 = vmul.f32 %v8809_v0, %v8809_v0 }
 0x75d   : > { %v5010_v61 = vmul.f32 %v8817_v29, %v8817_v29  ;;  %v5011_v39 = vmul.f32 %v8823_v16, %v8823_v16  ;;  %v8845_v13 = vsub.f32 %v8672_v33, %v8793_v49  ;;  %v5012_v53 = vmul.f32 %v8831_v25, %v8831_v25 }
 0x75e   : > { %v5038_v35 = vsel %vm4902_vm10, %v5006_v23, 0.0  ;;  %v5039_v38 = vsel %vm4902_vm10, %v5007_v26, 0.0  ;;  %v5041_v9 = vsel %vm4902_vm10, %v5008_v54, 0.0  ;;  %v5043_v47 = vsel %vm4902_vm10, %v5009_v60, 0.0 }
 0x75f   : > { %v5040_v21 = vadd.f32 %v5039_v38, %v5038_v35  ;;  %v5045_v5 = vsel %vm4902_vm10, %v5010_v61, 0.0  ;;  %v8852_v50 = vsub.f32 %v8675_v51, %v8793_v49  ;;  %v5013_v10 = vmul.f32 %v8838_v3, %v8838_v3 }
 0x760   : > { %v5047_v20 = vsel %vm4902_vm10, %v5011_v39, 0.0  ;;  %v8859_v33 = vsub.f32 %v8684_v63, %v8793_v49  ;;  %v5014_v18 = vmul.f32 %v8845_v13, %v8845_v13  ;;  %v5049_v45 = vsel %vm4902_vm10, %v5012_v53, 0.0 }
 0x761   : > { %v5042_v24 = vadd.f32 %v5041_v9, %v5040_v21  ;;  %v8866_v51 = vsub.f32 %v8689_v41, %v8793_v49  ;;  %v5015_v32 = vmul.f32 %v8852_v50, %v8852_v50  ;;  %v5051_v8 = vsel %vm4902_vm10, %v5013_v10, 0.0 }
 0x762   : > { %v8873_v63 = vsub.f32 %v8692_v43, %v8793_v49  ;;  %v5016_v15 = vmul.f32 %v8859_v33, %v8859_v33  ;;  %v5053_v4 = vsel %vm4902_vm10, %v5014_v18, 0.0  ;;  %v8880_v41 = vsub.f32 %v8695_v30, %v8793_v49 }
 0x763   : > { %v5044_v28 = vadd.f32 %v5043_v47, %v5042_v24  ;;  %v5017_v52 = vmul.f32 %v8866_v51, %v8866_v51  ;;  %v5055_v23 = vsel %vm4902_vm10, %v5015_v32, 0.0  ;;  %v8887_v43 = vsub.f32 %v8704_v22, %v8793_v49 }
 0x764   : > { %v5018_v54 = vmul.f32 %v8873_v63, %v8873_v63  ;;  %v5057_v60 = vsel %vm4902_vm10, %v5016_v15, 0.0  ;;  %v8894_v30 = vsub.f32 %v8709_v44, %v8793_v49  ;;  %v5019_v38 = vmul.f32 %v8880_v41, %v8880_v41 }
 0x765   : > { %v5046_v57 = vadd.f32 %v5045_v5, %v5044_v28  ;;  %v5059_v21 = vsel %vm4902_vm10, %v5017_v52, 0.0  ;;  %v8901_v22 = vsub.f32 %v8712_v14, %v8793_v49  ;;  %v5020_v9 = vmul.f32 %v8887_v43, %v8887_v43 }
 0x766   : > { %v5061_v24 = vsel %vm4902_vm10, %v5018_v54, 0.0  ;;  %v8908_v44 = vsub.f32 %v8715_v56, %v8793_v49  ;;  %v5021_v47 = vmul.f32 %v8894_v30, %v8894_v30  ;;  %v5063_v28 = vsel %vm4902_vm10, %v5019_v38, 0.0 }
 0x767   : > { %v5048_v42 = vadd.f32 %v5047_v20, %v5046_v57  ;;  %v8915_v14 = vsub.f32 %v8724_v17, %v8793_v49  ;;  %v5022_v5 = vmul.f32 %v8901_v22, %v8901_v22  ;;  %v5065_v57 = vsel %vm4902_vm10, %v5020_v9, 0.0 }
 0x768   : > { %v8922_v56 = vsub.f32 %v8729_v6, %v8793_v49  ;;  %v5023_v20 = vmul.f32 %v8908_v44, %v8908_v44  ;;  %v8929_v17 = vsub.f32 %v8732_v36, %v8793_v49  ;;  %v8936_v6 = vsub.f32 %v8735_v7, %v8793_v49 }
 0x769   : > { %v5050_v27 = vadd.f32 %v5049_v45, %v5048_v42  ;;  %v5067_v42 = vsel %vm4902_vm10, %v5021_v47, 0.0  ;;  %v5024_v45 = vmul.f32 %v8915_v14, %v8915_v14  ;;  %v8943_v36 = vsub.f32 %v8744_v19, %v8793_v49 }
 0x76a   : > { %v8950_v7 = vsub.f32 %v8749_v37, %v8793_v49  ;;  %v8957_v19 = vsub.f32 %v8752_v59, %v8793_v49  ;;  %v8964_v37 = vsub.f32 %v8755_v1, %v8793_v49  ;;  %v8971_v59 = vsub.f32 %v8764_v31, %v8793_v49 }
 0x76b   : > { %v5052_v11 = vadd.f32 %v5051_v8, %v5050_v27  ;;  %v5069_v27 = vsel %vm4902_vm10, %v5022_v5, 0.0  ;;  %v5025_v8 = vmul.f32 %v8922_v56, %v8922_v56  ;;  %v8978_v1 = vsub.f32 %v8769_v46, %v8793_v49 }
 0x76c   : > { %v8985_v31 = vsub.f32 %v8772_v40, %v8793_v49  ;;  %v5003_v46 = vsub.f32 %v8782_v58, %v8793_v49 }
 0x76d   : > { %v5054_v62 = vadd.f32 %v5053_v4, %v5052_v11  ;;  %v5071_v11 = vsel %vm4902_vm10, %v5023_v20, 0.0  ;;  %v5026_v4 = vmul.f32 %v8929_v17, %v8929_v17 }
 0x76e   : > { %v5034_v40 = vmul.f32 %v8985_v31, %v8985_v31  ;;  %v5035_v58 = vmul.f32 %v5003_v46, %v5003_v46 }
 0x76f   : > { %v5056_v26 = vadd.f32 %v5055_v23, %v5054_v62  ;;  %v5073_v62 = vsel %vm4902_vm10, %v5024_v45, 0.0  ;;  %v5027_v23 = vmul.f32 %v8936_v6, %v8936_v6 }
 0x771   : > { %v5058_v35 = vadd.f32 %v5057_v60, %v5056_v26  ;;  %v5075_v26 = vsel %vm4902_vm10, %v5025_v8, 0.0  ;;  %v5028_v60 = vmul.f32 %v8943_v36, %v8943_v36 }
 0x773   : > { %v5060_v61 = vadd.f32 %v5059_v21, %v5058_v35  ;;  %v5077_v35 = vsel %vm4902_vm10, %v5026_v4, 0.0  ;;  %v5029_v21 = vmul.f32 %v8950_v7, %v8950_v7 }
 0x775   : > { %v5062_v39 = vadd.f32 %v5061_v24, %v5060_v61  ;;  %v5079_v61 = vsel %vm4902_vm10, %v5027_v23, 0.0  ;;  %v5030_v24 = vmul.f32 %v8957_v19, %v8957_v19 }
 0x777   : > { %v5064_v53 = vadd.f32 %v5063_v28, %v5062_v39  ;;  %v5081_v39 = vsel %vm4902_vm10, %v5028_v60, 0.0  ;;  %v5031_v28 = vmul.f32 %v8964_v37, %v8964_v37 }
 0x779   : > { %v5066_v10 = vadd.f32 %v5065_v57, %v5064_v53  ;;  %v5083_v53 = vsel %vm4902_vm10, %v5029_v21, 0.0  ;;  %v5032_v57 = vmul.f32 %v8971_v59, %v8971_v59 }
 0x77b   : > { %v5068_v18 = vadd.f32 %v5067_v42, %v5066_v10  ;;  %v5085_v10 = vsel %vm4902_vm10, %v5030_v24, 0.0  ;;  %v5033_v42 = vmul.f32 %v8978_v1, %v8978_v1 }
 0x77d   : > { %v5070_v32 = vadd.f32 %v5069_v27, %v5068_v18  ;;  %v5087_v18 = vsel %vm4902_vm10, %v5031_v28, 0.0  ;;  %v8997_v27 = vsub.f32 %v8779_v34, %v8793_v49  ;;  %v5093_v34 = vsel %vm4902_vm10, %v5034_v40, 0.0 }
 0x77f   : > { %v5072_v15 = vadd.f32 %v5071_v11, %v5070_v32  ;;  %v5089_v32 = vsel %vm4902_vm10, %v5032_v57, 0.0  ;;  %v9004_v11 = vsub.f32 %v8785_v2, %v8793_v49 }
 0x781   : > { %v5074_v52 = vadd.f32 %v5073_v62, %v5072_v15  ;;  %v5091_v15 = vsel %vm4902_vm10, %v5033_v42, 0.0  ;;  %v5036_v62 = vmul.f32 %v8997_v27, %v8997_v27  ;;  %v5037_v23 = vmul.f32 %v9004_v11, %v9004_v11  ;;  %v9027_v42 = vld [vmem:[%s9870_s10] ss:$0 sm:$0xff] }
 0x783   : > { %v5076_v54 = vadd.f32 %v5075_v26, %v5074_v52  ;;  %v5095_v26 = vsel %vm4902_vm10, %v5035_v58, 0.0  ;;  %v5097_v60 = vsel %vm4902_vm10, %v5036_v62, 0.0  ;;  %v5099_v49 = vsel %vm4902_vm10, %v5037_v23, 0.0 }
 0x785   : > { %v5078_v38 = vadd.f32 %v5077_v35, %v5076_v54 }
 0x787   : > { %v5080_v9 = vadd.f32 %v5079_v61, %v5078_v38 }
 0x789   : > { %v5082_v47 = vadd.f32 %v5081_v39, %v5080_v9 }
 0x78b   : > { %v5084_v5 = vadd.f32 %v5083_v53, %v5082_v47 }
 0x78d   : > { %v5086_v20 = vadd.f32 %v5085_v10, %v5084_v5  ;;  %v9018_v5 = vld [vmem:[%s9869_s9] ss:$0 sm:$0xff] }
 0x78f   : > { %v5088_v45 = vadd.f32 %v5087_v18, %v5086_v20 }
 0x791   : > { %v5090_v8 = vadd.f32 %v5089_v32, %v5088_v45 }
 0x793   : > { %v5092_v4 = vadd.f32 %v5091_v15, %v5090_v8 }
 0x795   : > { %v5094_v52 = vadd.f32 %v5093_v34, %v5092_v4 }
 0x797   : > { %v5096_v54 = vadd.f32 %v5095_v26, %v5094_v52 }
 0x799   : > { %v5098_v2 = vadd.f32 %v5097_v60, %v5096_v54 }
 0x79b   : > { %v5100_v35 = vadd.f32 %v5099_v49, %v5098_v2 }
 0x79d   : > { %v5101_v38 = vrot.slane %v5100_v35, 4 }
 0x79f   : > { %v5102_v21 = vadd.f32 %v5101_v38, %v5100_v35 }
 0x7a1   : > { %v5103_v61 = vrot.slane %v5102_v21, 2 }
 0x7a3   : > { %v5104_v9 = vadd.f32 %v5103_v61, %v5102_v21 }
 0x7a5   : > { %v5105_v24 = vrot.slane %v5104_v9, 1 }
 0x7a7   : > { %v5106_v39 = vadd.f32 %v5105_v24, %v5104_v9 }
 0x7a9   : > { %v5107_v47 = vmul.f32 0.00390625, %v5106_v39 }
 0x7ab   : > { %v5108_v28 = vadd.f32 1e-05, %v5107_v47 }
 0x7ad   : > { %6224 = vrsqrt.f32 %v5108_v28 }
 0x7ba   : > { %v6225_v53 = vpop.eup %6224 }
 0x7bb   : > { %v5139_v57 = vmul.f32 %v6225_v53, %v5003_v46  ;;  %v5110_v10 = vmul.f32 %v6225_v53, %v8797_v48  ;;  %v9022_v20 = vmul.f32 %v6225_v53, %v8801_v12  ;;  %v9030_v18 = vmul.f32 %v6225_v53, %v8805_v55 }
 0x7bc   : > { %v9033_v45 = vmul.f32 %v6225_v53, %v8809_v0  ;;  %v9036_v40 = vmul.f32 %v6225_v53, %v8817_v29  ;;  %v9039_v46 = vmul.f32 %v6225_v53, %v8823_v16  ;;  %v9043_v12 = vmul.f32 %v6225_v53, %v8831_v25 }
 0x7bd   : > { %v5178_v48 = vmul.f32 %v9018_v5, %v5139_v57  ;;  %v9046_v32 = vmul.f32 %v6225_v53, %v8838_v3  ;;  %v9049_v55 = vmul.f32 %v6225_v53, %v8845_v13  ;;  %v9052_v0 = vmul.f32 %v6225_v53, %v8852_v50 }
 0x7be   : > { %v9055_v29 = vmul.f32 %v6225_v53, %v8859_v33  ;;  %v9058_v16 = vmul.f32 %v6225_v53, %v8866_v51  ;;  %v9061_v8 = vmul.f32 %v6225_v53, %v8873_v63  ;;  %v9067_v3 = vmul.f32 %v6225_v53, %v8880_v41 }
 0x7bf   : > { %v9064_v25 = vadd.f32 %v9027_v42, %v5178_v48  ;;  %v9070_v13 = vmul.f32 %v6225_v53, %v8887_v43  ;;  %v5126_v50 = vmul.f32 %v6225_v53, %v8901_v22  ;;  %v9074_v33 = vmul.f32 %v6225_v53, %v8894_v30 }
 0x7c0   : > { %v9077_v51 = vmul.f32 %v6225_v53, %v8908_v44  ;;  %v5128_v63 = vmul.f32 %v6225_v53, %v8915_v14  ;;  %v5130_v58 = vmul.f32 %v6225_v53, %v8929_v17  ;;  %v5129_v41 = vmul.f32 %v6225_v53, %v8922_v56 }
 0x7c1   : > { %v5131_v15 = vmul.f32 %v6225_v53, %v8936_v6  ;;  %v5132_v43 = vmul.f32 %v6225_v53, %v8943_v36  ;;  %v5134_v22 = vmul.f32 %v6225_v53, %v8957_v19  ;;  %v5133_v30 = vmul.f32 %v6225_v53, %v8950_v7 }
 0x7c2   : > { %v5135_v4 = vmul.f32 %v6225_v53, %v8964_v37  ;;  %v5136_v44 = vmul.f32 %v6225_v53, %v8971_v59  ;;  %v5138_v14 = vmul.f32 %v6225_v53, %v8985_v31  ;;  %v5140_v17 = vmul.f32 %v6225_v53, %v8997_v27 }
 0x7c3   : > { %v9091_v56 = vmul.f32 %v6225_v53, %v9004_v11  ;;  %v5165_v6 = vmul.f32 %v9018_v5, %v5126_v50  ;;  %v5167_v36 = vmul.f32 %v9018_v5, %v5128_v63  ;;  %v5169_v19 = vmul.f32 %v9018_v5, %v5130_v58 }
 0x7c4   : > { %v5171_v7 = vmul.f32 %v9018_v5, %v5132_v43  ;;  %v5173_v37 = vmul.f32 %v9018_v5, %v5134_v22  ;;  %v5175_v59 = vmul.f32 %v9018_v5, %v5136_v44  ;;  %v5137_v31 = vmul.f32 %v6225_v53, %v8978_v1 }
 0x7c5   : > { %v5177_v27 = vmul.f32 %v9018_v5, %v5138_v14  ;;  %v5179_v11 = vmul.f32 %v9018_v5, %v5140_v17  ;;  %v9103_v62 = vadd.f32 %v9027_v42, %v5165_v6  ;;  %v9106_v34 = vadd.f32 %v9027_v42, %v5169_v19 }
 0x7c6   : > { %v9109_v52 = vadd.f32 %v9027_v42, %v5171_v7  ;;  %v9112_v23 = vadd.f32 %v9027_v42, %v5173_v37  ;;  %v9115_v26 = vadd.f32 %v9027_v42, %v5175_v59  ;;  %v9118_v1 = vadd.f32 %v9027_v42, %v5167_v36 }
 0x7c7   : > { %v9121_v54 = vadd.f32 %v9027_v42, %v5177_v27  ;;  %v9124_v60 = vadd.f32 %v9027_v42, %v5179_v11  ;;  %v5289_v2 = vrot.slane %v9103_v62, 1  ;;  %v5291_v49 = vrot.slane %v9106_v34, 7 }
 0x7c8   : > { %v5293_v35 = vrot.slane %v9109_v52, 6  ;;  %v5295_v38 = vrot.slane %v9112_v23, 5  ;;  %v5149_v21 = vmul.f32 %v9018_v5, %v5110_v10  ;;  %v5297_v9 = vrot.slane %v9115_v26, 4 }
 0x7c9   : > { %v5290_v61 = vsel %vm5237_vm11, %v9118_v1, %v5289_v2  ;;  %v5299_v24 = vrot.slane %v9121_v54, 3  ;;  %v5301_v39 = vrot.slane %v9124_v60, 2  ;;  %v5150_v28 = vmul.f32 %v9018_v5, %v9022_v20 }
 0x7ca   : > { %v5292_v47 = vsel %vm5240_vm12, %v5291_v49, %v5290_v61  ;;  %v5151_v53 = vmul.f32 %v9018_v5, %v9030_v18  ;;  %v5152_v57 = vmul.f32 %v9018_v5, %v9033_v45  ;;  %v5153_v48 = vmul.f32 %v9018_v5, %v9036_v40 }
 0x7cb   : > { %v5294_v10 = vsel %vm5243_vm13, %v5293_v35, %v5292_v47  ;;  %v5154_v50 = vmul.f32 %v9018_v5, %v9039_v46  ;;  %v5155_v63 = vmul.f32 %v9018_v5, %v9043_v12  ;;  %v5156_v20 = vmul.f32 %v9018_v5, %v9046_v32 }
 0x7cc   : > { %v5296_v58 = vsel %vm5246_vm14, %v5295_v38, %v5294_v10  ;;  %v5157_v18 = vmul.f32 %v9018_v5, %v9049_v55  ;;  %v5158_v45 = vmul.f32 %v9018_v5, %v9052_v0  ;;  %v5159_v40 = vmul.f32 %v9018_v5, %v9055_v29 }
 0x7cd   : > { %v5298_v43 = vsel %vm5249_vm15, %v5297_v9, %v5296_v58  ;;  %v5160_v46 = vmul.f32 %v9018_v5, %v9058_v16  ;;  %v5161_v12 = vmul.f32 %v9018_v5, %v9061_v8  ;;  %v5162_v32 = vmul.f32 %v9018_v5, %v9067_v3 }
 0x7ce   : > { %v5300_v22 = vsel %vm5252_vm0, %v5299_v24, %v5298_v43  ;;  %v5163_v55 = vmul.f32 %v9018_v5, %v9070_v13  ;;  %v5164_v0 = vmul.f32 %v9018_v5, %v9074_v33  ;;  %v5166_v29 = vmul.f32 %v9018_v5, %v9077_v51 }
 0x7cf   : > { %v5302_v44 = vsel %vm5255_vm1, %v5301_v39, %v5300_v22  ;;  %v5168_v16 = vmul.f32 %v9018_v5, %v5129_v41  ;;  %v5170_v8 = vmul.f32 %v9018_v5, %v5131_v15  ;;  %v5172_v14 = vmul.f32 %v9018_v5, %v5133_v30 }
 0x7d0   : > { %5305 = vrot.lane.b32.xlu1 %v5302_v44, %s9878_s16  ;;  %v5174_v3 = vmul.f32 %v9018_v5, %v5135_v4  ;;  %v5176_v13 = vmul.f32 %v9018_v5, %v5137_v31  ;;  %v9181_v17 = vadd.f32 %v9027_v42, %v5149_v21  ;;  %v9184_v33 = vadd.f32 %v9027_v42, %v5151_v53 }
 0x7d1   : > { %v9187_v51 = vadd.f32 %v9027_v42, %v5153_v48  ;;  %v9190_v41 = vadd.f32 %v9027_v42, %v5155_v63  ;;  %v9193_v15 = vadd.f32 %v9027_v42, %v5157_v18  ;;  %v9196_v30 = vadd.f32 %v9027_v42, %v5159_v40 }
 0x7d2   : > { %v9199_v4 = vadd.f32 %v9027_v42, %v5161_v12  ;;  %v9202_v6 = vadd.f32 %v9027_v42, %v5163_v55  ;;  %v5275_v36 = vrot.slane %v9181_v17, 1  ;;  %v5180_v19 = vmul.f32 %v9018_v5, %v9091_v56 }
 0x7d3   : > { %v5277_v7 = vrot.slane %v9187_v51, 7  ;;  %v5279_v37 = vrot.slane %v9190_v41, 6  ;;  %v5281_v59 = vrot.slane %v9193_v15, 5  ;;  %v5283_v27 = vrot.slane %v9196_v30, 4 }
 0x7d4   : > { %v5276_v31 = vsel %vm5237_vm11, %v9184_v33, %v5275_v36  ;;  %v5285_v11 = vrot.slane %v9199_v4, 3  ;;  %v9215_v2 = vadd.f32 %v9027_v42, %v5150_v28  ;;  %v5287_v5 = vrot.slane %v9202_v6, 2 }
 0x7d5   : > { %v5278_v49 = vsel %vm5240_vm12, %v5277_v7, %v5276_v31  ;;  %v9220_v56 = vadd.f32 %v9027_v42, %v5152_v57  ;;  %v9223_v35 = vadd.f32 %v9027_v42, %v5154_v50  ;;  %v9227_v21 = vadd.f32 %v9027_v42, %v5156_v20 }
 0x7d6   : > { %v5280_v38 = vsel %vm5243_vm13, %v5279_v37, %v5278_v49  ;;  %v9230_v61 = vadd.f32 %v9027_v42, %v5158_v45  ;;  %v9233_v9 = vadd.f32 %v9027_v42, %v5160_v46  ;;  %v9237_v39 = vadd.f32 %v9027_v42, %v5162_v32 }
 0x7d7   : > { %v5282_v24 = vsel %vm5246_vm14, %v5281_v59, %v5280_v38  ;;  %v9240_v47 = vadd.f32 %v9027_v42, %v5164_v0  ;;  %v9243_v28 = vadd.f32 %v9027_v42, %v5166_v29  ;;  %v9247_v57 = vadd.f32 %v9027_v42, %v5168_v16 }
 0x7d8   : > { %v5284_v53 = vsel %vm5249_vm15, %v5283_v27, %v5282_v24  ;;  %v9250_v10 = vadd.f32 %v9027_v42, %v5170_v8  ;;  %v9253_v48 = vadd.f32 %v9027_v42, %v5172_v14  ;;  %v9257_v63 = vadd.f32 %v9027_v42, %v5174_v3 }
 0x7d9   : > { %v5286_v50 = vsel %vm5252_vm0, %v5285_v11, %v5284_v53  ;;  %v9260_v58 = vadd.f32 %v9027_v42, %v5176_v13  ;;  %v5432_v20 = vrot.slane %v9103_v62, 5  ;;  %v9265_v45 = vadd.f32 %v9027_v42, %v5180_v19 }
 0x7da   : > { %v5288_v18 = vsel %vm5255_vm1, %v5287_v5, %v5286_v50  ;;  %v5433_v43 = vrot.slane %v9118_v1, 4  ;;  %v5435_v40 = vrot.slane %v9106_v34, 3  ;;  %v5437_v46 = vrot.slane %v9109_v52, 2 }
 0x7db   : > { %5303 = vrot.lane.b32.xlu0 %v5288_v18, %s9878_s16  ;;  %v5439_v12 = vrot.slane %v9112_v23, 1  ;;  %v5442_v22 = vrot.slane %v9121_v54, 7  ;;  %v5418_v32 = vrot.slane %v9181_v17, 5  ;;  %v5444_v0 = vrot.slane %v9124_v60, 6 }
 0x7dc   : > { %v5434_v55 = vsel %vm5237_vm11, %v5433_v43, %v5432_v20  ;;  %v5419_v42 = vrot.slane %v9184_v33, 4  ;;  %v5421_v44 = vrot.slane %v9187_v51, 3  ;;  %v5423_v16 = vrot.slane %v9190_v41, 2 }
 0x7dd   : > { %v5436_v29 = vsel %vm5240_vm12, %v5435_v40, %v5434_v55  ;;  %v5425_v8 = vrot.slane %v9193_v15, 1  ;;  %v5428_v14 = vrot.slane %v9199_v4, 7  ;;  %v5588_v36 = vrot.slane %v9243_v28, 1 }
 0x7de   : > { %v5438_v3 = vsel %vm5243_vm13, %v5437_v46, %v5436_v29  ;;  %v5420_v13 = vsel %vm5237_vm11, %v5419_v42, %v5418_v32  ;;  %v5590_v19 = vrot.slane %v9250_v10, 7  ;;  %v5430_v59 = vrot.slane %v9202_v6, 6 }
 0x7df   : > { %v5440_v7 = vsel %vm5246_vm14, %v5439_v12, %v5438_v3  ;;  %v5422_v37 = vsel %vm5240_vm12, %v5421_v44, %v5420_v13  ;;  %v5592_v31 = vrot.slane %v9253_v48, 6  ;;  %v5589_v49 = vsel %vm5237_vm11, %v9247_v57, %v5588_v36 }
 0x7e0   : > { %v5441_v27 = vsel %vm5249_vm15, %v9115_v26, %v5440_v7  ;;  %v5424_v11 = vsel %vm5243_vm13, %v5423_v16, %v5422_v37  ;;  %v5594_v5 = vrot.slane %v9257_v63, 5  ;;  %v5591_v53 = vsel %vm5240_vm12, %v5590_v19, %v5589_v49 }
 0x7e1   : > { %v5443_v38 = vsel %vm5252_vm0, %v5442_v22, %v5441_v27  ;;  %v5426_v24 = vsel %vm5246_vm14, %v5425_v8, %v5424_v11  ;;  %v5596_v50 = vrot.slane %v9260_v58, 4  ;;  %v5593_v43 = vsel %vm5243_vm13, %v5592_v31, %v5591_v53 }
 0x7e2   : > { %v5445_v20 = vsel %vm5255_vm1, %v5444_v0, %v5443_v38  ;;  %v5427_v18 = vsel %vm5249_vm15, %v9196_v30, %v5426_v24  ;;  %v5598_v40 = vrot.slane %v9064_v25, 3  ;;  %v5595_v12 = vsel %vm5246_vm14, %v5594_v5, %v5593_v43 }
 0x7e3   : > { %5448 = vrot.lane.b32.xlu1 %v5445_v20, %s9878_s16  ;;  %v5429_v46 = vsel %vm5252_vm0, %v5428_v14, %v5427_v18  ;;  %v5574_v22 = vrot.slane %v9215_v2, 1  ;;  %v5576_v32 = vrot.slane %v9223_v35, 7  ;;  %v5597_v0 = vsel %vm5249_vm15, %v5596_v50, %v5595_v12 }
 0x7e4   : > { %v5431_v55 = vsel %vm5255_vm1, %v5430_v59, %v5429_v46  ;;  %v5600_v42 = vrot.slane %v9265_v45, 2  ;;  %v5578_v44 = vrot.slane %v9227_v21, 6  ;;  %v5599_v29 = vsel %vm5252_vm0, %v5598_v40, %v5597_v0 }
 0x7e5   : > { %5446 = vrot.lane.b32.xlu0 %v5431_v55, %s9878_s16  ;;  %v5575_v16 = vsel %vm5237_vm11, %v9220_v56, %v5574_v22  ;;  %v5580_v8 = vrot.slane %v9230_v61, 5  ;;  %v5582_v14 = vrot.slane %v9233_v9, 4  ;;  %v5584_v36 = vrot.slane %v9237_v39, 3 }
 0x7e6   : > { %v5601_v3 = vsel %vm5255_vm1, %v5600_v42, %v5599_v29  ;;  %v5577_v13 = vsel %vm5240_vm12, %v5576_v32, %v5575_v16  ;;  %v5728_v19 = vrot.slane %v9243_v28, 5  ;;  %v5586_v37 = vrot.slane %v9240_v47, 2 }
 0x7e7   : > { %5604 = vrot.lane.b32.xlu1 %v5601_v3, %s9878_s16  ;;  %v5579_v7 = vsel %vm5243_vm13, %v5578_v44, %v5577_v13  ;;  %v5729_v59 = vrot.slane %v9247_v57, 4  ;;  %v5731_v31 = vrot.slane %v9250_v10, 3  ;;  %v5733_v11 = vrot.slane %v9253_v48, 2 }
 0x7e8   : > { %v5581_v27 = vsel %vm5246_vm14, %v5580_v8, %v5579_v7  ;;  %v5735_v49 = vrot.slane %v9257_v63, 1  ;;  %v5738_v5 = vrot.slane %v9064_v25, 7  ;;  %v5714_v53 = vrot.slane %v9215_v2, 5 }
 0x7e9   : > { %v5583_v38 = vsel %vm5249_vm15, %v5582_v14, %v5581_v27  ;;  %v5730_v24 = vsel %vm5237_vm11, %v5729_v59, %v5728_v19  ;;  %v5715_v50 = vrot.slane %v9220_v56, 4  ;;  %v5740_v43 = vrot.slane %v9265_v45, 6 }
 0x7ea   : > { %v5585_v20 = vsel %vm5252_vm0, %v5584_v36, %v5583_v38  ;;  %v5732_v18 = vsel %vm5240_vm12, %v5731_v31, %v5730_v24  ;;  %v5717_v40 = vrot.slane %v9223_v35, 3  ;;  %v5719_v32 = vrot.slane %v9227_v21, 2 }
 0x7eb   : > { %v5587_v46 = vsel %vm5255_vm1, %v5586_v37, %v5585_v20  ;;  %v5734_v12 = vsel %vm5243_vm13, %v5733_v11, %v5732_v18  ;;  %v5716_v22 = vsel %vm5237_vm11, %v5715_v50, %v5714_v53  ;;  %v5721_v42 = vrot.slane %v9230_v61, 1 }
 0x7ec   : > { %5602 = vrot.lane.b32.xlu0 %v5587_v46, %s9878_s16  ;;  %v5736_v55 = vsel %vm5246_vm14, %v5735_v49, %v5734_v12  ;;  %v5718_v0 = vsel %vm5240_vm12, %v5717_v40, %v5716_v22  ;;  %v5724_v44 = vrot.slane %v9237_v39, 7  ;;  %v5326_v8 = vrot.slane %v9103_v62, 2 }
 0x7ed   : > { %v5737_v29 = vsel %vm5249_vm15, %v9260_v58, %v5736_v55  ;;  %v5720_v16 = vsel %vm5243_vm13, %v5719_v32, %v5718_v0  ;;  %v5327_v14 = vrot.slane %v9118_v1, 1  ;;  %v5726_v36 = vrot.slane %v9240_v47, 6 }
 0x7ee   : > { %v5739_v3 = vsel %vm5252_vm0, %v5738_v5, %v5737_v29  ;;  %v5722_v13 = vsel %vm5246_vm14, %v5721_v42, %v5720_v16  ;;  %v5330_v19 = vrot.slane %v9109_v52, 7  ;;  %v5332_v31 = vrot.slane %v9112_v23, 6 }
 0x7ef   : > { %v5741_v7 = vsel %vm5255_vm1, %v5740_v43, %v5739_v3  ;;  %v5723_v37 = vsel %vm5249_vm15, %v9233_v9, %v5722_v13  ;;  %v5328_v59 = vsel %vm5237_vm11, %v5327_v14, %v5326_v8  ;;  %v5334_v49 = vrot.slane %v9115_v26, 5 }
 0x7f0   : > { %5744 = vrot.lane.b32.xlu1 %v5741_v7, %s9878_s16  ;;  %v5725_v27 = vsel %vm5252_vm0, %v5724_v44, %v5723_v37  ;;  %v5329_v11 = vsel %vm5240_vm12, %v9106_v34, %v5328_v59  ;;  %v5336_v5 = vrot.slane %v9121_v54, 4  ;;  %v5312_v53 = vrot.slane %v9181_v17, 2 }
 0x7f1   : > { %v5727_v38 = vsel %vm5255_vm1, %v5726_v36, %v5725_v27  ;;  %v5331_v24 = vsel %vm5243_vm13, %v5330_v19, %v5329_v11  ;;  %v5313_v50 = vrot.slane %v9184_v33, 1  ;;  %v5338_v18 = vrot.slane %v9124_v60, 3 }
 0x7f2   : > { %5742 = vrot.lane.b32.xlu0 %v5727_v38, %s9878_s16  ;;  %v5333_v20 = vsel %vm5246_vm14, %v5332_v31, %v5331_v24  ;;  %v5316_v43 = vrot.slane %v9190_v41, 7  ;;  %v5318_v40 = vrot.slane %v9193_v15, 6  ;;  %v5320_v22 = vrot.slane %v9196_v30, 5 }
 0x7f3   : > { %v5335_v46 = vsel %vm5249_vm15, %v5334_v49, %v5333_v20  ;;  %v5314_v12 = vsel %vm5237_vm11, %v5313_v50, %v5312_v53  ;;  %v5322_v32 = vrot.slane %v9199_v4, 4  ;;  %v5468_v42 = vrot.slane %v9103_v62, 6 }
 0x7f4   : > { %v5337_v55 = vsel %vm5252_vm0, %v5336_v5, %v5335_v46  ;;  %v5315_v0 = vsel %vm5240_vm12, %v9187_v51, %v5314_v12  ;;  %v5469_v44 = vrot.slane %v9118_v1, 5  ;;  %v5324_v8 = vrot.slane %v9202_v6, 3 }
 0x7f5   : > { %v5339_v29 = vsel %vm5255_vm1, %v5338_v18, %v5337_v55  ;;  %v5317_v16 = vsel %vm5243_vm13, %v5316_v43, %v5315_v0  ;;  %v5471_v14 = vrot.slane %v9106_v34, 4  ;;  %v5473_v36 = vrot.slane %v9109_v52, 3 }
 0x7f6   : > { %5342 = vrot.lane.b32.xlu1 %v5339_v29, %s6306_s14  ;;  %v5319_v3 = vsel %vm5246_vm14, %v5318_v40, %v5317_v16  ;;  %v5470_v13 = vsel %vm5237_vm11, %v5469_v44, %v5468_v42  ;;  %v5475_v19 = vrot.slane %v9112_v23, 2  ;;  %v5477_v59 = vrot.slane %v9115_v26, 1 }
 0x7f7   : > { %v5321_v7 = vsel %vm5249_vm15, %v5320_v22, %v5319_v3  ;;  %v5472_v37 = vsel %vm5240_vm12, %v5471_v14, %v5470_v13  ;;  %v5454_v31 = vrot.slane %v9181_v17, 6  ;;  %v5455_v49 = vrot.slane %v9184_v33, 5 }
 0x7f8   : > { %v5323_v27 = vsel %vm5252_vm0, %v5322_v32, %v5321_v7  ;;  %v5474_v11 = vsel %vm5243_vm13, %v5473_v36, %v5472_v37  ;;  %v5457_v5 = vrot.slane %v9187_v51, 4  ;;  %v5480_v53 = vrot.slane %v9124_v60, 7 }
 0x7f9   : > { %v5325_v38 = vsel %vm5255_vm1, %v5324_v8, %v5323_v27  ;;  %v5476_v24 = vsel %vm5246_vm14, %v5475_v19, %v5474_v11  ;;  %v5459_v50 = vrot.slane %v9190_v41, 3  ;;  %v5456_v18 = vsel %vm5237_vm11, %v5455_v49, %v5454_v31 }
 0x7fa   : > { %5340 = vrot.lane.b32.xlu0 %v5325_v38, %s6306_s14  ;;  %v5478_v20 = vsel %vm5249_vm15, %v5477_v59, %v5476_v24  ;;  %v5461_v43 = vrot.slane %v9193_v15, 2  ;;  %v5463_v40 = vrot.slane %v9196_v30, 1  ;;  %v5458_v12 = vsel %vm5240_vm12, %v5457_v5, %v5456_v18 }
 0x7fb   : > { %v5479_v46 = vsel %vm5252_vm0, %v9121_v54, %v5478_v20  ;;  %v5624_v22 = vrot.slane %v9243_v28, 2  ;;  %v5625_v32 = vrot.slane %v9247_v57, 1  ;;  %v5460_v0 = vsel %vm5243_vm13, %v5459_v50, %v5458_v12 }
 0x7fc   : > { %v5481_v55 = vsel %vm5255_vm1, %v5480_v53, %v5479_v46  ;;  %v5466_v42 = vrot.slane %v9202_v6, 7  ;;  %v5628_v44 = vrot.slane %v9253_v48, 7  ;;  %v5462_v29 = vsel %vm5246_vm14, %v5461_v43, %v5460_v0 }
 0x7fd   : > { %5484 = vrot.lane.b32.xlu1 %v5481_v55, %s6306_s14  ;;  %v5626_v16 = vsel %vm5237_vm11, %v5625_v32, %v5624_v22  ;;  %v5630_v8 = vrot.slane %v9257_v63, 6  ;;  %v5632_v14 = vrot.slane %v9260_v58, 5  ;;  %v5464_v3 = vsel %vm5249_vm15, %v5463_v40, %v5462_v29 }
 0x7fe   : > { %v5627_v13 = vsel %vm5240_vm12, %v9250_v10, %v5626_v16  ;;  %v5634_v36 = vrot.slane %v9064_v25, 4  ;;  %v5610_v19 = vrot.slane %v9215_v2, 2  ;;  %v5465_v7 = vsel %vm5252_vm0, %v9199_v4, %v5464_v3 }
 0x7ff   : > { %v5629_v37 = vsel %vm5243_vm13, %v5628_v44, %v5627_v13  ;;  %v5636_v59 = vrot.slane %v9265_v45, 3  ;;  %v5611_v31 = vrot.slane %v9220_v56, 1  ;;  %v5467_v27 = vsel %vm5255_vm1, %v5466_v42, %v5465_v7 }
 0x800   : > { %v5631_v11 = vsel %vm5246_vm14, %v5630_v8, %v5629_v37  ;;  %v5614_v49 = vrot.slane %v9227_v21, 7  ;;  %v5616_v5 = vrot.slane %v9230_v61, 6  ;;  %5482 = vrot.lane.b32.xlu0 %v5467_v27, %s6306_s14  ;;  %v5618_v53 = vrot.slane %v9233_v9, 5 }
 0x801   : > { %v5633_v38 = vsel %vm5249_vm15, %v5632_v14, %v5631_v11  ;;  %v5612_v24 = vsel %vm5237_vm11, %v5611_v31, %v5610_v19  ;;  %v5620_v50 = vrot.slane %v9237_v39, 4  ;;  %v5764_v43 = vrot.slane %v9243_v28, 6 }
 0x802   : > { %v5635_v20 = vsel %vm5252_vm0, %v5634_v36, %v5633_v38  ;;  %v5613_v18 = vsel %vm5240_vm12, %v9223_v35, %v5612_v24  ;;  %v5765_v40 = vrot.slane %v9247_v57, 5  ;;  %v5622_v22 = vrot.slane %v9240_v47, 3 }
 0x803   : > { %v5637_v46 = vsel %vm5255_vm1, %v5636_v59, %v5635_v20  ;;  %v5615_v12 = vsel %vm5243_vm13, %v5614_v49, %v5613_v18  ;;  %v5767_v32 = vrot.slane %v9250_v10, 4  ;;  %v5769_v42 = vrot.slane %v9253_v48, 3 }
 0x804   : > { %5640 = vrot.lane.b32.xlu1 %v5637_v46, %s6306_s14  ;;  %v5617_v55 = vsel %vm5246_vm14, %v5616_v5, %v5615_v12  ;;  %v5766_v0 = vsel %vm5237_vm11, %v5765_v40, %v5764_v43  ;;  %v5771_v44 = vrot.slane %v9257_v63, 2  ;;  %v5773_v8 = vrot.slane %v9260_v58, 1 }
 0x805   : > { %v5619_v29 = vsel %vm5249_vm15, %v5618_v53, %v5617_v55  ;;  %v5768_v16 = vsel %vm5240_vm12, %v5767_v32, %v5766_v0  ;;  %v5750_v14 = vrot.slane %v9215_v2, 6  ;;  %v5751_v36 = vrot.slane %v9220_v56, 5 }
 0x806   : > { %v5621_v3 = vsel %vm5252_vm0, %v5620_v50, %v5619_v29  ;;  %v5770_v13 = vsel %vm5243_vm13, %v5769_v42, %v5768_v16  ;;  %v5753_v19 = vrot.slane %v9223_v35, 4  ;;  %v5776_v59 = vrot.slane %v9265_v45, 7 }
 0x807   : > { %v5623_v7 = vsel %vm5255_vm1, %v5622_v22, %v5621_v3  ;;  %v5772_v37 = vsel %vm5246_vm14, %v5771_v44, %v5770_v13  ;;  %v5755_v31 = vrot.slane %v9227_v21, 3  ;;  %v5752_v11 = vsel %vm5237_vm11, %v5751_v36, %v5750_v14 }
 0x808   : > { %5638 = vrot.lane.b32.xlu0 %v5623_v7, %s6306_s14  ;;  %v5774_v27 = vsel %vm5249_vm15, %v5773_v8, %v5772_v37  ;;  %v5757_v49 = vrot.slane %v9230_v61, 2  ;;  %v5759_v5 = vrot.slane %v9233_v9, 1  ;;  %v5754_v24 = vsel %vm5240_vm12, %v5753_v19, %v5752_v11 }
 0x809   : > { %v5775_v38 = vsel %vm5252_vm0, %v9064_v25, %v5774_v27  ;;  %v5363_v53 = vrot.slane %v9103_v62, 3  ;;  %v5364_v50 = vrot.slane %v9118_v1, 2  ;;  %v5756_v18 = vsel %vm5243_vm13, %v5755_v31, %v5754_v24 }
 0x80a   : > { %v5777_v20 = vsel %vm5255_vm1, %v5776_v59, %v5775_v38  ;;  %v5762_v43 = vrot.slane %v9240_v47, 7  ;;  %v5366_v40 = vrot.slane %v9106_v34, 1  ;;  %v5758_v46 = vsel %vm5246_vm14, %v5757_v49, %v5756_v18 }
 0x80b   : > { %5780 = vrot.lane.b32.xlu1 %v5777_v20, %s6306_s14  ;;  %v5365_v12 = vsel %vm5237_vm11, %v5364_v50, %v5363_v53  ;;  %v5369_v22 = vrot.slane %v9112_v23, 7  ;;  %v5371_v32 = vrot.slane %v9115_v26, 6  ;;  %v5760_v55 = vsel %vm5249_vm15, %v5759_v5, %v5758_v46 }
 0x80c   : > { %v5367_v0 = vsel %vm5240_vm12, %v5366_v40, %v5365_v12  ;;  %v5373_v42 = vrot.slane %v9121_v54, 5  ;;  %v5349_v44 = vrot.slane %v9181_v17, 3  ;;  %v5761_v29 = vsel %vm5252_vm0, %v9237_v39, %v5760_v55 }
 0x80d   : > { %v5368_v16 = vsel %vm5243_vm13, %v9109_v52, %v5367_v0  ;;  %v5350_v8 = vrot.slane %v9184_v33, 2  ;;  %v5352_v14 = vrot.slane %v9187_v51, 1  ;;  %v5763_v3 = vsel %vm5255_vm1, %v5762_v43, %v5761_v29 }
 0x80e   : > { %v5370_v13 = vsel %vm5246_vm14, %v5369_v22, %v5368_v16  ;;  %v5375_v36 = vrot.slane %v9124_v60, 4  ;;  %v5355_v19 = vrot.slane %v9193_v15, 7  ;;  %5778 = vrot.lane.b32.xlu0 %v5763_v3, %s6306_s14  ;;  %v5357_v59 = vrot.slane %v9196_v30, 6  ;;  %s377_s14 = sand.u32 1, %s6280_s18  }
 0x80f   : > { %v5372_v7 = vsel %vm5249_vm15, %v5371_v32, %v5370_v13  ;;  %v5351_v37 = vsel %vm5237_vm11, %v5350_v8, %v5349_v44  ;;  %v5359_v31 = vrot.slane %v9199_v4, 5  ;;  %v5504_v49 = vrot.slane %v9103_v62, 7  ;;  %s5902_s24 = sshll.u32 %s377_s14, 6  ;;  %s9819_s29 = scalar_lea.sflag [#allocation7], %s377_s14 }
 0x810   : > { %v5374_v27 = vsel %vm5252_vm0, %v5373_v42, %v5372_v7  ;;  %v5353_v11 = vsel %vm5240_vm12, %v5352_v14, %v5351_v37  ;;  %v5505_v5 = vrot.slane %v9118_v1, 6  ;;  %v5361_v53 = vrot.slane %v9202_v6, 4 }
 0x811   : > { %v5376_v38 = vsel %vm5255_vm1, %v5375_v36, %v5374_v27  ;;  %v5354_v24 = vsel %vm5243_vm13, %v9190_v41, %v5353_v11  ;;  %v5507_v50 = vrot.slane %v9106_v34, 5  ;;  %v5509_v43 = vrot.slane %v9109_v52, 4 }
 0x812   : > { %5379 = vrot.lane.b32.xlu1 %v5376_v38, %s6302_s25  ;;  %v5356_v20 = vsel %vm5246_vm14, %v5355_v19, %v5354_v24  ;;  %v5506_v18 = vsel %vm5237_vm11, %v5505_v5, %v5504_v49  ;;  %v5511_v40 = vrot.slane %v9112_v23, 3  ;;  %v5513_v22 = vrot.slane %v9115_v26, 2 }
 0x813   : > { %v5358_v46 = vsel %vm5249_vm15, %v5357_v59, %v5356_v20  ;;  %v5508_v12 = vsel %vm5240_vm12, %v5507_v50, %v5506_v18  ;;  %v5490_v32 = vrot.slane %v9181_v17, 7  ;;  %v5491_v42 = vrot.slane %v9184_v33, 6 }
 0x814   : > { %v5360_v55 = vsel %vm5252_vm0, %v5359_v31, %v5358_v46  ;;  %v5510_v0 = vsel %vm5243_vm13, %v5509_v43, %v5508_v12  ;;  %v5493_v44 = vrot.slane %v9187_v51, 5  ;;  %v5515_v8 = vrot.slane %v9121_v54, 1 }
 0x815   : > { %v5362_v29 = vsel %vm5255_vm1, %v5361_v53, %v5360_v55  ;;  %v5512_v16 = vsel %vm5246_vm14, %v5511_v40, %v5510_v0  ;;  %v5495_v14 = vrot.slane %v9190_v41, 4  ;;  %v5492_v13 = vsel %vm5237_vm11, %v5491_v42, %v5490_v32 }
 0x816   : > { %5377 = vrot.lane.b32.xlu0 %v5362_v29, %s6302_s25  ;;  %v5514_v3 = vsel %vm5249_vm15, %v5513_v22, %v5512_v16  ;;  %v5497_v36 = vrot.slane %v9193_v15, 3  ;;  %v5499_v19 = vrot.slane %v9196_v30, 2  ;;  %v5494_v37 = vsel %vm5240_vm12, %v5493_v44, %v5492_v13 }
 0x817   : > { %v5516_v7 = vsel %vm5252_vm0, %v5515_v8, %v5514_v3  ;;  %v5660_v59 = vrot.slane %v9243_v28, 3  ;;  %v5661_v31 = vrot.slane %v9247_v57, 2  ;;  %v5496_v11 = vsel %vm5243_vm13, %v5495_v14, %v5494_v37 }
 0x818   : > { %v5517_v27 = vsel %vm5255_vm1, %v9124_v60, %v5516_v7  ;;  %v5501_v49 = vrot.slane %v9199_v4, 1  ;;  %v5663_v5 = vrot.slane %v9250_v10, 1  ;;  %v5498_v38 = vsel %vm5246_vm14, %v5497_v36, %v5496_v11 }
 0x819   : > { %5520 = vrot.lane.b32.xlu1 %v5517_v27, %s6302_s25  ;;  %v5662_v24 = vsel %vm5237_vm11, %v5661_v31, %v5660_v59  ;;  %v5666_v53 = vrot.slane %v9257_v63, 7  ;;  %v5668_v50 = vrot.slane %v9260_v58, 6  ;;  %v5500_v20 = vsel %vm5249_vm15, %v5499_v19, %v5498_v38 }
 0x81a   : > { %v5664_v18 = vsel %vm5240_vm12, %v5663_v5, %v5662_v24  ;;  %v5670_v43 = vrot.slane %v9064_v25, 5  ;;  %v5646_v40 = vrot.slane %v9215_v2, 3  ;;  %v5502_v46 = vsel %vm5252_vm0, %v5501_v49, %v5500_v20 }
 0x81b   : > { %v5665_v12 = vsel %vm5243_vm13, %v9253_v48, %v5664_v18  ;;  %v5647_v22 = vrot.slane %v9220_v56, 2  ;;  %v5649_v32 = vrot.slane %v9223_v35, 1  ;;  %v5503_v55 = vsel %vm5255_vm1, %v9202_v6, %v5502_v46 }
 0x81c   : > { %v5667_v0 = vsel %vm5246_vm14, %v5666_v53, %v5665_v12  ;;  %v5672_v42 = vrot.slane %v9265_v45, 4  ;;  %v5652_v44 = vrot.slane %v9230_v61, 7  ;;  %5518 = vrot.lane.b32.xlu0 %v5503_v55, %s6302_s25  ;;  %v5654_v8 = vrot.slane %v9233_v9, 6 }
 0x81d   : > { %v5669_v29 = vsel %vm5249_vm15, %v5668_v50, %v5667_v0  ;;  %v5648_v16 = vsel %vm5237_vm11, %v5647_v22, %v5646_v40  ;;  %v5656_v14 = vrot.slane %v9237_v39, 5  ;;  %v5800_v36 = vrot.slane %v9243_v28, 7 }
 0x81e   : > { %v5671_v3 = vsel %vm5252_vm0, %v5670_v43, %v5669_v29  ;;  %v5650_v13 = vsel %vm5240_vm12, %v5649_v32, %v5648_v16  ;;  %v5801_v19 = vrot.slane %v9247_v57, 6  ;;  %v5658_v59 = vrot.slane %v9240_v47, 4 }
 0x81f   : > { %v5673_v7 = vsel %vm5255_vm1, %v5672_v42, %v5671_v3  ;;  %v5651_v37 = vsel %vm5243_vm13, %v9227_v21, %v5650_v13  ;;  %v5803_v31 = vrot.slane %v9250_v10, 5  ;;  %v5805_v49 = vrot.slane %v9253_v48, 4 }
 0x820   : > { %5676 = vrot.lane.b32.xlu1 %v5673_v7, %s6302_s25  ;;  %v5653_v27 = vsel %vm5246_vm14, %v5652_v44, %v5651_v37  ;;  %v5802_v11 = vsel %vm5237_vm11, %v5801_v19, %v5800_v36  ;;  %v5807_v5 = vrot.slane %v9257_v63, 3  ;;  %v5809_v53 = vrot.slane %v9260_v58, 2 }
 0x821   : > { %v5655_v38 = vsel %vm5249_vm15, %v5654_v8, %v5653_v27  ;;  %v5804_v24 = vsel %vm5240_vm12, %v5803_v31, %v5802_v11  ;;  %v5786_v50 = vrot.slane %v9215_v2, 7  ;;  %v5787_v43 = vrot.slane %v9220_v56, 6 }
 0x822   : > { %v5657_v20 = vsel %vm5252_vm0, %v5656_v14, %v5655_v38  ;;  %v5806_v18 = vsel %vm5243_vm13, %v5805_v49, %v5804_v24  ;;  %v5789_v40 = vrot.slane %v9223_v35, 5  ;;  %v5811_v22 = vrot.slane %v9064_v25, 1 }
 0x823   : > { %v5659_v46 = vsel %vm5255_vm1, %v5658_v59, %v5657_v20  ;;  %v5808_v12 = vsel %vm5246_vm14, %v5807_v5, %v5806_v18  ;;  %v5791_v32 = vrot.slane %v9227_v21, 4  ;;  %v5788_v0 = vsel %vm5237_vm11, %v5787_v43, %v5786_v50 }
 0x824   : > { %5674 = vrot.lane.b32.xlu0 %v5659_v46, %s6302_s25  ;;  %v5810_v55 = vsel %vm5249_vm15, %v5809_v53, %v5808_v12  ;;  %v5793_v42 = vrot.slane %v9230_v61, 3  ;;  %v5795_v44 = vrot.slane %v9233_v9, 2  ;;  %v5790_v16 = vsel %vm5240_vm12, %v5789_v40, %v5788_v0 }
 0x825   : > { %v5812_v29 = vsel %vm5252_vm0, %v5811_v22, %v5810_v55  ;;  %v5257_v8 = vrot.slane %v9118_v1, 7  ;;  %v5259_v14 = vrot.slane %v9106_v34, 6  ;;  %v5792_v13 = vsel %vm5243_vm13, %v5791_v32, %v5790_v16 }
 0x826   : > { %v5813_v3 = vsel %vm5255_vm1, %v9265_v45, %v5812_v29  ;;  %v5797_v36 = vrot.slane %v9237_v39, 1  ;;  %v5261_v19 = vrot.slane %v9109_v52, 5  ;;  %v5794_v7 = vsel %vm5246_vm14, %v5793_v42, %v5792_v13 }
 0x827   : > { %5816 = vrot.lane.b32.xlu1 %v5813_v3, %s6302_s25  ;;  %v5263_v37 = vrot.slane %v9112_v23, 4  ;;  %v5265_v59 = vrot.slane %v9115_v26, 3  ;;  %v5267_v31 = vrot.slane %v9121_v54, 2  ;;  %v5796_v27 = vsel %vm5249_vm15, %v5795_v44, %v5794_v7 }
 0x828   : > { %v5258_v11 = vsel %vm5237_vm11, %v5257_v8, %v9103_v62  ;;  %v5236_v49 = vrot.slane %v9184_v33, 7  ;;  %v5239_v5 = vrot.slane %v9187_v51, 6  ;;  %v5798_v38 = vsel %vm5252_vm0, %v5797_v36, %v5796_v27 }
 0x829   : > { %v5269_v24 = vrot.slane %v9124_v60, 1  ;;  %v5260_v53 = vsel %vm5240_vm12, %v5259_v14, %v5258_v11  ;;  %v5242_v50 = vrot.slane %v9190_v41, 5  ;;  %v5799_v20 = vsel %vm5255_vm1, %v9240_v47, %v5798_v38 }
 0x82a   : > { %v5262_v18 = vsel %vm5243_vm13, %v5261_v19, %v5260_v53  ;;  %v5245_v43 = vrot.slane %v9193_v15, 4  ;;  %v5248_v40 = vrot.slane %v9196_v30, 3  ;;  %5814 = vrot.lane.b32.xlu0 %v5799_v20, %s6302_s25  ;;  %v5251_v12 = vrot.slane %v9199_v4, 2  ;;  %s9655_s25 = scalar_lea.vmem [#allocation6], %s5902_s24  ;;  %s6308_s24 = smov [#allocation6]  }
 0x82b   : > { %v5264_v46 = vsel %vm5246_vm14, %v5263_v37, %v5262_v18  ;;  %v5238_v22 = vsel %vm5237_vm11, %v5236_v49, %v9181_v17  ;;  %v5400_v32 = vrot.slane %v9103_v62, 4  ;;  %v5401_v42 = vrot.slane %v9118_v1, 3  ;;  %s5836_s30 = sshll.u32 %s9655_s25, 4  ;;  %s6232_s22 = sshll.u32 %s6308_s24, 4  ;;  %s9813_s30 = int_to_ptr.vmem [resolvable:$true] %s5836_s30  ;;  %s6233_s22 = int_to_ptr.vmem [resolvable:$false] %s6232_s22 }
 0x82c   : > { %v5266_v55 = vsel %vm5249_vm15, %v5265_v59, %v5264_v46  ;;  %v5241_v0 = vsel %vm5240_vm12, %v5239_v5, %v5238_v22  ;;  %v5403_v44 = vrot.slane %v9106_v34, 2  ;;  %v5254_v16 = vrot.slane %v9202_v6, 1  ;;  %s6228_s21 = scalar_lea.vmem %s9813_s30, 1024  ;;  %s6234_s15 = scalar_lea.vmem %s6233_s22, 2048 }
 0x82d   : > { %v5268_v29 = vsel %vm5252_vm0, %v5267_v31, %v5266_v55  ;;  %v5244_v8 = vsel %vm5243_vm13, %v5242_v50, %v5241_v0  ;;  %v5405_v14 = vrot.slane %v9109_v52, 1  ;;  %v5402_v13 = vsel %vm5237_vm11, %v5401_v42, %v5400_v32  ;;  %p6229_p11 = scmp.ne.s32.totalorder %s9813_s30, %s6228_s21  ;;  %p6235_p0 = scmp.lt.s32.totalorder %s9813_s30, %s6233_s22 }
 0x82e   : > { %v5270_v3 = vsel %vm5255_vm1, %v5269_v24, %v5268_v29  ;;  %v5247_v62 = vsel %vm5246_vm14, %v5245_v43, %v5244_v8  ;;  %v5408_v36 = vrot.slane %v9115_v26, 7  ;;  %v5404_v1 = vsel %vm5240_vm12, %v5403_v44, %v5402_v13  ;;  %p6236_p1 = scmp.lt.s32.totalorder %s6234_s15, %s6228_s21 }
 0x82f   : > { %5274 = vst.msk [vmem:[%s9655_s25 + $0x20] sm:$0xff] %vm4902_vm10, %v5270_v3  ;;  %v5250_v34 = vsel %vm5249_vm15, %v5248_v40, %v5247_v62  ;;  %v5410_v52 = vrot.slane %v9121_v54, 6  ;;  %v5386_v19 = vrot.slane %v9181_v17, 4  ;;  %v5406_v37 = vsel %vm5243_vm13, %v5405_v14, %v5404_v1  ;;  %p6230_p12 = pnand %p6229_p11, %p6408_p5 }
 0x830   : > { %v5253_v7 = vsel %vm5252_vm0, %v5251_v12, %v5250_v34  ;;  %v5387_v26 = vrot.slane %v9184_v33, 3  ;;  %v5389_v59 = vrot.slane %v9187_v51, 2  ;;  %v5407_v27 = vsel %vm5246_vm14, %v9112_v23, %v5406_v37  ;;  %p6237_p2 = por %p6236_p1, %p6235_p0 }
 0x831   : > { %v5256_v31 = vsel %vm5255_vm1, %v5254_v16, %v5253_v7  ;;  %v5412_v11 = vrot.slane %v9124_v60, 5  ;;  %v5391_v54 = vrot.slane %v9190_v41, 1  ;;  %v5409_v17 = vsel %vm5249_vm15, %v5408_v36, %v5407_v27  ;;  %p6231_p13 = pneg %p6230_p12 }
 0x832   : > { %5273 = vst.msk [vmem:[%s9655_s25] sm:$0xff] %vm4902_vm10, %v5256_v31  ;;  %v5388_v49 = vsel %vm5237_vm11, %v5387_v26, %v5386_v19  ;;  %v5394_v33 = vrot.slane %v9196_v30, 7  ;;  %v5396_v51 = vrot.slane %v9199_v4, 6  ;;  %v5411_v5 = vsel %vm5252_vm0, %v5410_v52, %v5409_v17 }
 0x833   : > { %v5390_v38 = vsel %vm5240_vm12, %v5389_v59, %v5388_v49  ;;  %v5556_v23 = vrot.slane %v9247_v57, 7  ;;  %v5558_v60 = vrot.slane %v9250_v10, 6  ;;  %v5413_v41 = vsel %vm5255_vm1, %v5412_v11, %v5411_v5  ;;  %p6238_p3 = pnand %p6237_p2, %p6231_p13 }
 0x834   : > { %v5392_v24 = vsel %vm5243_vm13, %v5391_v54, %v5390_v38  ;;  %v5398_v53 = vrot.slane %v9202_v6, 5  ;;  %v5560_v50 = vrot.slane %v9253_v48, 5  ;;  %5417 = vst.msk [vmem:[%s9655_s25 + $0x28] sm:$0xff] %vm4902_vm10, %v5413_v41  ;;  %v5562_v20 = vrot.slane %v9257_v63, 4 }
 0x835   : > { %v5393_v30 = vsel %vm5246_vm14, %v9193_v15, %v5392_v24  ;;  %v5557_v4 = vsel %vm5237_vm11, %v5556_v23, %v9243_v28  ;;  %v5564_v18 = vrot.slane %v9260_v58, 3  ;;  %v5566_v6 = vrot.slane %v9064_v25, 2 }
 0x836   : > { %v5395_v43 = vsel %vm5249_vm15, %v5394_v33, %v5393_v30  ;;  %v5559_v40 = vsel %vm5240_vm12, %v5558_v60, %v5557_v4  ;;  %v5542_v46 = vrot.slane %v9220_v56, 7  ;;  %v5568_v22 = vrot.slane %v9265_v45, 1 }
 0x837   : > { %v5397_v12 = vsel %vm5252_vm0, %v5396_v51, %v5395_v43  ;;  %v5561_v15 = vsel %vm5243_vm13, %v5560_v50, %v5559_v40  ;;  %v5544_v32 = vrot.slane %v9223_v35, 6  ;;  %v5546_v44 = vrot.slane %v9227_v21, 5 }
 0x838   : > { %v5399_v55 = vsel %vm5255_vm1, %v5398_v53, %v5397_v12  ;;  %v5563_v0 = vsel %vm5246_vm14, %v5562_v20, %v5561_v15  ;;  %v5543_v42 = vsel %vm5237_vm11, %v5542_v46, %v9215_v2  ;;  %v5548_v8 = vrot.slane %v9230_v61, 4 }
 0x839   : > { %5416 = vst.msk [vmem:[%s9655_s25 + $0x8] sm:$0xff] %vm4902_vm10, %v5399_v55  ;;  %v5565_v29 = vsel %vm5249_vm15, %v5564_v18, %v5563_v0  ;;  %v5545_v16 = vsel %vm5240_vm12, %v5544_v32, %v5543_v42  ;;  %v5550_v14 = vrot.slane %v9233_v9, 3  ;;  %v5552_v13 = vrot.slane %v9237_v39, 2 }
 0x83a   : > { %v5567_v3 = vsel %vm5252_vm0, %v5566_v6, %v5565_v29  ;;  %v5547_v62 = vsel %vm5243_vm13, %v5546_v44, %v5545_v16  ;;  %v5696_v36 = vrot.slane %v9243_v28, 4  ;;  %v5697_v52 = vrot.slane %v9247_v57, 3 }
 0x83b   : > { %v5569_v34 = vsel %vm5255_vm1, %v5568_v22, %v5567_v3  ;;  %v5549_v1 = vsel %vm5246_vm14, %v5548_v8, %v5547_v62  ;;  %v5699_v19 = vrot.slane %v9250_v10, 2  ;;  %v5554_v37 = vrot.slane %v9240_v47, 1 }
 0x83c   : > { %5573 = vst.msk [vmem:[%s9655_s25 + $0x30] sm:$0xff] %vm4902_vm10, %v5569_v34  ;;  %v5551_v7 = vsel %vm5249_vm15, %v5550_v14, %v5549_v1  ;;  %v5698_v59 = vsel %vm5237_vm11, %v5697_v52, %v5696_v36  ;;  %v5701_v28 = vrot.slane %v9253_v48, 1  ;;  %v5682_v31 = vrot.slane %v9215_v2, 4 }
 0x83d   : > { %v5553_v26 = vsel %vm5252_vm0, %v5552_v13, %v5551_v7  ;;  %v5700_v57 = vsel %vm5240_vm12, %v5699_v19, %v5698_v59  ;;  %v5683_v10 = vrot.slane %v9220_v56, 3  ;;  %v5685_v11 = vrot.slane %v9223_v35, 2 }
 0x83e   : > { %v5555_v27 = vsel %vm5255_vm1, %v5554_v37, %v5553_v26  ;;  %v5702_v54 = vsel %vm5243_vm13, %v5701_v28, %v5700_v57  ;;  %v5704_v17 = vrot.slane %v9260_v58, 7  ;;  %v5706_v48 = vrot.slane %v9064_v25, 6 }
 0x83f   : > { %5572 = vst.msk [vmem:[%s9655_s25 + $0x10] sm:$0xff] %vm4902_vm10, %v5555_v27  ;;  %v5703_v2 = vsel %vm5246_vm14, %v9257_v63, %v5702_v54  ;;  %v5684_v49 = vsel %vm5237_vm11, %v5683_v10, %v5682_v31  ;;  %v5687_v56 = vrot.slane %v9227_v21, 1  ;;  %v5708_v33 = vrot.slane %v9265_v45, 5 }
 0x840   : > { %v5705_v35 = vsel %vm5249_vm15, %v5704_v17, %v5703_v2  ;;  %v5686_v51 = vsel %vm5240_vm12, %v5685_v11, %v5684_v49  ;;  %v5690_v25 = vrot.slane %v9233_v9, 7  ;;  %v5692_v38 = vrot.slane %v9237_v39, 6 }
 0x841   : > { %v5707_v58 = vsel %vm5252_vm0, %v5706_v48, %v5705_v35  ;;  %v5688_v63 = vsel %vm5243_vm13, %v5687_v56, %v5686_v51  ;;  %v5694_v60 = vrot.slane %v9240_v47, 5 }
 0x842   : > { %v5306_v5 = vpop.permute.xlu1 %5305  ;;  %v5709_v21 = vsel %vm5255_vm1, %v5708_v33, %v5707_v58  ;;  %v5689_v45 = vsel %vm5246_vm14, %v9230_v61, %v5688_v63 }
 0x843   : > { %5311 = vst.msk [vmem:[%s9655_s25 + $0x20] sm:$0xff] %vm5309_vm2, %v5306_v5  ;;  %v5691_v23 = vsel %vm5249_vm15, %v5690_v25, %v5689_v45 }
 0x844   : > { %5713 = vst.msk [vmem:[%s9655_s25 + $0x38] sm:$0xff] %vm4902_vm10, %v5709_v21  ;;  %v5693_v9 = vsel %vm5252_vm0, %v5692_v38, %v5691_v23 }
 0x845   : > { %v5695_v41 = vsel %vm5255_vm1, %v5694_v60, %v5693_v9 }
 0x846   : > { %5712 = vst.msk [vmem:[%s9655_s25 + $0x18] sm:$0xff] %vm4902_vm10, %v5695_v41 }
 0x84d   : > { %v5304_v24 = vpop.permute.xlu0 %5303 }
 0x84e   : > { %5310 = vst.msk [vmem:[%s9655_s25] sm:$0xff] %vm5309_vm2, %v5304_v24 }
 0x855   : > { %v5449_v61 = vpop.permute.xlu1 %5448 }
 0x856   : > { %5453 = vst.msk [vmem:[%s9655_s25 + $0x28] sm:$0xff] %vm5309_vm2, %v5449_v61 }
 0x857   : > { %v5447_v39 = vpop.permute.xlu0 %5446 }
 0x858   : > { %5452 = vst.msk [vmem:[%s9655_s25 + $0x8] sm:$0xff] %vm5309_vm2, %v5447_v39 }
 0x859   : > { %v5605_v47 = vpop.permute.xlu1 %5604 }
 0x85a   : > { %5609 = vst.msk [vmem:[%s9655_s25 + $0x30] sm:$0xff] %vm5309_vm2, %v5605_v47 }
 0x85e   : > { %v5603_v53 = vpop.permute.xlu0 %5602 }
 0x85f   : > { %5608 = vst.msk [vmem:[%s9655_s25 + $0x10] sm:$0xff] %vm5309_vm2, %v5603_v53 }
 0x862   : > { %v5745_v50 = vpop.permute.xlu1 %5744 }
 0x863   : > { %5749 = vst.msk [vmem:[%s9655_s25 + $0x38] sm:$0xff] %vm5309_vm2, %v5745_v50 }
 0x864   : > { %v5743_v30 = vpop.permute.xlu0 %5742 }
 0x865   : > { %5748 = vst.msk [vmem:[%s9655_s25 + $0x18] sm:$0xff] %vm5309_vm2, %v5743_v30 }
 0x868   : > { %v5343_v4 = vpop.permute.xlu1 %5342 }
 0x869   : > { %5348 = vst.msk [vmem:[%s9655_s25 + $0x20] sm:$0xff] %vm5346_vm3, %v5343_v4 }
 0x86c   : > { %v5341_v20 = vpop.permute.xlu0 %5340 }
 0x86d   : > { %5347 = vst.msk [vmem:[%s9655_s25] sm:$0xff] %vm5346_vm3, %v5341_v20 }
 0x86f   : > { %v5485_v18 = vpop.permute.xlu1 %5484 }
 0x870   : > { %5489 = vst.msk [vmem:[%s9655_s25 + $0x28] sm:$0xff] %vm5346_vm3, %v5485_v18 }
 0x872   : > { %v5483_v43 = vpop.permute.xlu0 %5482 }
 0x873   : > { %5488 = vst.msk [vmem:[%s9655_s25 + $0x8] sm:$0xff] %vm5346_vm3, %v5483_v43 }
 0x876   : > { %v5641_v40 = vpop.permute.xlu1 %5640 }
 0x877   : > { %5645 = vst.msk [vmem:[%s9655_s25 + $0x30] sm:$0xff] %vm5346_vm3, %v5641_v40 }
 0x87a   : > { %v5639_v6 = vpop.permute.xlu0 %5638 }
 0x87b   : > { %5644 = vst.msk [vmem:[%s9655_s25 + $0x10] sm:$0xff] %vm5346_vm3, %v5639_v6 }
 0x87d   : > { %v5781_v46 = vpop.permute.xlu1 %5780 }
 0x87e   : > { %5785 = vst.msk [vmem:[%s9655_s25 + $0x38] sm:$0xff] %vm5346_vm3, %v5781_v46 }
 0x880   : > { %v5779_v12 = vpop.permute.xlu0 %5778 }
 0x881   : > { %5784 = vst.msk [vmem:[%s9655_s25 + $0x18] sm:$0xff] %vm5346_vm3, %v5779_v12 }
 0x884   : > { %v5380_v15 = vpop.permute.xlu1 %5379 }
 0x885   : > { %5385 = vst.msk [vmem:[%s9655_s25 + $0x20] sm:$0xff] %vm5383_vm4, %v5380_v15 }
 0x888   : > { %v5378_v22 = vpop.permute.xlu0 %5377 }
 0x889   : > { %5384 = vst.msk [vmem:[%s9655_s25] sm:$0xff] %vm5383_vm4, %v5378_v22 }
 0x88b   : > { %v5521_v32 = vpop.permute.xlu1 %5520 }
 0x88c   : > { %5525 = vst.msk [vmem:[%s9655_s25 + $0x28] sm:$0xff] %vm5383_vm4, %v5521_v32 }
 0x88e   : > { %v5519_v55 = vpop.permute.xlu0 %5518 }
 0x88f   : > { %5524 = vst.msk [vmem:[%s9655_s25 + $0x8] sm:$0xff] %vm5383_vm4, %v5519_v55 }
 0x892   : > { %v5677_v0 = vpop.permute.xlu1 %5676 }
 0x893   : > { %5681 = vst.msk [vmem:[%s9655_s25 + $0x30] sm:$0xff] %vm5383_vm4, %v5677_v0 }
 0x896   : > { %v5675_v42 = vpop.permute.xlu0 %5674 }
 0x897   : > { %5680 = vst.msk [vmem:[%s9655_s25 + $0x10] sm:$0xff] %vm5383_vm4, %v5675_v42 }
 0x899   : > { %v5817_v44 = vpop.permute.xlu1 %5816 }
 0x89a   : > { %5821 = vst.msk [vmem:[%s9655_s25 + $0x38] sm:$0xff] %vm5383_vm4, %v5817_v44 }
 0x89c   : > { %v5815_v29 = vpop.permute.xlu0 %5814 }
 0x89d   : > { %5820 = vst.msk [vmem:[%s9655_s25 + $0x18] sm:$0xff] %vm5383_vm4, %v5815_v29 }
 0x89e   : > { %6241 = shalt.err (!%p6238_p3)
}
 0x89f   : > { %s6242_s14 = scalar_lea.hbm %s9811_s12, 1024  ;;  %s6246_s24 = scalar_lea.hbm %s9871_s11, 2048 }
 0x8a0   : > { %p6243_p4 = scmp.ne.s32.totalorder %s9811_s12, %s6242_s14  ;;  %p6247_p9 = scmp.lt.s32.totalorder %s9811_s12, %s9871_s11 }
 0x8a1   : > { %p6248_p10 = scmp.lt.s32.totalorder %s6246_s24, %s6242_s14 }
 0x8a2   : > { %p6244_p7 = pnand %p6243_p4, %p6408_p5 }
 0x8a3   : > { %p6249_p11 = por %p6248_p10, %p6247_p9 }
 0x8a4   : > { %p6245_p8 = pneg %p6244_p7 }
 0x8a6   : > { %p6250_p12 = pnand %p6249_p11, %p6245_p8 }
 0x8a8   : > { %6253 = shalt.err (!%p6250_p12)
}
 0x8a9   : > { %s6309_s21 = smov 512   ;;  %s9886_s22 = smov 32  }
 0x8aa   : > { %6154 = dma.vmem_to_hbm [thread:$0]  (%p6408_p5), %s9813_s30, 1024, %s9811_s12, %s9819_s29, %s6309_s21, %s6309_s21, %s9886_s22  }
 0x8ab PF: > { %p6160_p13 = scmp.ge.s32.totalorder %s6288_s20, 2  ;;  %s5851_s15 = sand.u32 1, %s6276_s17  }
 0x8ac   : > { %s5852_s0 = scalar_lea.sflag [#allocation7], %s5851_s15 }
 0x8ad   : > { %p6157_p0 = pnand %p6160_p13, %p6412_p6 }
 0x8af   : > { %p6158_p1 = pneg %p6157_p0 }
 0x8b1   : > { %6271 = dma.done.wait (%p6158_p1), %s5852_s0, 1024  }
 0x8b2   : > { %6273 = vsyncadd (%p6158_p1), %s5852_s0, 4294966272  ;;  %p21_p2 = scmp.ge.s32.totalorder %s6395_s23, 4   ;;  %s9887_s17 = smov %s6280_s18 }
 0x8b3   : > { %s9888_s18 = smov %s6284_s19  ;;  %s9889_s19 = smov %s6406_s26 }
 0x8b4   : > { %s9890_s20 = smov %s6395_s23  ;;  %23 = sbr.rel (!%p21_p2) target bundleno = 5 (0x5), region = 105 }
 0x8b9   :  { %5857 = vsyncpa [#allocation7], 1 }
 0x8ba   :  { %5859 = vsyncpa [#allocation7 + $0x1], 1 }

</bundles_post_ra>
